<compile_context>
chip_gen: v7x
topology: tpu7x:2x2x1
jax: 0.10.0
libtpu: 0.0.40
codegen_flags: <defaults>
</compile_context>

<pallas_src>
import functools

import jax
import jax.numpy as jnp
from jax.experimental import pallas as pl
from jax.experimental.pallas import tpu as pltpu

EPS = 1e-5
GROUPS = 16


def _pick_row_band(H, W, C, itemsize, budget_bytes=4 * 1024 * 1024):
    """Rows per im2col band so the (band*W, 9*C) patch stays within budget."""
    rows = budget_bytes // max(1, W * 9 * C * itemsize)
    return int(max(1, min(H, rows)))


def _nobottleneck_kernel(x_ref, gmat_ref, g1_ref, b1_ref, w1_ref,
                         g2_ref, b2_ref, w2_ref, o_ref, pad_ref,
                         *, H, W, C, CPG, conv_dtype, band_rows):
    HW = H * W

    # ---- zero ONLY the 1-px halo of the shared padded-activation scratch ----
    # The interior is fully overwritten before every conv matmul, so zeroing it
    # is pure wasted vector-store work; only the border must stay zero.
    # (Done every grid step -- O((H+W)*C), cheap -- so it stays correct under
    # v7x megacore sharding where each TensorCore owns a private scratch.)
    zrow = jnp.zeros((1, W + 2, C), jnp.float32)
    pad_ref[pl.ds(0, 1), :, :] = zrow
    pad_ref[pl.ds(H + 1, 1), :, :] = zrow
    zcol = jnp.zeros((H + 2, 1, C), jnp.float32)
    pad_ref[:, pl.ds(0, 1), :] = zcol
    pad_ref[:, pl.ds(W + 1, 1), :] = zcol

    gmat = gmat_ref[...]                               # (C, C) group membership
    inv_cnt = 1.0 / float(HW * CPG)
    ones_row = jnp.ones((1, HW), jnp.float32)          # hoisted: used by both GNs

    def gn_relu(y2d, gamma, beta):
        # Channel sums on the MXU (ones-row matvec) instead of a cross-sublane
        # XLU reduction; group broadcast via one (2,C)x(C,C) matmul; the
        # normalization folds into a single scale/shift on the full tile.
        # GN statistics are kept in f32 (single-pass E[x^2]-E[x]^2 — do NOT
        # move to bf16, cancellation would hurt precision).
        s = jnp.dot(ones_row, y2d, preferred_element_type=jnp.float32)         # (1, C)
        ss = jnp.dot(ones_row, y2d * y2d, preferred_element_type=jnp.float32)  # (1, C)
        stats = jnp.concatenate([s, ss], axis=0)                               # (2, C)
        gstats = jnp.dot(stats, gmat, preferred_element_type=jnp.float32)
        mean = gstats[0:1, :] * inv_cnt
        ex2 = gstats[1:2, :] * inv_cnt
        var = ex2 - mean * mean                        # biased var (PyTorch GN)
        scale = jax.lax.rsqrt(var + EPS) * gamma       # (1, C)
        shift = beta - mean * scale                    # (1, C)
        return jnp.maximum(y2d * scale + shift, 0.0)

    def conv3x3(y2d, w_ref):
        # im2col conv: write the activation into the (already halo-zeroed)
        # padded scratch, then per row-band gather the nine shifted taps, cast
        # to the conv dtype (bf16 fast path), concatenate along channels and
        # run ONE MXU matmul with K = 9*C.  Row-banding bounds the live patch
        # footprint (important on v7x's 64 MiB VMEM).
        # TODO(synk): a bf16 pad scratch would also halve scratch bytes + tap
        #             load traffic; needs a packed-dtype offset-store check.
        pad_ref[pl.ds(1, H), pl.ds(1, W), :] = y2d.reshape(H, W, C)
        w = w_ref[...]
        parts = []
        for h0 in range(0, H, band_rows):
            hb = min(band_rows, H - h0)
            taps = [
                pad_ref[pl.ds(h0 + k // 3, hb), pl.ds(k % 3, W), :]
                .reshape(hb * W, C).astype(conv_dtype)
                for k in range(9)
            ]
            patch = jnp.concatenate(taps, axis=1)                  # (hb*W, 9*C)
            parts.append(jnp.dot(patch, w,
                                 preferred_element_type=jnp.float32))
        return parts[0] if len(parts) == 1 else jnp.concatenate(parts, axis=0)

    x2d = x_ref[0].reshape(HW, C)
    y1 = gn_relu(x2d, g1_ref[...], b1_ref[...])
    c1 = conv3x3(y1, w1_ref)
    y2 = gn_relu(c1, g2_ref[...], b2_ref[...])
    c2 = conv3x3(y2, w2_ref)

    # Residual add (downsample is None): re-read x from VMEM instead of keeping
    # it live across both GN+conv stages (lower vreg pressure).
    resid = x_ref[0].reshape(HW, C)
    o_ref[0] = (c2 + resid).reshape(H, W, C)


def _vmem_limit_bytes():
    # Per-generation ceiling (v5e/v6e: 128 MiB physical, v7x: 64 MiB) minus
    # headroom; fall back conservatively if the query is unavailable.
    try:
        cap = int(pltpu.get_tpu_info().vmem_capacity_bytes)
    except Exception:
        cap = 64 * 1024 * 1024
    return max(16 * 1024 * 1024, min(cap - 8 * 1024 * 1024, 100 * 1024 * 1024))


def nobottleneck_forward_nhwc(x_nhwc, params, conv_dtype=jnp.bfloat16):
    """NHWC fast path (no layout transposes).  x_nhwc: (N, H, W, C) float32.

    conv_dtype controls the MXU operand dtype of the two 3x3 convs (bf16 by
    default: MXU-native on v5e/v6e/v7x, f32 accumulation).  GroupNorm stats and
    all elementwise math stay f32.  Expected |err| vs an f32 reference for
    bf16 convs is a few 1e-2.
    """
    g1, b1, w1, g2, b2, w2 = params
    N, H, W, C = x_nhwc.shape
    assert C % GROUPS == 0, "GroupNorm(16, C) requires C % 16 == 0"
    # stride=1 / downsample=None path only (the module defaults); fail loudly
    # so callers cannot silently hit the unimplemented strided path.
    assert w1.shape == (C, C, 3, 3) and w2.shape == (C, C, 3, 3), (
        "only inplanes == planes, stride=1, downsample=None is implemented")
    CPG = C // GROUPS

    # group-membership matrix: gmat[i, j] = 1 iff channels i, j share a group
    idx = jnp.arange(C)
    gmat = (idx[:, None] // CPG == idx[None, :] // CPG).astype(jnp.float32)

    # PyTorch conv weights (Cout, Cin, kh, kw) -> im2col weights (9*Cin, Cout)
    # with row index (kh*3 + kw)*Cin + cin, matching the in-kernel tap concat.
    def im2col_w(w):
        return jnp.transpose(w, (2, 3, 1, 0)).reshape(9 * C, C).astype(conv_dtype)

    w1f, w2f = im2col_w(w1), im2col_w(w2)
    g1r = g1.reshape(1, C).astype(jnp.float32)
    b1r = b1.reshape(1, C).astype(jnp.float32)
    g2r = g2.reshape(1, C).astype(jnp.float32)
    b2r = b2.reshape(1, C).astype(jnp.float32)

    itemsize = jnp.dtype(conv_dtype).itemsize
    band_rows = _pick_row_band(H, W, C, itemsize)
    kernel = functools.partial(_nobottleneck_kernel, H=H, W=W, C=C, CPG=CPG,
                               conv_dtype=conv_dtype, band_rows=band_rows)

    # Advisory cost estimate so XLA can schedule/overlap neighbouring ops.
    conv_flops = 2 * 2 * H * W * (9 * C) * C            # two K=9C matmuls
    gn_flops = 2 * (2 * 2 * H * W * C + 2 * 2 * C * C + 6 * H * W * C)
    cost = pl.CostEstimate(
        flops=int(N * (conv_flops + gn_flops)),
        transcendentals=int(N * 2 * C),
        bytes_accessed=int(2 * x_nhwc.size * 4
                           + 2 * 9 * C * C * itemsize
                           + (C * C + 4 * C) * 4),
    )

    def run(single_buffer_consts):
        # Constant-index operands are never re-fetched across grid steps;
        # request single buffering so they don't pay the default 2-deep
        # pipelining (decisive VMEM saving for large C on v7x).
        const = dict(pipeline_mode=pl.Buffered(1)) if single_buffer_consts else {}
        in_specs = [
            pl.BlockSpec((1, H, W, C), lambda n: (n, 0, 0, 0)),          # x
            pl.BlockSpec((C, C), lambda n: (0, 0), **const),             # gmat
            pl.BlockSpec((1, C), lambda n: (0, 0), **const),             # gamma1
            pl.BlockSpec((1, C), lambda n: (0, 0), **const),             # beta1
            pl.BlockSpec((9 * C, C), lambda n: (0, 0), **const),         # conv1 W
            pl.BlockSpec((1, C), lambda n: (0, 0), **const),             # gamma2
            pl.BlockSpec((1, C), lambda n: (0, 0), **const),             # beta2
            pl.BlockSpec((9 * C, C), lambda n: (0, 0), **const),         # conv2 W
        ]
        return pl.pallas_call(
            kernel,
            out_shape=jax.ShapeDtypeStruct((N, H, W, C), jnp.float32),
            grid_spec=pltpu.PrefetchScalarGridSpec(
                num_scalar_prefetch=0,
                grid=(N,),
                in_specs=in_specs,
                out_specs=pl.BlockSpec((1, H, W, C), lambda n: (n, 0, 0, 0)),
                scratch_shapes=[
                    pltpu.VMEM((H + 2, W + 2, C), jnp.float32),  # padded act
                ],
            ),
            compiler_params=pltpu.CompilerParams(
                dimension_semantics=("parallel",),
                vmem_limit_bytes=_vmem_limit_bytes(),
            ),
            cost_estimate=cost,
        )(x_nhwc, gmat, g1r, b1r, w1f, g2r, b2r, w2f)

    try:
        return run(True)
    except Exception:
        # pipeline_mode=pl.Buffered(1) not supported by this jax/Mosaic build;
        # fall back to default double-buffered constants (identical results).
        return run(False)


def nobottleneck_forward(x_nchw, params, conv_dtype=jnp.bfloat16):
    """NCHW API matching the PyTorch module.  Transposes only at the boundary;
    keep a surrounding model in NHWC and call nobottleneck_forward_nhwc to
    avoid the two HBM layout passes entirely."""
    x_nhwc = jnp.transpose(x_nchw, (0, 2, 3, 1)).astype(jnp.float32)
    out_nhwc = nobottleneck_forward_nhwc(x_nhwc, params, conv_dtype=conv_dtype)
    return jnp.transpose(out_nhwc, (0, 3, 1, 2))


def nobottleneck_reference(x, params):
    """Pure-JAX reference matching the PyTorch module (NCHW, f32)."""
    g1, b1, w1, g2, b2, w2 = params

    def gn(y, gamma, beta):
        n, c, h, w = y.shape
        yr = y.reshape(n, GROUPS, c // GROUPS, h, w)
        mean = yr.mean(axis=(2, 3, 4), keepdims=True)
        var = yr.var(axis=(2, 3, 4), keepdims=True)
        yn = ((yr - mean) / jnp.sqrt(var + EPS)).reshape(n, c, h, w)
        return yn * gamma[None, :, None, None] + beta[None, :, None, None]

    def conv(y, w):
        return jax.lax.conv_general_dilated(
            y, w, window_strides=(1, 1), padding="SAME",
            dimension_numbers=("NCHW", "OIHW", "NCHW"))

    out = jax.nn.relu(gn(x, g1, b1))
    out = conv(out, w1)
    out = jax.nn.relu(gn(out, g2, b2))
    out = conv(out, w2)
    return out + x


if __name__ == "__main__":
    # GroupNorm(16, C) needs C % 16 == 0 -> smallest sensible test: C = 32
    N, C, H, W = 2, 32, 16, 16

    key = jax.random.PRNGKey(0)
    kx, k1, k2, k3, k4, k5, k6 = jax.random.split(key, 7)

    x = jax.random.normal(kx, (N, C, H, W), dtype=jnp.float32)

    g1 = 1.0 + 0.1 * jax.random.normal(k1, (C,), dtype=jnp.float32)
    b1 = 0.1 * jax.random.normal(k2, (C,), dtype=jnp.float32)
    w1 = 0.1 * jax.random.normal(k3, (C, C, 3, 3), dtype=jnp.float32)
    g2 = 1.0 + 0.1 * jax.random.normal(k4, (C,), dtype=jnp.float32)
    b2 = 0.1 * jax.random.normal(k5, (C,), dtype=jnp.float32)
    w2 = 0.1 * jax.random.normal(k6, (C, C, 3, 3), dtype=jnp.float32)

    params = (g1, b1, w1, g2, b2, w2)

    ref = jax.block_until_ready(nobottleneck_reference(x, params))

    # f32-conv path: exact parity with the reference.
    out_f32 = jax.block_until_ready(
        nobottleneck_forward(x, params, conv_dtype=jnp.float32))
    assert out_f32.shape == (N, C, H, W)
    err_f32 = float(jnp.max(jnp.abs(out_f32 - ref)))
    assert jnp.allclose(out_f32, ref, rtol=1e-4, atol=1e-4), err_f32

    # bf16-conv fast path (default): MXU-native operands, f32 accumulation.
    # Expected max abs error vs the f32 reference is ~1e-2..4e-2 at these
    # magnitudes (documented loosened tolerance).
    out_bf16 = jax.block_until_ready(nobottleneck_forward(x, params))
    err_bf16 = float(jnp.max(jnp.abs(out_bf16 - ref)))
    assert jnp.allclose(out_bf16, ref, rtol=5e-2, atol=1e-1), err_bf16

    print("KERNEL_OK")
</pallas_src>

<mosaic_0001>
module attributes {stable_mosaic.version = 11 : i64} {
  func.func @_nobottleneck_kernel(%arg0: i32, %arg1: memref<1x16x16x32xf32, #tpu.memory_space<vmem>>, %arg2: memref<32x32xf32, #tpu.memory_space<vmem>>, %arg3: memref<1x32xf32, #tpu.memory_space<vmem>>, %arg4: memref<1x32xf32, #tpu.memory_space<vmem>>, %arg5: memref<288x32xf32, #tpu.memory_space<vmem>>, %arg6: memref<1x32xf32, #tpu.memory_space<vmem>>, %arg7: memref<1x32xf32, #tpu.memory_space<vmem>>, %arg8: memref<288x32xf32, #tpu.memory_space<vmem>>, %arg9: memref<1x16x16x32xf32, #tpu.memory_space<vmem>>, %arg10: memref<18x18x32xf32, #tpu.memory_space<vmem>>) attributes {dimension_semantics = [#tpu.dimension_semantics<parallel>], iteration_bounds = array<i64: 2>, scalar_prefetch = 0 : i64, scratch_operands = 1 : i64, tpu.core_type = #tpu.core_type<tc>, window_params = [{transform_indices = @transform_0, window_bounds = array<i64: 1, 16, 16, 32>}, {pipeline_mode = #tpu.pipeline_mode<synchronous>, transform_indices = @transform_1, window_bounds = array<i64: 32, 32>}, {pipeline_mode = #tpu.pipeline_mode<synchronous>, transform_indices = @transform_2, window_bounds = array<i64: 1, 32>}, {pipeline_mode = #tpu.pipeline_mode<synchronous>, transform_indices = @transform_3, window_bounds = array<i64: 1, 32>}, {pipeline_mode = #tpu.pipeline_mode<synchronous>, transform_indices = @transform_4, window_bounds = array<i64: 288, 32>}, {pipeline_mode = #tpu.pipeline_mode<synchronous>, transform_indices = @transform_5, window_bounds = array<i64: 1, 32>}, {pipeline_mode = #tpu.pipeline_mode<synchronous>, transform_indices = @transform_6, window_bounds = array<i64: 1, 32>}, {pipeline_mode = #tpu.pipeline_mode<synchronous>, transform_indices = @transform_7, window_bounds = array<i64: 288, 32>}, {transform_indices = @transform_8, window_bounds = array<i64: 1, 16, 16, 32>}]} {
    %cst = arith.constant 0.000000e+00 : f32
    %0 = vector.broadcast %cst : f32 to vector<1x18x32xf32>
    %c0 = arith.constant 0 : index
    %c0_0 = arith.constant 0 : index
    %c0_1 = arith.constant 0 : index
    %1 = vector.load %arg10[%c0, %c0_0, %c0_1] : memref<18x18x32xf32, #tpu.memory_space<vmem>>, vector<1x18x32xf32>
    tpu.vector_store %arg10[%c0, %c0_0, %c0_1], %0 {strides = array<i32>} : memref<18x18x32xf32, #tpu.memory_space<vmem>>, vector<1x18x32xf32>,
    %c17 = arith.constant 17 : index
    %c0_2 = arith.constant 0 : index
    %c0_3 = arith.constant 0 : index
    %2 = vector.load %arg10[%c17, %c0_2, %c0_3] : memref<18x18x32xf32, #tpu.memory_space<vmem>>, vector<1x18x32xf32>
    tpu.vector_store %arg10[%c17, %c0_2, %c0_3], %0 {strides = array<i32>} : memref<18x18x32xf32, #tpu.memory_space<vmem>>, vector<1x18x32xf32>,
    %cst_4 = arith.constant 0.000000e+00 : f32
    %3 = vector.broadcast %cst_4 : f32 to vector<18x1x32xf32>
    %c0_5 = arith.constant 0 : index
    %c0_6 = arith.constant 0 : index
    %c0_7 = arith.constant 0 : index
    %4 = vector.load %arg10[%c0_5, %c0_6, %c0_7] : memref<18x18x32xf32, #tpu.memory_space<vmem>>, vector<18x1x32xf32>
    tpu.vector_store %arg10[%c0_5, %c0_6, %c0_7], %3 {strides = array<i32>} : memref<18x18x32xf32, #tpu.memory_space<vmem>>, vector<18x1x32xf32>,
    %c0_8 = arith.constant 0 : index
    %c17_9 = arith.constant 17 : index
    %c0_10 = arith.constant 0 : index
    %5 = vector.load %arg10[%c0_8, %c17_9, %c0_10] : memref<18x18x32xf32, #tpu.memory_space<vmem>>, vector<18x1x32xf32>
    tpu.vector_store %arg10[%c0_8, %c17_9, %c0_10], %3 {strides = array<i32>} : memref<18x18x32xf32, #tpu.memory_space<vmem>>, vector<18x1x32xf32>,
    %c0_11 = arith.constant 0 : index
    %c0_12 = arith.constant 0 : index
    %6 = vector.load %arg2[%c0_11, %c0_12] : memref<32x32xf32, #tpu.memory_space<vmem>>, vector<32x32xf32>
    %cst_13 = arith.constant 1.000000e+00 : f32
    %7 = vector.broadcast %cst_13 : f32 to vector<1x256xf32>
    %c0_14 = arith.constant 0 : index
    %c0_15 = arith.constant 0 : index
    %c0_16 = arith.constant 0 : index
    %c0_17 = arith.constant 0 : index
    %8 = vector.load %arg1[%c0_14, %c0_15, %c0_16, %c0_17] : memref<1x16x16x32xf32, #tpu.memory_space<vmem>>, vector<1x16x16x32xf32>
    %9 = vector.shape_cast %8 : vector<1x16x16x32xf32> to vector<16x16x32xf32>
    %10 = vector.shape_cast %9 : vector<16x16x32xf32> to vector<256x32xf32>
    %c0_18 = arith.constant 0 : index
    %c0_19 = arith.constant 0 : index
    %11 = vector.load %arg3[%c0_18, %c0_19] : memref<1x32xf32, #tpu.memory_space<vmem>>, vector<1x32xf32>
    %c0_20 = arith.constant 0 : index
    %c0_21 = arith.constant 0 : index
    %12 = vector.load %arg4[%c0_20, %c0_21] : memref<1x32xf32, #tpu.memory_space<vmem>>, vector<1x32xf32>
    %cst_22 = arith.constant dense<0.000000e+00> : vector<1x32xf32>
    %13 = tpu.matmul %7, %10, %cst_22 {dimension_numbers = #tpu.dot_dimension_numbers<[1], [0], [0], [1], [0, 0, 1, 1], [], []>} : vector<1x256xf32>, vector<256x32xf32>, vector<1x32xf32> -> vector<1x32xf32>
    %14 = arith.mulf %10, %10 : vector<256x32xf32>
    %cst_23 = arith.constant dense<0.000000e+00> : vector<1x32xf32>
    %15 = tpu.matmul %7, %14, %cst_23 {dimension_numbers = #tpu.dot_dimension_numbers<[1], [0], [0], [1], [0, 0, 1, 1], [], []>} : vector<1x256xf32>, vector<256x32xf32>, vector<1x32xf32> -> vector<1x32xf32>
    %16 = tpu.concatenate %13, %15 in 0 : vector<1x32xf32>, vector<1x32xf32> -> vector<2x32xf32>
    %cst_24 = arith.constant dense<0.000000e+00> : vector<2x32xf32>
    %17 = tpu.matmul %16, %6, %cst_24 {dimension_numbers = #tpu.dot_dimension_numbers<[1], [0], [0], [1], [0, 0, 1, 1], [], []>} : vector<2x32xf32>, vector<32x32xf32>, vector<2x32xf32> -> vector<2x32xf32>
    %18 = vector.extract_strided_slice %17 {offsets = [0, 0], sizes = [1, 32], strides = [1, 1]} : vector<2x32xf32> to vector<1x32xf32>
    %cst_25 = arith.constant 0.001953125 : f32
    %19 = vector.broadcast %cst_25 : f32 to vector<1x32xf32>
    %20 = arith.mulf %18, %19 : vector<1x32xf32>
    %21 = vector.extract_strided_slice %17 {offsets = [1, 0], sizes = [1, 32], strides = [1, 1]} : vector<2x32xf32> to vector<1x32xf32>
    %cst_26 = arith.constant 0.001953125 : f32
    %22 = vector.broadcast %cst_26 : f32 to vector<1x32xf32>
    %23 = arith.mulf %21, %22 : vector<1x32xf32>
    %24 = arith.mulf %20, %20 : vector<1x32xf32>
    %25 = arith.subf %23, %24 : vector<1x32xf32>
    %cst_27 = arith.constant 9.99999974E-6 : f32
    %26 = vector.broadcast %cst_27 : f32 to vector<1x32xf32>
    %27 = arith.addf %25, %26 : vector<1x32xf32>
    %28 = math.rsqrt %27 : vector<1x32xf32>
    %29 = arith.mulf %28, %11 : vector<1x32xf32>
    %30 = arith.mulf %20, %29 : vector<1x32xf32>
    %31 = arith.subf %12, %30 : vector<1x32xf32>
    %32 = vector.broadcast %29 : vector<1x32xf32> to vector<256x32xf32>
    %33 = arith.mulf %10, %32 : vector<256x32xf32>
    %34 = vector.broadcast %31 : vector<1x32xf32> to vector<256x32xf32>
    %35 = arith.addf %33, %34 : vector<256x32xf32>
    %cst_28 = arith.constant 0.000000e+00 : f32
    %36 = vector.broadcast %cst_28 : f32 to vector<256x32xf32>
    %37 = arith.maximumf %35, %36 : vector<256x32xf32>
    %38 = vector.shape_cast %37 : vector<256x32xf32> to vector<16x16x32xf32>
    %c1 = arith.constant 1 : index
    %c1_29 = arith.constant 1 : index
    %c0_30 = arith.constant 0 : index
    %39 = vector.load %arg10[%c1, %c1_29, %c0_30] : memref<18x18x32xf32, #tpu.memory_space<vmem>>, vector<16x16x32xf32>
    tpu.vector_store %arg10[%c1, %c1_29, %c0_30], %38 {strides = array<i32>} : memref<18x18x32xf32, #tpu.memory_space<vmem>>, vector<16x16x32xf32>,
    %c0_31 = arith.constant 0 : index
    %c0_32 = arith.constant 0 : index
    %40 = vector.load %arg5[%c0_31, %c0_32] : memref<288x32xf32, #tpu.memory_space<vmem>>, vector<288x32xf32>
    %c0_33 = arith.constant 0 : index
    %c0_34 = arith.constant 0 : index
    %c0_35 = arith.constant 0 : index
    %41 = vector.load %arg10[%c0_33, %c0_34, %c0_35] : memref<18x18x32xf32, #tpu.memory_space<vmem>>, vector<16x16x32xf32>
    %42 = vector.shape_cast %41 : vector<16x16x32xf32> to vector<256x32xf32>
    %c0_36 = arith.constant 0 : index
    %c1_37 = arith.constant 1 : index
    %c0_38 = arith.constant 0 : index
    %43 = vector.load %arg10[%c0_36, %c1_37, %c0_38] : memref<18x18x32xf32, #tpu.memory_space<vmem>>, vector<16x16x32xf32>
    %44 = vector.shape_cast %43 : vector<16x16x32xf32> to vector<256x32xf32>
    %c0_39 = arith.constant 0 : index
    %c2 = arith.constant 2 : index
    %c0_40 = arith.constant 0 : index
    %45 = vector.load %arg10[%c0_39, %c2, %c0_40] : memref<18x18x32xf32, #tpu.memory_space<vmem>>, vector<16x16x32xf32>
    %46 = vector.shape_cast %45 : vector<16x16x32xf32> to vector<256x32xf32>
    %c1_41 = arith.constant 1 : index
    %c0_42 = arith.constant 0 : index
    %c0_43 = arith.constant 0 : index
    %47 = vector.load %arg10[%c1_41, %c0_42, %c0_43] : memref<18x18x32xf32, #tpu.memory_space<vmem>>, vector<16x16x32xf32>
    %48 = vector.shape_cast %47 : vector<16x16x32xf32> to vector<256x32xf32>
    %c1_44 = arith.constant 1 : index
    %c1_45 = arith.constant 1 : index
    %c0_46 = arith.constant 0 : index
    %49 = vector.load %arg10[%c1_44, %c1_45, %c0_46] : memref<18x18x32xf32, #tpu.memory_space<vmem>>, vector<16x16x32xf32>
    %50 = vector.shape_cast %49 : vector<16x16x32xf32> to vector<256x32xf32>
    %c1_47 = arith.constant 1 : index
    %c2_48 = arith.constant 2 : index
    %c0_49 = arith.constant 0 : index
    %51 = vector.load %arg10[%c1_47, %c2_48, %c0_49] : memref<18x18x32xf32, #tpu.memory_space<vmem>>, vector<16x16x32xf32>
    %52 = vector.shape_cast %51 : vector<16x16x32xf32> to vector<256x32xf32>
    %c2_50 = arith.constant 2 : index
    %c0_51 = arith.constant 0 : index
    %c0_52 = arith.constant 0 : index
    %53 = vector.load %arg10[%c2_50, %c0_51, %c0_52] : memref<18x18x32xf32, #tpu.memory_space<vmem>>, vector<16x16x32xf32>
    %54 = vector.shape_cast %53 : vector<16x16x32xf32> to vector<256x32xf32>
    %c2_53 = arith.constant 2 : index
    %c1_54 = arith.constant 1 : index
    %c0_55 = arith.constant 0 : index
    %55 = vector.load %arg10[%c2_53, %c1_54, %c0_55] : memref<18x18x32xf32, #tpu.memory_space<vmem>>, vector<16x16x32xf32>
    %56 = vector.shape_cast %55 : vector<16x16x32xf32> to vector<256x32xf32>
    %c2_56 = arith.constant 2 : index
    %c2_57 = arith.constant 2 : index
    %c0_58 = arith.constant 0 : index
    %57 = vector.load %arg10[%c2_56, %c2_57, %c0_58] : memref<18x18x32xf32, #tpu.memory_space<vmem>>, vector<16x16x32xf32>
    %58 = vector.shape_cast %57 : vector<16x16x32xf32> to vector<256x32xf32>
    %59 = tpu.concatenate %42, %44, %46, %48, %50, %52, %54, %56, %58 in 1 : vector<256x32xf32>, vector<256x32xf32>, vector<256x32xf32>, vector<256x32xf32>, vector<256x32xf32>, vector<256x32xf32>, vector<256x32xf32>, vector<256x32xf32>, vector<256x32xf32> -> vector<256x288xf32>
    %cst_59 = arith.constant dense<0.000000e+00> : vector<256x32xf32>
    %60 = tpu.matmul %59, %40, %cst_59 {dimension_numbers = #tpu.dot_dimension_numbers<[1], [0], [0], [1], [0, 0, 1, 1], [], []>} : vector<256x288xf32>, vector<288x32xf32>, vector<256x32xf32> -> vector<256x32xf32>
    %c0_60 = arith.constant 0 : index
    %c0_61 = arith.constant 0 : index
    %61 = vector.load %arg6[%c0_60, %c0_61] : memref<1x32xf32, #tpu.memory_space<vmem>>, vector<1x32xf32>
    %c0_62 = arith.constant 0 : index
    %c0_63 = arith.constant 0 : index
    %62 = vector.load %arg7[%c0_62, %c0_63] : memref<1x32xf32, #tpu.memory_space<vmem>>, vector<1x32xf32>
    %cst_64 = arith.constant dense<0.000000e+00> : vector<1x32xf32>
    %63 = tpu.matmul %7, %60, %cst_64 {dimension_numbers = #tpu.dot_dimension_numbers<[1], [0], [0], [1], [0, 0, 1, 1], [], []>} : vector<1x256xf32>, vector<256x32xf32>, vector<1x32xf32> -> vector<1x32xf32>
    %64 = arith.mulf %60, %60 : vector<256x32xf32>
    %cst_65 = arith.constant dense<0.000000e+00> : vector<1x32xf32>
    %65 = tpu.matmul %7, %64, %cst_65 {dimension_numbers = #tpu.dot_dimension_numbers<[1], [0], [0], [1], [0, 0, 1, 1], [], []>} : vector<1x256xf32>, vector<256x32xf32>, vector<1x32xf32> -> vector<1x32xf32>
    %66 = tpu.concatenate %63, %65 in 0 : vector<1x32xf32>, vector<1x32xf32> -> vector<2x32xf32>
    %cst_66 = arith.constant dense<0.000000e+00> : vector<2x32xf32>
    %67 = tpu.matmul %66, %6, %cst_66 {dimension_numbers = #tpu.dot_dimension_numbers<[1], [0], [0], [1], [0, 0, 1, 1], [], []>} : vector<2x32xf32>, vector<32x32xf32>, vector<2x32xf32> -> vector<2x32xf32>
    %68 = vector.extract_strided_slice %67 {offsets = [0, 0], sizes = [1, 32], strides = [1, 1]} : vector<2x32xf32> to vector<1x32xf32>
    %cst_67 = arith.constant 0.001953125 : f32
    %69 = vector.broadcast %cst_67 : f32 to vector<1x32xf32>
    %70 = arith.mulf %68, %69 : vector<1x32xf32>
    %71 = vector.extract_strided_slice %67 {offsets = [1, 0], sizes = [1, 32], strides = [1, 1]} : vector<2x32xf32> to vector<1x32xf32>
    %cst_68 = arith.constant 0.001953125 : f32
    %72 = vector.broadcast %cst_68 : f32 to vector<1x32xf32>
    %73 = arith.mulf %71, %72 : vector<1x32xf32>
    %74 = arith.mulf %70, %70 : vector<1x32xf32>
    %75 = arith.subf %73, %74 : vector<1x32xf32>
    %cst_69 = arith.constant 9.99999974E-6 : f32
    %76 = vector.broadcast %cst_69 : f32 to vector<1x32xf32>
    %77 = arith.addf %75, %76 : vector<1x32xf32>
    %78 = math.rsqrt %77 : vector<1x32xf32>
    %79 = arith.mulf %78, %61 : vector<1x32xf32>
    %80 = arith.mulf %70, %79 : vector<1x32xf32>
    %81 = arith.subf %62, %80 : vector<1x32xf32>
    %82 = vector.broadcast %79 : vector<1x32xf32> to vector<256x32xf32>
    %83 = arith.mulf %60, %82 : vector<256x32xf32>
    %84 = vector.broadcast %81 : vector<1x32xf32> to vector<256x32xf32>
    %85 = arith.addf %83, %84 : vector<256x32xf32>
    %cst_70 = arith.constant 0.000000e+00 : f32
    %86 = vector.broadcast %cst_70 : f32 to vector<256x32xf32>
    %87 = arith.maximumf %85, %86 : vector<256x32xf32>
    %88 = vector.shape_cast %87 : vector<256x32xf32> to vector<16x16x32xf32>
    %c1_71 = arith.constant 1 : index
    %c1_72 = arith.constant 1 : index
    %c0_73 = arith.constant 0 : index
    %89 = vector.load %arg10[%c1_71, %c1_72, %c0_73] : memref<18x18x32xf32, #tpu.memory_space<vmem>>, vector<16x16x32xf32>
    tpu.vector_store %arg10[%c1_71, %c1_72, %c0_73], %88 {strides = array<i32>} : memref<18x18x32xf32, #tpu.memory_space<vmem>>, vector<16x16x32xf32>,
    %c0_74 = arith.constant 0 : index
    %c0_75 = arith.constant 0 : index
    %90 = vector.load %arg8[%c0_74, %c0_75] : memref<288x32xf32, #tpu.memory_space<vmem>>, vector<288x32xf32>
    %c0_76 = arith.constant 0 : index
    %c0_77 = arith.constant 0 : index
    %c0_78 = arith.constant 0 : index
    %91 = vector.load %arg10[%c0_76, %c0_77, %c0_78] : memref<18x18x32xf32, #tpu.memory_space<vmem>>, vector<16x16x32xf32>
    %92 = vector.shape_cast %91 : vector<16x16x32xf32> to vector<256x32xf32>
    %c0_79 = arith.constant 0 : index
    %c1_80 = arith.constant 1 : index
    %c0_81 = arith.constant 0 : index
    %93 = vector.load %arg10[%c0_79, %c1_80, %c0_81] : memref<18x18x32xf32, #tpu.memory_space<vmem>>, vector<16x16x32xf32>
    %94 = vector.shape_cast %93 : vector<16x16x32xf32> to vector<256x32xf32>
    %c0_82 = arith.constant 0 : index
    %c2_83 = arith.constant 2 : index
    %c0_84 = arith.constant 0 : index
    %95 = vector.load %arg10[%c0_82, %c2_83, %c0_84] : memref<18x18x32xf32, #tpu.memory_space<vmem>>, vector<16x16x32xf32>
    %96 = vector.shape_cast %95 : vector<16x16x32xf32> to vector<256x32xf32>
    %c1_85 = arith.constant 1 : index
    %c0_86 = arith.constant 0 : index
    %c0_87 = arith.constant 0 : index
    %97 = vector.load %arg10[%c1_85, %c0_86, %c0_87] : memref<18x18x32xf32, #tpu.memory_space<vmem>>, vector<16x16x32xf32>
    %98 = vector.shape_cast %97 : vector<16x16x32xf32> to vector<256x32xf32>
    %c1_88 = arith.constant 1 : index
    %c1_89 = arith.constant 1 : index
    %c0_90 = arith.constant 0 : index
    %99 = vector.load %arg10[%c1_88, %c1_89, %c0_90] : memref<18x18x32xf32, #tpu.memory_space<vmem>>, vector<16x16x32xf32>
    %100 = vector.shape_cast %99 : vector<16x16x32xf32> to vector<256x32xf32>
    %c1_91 = arith.constant 1 : index
    %c2_92 = arith.constant 2 : index
    %c0_93 = arith.constant 0 : index
    %101 = vector.load %arg10[%c1_91, %c2_92, %c0_93] : memref<18x18x32xf32, #tpu.memory_space<vmem>>, vector<16x16x32xf32>
    %102 = vector.shape_cast %101 : vector<16x16x32xf32> to vector<256x32xf32>
    %c2_94 = arith.constant 2 : index
    %c0_95 = arith.constant 0 : index
    %c0_96 = arith.constant 0 : index
    %103 = vector.load %arg10[%c2_94, %c0_95, %c0_96] : memref<18x18x32xf32, #tpu.memory_space<vmem>>, vector<16x16x32xf32>
    %104 = vector.shape_cast %103 : vector<16x16x32xf32> to vector<256x32xf32>
    %c2_97 = arith.constant 2 : index
    %c1_98 = arith.constant 1 : index
    %c0_99 = arith.constant 0 : index
    %105 = vector.load %arg10[%c2_97, %c1_98, %c0_99] : memref<18x18x32xf32, #tpu.memory_space<vmem>>, vector<16x16x32xf32>
    %106 = vector.shape_cast %105 : vector<16x16x32xf32> to vector<256x32xf32>
    %c2_100 = arith.constant 2 : index
    %c2_101 = arith.constant 2 : index
    %c0_102 = arith.constant 0 : index
    %107 = vector.load %arg10[%c2_100, %c2_101, %c0_102] : memref<18x18x32xf32, #tpu.memory_space<vmem>>, vector<16x16x32xf32>
    %108 = vector.shape_cast %107 : vector<16x16x32xf32> to vector<256x32xf32>
    %109 = tpu.concatenate %92, %94, %96, %98, %100, %102, %104, %106, %108 in 1 : vector<256x32xf32>, vector<256x32xf32>, vector<256x32xf32>, vector<256x32xf32>, vector<256x32xf32>, vector<256x32xf32>, vector<256x32xf32>, vector<256x32xf32>, vector<256x32xf32> -> vector<256x288xf32>
    %cst_103 = arith.constant dense<0.000000e+00> : vector<256x32xf32>
    %110 = tpu.matmul %109, %90, %cst_103 {dimension_numbers = #tpu.dot_dimension_numbers<[1], [0], [0], [1], [0, 0, 1, 1], [], []>} : vector<256x288xf32>, vector<288x32xf32>, vector<256x32xf32> -> vector<256x32xf32>
    %c0_104 = arith.constant 0 : index
    %c0_105 = arith.constant 0 : index
    %c0_106 = arith.constant 0 : index
    %c0_107 = arith.constant 0 : index
    %111 = vector.load %arg1[%c0_104, %c0_105, %c0_106, %c0_107] : memref<1x16x16x32xf32, #tpu.memory_space<vmem>>, vector<1x16x16x32xf32>
    %112 = vector.shape_cast %111 : vector<1x16x16x32xf32> to vector<16x16x32xf32>
    %113 = vector.shape_cast %112 : vector<16x16x32xf32> to vector<256x32xf32>
    %114 = arith.addf %110, %113 : vector<256x32xf32>
    %115 = vector.shape_cast %114 : vector<256x32xf32> to vector<16x16x32xf32>
    %c0_108 = arith.constant 0 : index
    %c0_109 = arith.constant 0 : index
    %c0_110 = arith.constant 0 : index
    %c0_111 = arith.constant 0 : index
    %116 = vector.load %arg9[%c0_108, %c0_109, %c0_110, %c0_111] : memref<1x16x16x32xf32, #tpu.memory_space<vmem>>, vector<1x16x16x32xf32>
    %117 = vector.shape_cast %116 : vector<1x16x16x32xf32> to vector<16x16x32xf32>
    %118 = vector.shape_cast %115 : vector<16x16x32xf32> to vector<1x16x16x32xf32>
    tpu.vector_store %arg9[%c0_108, %c0_109, %c0_110, %c0_111], %118 {strides = array<i32>} : memref<1x16x16x32xf32, #tpu.memory_space<vmem>>, vector<1x16x16x32xf32>,
    return
  }
  func.func @transform_0(%arg0: i32) -> (i32, i32, i32, i32) {
    %c0_i32 = arith.constant 0 : i32
    %c0_i32_0 = arith.constant 0 : i32
    %c0_i32_1 = arith.constant 0 : i32
    %c0_i32_2 = arith.constant 0 : i32
    return %arg0, %c0_i32, %c0_i32_0, %c0_i32_1 : i32, i32, i32, i32
  }
  func.func @transform_1(%arg0: i32) -> (i32, i32) {
    %c0_i32 = arith.constant 0 : i32
    %c0_i32_0 = arith.constant 0 : i32
    %c0_i32_1 = arith.constant 0 : i32
    return %c0_i32, %c0_i32_0 : i32, i32
  }
  func.func @transform_2(%arg0: i32) -> (i32, i32) {
    %c0_i32 = arith.constant 0 : i32
    %c0_i32_0 = arith.constant 0 : i32
    %c0_i32_1 = arith.constant 0 : i32
    return %c0_i32, %c0_i32_0 : i32, i32
  }
  func.func @transform_3(%arg0: i32) -> (i32, i32) {
    %c0_i32 = arith.constant 0 : i32
    %c0_i32_0 = arith.constant 0 : i32
    %c0_i32_1 = arith.constant 0 : i32
    return %c0_i32, %c0_i32_0 : i32, i32
  }
  func.func @transform_4(%arg0: i32) -> (i32, i32) {
    %c0_i32 = arith.constant 0 : i32
    %c0_i32_0 = arith.constant 0 : i32
    %c0_i32_1 = arith.constant 0 : i32
    return %c0_i32, %c0_i32_0 : i32, i32
  }
  func.func @transform_5(%arg0: i32) -> (i32, i32) {
    %c0_i32 = arith.constant 0 : i32
    %c0_i32_0 = arith.constant 0 : i32
    %c0_i32_1 = arith.constant 0 : i32
    return %c0_i32, %c0_i32_0 : i32, i32
  }
  func.func @transform_6(%arg0: i32) -> (i32, i32) {
    %c0_i32 = arith.constant 0 : i32
    %c0_i32_0 = arith.constant 0 : i32
    %c0_i32_1 = arith.constant 0 : i32
    return %c0_i32, %c0_i32_0 : i32, i32
  }
  func.func @transform_7(%arg0: i32) -> (i32, i32) {
    %c0_i32 = arith.constant 0 : i32
    %c0_i32_0 = arith.constant 0 : i32
    %c0_i32_1 = arith.constant 0 : i32
    return %c0_i32, %c0_i32_0 : i32, i32
  }
  func.func @transform_8(%arg0: i32) -> (i32, i32, i32, i32) {
    %c0_i32 = arith.constant 0 : i32
    %c0_i32_0 = arith.constant 0 : i32
    %c0_i32_1 = arith.constant 0 : i32
    %c0_i32_2 = arith.constant 0 : i32
    return %arg0, %c0_i32, %c0_i32_0, %c0_i32_1 : i32, i32, i32, i32
  }
}

module attributes {stable_mosaic.version = 11 : i64} {
  func.func @_nobottleneck_kernel(%arg0: i32, %arg1: memref<1x16x16x32xf32, #tpu.memory_space<vmem>>, %arg2: memref<32x32xf32, #tpu.memory_space<vmem>>, %arg3: memref<1x32xf32, #tpu.memory_space<vmem>>, %arg4: memref<1x32xf32, #tpu.memory_space<vmem>>, %arg5: memref<288x32xf32, #tpu.memory_space<vmem>>, %arg6: memref<1x32xf32, #tpu.memory_space<vmem>>, %arg7: memref<1x32xf32, #tpu.memory_space<vmem>>, %arg8: memref<288x32xf32, #tpu.memory_space<vmem>>, %arg9: memref<1x16x16x32xf32, #tpu.memory_space<vmem>>, %arg10: memref<18x18x32xf32, #tpu.memory_space<vmem>>) attributes {dimension_semantics = [#tpu.dimension_semantics<parallel>], iteration_bounds = array<i64: 2>, scalar_prefetch = 0 : i64, scratch_operands = 1 : i64, tpu.core_type = #tpu.core_type<tc>, window_params = [{transform_indices = @transform_0, window_bounds = array<i64: 1, 16, 16, 32>}, {pipeline_mode = #tpu.pipeline_mode<synchronous>, transform_indices = @transform_1, window_bounds = array<i64: 32, 32>}, {pipeline_mode = #tpu.pipeline_mode<synchronous>, transform_indices = @transform_2, window_bounds = array<i64: 1, 32>}, {pipeline_mode = #tpu.pipeline_mode<synchronous>, transform_indices = @transform_3, window_bounds = array<i64: 1, 32>}, {pipeline_mode = #tpu.pipeline_mode<synchronous>, transform_indices = @transform_4, window_bounds = array<i64: 288, 32>}, {pipeline_mode = #tpu.pipeline_mode<synchronous>, transform_indices = @transform_5, window_bounds = array<i64: 1, 32>}, {pipeline_mode = #tpu.pipeline_mode<synchronous>, transform_indices = @transform_6, window_bounds = array<i64: 1, 32>}, {pipeline_mode = #tpu.pipeline_mode<synchronous>, transform_indices = @transform_7, window_bounds = array<i64: 288, 32>}, {transform_indices = @transform_8, window_bounds = array<i64: 1, 16, 16, 32>}]} {
    %cst = arith.constant 0.000000e+00 : f32
    %0 = vector.broadcast %cst : f32 to vector<1x18x32xf32>
    %c0 = arith.constant 0 : index
    %c0_0 = arith.constant 0 : index
    %c0_1 = arith.constant 0 : index
    %1 = vector.load %arg10[%c0, %c0_0, %c0_1] : memref<18x18x32xf32, #tpu.memory_space<vmem>>, vector<1x18x32xf32>
    tpu.vector_store %arg10[%c0, %c0_0, %c0_1], %0 {strides = array<i32>} : memref<18x18x32xf32, #tpu.memory_space<vmem>>, vector<1x18x32xf32>,
    %c17 = arith.constant 17 : index
    %c0_2 = arith.constant 0 : index
    %c0_3 = arith.constant 0 : index
    %2 = vector.load %arg10[%c17, %c0_2, %c0_3] : memref<18x18x32xf32, #tpu.memory_space<vmem>>, vector<1x18x32xf32>
    tpu.vector_store %arg10[%c17, %c0_2, %c0_3], %0 {strides = array<i32>} : memref<18x18x32xf32, #tpu.memory_space<vmem>>, vector<1x18x32xf32>,
    %cst_4 = arith.constant 0.000000e+00 : f32
    %3 = vector.broadcast %cst_4 : f32 to vector<18x1x32xf32>
    %c0_5 = arith.constant 0 : index
    %c0_6 = arith.constant 0 : index
    %c0_7 = arith.constant 0 : index
    %4 = vector.load %arg10[%c0_5, %c0_6, %c0_7] : memref<18x18x32xf32, #tpu.memory_space<vmem>>, vector<18x1x32xf32>
    tpu.vector_store %arg10[%c0_5, %c0_6, %c0_7], %3 {strides = array<i32>} : memref<18x18x32xf32, #tpu.memory_space<vmem>>, vector<18x1x32xf32>,
    %c0_8 = arith.constant 0 : index
    %c17_9 = arith.constant 17 : index
    %c0_10 = arith.constant 0 : index
    %5 = vector.load %arg10[%c0_8, %c17_9, %c0_10] : memref<18x18x32xf32, #tpu.memory_space<vmem>>, vector<18x1x32xf32>
    tpu.vector_store %arg10[%c0_8, %c17_9, %c0_10], %3 {strides = array<i32>} : memref<18x18x32xf32, #tpu.memory_space<vmem>>, vector<18x1x32xf32>,
    %c0_11 = arith.constant 0 : index
    %c0_12 = arith.constant 0 : index
    %6 = vector.load %arg2[%c0_11, %c0_12] : memref<32x32xf32, #tpu.memory_space<vmem>>, vector<32x32xf32>
    %cst_13 = arith.constant 1.000000e+00 : f32
    %7 = vector.broadcast %cst_13 : f32 to vector<1x256xf32>
    %c0_14 = arith.constant 0 : index
    %c0_15 = arith.constant 0 : index
    %c0_16 = arith.constant 0 : index
    %c0_17 = arith.constant 0 : index
    %8 = vector.load %arg1[%c0_14, %c0_15, %c0_16, %c0_17] : memref<1x16x16x32xf32, #tpu.memory_space<vmem>>, vector<1x16x16x32xf32>
    %9 = vector.shape_cast %8 : vector<1x16x16x32xf32> to vector<16x16x32xf32>
    %10 = vector.shape_cast %9 : vector<16x16x32xf32> to vector<256x32xf32>
    %c0_18 = arith.constant 0 : index
    %c0_19 = arith.constant 0 : index
    %11 = vector.load %arg3[%c0_18, %c0_19] : memref<1x32xf32, #tpu.memory_space<vmem>>, vector<1x32xf32>
    %c0_20 = arith.constant 0 : index
    %c0_21 = arith.constant 0 : index
    %12 = vector.load %arg4[%c0_20, %c0_21] : memref<1x32xf32, #tpu.memory_space<vmem>>, vector<1x32xf32>
    %cst_22 = arith.constant dense<0.000000e+00> : vector<1x32xf32>
    %13 = tpu.matmul %7, %10, %cst_22 {dimension_numbers = #tpu.dot_dimension_numbers<[1], [0], [0], [1], [0, 0, 1, 1], [], []>} : vector<1x256xf32>, vector<256x32xf32>, vector<1x32xf32> -> vector<1x32xf32>
    %14 = arith.mulf %10, %10 : vector<256x32xf32>
    %cst_23 = arith.constant dense<0.000000e+00> : vector<1x32xf32>
    %15 = tpu.matmul %7, %14, %cst_23 {dimension_numbers = #tpu.dot_dimension_numbers<[1], [0], [0], [1], [0, 0, 1, 1], [], []>} : vector<1x256xf32>, vector<256x32xf32>, vector<1x32xf32> -> vector<1x32xf32>
    %16 = tpu.concatenate %13, %15 in 0 : vector<1x32xf32>, vector<1x32xf32> -> vector<2x32xf32>
    %cst_24 = arith.constant dense<0.000000e+00> : vector<2x32xf32>
    %17 = tpu.matmul %16, %6, %cst_24 {dimension_numbers = #tpu.dot_dimension_numbers<[1], [0], [0], [1], [0, 0, 1, 1], [], []>} : vector<2x32xf32>, vector<32x32xf32>, vector<2x32xf32> -> vector<2x32xf32>
    %18 = vector.extract_strided_slice %17 {offsets = [0, 0], sizes = [1, 32], strides = [1, 1]} : vector<2x32xf32> to vector<1x32xf32>
    %cst_25 = arith.constant 0.001953125 : f32
    %19 = vector.broadcast %cst_25 : f32 to vector<1x32xf32>
    %20 = arith.mulf %18, %19 : vector<1x32xf32>
    %21 = vector.extract_strided_slice %17 {offsets = [1, 0], sizes = [1, 32], strides = [1, 1]} : vector<2x32xf32> to vector<1x32xf32>
    %cst_26 = arith.constant 0.001953125 : f32
    %22 = vector.broadcast %cst_26 : f32 to vector<1x32xf32>
    %23 = arith.mulf %21, %22 : vector<1x32xf32>
    %24 = arith.mulf %20, %20 : vector<1x32xf32>
    %25 = arith.subf %23, %24 : vector<1x32xf32>
    %cst_27 = arith.constant 9.99999974E-6 : f32
    %26 = vector.broadcast %cst_27 : f32 to vector<1x32xf32>
    %27 = arith.addf %25, %26 : vector<1x32xf32>
    %28 = math.rsqrt %27 : vector<1x32xf32>
    %29 = arith.mulf %28, %11 : vector<1x32xf32>
    %30 = arith.mulf %20, %29 : vector<1x32xf32>
    %31 = arith.subf %12, %30 : vector<1x32xf32>
    %32 = vector.broadcast %29 : vector<1x32xf32> to vector<256x32xf32>
    %33 = arith.mulf %10, %32 : vector<256x32xf32>
    %34 = vector.broadcast %31 : vector<1x32xf32> to vector<256x32xf32>
    %35 = arith.addf %33, %34 : vector<256x32xf32>
    %cst_28 = arith.constant 0.000000e+00 : f32
    %36 = vector.broadcast %cst_28 : f32 to vector<256x32xf32>
    %37 = arith.maximumf %35, %36 : vector<256x32xf32>
    %38 = vector.shape_cast %37 : vector<256x32xf32> to vector<16x16x32xf32>
    %c1 = arith.constant 1 : index
    %c1_29 = arith.constant 1 : index
    %c0_30 = arith.constant 0 : index
    %39 = vector.load %arg10[%c1, %c1_29, %c0_30] : memref<18x18x32xf32, #tpu.memory_space<vmem>>, vector<16x16x32xf32>
    tpu.vector_store %arg10[%c1, %c1_29, %c0_30], %38 {strides = array<i32>} : memref<18x18x32xf32, #tpu.memory_space<vmem>>, vector<16x16x32xf32>,
    %c0_31 = arith.constant 0 : index
    %c0_32 = arith.constant 0 : index
    %40 = vector.load %arg5[%c0_31, %c0_32] : memref<288x32xf32, #tpu.memory_space<vmem>>, vector<288x32xf32>
    %c0_33 = arith.constant 0 : index
    %c0_34 = arith.constant 0 : index
    %c0_35 = arith.constant 0 : index
    %41 = vector.load %arg10[%c0_33, %c0_34, %c0_35] : memref<18x18x32xf32, #tpu.memory_space<vmem>>, vector<16x16x32xf32>
    %42 = vector.shape_cast %41 : vector<16x16x32xf32> to vector<256x32xf32>
    %c0_36 = arith.constant 0 : index
    %c1_37 = arith.constant 1 : index
    %c0_38 = arith.constant 0 : index
    %43 = vector.load %arg10[%c0_36, %c1_37, %c0_38] : memref<18x18x32xf32, #tpu.memory_space<vmem>>, vector<16x16x32xf32>
    %44 = vector.shape_cast %43 : vector<16x16x32xf32> to vector<256x32xf32>
    %c0_39 = arith.constant 0 : index
    %c2 = arith.constant 2 : index
    %c0_40 = arith.constant 0 : index
    %45 = vector.load %arg10[%c0_39, %c2, %c0_40] : memref<18x18x32xf32, #tpu.memory_space<vmem>>, vector<16x16x32xf32>
    %46 = vector.shape_cast %45 : vector<16x16x32xf32> to vector<256x32xf32>
    %c1_41 = arith.constant 1 : index
    %c0_42 = arith.constant 0 : index
    %c0_43 = arith.constant 0 : index
    %47 = vector.load %arg10[%c1_41, %c0_42, %c0_43] : memref<18x18x32xf32, #tpu.memory_space<vmem>>, vector<16x16x32xf32>
    %48 = vector.shape_cast %47 : vector<16x16x32xf32> to vector<256x32xf32>
    %c1_44 = arith.constant 1 : index
    %c1_45 = arith.constant 1 : index
    %c0_46 = arith.constant 0 : index
    %49 = vector.load %arg10[%c1_44, %c1_45, %c0_46] : memref<18x18x32xf32, #tpu.memory_space<vmem>>, vector<16x16x32xf32>
    %50 = vector.shape_cast %49 : vector<16x16x32xf32> to vector<256x32xf32>
    %c1_47 = arith.constant 1 : index
    %c2_48 = arith.constant 2 : index
    %c0_49 = arith.constant 0 : index
    %51 = vector.load %arg10[%c1_47, %c2_48, %c0_49] : memref<18x18x32xf32, #tpu.memory_space<vmem>>, vector<16x16x32xf32>
    %52 = vector.shape_cast %51 : vector<16x16x32xf32> to vector<256x32xf32>
    %c2_50 = arith.constant 2 : index
    %c0_51 = arith.constant 0 : index
    %c0_52 = arith.constant 0 : index
    %53 = vector.load %arg10[%c2_50, %c0_51, %c0_52] : memref<18x18x32xf32, #tpu.memory_space<vmem>>, vector<16x16x32xf32>
    %54 = vector.shape_cast %53 : vector<16x16x32xf32> to vector<256x32xf32>
    %c2_53 = arith.constant 2 : index
    %c1_54 = arith.constant 1 : index
    %c0_55 = arith.constant 0 : index
    %55 = vector.load %arg10[%c2_53, %c1_54, %c0_55] : memref<18x18x32xf32, #tpu.memory_space<vmem>>, vector<16x16x32xf32>
    %56 = vector.shape_cast %55 : vector<16x16x32xf32> to vector<256x32xf32>
    %c2_56 = arith.constant 2 : index
    %c2_57 = arith.constant 2 : index
    %c0_58 = arith.constant 0 : index
    %57 = vector.load %arg10[%c2_56, %c2_57, %c0_58] : memref<18x18x32xf32, #tpu.memory_space<vmem>>, vector<16x16x32xf32>
    %58 = vector.shape_cast %57 : vector<16x16x32xf32> to vector<256x32xf32>
    %59 = tpu.concatenate %42, %44, %46, %48, %50, %52, %54, %56, %58 in 1 : vector<256x32xf32>, vector<256x32xf32>, vector<256x32xf32>, vector<256x32xf32>, vector<256x32xf32>, vector<256x32xf32>, vector<256x32xf32>, vector<256x32xf32>, vector<256x32xf32> -> vector<256x288xf32>
    %cst_59 = arith.constant dense<0.000000e+00> : vector<256x32xf32>
    %60 = tpu.matmul %59, %40, %cst_59 {dimension_numbers = #tpu.dot_dimension_numbers<[1], [0], [0], [1], [0, 0, 1, 1], [], []>} : vector<256x288xf32>, vector<288x32xf32>, vector<256x32xf32> -> vector<256x32xf32>
    %c0_60 = arith.constant 0 : index
    %c0_61 = arith.constant 0 : index
    %61 = vector.load %arg6[%c0_60, %c0_61] : memref<1x32xf32, #tpu.memory_space<vmem>>, vector<1x32xf32>
    %c0_62 = arith.constant 0 : index
    %c0_63 = arith.constant 0 : index
    %62 = vector.load %arg7[%c0_62, %c0_63] : memref<1x32xf32, #tpu.memory_space<vmem>>, vector<1x32xf32>
    %cst_64 = arith.constant dense<0.000000e+00> : vector<1x32xf32>
    %63 = tpu.matmul %7, %60, %cst_64 {dimension_numbers = #tpu.dot_dimension_numbers<[1], [0], [0], [1], [0, 0, 1, 1], [], []>} : vector<1x256xf32>, vector<256x32xf32>, vector<1x32xf32> -> vector<1x32xf32>
    %64 = arith.mulf %60, %60 : vector<256x32xf32>
    %cst_65 = arith.constant dense<0.000000e+00> : vector<1x32xf32>
    %65 = tpu.matmul %7, %64, %cst_65 {dimension_numbers = #tpu.dot_dimension_numbers<[1], [0], [0], [1], [0, 0, 1, 1], [], []>} : vector<1x256xf32>, vector<256x32xf32>, vector<1x32xf32> -> vector<1x32xf32>
    %66 = tpu.concatenate %63, %65 in 0 : vector<1x32xf32>, vector<1x32xf32> -> vector<2x32xf32>
    %cst_66 = arith.constant dense<0.000000e+00> : vector<2x32xf32>
    %67 = tpu.matmul %66, %6, %cst_66 {dimension_numbers = #tpu.dot_dimension_numbers<[1], [0], [0], [1], [0, 0, 1, 1], [], []>} : vector<2x32xf32>, vector<32x32xf32>, vector<2x32xf32> -> vector<2x32xf32>
    %68 = vector.extract_strided_slice %67 {offsets = [0, 0], sizes = [1, 32], strides = [1, 1]} : vector<2x32xf32> to vector<1x32xf32>
    %cst_67 = arith.constant 0.001953125 : f32
    %69 = vector.broadcast %cst_67 : f32 to vector<1x32xf32>
    %70 = arith.mulf %68, %69 : vector<1x32xf32>
    %71 = vector.extract_strided_slice %67 {offsets = [1, 0], sizes = [1, 32], strides = [1, 1]} : vector<2x32xf32> to vector<1x32xf32>
    %cst_68 = arith.constant 0.001953125 : f32
    %72 = vector.broadcast %cst_68 : f32 to vector<1x32xf32>
    %73 = arith.mulf %71, %72 : vector<1x32xf32>
    %74 = arith.mulf %70, %70 : vector<1x32xf32>
    %75 = arith.subf %73, %74 : vector<1x32xf32>
    %cst_69 = arith.constant 9.99999974E-6 : f32
    %76 = vector.broadcast %cst_69 : f32 to vector<1x32xf32>
    %77 = arith.addf %75, %76 : vector<1x32xf32>
    %78 = math.rsqrt %77 : vector<1x32xf32>
    %79 = arith.mulf %78, %61 : vector<1x32xf32>
    %80 = arith.mulf %70, %79 : vector<1x32xf32>
    %81 = arith.subf %62, %80 : vector<1x32xf32>
    %82 = vector.broadcast %79 : vector<1x32xf32> to vector<256x32xf32>
    %83 = arith.mulf %60, %82 : vector<256x32xf32>
    %84 = vector.broadcast %81 : vector<1x32xf32> to vector<256x32xf32>
    %85 = arith.addf %83, %84 : vector<256x32xf32>
    %cst_70 = arith.constant 0.000000e+00 : f32
    %86 = vector.broadcast %cst_70 : f32 to vector<256x32xf32>
    %87 = arith.maximumf %85, %86 : vector<256x32xf32>
    %88 = vector.shape_cast %87 : vector<256x32xf32> to vector<16x16x32xf32>
    %c1_71 = arith.constant 1 : index
    %c1_72 = arith.constant 1 : index
    %c0_73 = arith.constant 0 : index
    %89 = vector.load %arg10[%c1_71, %c1_72, %c0_73] : memref<18x18x32xf32, #tpu.memory_space<vmem>>, vector<16x16x32xf32>
    tpu.vector_store %arg10[%c1_71, %c1_72, %c0_73], %88 {strides = array<i32>} : memref<18x18x32xf32, #tpu.memory_space<vmem>>, vector<16x16x32xf32>,
    %c0_74 = arith.constant 0 : index
    %c0_75 = arith.constant 0 : index
    %90 = vector.load %arg8[%c0_74, %c0_75] : memref<288x32xf32, #tpu.memory_space<vmem>>, vector<288x32xf32>
    %c0_76 = arith.constant 0 : index
    %c0_77 = arith.constant 0 : index
    %c0_78 = arith.constant 0 : index
    %91 = vector.load %arg10[%c0_76, %c0_77, %c0_78] : memref<18x18x32xf32, #tpu.memory_space<vmem>>, vector<16x16x32xf32>
    %92 = vector.shape_cast %91 : vector<16x16x32xf32> to vector<256x32xf32>
    %c0_79 = arith.constant 0 : index
    %c1_80 = arith.constant 1 : index
    %c0_81 = arith.constant 0 : index
    %93 = vector.load %arg10[%c0_79, %c1_80, %c0_81] : memref<18x18x32xf32, #tpu.memory_space<vmem>>, vector<16x16x32xf32>
    %94 = vector.shape_cast %93 : vector<16x16x32xf32> to vector<256x32xf32>
    %c0_82 = arith.constant 0 : index
    %c2_83 = arith.constant 2 : index
    %c0_84 = arith.constant 0 : index
    %95 = vector.load %arg10[%c0_82, %c2_83, %c0_84] : memref<18x18x32xf32, #tpu.memory_space<vmem>>, vector<16x16x32xf32>
    %96 = vector.shape_cast %95 : vector<16x16x32xf32> to vector<256x32xf32>
    %c1_85 = arith.constant 1 : index
    %c0_86 = arith.constant 0 : index
    %c0_87 = arith.constant 0 : index
    %97 = vector.load %arg10[%c1_85, %c0_86, %c0_87] : memref<18x18x32xf32, #tpu.memory_space<vmem>>, vector<16x16x32xf32>
    %98 = vector.shape_cast %97 : vector<16x16x32xf32> to vector<256x32xf32>
    %c1_88 = arith.constant 1 : index
    %c1_89 = arith.constant 1 : index
    %c0_90 = arith.constant 0 : index
    %99 = vector.load %arg10[%c1_88, %c1_89, %c0_90] : memref<18x18x32xf32, #tpu.memory_space<vmem>>, vector<16x16x32xf32>
    %100 = vector.shape_cast %99 : vector<16x16x32xf32> to vector<256x32xf32>
    %c1_91 = arith.constant 1 : index
    %c2_92 = arith.constant 2 : index
    %c0_93 = arith.constant 0 : index
    %101 = vector.load %arg10[%c1_91, %c2_92, %c0_93] : memref<18x18x32xf32, #tpu.memory_space<vmem>>, vector<16x16x32xf32>
    %102 = vector.shape_cast %101 : vector<16x16x32xf32> to vector<256x32xf32>
    %c2_94 = arith.constant 2 : index
    %c0_95 = arith.constant 0 : index
    %c0_96 = arith.constant 0 : index
    %103 = vector.load %arg10[%c2_94, %c0_95, %c0_96] : memref<18x18x32xf32, #tpu.memory_space<vmem>>, vector<16x16x32xf32>
    %104 = vector.shape_cast %103 : vector<16x16x32xf32> to vector<256x32xf32>
    %c2_97 = arith.constant 2 : index
    %c1_98 = arith.constant 1 : index
    %c0_99 = arith.constant 0 : index
    %105 = vector.load %arg10[%c2_97, %c1_98, %c0_99] : memref<18x18x32xf32, #tpu.memory_space<vmem>>, vector<16x16x32xf32>
    %106 = vector.shape_cast %105 : vector<16x16x32xf32> to vector<256x32xf32>
    %c2_100 = arith.constant 2 : index
    %c2_101 = arith.constant 2 : index
    %c0_102 = arith.constant 0 : index
    %107 = vector.load %arg10[%c2_100, %c2_101, %c0_102] : memref<18x18x32xf32, #tpu.memory_space<vmem>>, vector<16x16x32xf32>
    %108 = vector.shape_cast %107 : vector<16x16x32xf32> to vector<256x32xf32>
    %109 = tpu.concatenate %92, %94, %96, %98, %100, %102, %104, %106, %108 in 1 : vector<256x32xf32>, vector<256x32xf32>, vector<256x32xf32>, vector<256x32xf32>, vector<256x32xf32>, vector<256x32xf32>, vector<256x32xf32>, vector<256x32xf32>, vector<256x32xf32> -> vector<256x288xf32>
    %cst_103 = arith.constant dense<0.000000e+00> : vector<256x32xf32>
    %110 = tpu.matmul %109, %90, %cst_103 {dimension_numbers = #tpu.dot_dimension_numbers<[1], [0], [0], [1], [0, 0, 1, 1], [], []>} : vector<256x288xf32>, vector<288x32xf32>, vector<256x32xf32> -> vector<256x32xf32>
    %c0_104 = arith.constant 0 : index
    %c0_105 = arith.constant 0 : index
    %c0_106 = arith.constant 0 : index
    %c0_107 = arith.constant 0 : index
    %111 = vector.load %arg1[%c0_104, %c0_105, %c0_106, %c0_107] : memref<1x16x16x32xf32, #tpu.memory_space<vmem>>, vector<1x16x16x32xf32>
    %112 = vector.shape_cast %111 : vector<1x16x16x32xf32> to vector<16x16x32xf32>
    %113 = vector.shape_cast %112 : vector<16x16x32xf32> to vector<256x32xf32>
    %114 = arith.addf %110, %113 : vector<256x32xf32>
    %115 = vector.shape_cast %114 : vector<256x32xf32> to vector<16x16x32xf32>
    %c0_108 = arith.constant 0 : index
    %c0_109 = arith.constant 0 : index
    %c0_110 = arith.constant 0 : index
    %c0_111 = arith.constant 0 : index
    %116 = vector.load %arg9[%c0_108, %c0_109, %c0_110, %c0_111] : memref<1x16x16x32xf32, #tpu.memory_space<vmem>>, vector<1x16x16x32xf32>
    %117 = vector.shape_cast %116 : vector<1x16x16x32xf32> to vector<16x16x32xf32>
    %118 = vector.shape_cast %115 : vector<16x16x32xf32> to vector<1x16x16x32xf32>
    tpu.vector_store %arg9[%c0_108, %c0_109, %c0_110, %c0_111], %118 {strides = array<i32>} : memref<1x16x16x32xf32, #tpu.memory_space<vmem>>, vector<1x16x16x32xf32>,
    return
  }
  func.func @transform_0(%arg0: i32) -> (i32, i32, i32, i32) {
    %c0_i32 = arith.constant 0 : i32
    %c0_i32_0 = arith.constant 0 : i32
    %c0_i32_1 = arith.constant 0 : i32
    %c0_i32_2 = arith.constant 0 : i32
    return %arg0, %c0_i32, %c0_i32_0, %c0_i32_1 : i32, i32, i32, i32
  }
  func.func @transform_1(%arg0: i32) -> (i32, i32) {
    %c0_i32 = arith.constant 0 : i32
    %c0_i32_0 = arith.constant 0 : i32
    %c0_i32_1 = arith.constant 0 : i32
    return %c0_i32, %c0_i32_0 : i32, i32
  }
  func.func @transform_2(%arg0: i32) -> (i32, i32) {
    %c0_i32 = arith.constant 0 : i32
    %c0_i32_0 = arith.constant 0 : i32
    %c0_i32_1 = arith.constant 0 : i32
    return %c0_i32, %c0_i32_0 : i32, i32
  }
  func.func @transform_3(%arg0: i32) -> (i32, i32) {
    %c0_i32 = arith.constant 0 : i32
    %c0_i32_0 = arith.constant 0 : i32
    %c0_i32_1 = arith.constant 0 : i32
    return %c0_i32, %c0_i32_0 : i32, i32
  }
  func.func @transform_4(%arg0: i32) -> (i32, i32) {
    %c0_i32 = arith.constant 0 : i32
    %c0_i32_0 = arith.constant 0 : i32
    %c0_i32_1 = arith.constant 0 : i32
    return %c0_i32, %c0_i32_0 : i32, i32
  }
  func.func @transform_5(%arg0: i32) -> (i32, i32) {
    %c0_i32 = arith.constant 0 : i32
    %c0_i32_0 = arith.constant 0 : i32
    %c0_i32_1 = arith.constant 0 : i32
    return %c0_i32, %c0_i32_0 : i32, i32
  }
  func.func @transform_6(%arg0: i32) -> (i32, i32) {
    %c0_i32 = arith.constant 0 : i32
    %c0_i32_0 = arith.constant 0 : i32
    %c0_i32_1 = arith.constant 0 : i32
    return %c0_i32, %c0_i32_0 : i32, i32
  }
  func.func @transform_7(%arg0: i32) -> (i32, i32) {
    %c0_i32 = arith.constant 0 : i32
    %c0_i32_0 = arith.constant 0 : i32
    %c0_i32_1 = arith.constant 0 : i32
    return %c0_i32, %c0_i32_0 : i32, i32
  }
  func.func @transform_8(%arg0: i32) -> (i32, i32, i32, i32) {
    %c0_i32 = arith.constant 0 : i32
    %c0_i32_0 = arith.constant 0 : i32
    %c0_i32_1 = arith.constant 0 : i32
    %c0_i32_2 = arith.constant 0 : i32
    return %arg0, %c0_i32, %c0_i32_0, %c0_i32_1 : i32, i32, i32, i32
  }
}

</mosaic_0001>

<bundles_post_ra>
// kernel: tpu_custom_call.1
= control target key start
LH: loop header
LB: loop body
LE: loop exit
PB: predicated region body
PF: predicated region fallthrough
CT: control target
= control target key end

     0   :  { %13 = vsyncpa [#allocation4], 0  ;;  %s9398_s0 = inlined_call_operand.vmem [shape: f32[2,16,16,32], index: 0, kind: input, shape index: {}]   ;;  %s9399_s1 = inlined_call_operand.vmem [shape: f32[32,32], index: 1, kind: input, shape index: {}]   ;;  %s9400_s2 = inlined_call_operand.vmem [shape: f32[1,32], index: 2, kind: input, shape index: {}]   ;;  %s9401_s3 = inlined_call_operand.vmem [shape: f32[1,32], index: 3, kind: input, shape index: {}]   ;;  %s9402_s4 = inlined_call_operand.vmem [shape: f32[288,32], index: 4, kind: input, shape index: {}]   ;;  %s9403_s5 = inlined_call_operand.vmem [shape: f32[1,32], index: 5, kind: input, shape index: {}]   ;;  %s9404_s6 = inlined_call_operand.vmem [shape: f32[1,32], index: 6, kind: input, shape index: {}]   ;;  %s9405_s7 = inlined_call_operand.vmem [shape: f32[288,32], index: 7, kind: input, shape index: {}]   ;;  %s9406_s8 = inlined_call_operand.hbm [shape: f32[2,16,16,32], index: 8, kind: output, shape index: {}]  }
   0x1   :  { %15 = vsyncpa [#allocation4 + $0x1], 0  ;;  %s6830_s27 = smov 0   ;;  %s6832_s28 = smov 0  }
   0x2   :  { %s6834_s29 = smov 0   ;;  %s6836_s30 = smov 0  }
   0x3 LB: > { %s6851_s9 = sadd.s32 4294967295, %s6773_s30   ;;  %s5009_s10 = sadd.s32 4294967294, %s6773_s30   ;;  %s6773_s30 = sphi %s6836_s30, %s9415_s30   ;;  %s6769_s29 = sphi %s6834_s29, %s9414_s29   ;;  %s6765_s28 = sphi %s6832_s28, %s9413_s28   ;;  %s6761_s27 = sphi %s6830_s27, %s9412_s27  }
   0x4   : > { %s6855_s11 = sadd.s32 1, %s6773_s30   ;;  %s201_s12 = sadd.s32 1, %s6769_s29 }
   0x5   : > { %s198_s13 = ssub.s32 %s6773_s30, %s6855_s11  ;;  %p211_p0 = scmp.ne.s32.totalorder %s6769_s29, %s6765_s28 }
   0x6   : > { %p199_p1 = scmp.eq.s32.totalorder %s198_s13, 0  ;;  %p212_p2 = scmp.eq.s32.totalorder %s6851_s9, 1 }
   0x7   : > { %p217_p3 = scmp.ne.s32.totalorder %s6765_s28, %s6761_s27  ;;  %p218_p4 = scmp.eq.s32.totalorder %s5009_s10, 1 }
   0x8   : > { %s6866_s14 = scalar_select %p199_p1, %s6769_s29, %s201_s12  }
   0x9   : > { %p6868_p5 = por %p212_p2, %p211_p0  ;;  %p6872_p6 = por %p218_p4, %p217_p3 }
   0xa   : > { %p5012_p7 = scmp.ge.s32.totalorder %s6773_s30, 1  ;;  %p265_p8 = scmp.lt.s32.totalorder %s6773_s30, 3 }
   0xc   : > { %p266_p9 = pnand %p5012_p7, %p265_p8 }
   0xd   : > { %p299_p10 = scmp.lt.s32.totalorder (!%p266_p9), %s6851_s9, 1  ;;  %v6775_v0 = vmov (!%p266_p9), 1.0   ;;  %vm304_vm0 = vcmask (!%p266_p9), 261120   ;;  %vm6777_vm1 = vmmov (!%p266_p9), 0   ;;  %vm563_vm2 = vcmask (!%p266_p9), 1040384   ;;  %s6779_s22 = smov (!%p266_p9), 32  }
   0xe   : > { %269 = sbr.rel (%p266_p9) target bundleno = 2100 (0x834), region = 52  ;;  %554 = vmatprep.mubr.f32.mxu1 (!%p266_p9), %v6775_v0  ;;  %452 = vmatprep.mubr.f32.mxu0 (!%p266_p9), %v6775_v0  ;;  %vm307_vm3 = vcmask (!%p266_p9), 254976   ;;  %vm313_vm4 = vcmask (!%p266_p9), 253952   ;;  %s9407_s23 = smov (!%p266_p9), 96   ;;  %vm1922_vm5 = vcmask (!%p266_p9), 523264   ;;  %vm1955_vm6 = vcmask (!%p266_p9), 785408  }
   0xf   : > { %s6781_s12 = smov (!%p266_p9), 64   ;;  %s9411_s24 = smov (!%p266_p9), 96  }
  0x10   : > { %s6782_s25 = smov (!%p266_p9), [#allocation3]  }
  0x15   : > { %s300_s17 = scalar_select %p299_p10, %s6851_s9, 1 }
  0x17   : > { %s5089_s18 = sshll.u32 %s300_s17, 8  ;;  %s5090_s17 = sshll.u32 %s6851_s9, 12 }
  0x18   : > { %s6885_s21 = scalar_lea.vmem %s9398_s0, %s5089_s18 }
  0x19   : > { %v6888_v1 = vld [vmem:[%s6885_s21 + $0x80] sm:$0xff]  ;;  %v6891_v2 = vld [vmem:[%s6885_s21 + $0x88] sm:$0xff]  ;;  %v6908_v9 = vld [vmem:[%s6885_s21 + $0x90] sm:$0xff] }
  0x1a   : > { %v6894_v3 = vld [vmem:[%s6885_s21] sm:$0xff]  ;;  %v474_v4 = vmul.f32 %v6888_v1, %v6888_v1  ;;  %v475_v5 = vmul.f32 %v6891_v2, %v6891_v2  ;;  %v5447_v6 = vpack.c.bf16 %v6891_v2, %v6888_v1  ;;  %v6903_v7 = vld [vmem:[%s6885_s21 + $0x8] sm:$0xff]  ;;  %v6911_v10 = vld [vmem:[%s6885_s21 + $0x98] sm:$0xff]  ;;  %v476_v13 = vmul.f32 %v6908_v9, %v6908_v9 }
  0x1b   : > { %v458_v8 = vmul.f32 %v6894_v3, %v6894_v3  ;;  %v459_v11 = vmul.f32 %v6903_v7, %v6903_v7  ;;  %v5449_v12 = vpack.c.bf16 %v6903_v7, %v6894_v3  ;;  %v477_v14 = vmul.f32 %v6911_v10, %v6911_v10  ;;  %v6922_v15 = vld [vmem:[%s6885_s21 + $0x10] sm:$0xff]  ;;  %v6925_v16 = vld [vmem:[%s6885_s21 + $0x18] sm:$0xff]  ;;  %v6928_v17 = vld [vmem:[%s6885_s21 + $0xa0] sm:$0xff] }
  0x1c   : > { %v5479_v18 = vpack.c.bf16 %v475_v5, %v474_v4  ;;  %5448 = vmatprep.subr.bf16.mxu0 %v5447_v6  ;;  %v5451_v19 = vpack.c.bf16 %v6911_v10, %v6908_v9  ;;  %v460_v20 = vmul.f32 %v6922_v15, %v6922_v15  ;;  %v461_v21 = vmul.f32 %v6925_v16, %v6925_v16  ;;  %v6937_v22 = vld [vmem:[%s6885_s21 + $0xa8] sm:$0xff]  ;;  %v6940_v23 = vld [vmem:[%s6885_s21 + $0x20] sm:$0xff]  ;;  %v6950_v29 = vld [vmem:[%s6885_s21 + $0xb0] sm:$0xff] }
  0x1d   : > { %v6943_v24 = vld [vmem:[%s6885_s21 + $0x28] sm:$0xff]  ;;  %v5481_v25 = vpack.c.bf16 %v459_v11, %v458_v8  ;;  %5450 = vmatpush3.bf16.msra.mxu0 %v5449_v12  ;;  %v5483_v26 = vpack.c.bf16 %v477_v14, %v476_v13  ;;  %v5453_v27 = vpack.c.bf16 %v6925_v16, %v6922_v15  ;;  %v478_v28 = vmul.f32 %v6928_v17, %v6928_v17  ;;  %v6953_v30 = vld [vmem:[%s6885_s21 + $0xb8] sm:$0xff]  ;;  %v6968_v39 = vld [vmem:[%s6885_s21 + $0x30] sm:$0xff] }
  0x1e   : > { %5480 = vmatprep.subr.bf16.mxu1 %v5479_v18  ;;  %5452 = vmatprep.subr.bf16.mxu0 %v5451_v19  ;;  %v479_v31 = vmul.f32 %v6937_v22, %v6937_v22  ;;  %v5455_v32 = vpack.c.bf16 %v6937_v22, %v6928_v17  ;;  %v5485_v33 = vpack.c.bf16 %v461_v21, %v460_v20  ;;  %v6971_v40 = vld [vmem:[%s6885_s21 + $0x38] sm:$0xff]  ;;  %v6976_v42 = vld [vmem:[%s6885_s21 + $0xc0] sm:$0xff]  ;;  %v6979_v43 = vld [vmem:[%s6885_s21 + $0xc8] sm:$0xff] }
  0x1f   : > { %5482 = vmatpush3.bf16.msra.mxu1 %v5481_v25  ;;  %v462_v34 = vmul.f32 %v6940_v23, %v6940_v23  ;;  %v463_v35 = vmul.f32 %v6943_v24, %v6943_v24  ;;  %v480_v37 = vmul.f32 %v6950_v29, %v6950_v29  ;;  %v481_v38 = vmul.f32 %v6953_v30, %v6953_v30  ;;  %v6992_v51 = vld [vmem:[%s6885_s21 + $0x40] sm:$0xff]  ;;  %v6995_v52 = vld [vmem:[%s6885_s21 + $0x48] sm:$0xff]  ;;  %v7000_v54 = vld [vmem:[%s6885_s21 + $0xd0] sm:$0xff] }
  0x20   : > { %5484 = vmatprep.subr.bf16.mxu1 %v5483_v26  ;;  %v5487_v36 = vpack.c.bf16 %v479_v31, %v478_v28  ;;  %v5457_v41 = vpack.c.bf16 %v6943_v24, %v6940_v23  ;;  %v5459_v44 = vpack.c.bf16 %v6953_v30, %v6950_v29  ;;  %v464_v46 = vmul.f32 %v6968_v39, %v6968_v39  ;;  %v7003_v55 = vld [vmem:[%s6885_s21 + $0xd8] sm:$0xff]  ;;  %v7016_v63 = vld [vmem:[%s6885_s21 + $0x50] sm:$0xff]  ;;  %v7024_v6 = vld [vmem:[%s6885_s21 + $0xe0] sm:$0xff] }
  0x21   : > { %5454 = vmatpush3.bf16.msra.mxu0 %v5453_v27  ;;  %v5489_v45 = vpack.c.bf16 %v463_v35, %v462_v34  ;;  %v465_v47 = vmul.f32 %v6971_v40, %v6971_v40  ;;  %v5491_v48 = vpack.c.bf16 %v481_v38, %v480_v37  ;;  %v482_v49 = vmul.f32 %v6976_v42, %v6976_v42  ;;  %v7019_v4 = vld [vmem:[%s6885_s21 + $0x58] sm:$0xff]  ;;  %v7027_v8 = vld [vmem:[%s6885_s21 + $0xe8] sm:$0xff]  ;;  %v7040_v21 = vld [vmem:[%s6885_s21 + $0x60] sm:$0xff] }
  0x22   : > { %5456 = vmatprep.subr.bf16.mxu0 %v5455_v32  ;;  %v483_v50 = vmul.f32 %v6979_v43, %v6979_v43  ;;  %v5461_v53 = vpack.c.bf16 %v6971_v40, %v6968_v39  ;;  %v5463_v56 = vpack.c.bf16 %v6979_v43, %v6976_v42  ;;  %v466_v58 = vmul.f32 %v6992_v51, %v6992_v51  ;;  %v7043_v25 = vld [vmem:[%s6885_s21 + $0x68] sm:$0xff]  ;;  %v7048_v27 = vld [vmem:[%s6885_s21 + $0xf0] sm:$0xff]  ;;  %v7051_v28 = vld [vmem:[%s6885_s21 + $0xf8] sm:$0xff] }
  0x23   : > { %5486 = vmatpush3.bf16.msra.mxu1 %v5485_v33  ;;  %v5493_v57 = vpack.c.bf16 %v465_v47, %v464_v46  ;;  %v467_v59 = vmul.f32 %v6995_v52, %v6995_v52  ;;  %v484_v61 = vmul.f32 %v7000_v54, %v7000_v54  ;;  %v485_v62 = vmul.f32 %v7003_v55, %v7003_v55  ;;  %v7064_v38 = vld [vmem:[%s6885_s21 + $0x70] sm:$0xff] }
  0x24   : > { %5488 = vmatprep.subr.bf16.mxu1 %v5487_v36  ;;  %v5495_v60 = vpack.c.bf16 %v483_v50, %v482_v49  ;;  %v5465_v5 = vpack.c.bf16 %v6995_v52, %v6992_v51  ;;  %v5467_v11 = vpack.c.bf16 %v7003_v55, %v7000_v54  ;;  %v468_v13 = vmul.f32 %v7016_v63, %v7016_v63 }
  0x25   : > { %5458 = vmatpush3.bf16.msra.mxu0 %v5457_v41  ;;  %v5497_v12 = vpack.c.bf16 %v467_v59, %v466_v58  ;;  %v469_v14 = vmul.f32 %v7019_v4, %v7019_v4  ;;  %v5499_v18 = vpack.c.bf16 %v485_v62, %v484_v61  ;;  %v486_v19 = vmul.f32 %v7024_v6, %v7024_v6  ;;  %v7067_v41 = vld [vmem:[%s6885_s21 + $0x78] sm:$0xff]  ;;  %v351_v58 = vld [vmem:[%s9399_s1 + $0x8] sm:$0xff] }
  0x26   : > { %5460 = vmatprep.subr.bf16.mxu0 %v5459_v44  ;;  %v487_v20 = vmul.f32 %v7027_v8, %v7027_v8  ;;  %v5469_v26 = vpack.c.bf16 %v7019_v4, %v7016_v63  ;;  %v5471_v31 = vpack.c.bf16 %v7027_v8, %v7024_v6  ;;  %v470_v33 = vmul.f32 %v7040_v21, %v7040_v21  ;;  %v353_v61 = vld [vmem:[%s9399_s1 + $0x18] sm:$0xff] }
  0x27   : > { %5490 = vmatpush3.bf16.msra.mxu1 %v5489_v45  ;;  %v5501_v32 = vpack.c.bf16 %v469_v14, %v468_v13  ;;  %v471_v34 = vmul.f32 %v7043_v25, %v7043_v25  ;;  %v488_v36 = vmul.f32 %v7048_v27, %v7048_v27  ;;  %v489_v37 = vmul.f32 %v7051_v28, %v7051_v28 }
  0x28   : > { %5492 = vmatprep.subr.bf16.mxu1 %v5491_v48  ;;  %v5503_v35 = vpack.c.bf16 %v487_v20, %v486_v19  ;;  %v5473_v44 = vpack.c.bf16 %v7043_v25, %v7040_v21  ;;  %v5475_v45 = vpack.c.bf16 %v7051_v28, %v7048_v27  ;;  %v472_v47 = vmul.f32 %v7064_v38, %v7064_v38 }
  0x29   : > { %5462 = vmatpush3.bf16.msra.mxu0 %v5461_v53  ;;  %v5505_v46 = vpack.c.bf16 %v471_v34, %v470_v33  ;;  %v473_v48 = vmul.f32 %v7067_v41, %v7067_v41  ;;  %v5507_v49 = vpack.c.bf16 %v489_v37, %v488_v36  ;;  %v5477_v50 = vpack.c.bf16 %v7067_v41, %v7064_v38  ;;  %v831_v34 = vld [vmem:[%s9402_s4 + $0x110] sm:$0xff]  ;;  %v797_v37 = vld [vmem:[%s9402_s4] sm:$0xff] }
  0x2a   : > { %5464 = vmatprep.subr.bf16.mxu0 %v5463_v56  ;;  %v6776_v56 = vmov 0.0|0.0  }
  0x2b   : > { %5494 = vmatpush3.bf16.msra.mxu1 %v5493_v57  ;;  %v5509_v53 = vpack.c.bf16 %v473_v48, %v472_v47  ;;  %v350_v57 = vld [vmem:[%s9399_s1] sm:$0xff]  ;;  %v800_v47 = vld [vmem:[%s9402_s4 + $0x18] sm:$0xff] }
  0x2c   : > { %5496 = vmatprep.subr.bf16.mxu1 %v5495_v60  ;;  %v7088_v59 = vpack.c.bf16 %v351_v58, %v350_v57  ;;  %v352_v60 = vld [vmem:[%s9399_s1 + $0x10] sm:$0xff] }
  0x2d   : > { %5466 = vmatpush3.bf16.msra.mxu0 %v5465_v5  ;;  %v7098_v62 = vpack.c.bf16 %v353_v61, %v352_v60  ;;  %v6778_v5 = vmov 0.0   ;;  %v803_v58 = vld [vmem:[%s9402_s4 + $0x30] sm:$0xff]  ;;  %v804_v60 = vld [vmem:[%s9402_s4 + $0x38] sm:$0xff] }
  0x2e   : > { %5468 = vmatprep.subr.bf16.mxu0 %v5467_v11  ;;  %305 = vst.msk [vmem:[#allocation2] sm:$0xff] %vm304_vm0, %v6778_v5  ;;  %306 = vst.msk [vmem:[#allocation2 + $0x8] sm:$0xff] %vm304_vm0, %v6778_v5 }
  0x2f   : > { %5498 = vmatpush3.bf16.msra.mxu1 %v5497_v12  ;;  %310 = vst.msk [vmem:[#allocation2 + $0x198] sm:$0xff] %vm304_vm0, %v6778_v5  ;;  %311 = vst.msk [vmem:[#allocation2 + $0x1a0] sm:$0xff] %vm304_vm0, %v6778_v5 }
  0x30   : > { %5500 = vmatprep.subr.bf16.mxu1 %v5499_v18  ;;  %308 = vst.msk [vmem:[#allocation2 + $0x10] sm:$0x3] %vm307_vm3, %v6778_v5  ;;  %312 = vst.msk [vmem:[#allocation2 + $0x1a8] sm:$0x3] %vm307_vm3, %v6778_v5 }
  0x31   : > { %5470 = vmatpush3.bf16.msra.mxu0 %v5469_v26  ;;  %334 = vst.msk [vmem:[#allocation2 + $0x41] sm:$0x1] %vm313_vm4, %v6778_v5  ;;  %314 = vst.msk [vmem:[#allocation2] sm:$0x1] %vm313_vm4, %v6778_v5 }
  0x32   : > { %5472 = vmatprep.subr.bf16.mxu0 %v5471_v31  ;;  %v829_v31 = vld [vmem:[%s9402_s4 + $0x100] sm:$0xff]  ;;  %315 = vst.msk [vmem:[#allocation2 + $0x18] sm:$0x1] %vm313_vm4, %v6778_v5  ;;  %316 = vst.msk [vmem:[#allocation2 + $0x30] sm:$0x1] %vm313_vm4, %v6778_v5 }
  0x33   : > { %5502 = vmatpush3.bf16.msra.mxu1 %v5501_v32  ;;  %v830_v32 = vld [vmem:[%s9402_s4 + $0x108] sm:$0xff]  ;;  %317 = vst.msk [vmem:[#allocation2 + $0x48] sm:$0x1] %vm313_vm4, %v6778_v5  ;;  %318 = vst.msk [vmem:[#allocation2 + $0x60] sm:$0x1] %vm313_vm4, %v6778_v5 }
  0x34   : > { %5504 = vmatprep.subr.bf16.mxu1 %v5503_v35  ;;  %v5565_v33 = vpack.c.bf16 %v830_v32, %v829_v31  ;;  %v832_v35 = vld [vmem:[%s9402_s4 + $0x118] sm:$0xff]  ;;  %319 = vst.msk [vmem:[#allocation2 + $0x78] sm:$0x1] %vm313_vm4, %v6778_v5  ;;  %320 = vst.msk [vmem:[#allocation2 + $0x90] sm:$0x1] %vm313_vm4, %v6778_v5  ;;  %v807_v31 = vld [vmem:[%s9402_s4 + $0x50] sm:$0xff] }
  0x35   : > { %5474 = vmatpush3.bf16.msra.mxu0 %v5473_v44  ;;  %321 = vst.msk [vmem:[#allocation2 + $0xa8] sm:$0x1] %vm313_vm4, %v6778_v5  ;;  %322 = vst.msk [vmem:[#allocation2 + $0xc0] sm:$0x1] %vm313_vm4, %v6778_v5  ;;  %v5569_v36 = vpack.c.bf16 %v832_v35, %v831_v34  ;;  %v798_v44 = vld [vmem:[%s9402_s4 + $0x8] sm:$0xff]  ;;  %v808_v32 = vld [vmem:[%s9402_s4 + $0x58] sm:$0xff]  ;;  %v658_v35 = vlaneseq }
  0x36   : > { %5476 = vmatprep.subr.bf16.mxu0 %v5475_v45  ;;  %323 = vst.msk [vmem:[#allocation2 + $0xd8] sm:$0x1] %vm313_vm4, %v6778_v5  ;;  %324 = vst.msk [vmem:[#allocation2 + $0xf0] sm:$0x1] %vm313_vm4, %v6778_v5  ;;  %v5518_v45 = vpack.c.bf16 %v798_v44, %v797_v37  ;;  %v5533_v34 = vpack.c.bf16 %v808_v32, %v807_v31  ;;  %v810_v37 = vld [vmem:[%s9402_s4 + $0x68] sm:$0xff] }
  0x37   : > { %5506 = vmatpush3.bf16.msra.mxu1 %v5505_v46  ;;  %325 = vst.msk [vmem:[#allocation2 + $0x108] sm:$0x1] %vm313_vm4, %v6778_v5  ;;  %326 = vst.msk [vmem:[#allocation2 + $0x120] sm:$0x1] %vm313_vm4, %v6778_v5  ;;  %v799_v46 = vld [vmem:[%s9402_s4 + $0x10] sm:$0xff] }
  0x38   : > { %5508 = vmatprep.subr.bf16.mxu1 %v5507_v49  ;;  %327 = vst.msk [vmem:[#allocation2 + $0x138] sm:$0x1] %vm313_vm4, %v6778_v5  ;;  %328 = vst.msk [vmem:[#allocation2 + $0x150] sm:$0x1] %vm313_vm4, %v6778_v5  ;;  %v5521_v48 = vpack.c.bf16 %v800_v47, %v799_v46  ;;  %v801_v49 = vld [vmem:[%s9402_s4 + $0x20] sm:$0xff]  ;;  %v811_v46 = vld [vmem:[%s9402_s4 + $0x70] sm:$0xff] }
  0x39   : > { %5478 = vmatpush3.bf16.msra.mxu0 %v5477_v50  ;;  %329 = vst.msk [vmem:[#allocation2 + $0x168] sm:$0x1] %vm313_vm4, %v6778_v5  ;;  %330 = vst.msk [vmem:[#allocation2 + $0x180] sm:$0x1] %vm313_vm4, %v6778_v5  ;;  %v802_v50 = vld [vmem:[%s9402_s4 + $0x28] sm:$0xff]  ;;  %v812_v47 = vld [vmem:[%s9402_s4 + $0x78] sm:$0xff] }
  0x3a   : > { %5566 = vmatprep.subr.bf16.mxu0 %v5565_v33  ;;  %331 = vst.msk [vmem:[#allocation2 + $0x198] sm:$0x1] %vm313_vm4, %v6778_v5  ;;  %333 = vst.msk [vmem:[#allocation2 + $0x29] sm:$0x1] %vm313_vm4, %v6778_v5 }
  0x3b   : > { %5510 = vmatpush3.bf16.msra.mxu1 %v5509_v53  ;;  %335 = vst.msk [vmem:[#allocation2 + $0x59] sm:$0x1] %vm313_vm4, %v6778_v5  ;;  %336 = vst.msk [vmem:[#allocation2 + $0x71] sm:$0x1] %vm313_vm4, %v6778_v5  ;;  %v5524_v53 = vpack.c.bf16 %v802_v50, %v801_v49  ;;  %v5017_v49 = vld [vmem:[%s9400_s2] ss:$0 sm:$0xff] }
  0x3c   : > { %453 = vmatmul.mubr.f32.vlgmr.msra.gmra.mrb[0].mxu0 %v6775_v0  ;;  %5511 = vmatprep.subr.bf16.mxu1 %v6776_v56  ;;  %337 = vst.msk [vmem:[#allocation2 + $0x89] sm:$0x1] %vm313_vm4, %v6778_v5  ;;  %338 = vst.msk [vmem:[#allocation2 + $0xa1] sm:$0x1] %vm313_vm4, %v6778_v5 }
  0x3d   : > { %5568 = vmatpush3.bf16.msra.mxu0 %v5565_v33  ;;  %339 = vst.msk [vmem:[#allocation2 + $0xb9] sm:$0x1] %vm313_vm4, %v6778_v5  ;;  %340 = vst.msk [vmem:[#allocation2 + $0xd1] sm:$0x1] %vm313_vm4, %v6778_v5 }
  0x3e   : > { %555 = vmatmul.mubr.f32.vlgmr.msra.gmra.mrb[0].mxu1 %v6775_v0  ;;  %341 = vst.msk [vmem:[#allocation2 + $0xe9] sm:$0x1] %vm313_vm4, %v6778_v5  ;;  %342 = vst.msk [vmem:[#allocation2 + $0x101] sm:$0x1] %vm313_vm4, %v6778_v5  ;;  %5570 = vmatprep.subr.bf16.mxu0 %v5569_v36 }
  0x3f   : > { %5513 = vmatpush3.bf16.msra.mxu1 %v7088_v59  ;;  %5321 = vmatprep.mubr.msk.f32.mxu1 %vm6777_vm1, %v6778_v5  ;;  %343 = vst.msk [vmem:[#allocation2 + $0x119] sm:$0x1] %vm313_vm4, %v6778_v5  ;;  %344 = vst.msk [vmem:[#allocation2 + $0x131] sm:$0x1] %vm313_vm4, %v6778_v5 }
  0x40   : > { %5514 = vmatprep.subr.bf16.mxu1 %v6776_v56  ;;  %345 = vst.msk [vmem:[#allocation2 + $0x149] sm:$0x1] %vm313_vm4, %v6778_v5  ;;  %346 = vst.msk [vmem:[#allocation2 + $0x161] sm:$0x1] %vm313_vm4, %v6778_v5 }
  0x41   : > { %347 = vst.msk [vmem:[#allocation2 + $0x179] sm:$0x1] %vm313_vm4, %v6778_v5  ;;  %348 = vst.msk [vmem:[#allocation2 + $0x191] sm:$0x1] %vm313_vm4, %v6778_v5  ;;  %5572 = vmatpush3.bf16.msra.mxu0 %v5569_v36  ;;  %v809_v36 = vld [vmem:[%s9402_s4 + $0x60] sm:$0xff] }
  0x42   : > { %332 = vst.msk [vmem:[#allocation2 + $0x11] sm:$0x1] %vm313_vm4, %v6778_v5  ;;  %349 = vst.msk [vmem:[#allocation2 + $0x1a9] sm:$0x1] %vm313_vm4, %v6778_v5  ;;  %v5536_v44 = vpack.c.bf16 %v810_v37, %v809_v36 }
  0x43   : > { %5516 = vmatpush3.bf16.msra.mxu1 %v7098_v62 }
  0x44   : > { %5517 = vmatprep.subr.bf16.mxu1 %v6776_v56 }
 0x10f   : > { %v5123_v11 = vpop.f32.mrb[0].mxu0 }
 0x110   : > { %v5124_v12 = vpop.f32.mrb[1].mxu0 }
 0x111   : > { %v5158_v13 = vpop.f32.mrb[0].mxu1  ;;  %v5125_v14 = vadd.f32 %v5124_v12, %v5123_v11  ;;  %v5527_v12 = vpack.c.bf16 %v804_v60, %v803_v58 }
 0x112   : > { %v5159_v18 = vpop.f32.mrb[1].mxu1 }
 0x113   : > { %v5160_v19 = vadd.f32 %v5159_v18, %v5158_v13  ;;  %v806_v18 = vld [vmem:[%s9402_s4 + $0x48] sm:$0xff] }
 0x115   : > { %v561_v20 = vrot.slane %v5160_v19, 7 }
 0x117   : > { %v564_v26 = vsel %vm563_vm2, %v5125_v14, %v561_v20  ;;  %v805_v14 = vld [vmem:[%s9402_s4 + $0x40] sm:$0xff] }
 0x118   : > { %5322 = vmatmul.mubr.msk.f32.vlgmr.msra.gmra.mrb[2].mxu1 %vm304_vm0, %v564_v26  ;;  %v5530_v20 = vpack.c.bf16 %v806_v18, %v805_v14  ;;  %v815_v14 = vld [vmem:[%s9402_s4 + $0x90] sm:$0xff]  ;;  %v816_v18 = vld [vmem:[%s9402_s4 + $0x98] sm:$0xff] }
 0x119   : > { %5519 = vmatpush1.bf16.msra.mxu1 %v5518_v45  ;;  %v7248_v45 = vshrl.u32 %v658_v35, 7 }
 0x11a   : > { %5520 = vmatprep.subr.bf16.mxu1 %v6776_v56 }
 0x11b   : > { %v660_v50 = vsub.s32 1, %v7248_v45 }
 0x11d   : > { %5522 = vmatpush1.bf16.msra.mxu1 %v5521_v48  ;;  %v5539_v48 = vpack.c.bf16 %v812_v47, %v811_v46 }
 0x11e   : > { %5523 = vmatprep.subr.bf16.mxu1 %v6776_v56 }
 0x121   : > { %5525 = vmatpush1.bf16.msra.mxu1 %v5524_v53  ;;  %v813_v53 = vld [vmem:[%s9402_s4 + $0x80] sm:$0xff] }
 0x122   : > { %5526 = vmatprep.subr.bf16.mxu1 %v6776_v56 }
 0x125   : > { %5528 = vmatpush1.bf16.msra.mxu1 %v5527_v12 }
 0x126   : > { %5529 = vmatprep.subr.bf16.mxu1 %v6776_v56 }
 0x129   : > { %5531 = vmatpush1.bf16.msra.mxu1 %v5530_v20  ;;  %v697_v20 = vsub.s32 0, %v7248_v45 }
 0x12a   : > { %5532 = vmatprep.subr.bf16.mxu1 %v6776_v56 }
 0x12d   : > { %5534 = vmatpush1.bf16.msra.mxu1 %v5533_v34 }
 0x12e   : > { %5535 = vmatprep.subr.bf16.mxu1 %v6776_v56 }
 0x131   : > { %5537 = vmatpush1.bf16.msra.mxu1 %v5536_v44 }
 0x132   : > { %5538 = vmatprep.subr.bf16.mxu1 %v6776_v56 }
 0x135   : > { %5540 = vmatpush1.bf16.msra.mxu1 %v5539_v48 }
 0x136   : > { %5541 = vmatprep.subr.bf16.mxu1 %v6776_v56 }
 0x1eb   : > { %v634_v57 = vpop.f32.mrb[2].mxu1 }
 0x1ec   : > { %v638_v61 = vmul.f32 0.001953125, %v634_v57  ;;  %v5323_v11 = vpop.f32.mrb[3].mxu1  ;;  %v814_v57 = vld [vmem:[%s9402_s4 + $0x88] sm:$0xff] }
 0x1ed   : > { %v5542_v60 = vpack.c.bf16 %v814_v57, %v813_v53 }
 0x1ee   : > { %v639_v13 = vmul.f32 %v638_v61, %v638_v61 }
 0x1ef   : > { %5543 = vmatpush1.bf16.msra.mxu1 %v5542_v60 }
 0x1f0   : > { %v641_v19 = vrot.slane %v639_v13, 7  ;;  %5544 = vmatprep.subr.bf16.mxu1 %v6776_v56 }
 0x1f2   : > { %v643_v26 = vsub.f32 %v638_v61, %v641_v19  ;;  %v387_v19 = vld [vmem:[%s9401_s3] sm:$0x1] }
 0x1f4   : > { %v644_v33 = vadd.f32 1e-05, %v643_v26  ;;  %v5545_v26 = vpack.c.bf16 %v816_v18, %v815_v14 }
 0x1f6   : > { %6707 = vrsqrt.f32 %v644_v33  ;;  %5546 = vmatpush1.bf16.msra.mxu1 %v5545_v26 }
 0x1f7   : > { %5547 = vmatprep.subr.bf16.mxu1 %v6776_v56 }
 0x200   : > { %v6708_v58 = vpop.eup %6707 }
 0x201   : > { %v652_v11 = vmul.f32 %v6708_v58, %v5017_v49 }
 0x203   : > { %v654_v12 = vrot.slane %v652_v11, 1  ;;  %v661_v13 = vrot.slane %v652_v11, %v660_v50 }
 0x205   : > { %v656_v31 = vmul.f32 %v654_v12, %v638_v61  ;;  %v662_v32 = vmul.f32 %v661_v13, %v6894_v3  ;;  %v663_v33 = vmul.f32 %v661_v13, %v6903_v7  ;;  %v664_v34 = vmul.f32 %v661_v13, %v6922_v15 }
 0x206   : > { %v665_v35 = vmul.f32 %v661_v13, %v6925_v16  ;;  %v666_v36 = vmul.f32 %v661_v13, %v6940_v23  ;;  %v667_v37 = vmul.f32 %v661_v13, %v6943_v24  ;;  %v668_v44 = vmul.f32 %v661_v13, %v6968_v39 }
 0x207   : > { %v657_v46 = vsub.f32 %v387_v19, %v656_v31  ;;  %v669_v47 = vmul.f32 %v661_v13, %v6971_v40  ;;  %v670_v61 = vmul.f32 %v661_v13, %v6992_v51  ;;  %v671_v3 = vmul.f32 %v661_v13, %v6995_v52 }
 0x208   : > { %v672_v7 = vmul.f32 %v661_v13, %v7016_v63  ;;  %v673_v15 = vmul.f32 %v661_v13, %v7019_v4  ;;  %v674_v16 = vmul.f32 %v661_v13, %v7040_v21  ;;  %v675_v23 = vmul.f32 %v661_v13, %v7043_v25 }
 0x209   : > { %v698_v24 = vrot.slane %v657_v46, %v697_v20  ;;  %v676_v39 = vmul.f32 %v661_v13, %v7064_v38  ;;  %v677_v40 = vmul.f32 %v661_v13, %v7067_v41  ;;  %v678_v51 = vmul.f32 %v661_v13, %v6888_v1 }
 0x20a   : > { %v679_v52 = vmul.f32 %v661_v13, %v6891_v2  ;;  %v680_v48 = vmul.f32 %v661_v13, %v6908_v9  ;;  %v681_v63 = vmul.f32 %v661_v13, %v6911_v10  ;;  %v682_v4 = vmul.f32 %v661_v13, %v6928_v17 }
 0x20b   : > { %v683_v21 = vmul.f32 %v661_v13, %v6937_v22  ;;  %v684_v25 = vmul.f32 %v661_v13, %v6950_v29  ;;  %v685_v49 = vmul.f32 %v661_v13, %v6953_v30  ;;  %v686_v38 = vmul.f32 %v661_v13, %v6976_v42 }
 0x20c   : > { %v687_v41 = vmul.f32 %v661_v13, %v6979_v43  ;;  %v688_v1 = vmul.f32 %v661_v13, %v7000_v54  ;;  %v689_v2 = vmul.f32 %v661_v13, %v7003_v55  ;;  %v690_v9 = vmul.f32 %v661_v13, %v7024_v6 }
 0x20d   : > { %v691_v10 = vmul.f32 %v661_v13, %v7027_v8  ;;  %v692_v17 = vmul.f32 %v661_v13, %v7048_v27  ;;  %v693_v22 = vmul.f32 %v661_v13, %v7051_v28  ;;  %v700_v53 = vadd.f32 %v698_v24, %v662_v32 }
 0x20e   : > { %v701_v29 = vadd.f32 %v698_v24, %v663_v33  ;;  %v702_v57 = vadd.f32 %v698_v24, %v664_v34  ;;  %v703_v30 = vadd.f32 %v698_v24, %v665_v35  ;;  %v704_v58 = vadd.f32 %v698_v24, %v666_v36 }
 0x20f   : > { %v705_v42 = vadd.f32 %v698_v24, %v667_v37  ;;  %v706_v60 = vadd.f32 %v698_v24, %v668_v44  ;;  %v707_v43 = vadd.f32 %v698_v24, %v669_v47  ;;  %v708_v11 = vadd.f32 %v698_v24, %v670_v61 }
 0x210   : > { %v709_v54 = vadd.f32 %v698_v24, %v671_v3  ;;  %v710_v12 = vadd.f32 %v698_v24, %v672_v7  ;;  %v711_v55 = vadd.f32 %v698_v24, %v673_v15  ;;  %v712_v14 = vadd.f32 %v698_v24, %v674_v16 }
 0x211   : > { %v713_v6 = vadd.f32 %v698_v24, %v675_v23  ;;  %v714_v18 = vadd.f32 %v698_v24, %v676_v39  ;;  %v715_v8 = vadd.f32 %v698_v24, %v677_v40  ;;  %v716_v19 = vadd.f32 %v698_v24, %v678_v51 }
 0x212   : > { %v7316_v27 = vadd.f32 %v698_v24, %v679_v52  ;;  %v7318_v28 = vadd.f32 %v698_v24, %v680_v48  ;;  %v7320_v13 = vadd.f32 %v698_v24, %v681_v63  ;;  %v7322_v26 = vadd.f32 %v698_v24, %v682_v4 }
 0x213   : > { %v7324_v31 = vadd.f32 %v698_v24, %v683_v21  ;;  %v7326_v32 = vadd.f32 %v698_v24, %v684_v25  ;;  %v7328_v33 = vadd.f32 %v698_v24, %v685_v49  ;;  %v7330_v34 = vadd.f32 %v698_v24, %v686_v38 }
 0x214   : > { %v7332_v35 = vadd.f32 %v698_v24, %v687_v41  ;;  %v7334_v36 = vadd.f32 %v698_v24, %v688_v1  ;;  %v7336_v37 = vadd.f32 %v698_v24, %v689_v2  ;;  %v7338_v44 = vadd.f32 %v698_v24, %v690_v9 }
 0x215   : > { %v7340_v46 = vadd.f32 %v698_v24, %v691_v10  ;;  %v7342_v47 = vadd.f32 %v698_v24, %v692_v17  ;;  %v7344_v61 = vadd.f32 %v698_v24, %v693_v22  ;;  %v732_v3 = vmax.f32 %v700_v53, 0.0  ;;  %v817_v10 = vld [vmem:[%s9402_s4 + $0xa0] sm:$0xff]  ;;  %v818_v17 = vld [vmem:[%s9402_s4 + $0xa8] sm:$0xff] }
 0x216   : > { %v733_v7 = vmax.f32 %v701_v29, 0.0  ;;  %v734_v15 = vmax.f32 %v702_v57, 0.0  ;;  %v735_v16 = vmax.f32 %v703_v30, 0.0  ;;  %v736_v23 = vmax.f32 %v704_v58, 0.0 }
 0x217   : > { %v737_v39 = vmax.f32 %v705_v42, 0.0  ;;  %v738_v40 = vmax.f32 %v706_v60, 0.0  ;;  %v739_v51 = vmax.f32 %v707_v43, 0.0  ;;  %v740_v52 = vmax.f32 %v708_v11, 0.0  ;;  %765 = vst.msk [vmem:[#allocation2 + $0x19] sm:$0xff] %vm304_vm0, %v732_v3  ;;  %v819_v43 = vld [vmem:[%s9402_s4 + $0xb0] sm:$0xff] }
 0x218   : > { %v741_v48 = vmax.f32 %v709_v54, 0.0  ;;  %v742_v63 = vmax.f32 %v710_v12, 0.0  ;;  %v743_v4 = vmax.f32 %v711_v55, 0.0  ;;  %v744_v21 = vmax.f32 %v712_v14, 0.0  ;;  %766 = vst.msk [vmem:[#allocation2 + $0x21] sm:$0xff] %vm304_vm0, %v733_v7  ;;  %767 = vst.msk [vmem:[#allocation2 + $0x31] sm:$0xff] %vm304_vm0, %v734_v15 }
 0x219   : > { %768 = vst.msk [vmem:[#allocation2 + $0x39] sm:$0xff] %vm304_vm0, %v735_v16  ;;  %769 = vst.msk [vmem:[#allocation2 + $0x49] sm:$0xff] %vm304_vm0, %v736_v23  ;;  %v745_v24 = vmax.f32 %v713_v6, 0.0  ;;  %v746_v25 = vmax.f32 %v714_v18, 0.0  ;;  %v747_v49 = vmax.f32 %v715_v8, 0.0  ;;  %v748_v38 = vmax.f32 %v716_v19, 0.0 }
 0x21a   : > { %770 = vst.msk [vmem:[#allocation2 + $0x51] sm:$0xff] %vm304_vm0, %v737_v39  ;;  %771 = vst.msk [vmem:[#allocation2 + $0x61] sm:$0xff] %vm304_vm0, %v738_v40  ;;  %v749_v41 = vmax.f32 %v7316_v27, 0.0  ;;  %v750_v1 = vmax.f32 %v7318_v28, 0.0  ;;  %v751_v2 = vmax.f32 %v7320_v13, 0.0  ;;  %v752_v9 = vmax.f32 %v7322_v26, 0.0 }
 0x21b   : > { %772 = vst.msk [vmem:[#allocation2 + $0x69] sm:$0xff] %vm304_vm0, %v739_v51  ;;  %773 = vst.msk [vmem:[#allocation2 + $0x79] sm:$0xff] %vm304_vm0, %v740_v52  ;;  %v753_v22 = vmax.f32 %v7324_v31, 0.0  ;;  %v754_v53 = vmax.f32 %v7326_v32, 0.0  ;;  %v755_v29 = vmax.f32 %v7328_v33, 0.0  ;;  %v756_v57 = vmax.f32 %v7330_v34, 0.0 }
 0x21c   : > { %774 = vst.msk [vmem:[#allocation2 + $0x81] sm:$0xff] %vm304_vm0, %v741_v48  ;;  %775 = vst.msk [vmem:[#allocation2 + $0x91] sm:$0xff] %vm304_vm0, %v742_v63  ;;  %v757_v30 = vmax.f32 %v7332_v35, 0.0  ;;  %v758_v58 = vmax.f32 %v7334_v36, 0.0  ;;  %v759_v42 = vmax.f32 %v7336_v37, 0.0  ;;  %v760_v60 = vmax.f32 %v7338_v44, 0.0 }
 0x21d   : > { %776 = vst.msk [vmem:[#allocation2 + $0x99] sm:$0xff] %vm304_vm0, %v743_v4  ;;  %777 = vst.msk [vmem:[#allocation2 + $0xa9] sm:$0xff] %vm304_vm0, %v744_v21  ;;  %v820_v11 = vld [vmem:[%s9402_s4 + $0xb8] sm:$0xff]  ;;  %v761_v54 = vmax.f32 %v7340_v46, 0.0  ;;  %v762_v12 = vmax.f32 %v7342_v47, 0.0  ;;  %v763_v55 = vmax.f32 %v7344_v61, 0.0  ;;  %v5548_v6 = vpack.c.bf16 %v818_v17, %v817_v10 }
 0x21e   : > { %778 = vst.msk [vmem:[#allocation2 + $0xb1] sm:$0xff] %vm304_vm0, %v745_v24  ;;  %779 = vst.msk [vmem:[#allocation2 + $0xc1] sm:$0xff] %vm304_vm0, %v746_v25  ;;  %v865_v14 = vld [vmem:[#allocation2 + $0x1] sm:$0xff]  ;;  %v7402_v18 = vld [vmem:[#allocation2 + $0x18] sm:$0xff]  ;;  %v5551_v28 = vpack.c.bf16 %v820_v11, %v819_v43 }
 0x21f   : > { %780 = vst.msk [vmem:[#allocation2 + $0xc9] sm:$0xff] %vm304_vm0, %v747_v49  ;;  %781 = vst.msk [vmem:[#allocation2 + $0xd9] sm:$0xff] %vm304_vm0, %v748_v38  ;;  %v7411_v27 = vld [vmem:[#allocation2 + $0x1a] sm:$0xff]  ;;  %5549 = vmatpush1.bf16.msra.mxu1 %v5548_v6  ;;  %v7416_v26 = vld [vmem:[#allocation2 + $0x31] sm:$0xff] }
 0x220   : > { %782 = vst.msk [vmem:[#allocation2 + $0xe1] sm:$0xff] %vm304_vm0, %v749_v41  ;;  %783 = vst.msk [vmem:[#allocation2 + $0xf1] sm:$0xff] %vm304_vm0, %v750_v1  ;;  %v7407_v8 = vld [vmem:[#allocation2 + $0x32] sm:$0xff]  ;;  %v7409_v19 = vld [vmem:[#allocation2 + $0x3a] sm:$0xff]  ;;  %v5747_v13 = vpack.i.bf16 %v865_v14, %v7411_v27  ;;  %5550 = vmatprep.subr.bf16.mxu1 %v6776_v56  ;;  %v5757_v34 = vpack.i.bf16 %v7402_v18, %v7416_v26 }
 0x221   : > { %784 = vst.msk [vmem:[#allocation2 + $0xf9] sm:$0xff] %vm304_vm0, %v751_v2  ;;  %785 = vst.msk [vmem:[#allocation2 + $0x109] sm:$0xff] %vm304_vm0, %v752_v9  ;;  %5332 = vmatprep.mubr.msk.f32.mxu0 %vm304_vm0, %v7407_v8  ;;  %v821_v31 = vld [vmem:[%s9402_s4 + $0xc0] sm:$0xff]  ;;  %v822_v32 = vld [vmem:[%s9402_s4 + $0xc8] sm:$0xff] }
 0x222   : > { %786 = vst.msk [vmem:[#allocation2 + $0x111] sm:$0xff] %vm304_vm0, %v753_v22  ;;  %787 = vst.msk [vmem:[#allocation2 + $0x121] sm:$0xff] %vm304_vm0, %v754_v53  ;;  %5333 = vmatmul.mubr.msk.f32.vlgmr.msra.gmra.mrb[2].mxu0 %vm304_vm0, %v7409_v19  ;;  %v7427_v33 = vld [vmem:[#allocation2 + $0x4a] sm:$0xff]  ;;  %v897_v35 = vld [vmem:[#allocation2 + $0x2] sm:$0xff]  ;;  %5748 = vrot.lane.b32.xlu0 %v5747_v13, %s6779_s22  ;;  %v5554_v46 = vpack.c.bf16 %v822_v32, %v821_v31 }
 0x223   : > { %788 = vst.msk [vmem:[#allocation2 + $0x129] sm:$0xff] %vm304_vm0, %v755_v29  ;;  %789 = vst.msk [vmem:[#allocation2 + $0x139] sm:$0xff] %vm304_vm0, %v756_v57  ;;  %v7431_v36 = vld [vmem:[#allocation2 + $0x30] sm:$0xff]  ;;  %5335 = vmatprep.mubr.msk.f32.mxu0 %vm304_vm0, %v7427_v33  ;;  %v7436_v44 = vld [vmem:[#allocation2 + $0x22] sm:$0xff]  ;;  %5758 = vrot.lane.b32.xlu1 %v5757_v34, %s9407_s23 }
 0x224   : > { %790 = vst.msk [vmem:[#allocation2 + $0x141] sm:$0xff] %vm304_vm0, %v757_v30  ;;  %791 = vst.msk [vmem:[#allocation2 + $0x151] sm:$0xff] %vm304_vm0, %v758_v58  ;;  %v866_v37 = vld [vmem:[#allocation2 + $0x9] sm:$0xff]  ;;  %5552 = vmatpush1.bf16.msra.mxu1 %v5551_v28  ;;  %v7439_v47 = vld [vmem:[#allocation2 + $0x52] sm:$0xff]  ;;  %v5752_v61 = vpack.i.bf16 %v897_v35, %v7431_v36  ;;  %v5807_v28 = vpack.i.bf16 %v7416_v26, %v7427_v33 }
 0x225   : > { %792 = vst.msk [vmem:[#allocation2 + $0x159] sm:$0xff] %vm304_vm0, %v759_v42  ;;  %793 = vst.msk [vmem:[#allocation2 + $0x169] sm:$0xff] %vm304_vm0, %v760_v60  ;;  %5553 = vmatprep.subr.bf16.mxu1 %v6776_v56  ;;  %v823_v3 = vld [vmem:[%s9402_s4 + $0xd0] sm:$0xff]  ;;  %v824_v7 = vld [vmem:[%s9402_s4 + $0xd8] sm:$0xff]  ;;  %v5762_v16 = vpack.i.bf16 %v866_v37, %v7436_v44 }
 0x226   : > { %794 = vst.msk [vmem:[#allocation2 + $0x171] sm:$0xff] %vm304_vm0, %v761_v54  ;;  %795 = vst.msk [vmem:[#allocation2 + $0x181] sm:$0xff] %vm304_vm0, %v762_v12  ;;  %5336 = vmatmul.mubr.msk.f32.gmra.mrb[4].mxu0 %vm304_vm0, %v7439_v47  ;;  %v7451_v15 = vld [vmem:[#allocation2 + $0x62] sm:$0xff]  ;;  %v898_v23 = vld [vmem:[#allocation2 + $0xa] sm:$0xff]  ;;  %5753 = vrot.lane.b32.xlu0 %v5752_v61, %s6781_s12  ;;  %v5557_v52 = vpack.c.bf16 %v824_v7, %v823_v3 }
 0x227   : > { %796 = vst.msk [vmem:[#allocation2 + $0x189] sm:$0xff] %vm304_vm0, %v763_v55  ;;  %v1027_v39 = vld [vmem:[#allocation2 + $0x38] sm:$0xff]  ;;  %5338 = vmatprep.mubr.msk.f32.mxu0 %vm304_vm0, %v7451_v15  ;;  %v7457_v40 = vld [vmem:[#allocation2 + $0x20] sm:$0xff]  ;;  %5763 = vrot.lane.b32.xlu1 %v5762_v16, %s6779_s22  ;;  %v7462_v48 = vld [vmem:[#allocation2 + $0x6a] sm:$0xff] }
 0x228   : > { %v7459_v51 = vld [vmem:[#allocation2 + $0x39] sm:$0xff]  ;;  %5555 = vmatpush1.bf16.msra.mxu1 %v5554_v46  ;;  %v5767_v63 = vpack.i.bf16 %v898_v23, %v1027_v39  ;;  %v826_v21 = vld [vmem:[%s9402_s4 + $0xe8] sm:$0xff]  ;;  %v827_v9 = vld [vmem:[%s9402_s4 + $0xf0] sm:$0xff] }
 0x229   : > { %5556 = vmatprep.subr.bf16.mxu1 %v6776_v56  ;;  %v825_v4 = vld [vmem:[%s9402_s4 + $0xe0] sm:$0xff]  ;;  %v5772_v25 = vpack.i.bf16 %v7457_v40, %v7459_v51  ;;  %v1028_v38 = vld [vmem:[#allocation2 + $0x48] sm:$0xff]  ;;  %v7493_v10 = vld [vmem:[#allocation2 + $0x92] sm:$0xff] }
 0x22a   : > { %5339 = vmatmul.mubr.msk.f32.gmra.mrb[6].mxu0 %vm304_vm0, %v7462_v48  ;;  %v7473_v24 = vld [vmem:[#allocation2 + $0x7a] sm:$0xff]  ;;  %5768 = vrot.lane.b32.xlu0 %v5767_v63, %s6781_s12  ;;  %v5560_v41 = vpack.c.bf16 %v826_v21, %v825_v4  ;;  %v7483_v1 = vld [vmem:[#allocation2 + $0x82] sm:$0xff]  ;;  %v5782_v17 = vpack.i.bf16 %v7411_v27, %v1028_v38  ;;  %v7514_v42 = vld [vmem:[#allocation2 + $0xaa] sm:$0xff] }
 0x22b   : > { %v7477_v49 = vld [vmem:[#allocation2 + $0x19] sm:$0xff]  ;;  %5341 = vmatprep.mubr.msk.f32.mxu0 %vm304_vm0, %v7473_v24  ;;  %5773 = vrot.lane.b32.xlu1 %v5772_v25, %s9407_s23  ;;  %v7496_v22 = vld [vmem:[#allocation2 + $0x49] sm:$0xff]  ;;  %v7504_v29 = vld [vmem:[#allocation2 + $0x21] sm:$0xff] }
 0x22c   : > { %5558 = vmatpush1.bf16.msra.mxu1 %v5557_v52  ;;  %v5777_v2 = vpack.i.bf16 %v7477_v49, %v7407_v8  ;;  %v828_v53 = vld [vmem:[%s9402_s4 + $0xf8] sm:$0xff]  ;;  %v5787_v30 = vpack.i.bf16 %v7431_v36, %v7496_v22  ;;  %v5792_v60 = vpack.i.bf16 %v7504_v29, %v7409_v19  ;;  %v1029_v43 = vld [vmem:[#allocation2 + $0x50] sm:$0xff]  ;;  %v7529_v55 = vld [vmem:[#allocation2 + $0xc2] sm:$0xff] }
 0x22d   : > { %5559 = vmatprep.subr.bf16.mxu1 %v6776_v56  ;;  %v7507_v57 = vld [vmem:[#allocation2 + $0x9a] sm:$0xff]  ;;  %v5563_v58 = vpack.c.bf16 %v828_v53, %v827_v9  ;;  %v7521_v11 = vld [vmem:[#allocation2 + $0x51] sm:$0xff]  ;;  %v5797_v12 = vpack.i.bf16 %v7436_v44, %v1029_v43  ;;  %v7551_v34 = vld [vmem:[#allocation2 + $0xe2] sm:$0xff] }
 0x22e   : > { %5342 = vmatmul.mubr.msk.f32.gmra.mrb[8].mxu0 %vm304_vm0, %v7483_v1  ;;  %5778 = vrot.lane.b32.xlu0 %v5777_v2, %s6779_s22  ;;  %v7524_v54 = vld [vmem:[#allocation2 + $0xb2] sm:$0xff]  ;;  %v5802_v14 = vpack.i.bf16 %v1027_v39, %v7521_v11  ;;  %v1030_v6 = vld [vmem:[#allocation2 + $0x60] sm:$0xff]  ;;  %v7536_v27 = vld [vmem:[#allocation2 + $0xca] sm:$0xff]  ;;  %v5837_v39 = vpack.i.bf16 %v7496_v22, %v7451_v15 }
 0x22f   : > { %5344 = vmatprep.mubr.msk.f32.mxu0 %vm304_vm0, %v7493_v10  ;;  %5783 = vrot.lane.b32.xlu1 %v5782_v17, %s6781_s12  ;;  %v7542_v13 = vld [vmem:[#allocation2 + $0xda] sm:$0xff]  ;;  %v5812_v31 = vpack.i.bf16 %v7407_v8, %v1030_v6  ;;  %v7556_v36 = vld [vmem:[#allocation2 + $0xf2] sm:$0xff]  ;;  %v5822_v8 = vpack.i.bf16 %v7459_v51, %v7439_v47  ;;  %v1031_v37 = vld [vmem:[#allocation2 + $0x68] sm:$0xff] }
 0x230   : > { %5561 = vmatpush1.bf16.msra.mxu1 %v5560_v41  ;;  %v7545_v32 = vld [vmem:[#allocation2 + $0x61] sm:$0xff]  ;;  %v1063_v44 = vld [vmem:[#allocation2 + $0x69] sm:$0xff]  ;;  %v5827_v61 = vpack.i.bf16 %v7409_v19, %v1031_v37  ;;  %v1032_v16 = vld [vmem:[#allocation2 + $0x78] sm:$0xff] }
 0x231   : > { %5562 = vmatprep.subr.bf16.mxu1 %v6776_v56  ;;  %v5817_v35 = vpack.i.bf16 %v1028_v38, %v7545_v32  ;;  %v7564_v46 = vld [vmem:[#allocation2 + $0xfa] sm:$0xff]  ;;  %v7569_v3 = vld [vmem:[#allocation2 + $0x10a] sm:$0xff]  ;;  %v5832_v7 = vpack.i.bf16 %v1029_v43, %v1063_v44  ;;  %v7575_v23 = vld [vmem:[#allocation2 + $0x112] sm:$0xff]  ;;  %v5842_v52 = vpack.i.bf16 %v7427_v33, %v1032_v16  ;;  %v5852_v38 = vpack.i.bf16 %v7521_v11, %v7462_v48 }
 0x232   : > { %5345 = vmatmul.mubr.msk.f32.gmra.mrb[10].mxu0 %vm304_vm0, %v7507_v57  ;;  %5788 = vrot.lane.b32.xlu0 %v5787_v30, %s9407_s23  ;;  %v7581_v19 = vld [vmem:[#allocation2 + $0x122] sm:$0xff]  ;;  %v1064_v63 = vld [vmem:[#allocation2 + $0x79] sm:$0xff]  ;;  %v7588_v4 = vld [vmem:[#allocation2 + $0x12a] sm:$0xff] }
 0x233   : > { %5347 = vmatprep.mubr.msk.f32.mxu0 %vm304_vm0, %v7514_v42  ;;  %5793 = vrot.lane.b32.xlu1 %v5792_v60, %s6779_s22  ;;  %v5847_v21 = vpack.i.bf16 %v1030_v6, %v1064_v63  ;;  %v7592_v25 = vld [vmem:[#allocation2 + $0x13a] sm:$0xff]  ;;  %v7600_v2 = vld [vmem:[#allocation2 + $0x142] sm:$0xff]  ;;  %v7605_v17 = vld [vmem:[#allocation2 + $0x152] sm:$0xff]  ;;  %v5867_v60 = vpack.i.bf16 %v7545_v32, %v7473_v24 }
 0x234   : > { %5564 = vmatpush1.bf16.msra.mxu1 %v5563_v58  ;;  %v1033_v33 = vld [vmem:[#allocation2 + $0x80] sm:$0xff]  ;;  %v1034_v30 = vld [vmem:[#allocation2 + $0x90] sm:$0xff] }
 0x235   : > { %v1065_v41 = vld [vmem:[#allocation2 + $0x81] sm:$0xff]  ;;  %v5857_v9 = vpack.i.bf16 %v7439_v47, %v1033_v33  ;;  %v7617_v47 = vld [vmem:[#allocation2 + $0x16a] sm:$0xff]  ;;  %v5872_v43 = vpack.i.bf16 %v7451_v15, %v1034_v30  ;;  %v1067_v15 = vld [vmem:[#allocation2 + $0x99] sm:$0xff] }
 0x236   : > { %5348 = vmatmul.mubr.msk.f32.gmra.mrb[12].mxu0 %vm304_vm0, %v7524_v54  ;;  %5798 = vrot.lane.b32.xlu0 %v5797_v12, %s6781_s12  ;;  %v5862_v53 = vpack.i.bf16 %v1031_v37, %v1065_v41  ;;  %v7611_v58 = vld [vmem:[#allocation2 + $0x15a] sm:$0xff]  ;;  %v1066_v12 = vld [vmem:[#allocation2 + $0x91] sm:$0xff] }
 0x237   : > { %5350 = vmatprep.mubr.msk.f32.mxu0 %vm304_vm0, %v7529_v55  ;;  %5803 = vrot.lane.b32.xlu1 %v5802_v14, %s9407_s23  ;;  %v7624_v14 = vld [vmem:[#allocation2 + $0x172] sm:$0xff]  ;;  %v5877_v6 = vpack.i.bf16 %v1032_v16, %v1066_v12 }
 0x23a   : > { %5351 = vmatmul.mubr.msk.f32.gmra.mrb[14].mxu0 %vm304_vm0, %v7536_v27  ;;  %5808 = vrot.lane.b32.xlu0 %v5807_v28, %s6779_s22  ;;  %v1118_v28 = vld [vmem:[#allocation2 + $0x182] sm:$0xff] }
 0x23b   : > { %5353 = vmatprep.mubr.msk.f32.mxu0 %vm304_vm0, %v7542_v13  ;;  %5813 = vrot.lane.b32.xlu1 %v5812_v31, %s6781_s12  ;;  %v5882_v31 = vpack.i.bf16 %v1063_v44, %v7483_v1  ;;  %v5897_v44 = vpack.i.bf16 %v1064_v63, %v7493_v10  ;;  %v5927_v63 = vpack.i.bf16 %v1066_v12, %v7514_v42 }
 0x23e   : > { %5354 = vmatmul.mubr.msk.f32.gmra.mrb[16].mxu0 %vm304_vm0, %v7551_v34  ;;  %5818 = vrot.lane.b32.xlu0 %v5817_v35, %s9407_s23  ;;  %v1035_v35 = vld [vmem:[#allocation2 + $0x98] sm:$0xff] }
 0x23f   : > { %5356 = vmatprep.mubr.msk.f32.mxu0 %vm304_vm0, %v7556_v36  ;;  %5823 = vrot.lane.b32.xlu1 %v5822_v8, %s6779_s22  ;;  %v1119_v8 = vld [vmem:[#allocation2 + $0x18a] sm:$0xff]  ;;  %v5887_v37 = vpack.i.bf16 %v7462_v48, %v1035_v35  ;;  %v5912_v48 = vpack.i.bf16 %v1065_v41, %v7507_v57 }
 0x242   : > { %5357 = vmatmul.mubr.msk.f32.gmra.mrb[18].mxu0 %vm304_vm0, %v7564_v46  ;;  %5828 = vrot.lane.b32.xlu0 %v5827_v61, %s6781_s12  ;;  %v5892_v61 = vpack.i.bf16 %v1033_v33, %v1067_v15 }
 0x243   : > { %5359 = vmatprep.mubr.msk.f32.mxu0 %vm304_vm0, %v7569_v3  ;;  %5833 = vrot.lane.b32.xlu1 %v5832_v7, %s9407_s23  ;;  %v1036_v7 = vld [vmem:[#allocation2 + $0xa8] sm:$0xff] }
 0x244   : > { %v5902_v16 = vpack.i.bf16 %v7473_v24, %v1036_v7  ;;  %v1038_v24 = vld [vmem:[#allocation2 + $0xc0] sm:$0xff] }
 0x246   : > { %5360 = vmatmul.mubr.msk.f32.gmra.mrb[20].mxu0 %vm304_vm0, %v7575_v23  ;;  %5838 = vrot.lane.b32.xlu0 %v5837_v39, %s6779_s22  ;;  %v1068_v39 = vld [vmem:[#allocation2 + $0xa9] sm:$0xff] }
 0x247   : > { %5362 = vmatprep.mubr.msk.f32.mxu0 %vm304_vm0, %v7581_v19  ;;  %5843 = vrot.lane.b32.xlu1 %v5842_v52, %s6781_s12  ;;  %v5907_v52 = vpack.i.bf16 %v1034_v30, %v1068_v39  ;;  %v1070_v30 = vld [vmem:[#allocation2 + $0xc1] sm:$0xff]  ;;  %v5957_v12 = vpack.i.bf16 %v1068_v39, %v7529_v55  ;;  %v1074_v39 = vld [vmem:[#allocation2 + $0xf1] sm:$0xff] }
 0x248   : > { %v5937_v41 = vpack.i.bf16 %v1036_v7, %v1070_v30 }
 0x24a   : > { %5363 = vmatmul.mubr.msk.f32.gmra.mrb[22].mxu0 %vm304_vm0, %v7588_v4  ;;  %5848 = vrot.lane.b32.xlu0 %v5847_v21, %s9407_s23  ;;  %v1037_v21 = vld [vmem:[#allocation2 + $0xb0] sm:$0xff] }
 0x24b   : > { %5365 = vmatprep.mubr.msk.f32.mxu0 %vm304_vm0, %v7592_v25  ;;  %5853 = vrot.lane.b32.xlu1 %v5852_v38, %s6779_s22  ;;  %v1069_v38 = vld [vmem:[#allocation2 + $0xb1] sm:$0xff]  ;;  %v5917_v33 = vpack.i.bf16 %v7483_v1, %v1037_v21  ;;  %v1071_v1 = vld [vmem:[#allocation2 + $0xc9] sm:$0xff] }
 0x24e   : > { %5366 = vmatmul.mubr.msk.f32.gmra.mrb[24].mxu0 %vm304_vm0, %v7600_v2  ;;  %5858 = vrot.lane.b32.xlu0 %v5857_v9, %s6781_s12  ;;  %v5922_v9 = vpack.i.bf16 %v1035_v35, %v1069_v38  ;;  %v1072_v35 = vld [vmem:[#allocation2 + $0xd9] sm:$0xff] }
 0x24f   : > { %5368 = vmatprep.mubr.msk.f32.mxu0 %vm304_vm0, %v7605_v17  ;;  %5863 = vrot.lane.b32.xlu1 %v5862_v53, %s9407_s23  ;;  %v5932_v53 = vpack.i.bf16 %v7493_v10, %v1038_v24  ;;  %v1040_v10 = vld [vmem:[#allocation2 + $0xd8] sm:$0xff] }
 0x252   : > { %5369 = vmatmul.mubr.msk.f32.gmra.mrb[26].mxu0 %vm304_vm0, %v7611_v58  ;;  %5868 = vrot.lane.b32.xlu0 %v5867_v60, %s6779_s22  ;;  %v5942_v60 = vpack.i.bf16 %v1067_v15, %v7524_v54  ;;  %v5967_v15 = vpack.i.bf16 %v1038_v24, %v1072_v35 }
 0x253   : > { %5371 = vmatprep.mubr.msk.f32.mxu0 %vm304_vm0, %v7617_v47  ;;  %5873 = vrot.lane.b32.xlu1 %v5872_v43, %s6781_s12  ;;  %v1039_v43 = vld [vmem:[#allocation2 + $0xc8] sm:$0xff] }
 0x256   : > { %5372 = vmatmul.mubr.msk.f32.gmra.mrb[28].mxu0 %vm304_vm0, %v7624_v14  ;;  %5878 = vrot.lane.b32.xlu0 %v5877_v6, %s9407_s23  ;;  %v5947_v6 = vpack.i.bf16 %v7507_v57, %v1039_v43  ;;  %v1073_v57 = vld [vmem:[#allocation2 + $0xe1] sm:$0xff] }
 0x257   : > { %5374 = vmatprep.mubr.msk.f32.mxu0 %vm304_vm0, %v1118_v28  ;;  %5883 = vrot.lane.b32.xlu1 %v5882_v31, %s6779_s22  ;;  %v5952_v28 = vpack.i.bf16 %v1037_v21, %v1071_v1  ;;  %v5962_v31 = vpack.i.bf16 %v7514_v42, %v1040_v10  ;;  %v5982_v7 = vpack.i.bf16 %v1039_v43, %v1073_v57  ;;  %v1042_v42 = vld [vmem:[#allocation2 + $0xf0] sm:$0xff]  ;;  %v1043_v21 = vld [vmem:[#allocation2 + $0xf8] sm:$0xff] }
 0x25a   : > { %5375 = vmatmul.mubr.msk.f32.gmra.mrb[30].mxu0 %vm304_vm0, %v1119_v8  ;;  %5888 = vrot.lane.b32.xlu0 %v5887_v37, %s6781_s12  ;;  %v5972_v8 = vpack.i.bf16 %v1069_v38, %v7536_v27  ;;  %v1041_v37 = vld [vmem:[#allocation2 + $0xe0] sm:$0xff]  ;;  %v6007_v38 = vpack.i.bf16 %v7536_v27, %v1043_v21  ;;  %v6032_v27 = vpack.i.bf16 %v1073_v57, %v7564_v46 }
 0x25b   : > { %5893 = vrot.lane.b32.xlu1 %v5892_v61, %s9407_s23  ;;  %v5977_v61 = vpack.i.bf16 %v7524_v54, %v1041_v37  ;;  %v7672_v54 = vld [vmem:[#allocation2 + $0xf9] sm:$0xff] }
 0x25e   : > { %5898 = vrot.lane.b32.xlu0 %v5897_v44, %s6779_s22  ;;  %v5987_v44 = vpack.i.bf16 %v1070_v30, %v7542_v13  ;;  %v7687_v30 = vld [vmem:[#allocation2 + $0x110] sm:$0xff] }
 0x25f   : > { %5903 = vrot.lane.b32.xlu1 %v5902_v16, %s6781_s12  ;;  %v5992_v16 = vpack.i.bf16 %v7529_v55, %v1042_v42  ;;  %v1044_v55 = vld [vmem:[#allocation2 + $0x108] sm:$0xff] }
 0x260   : > { %v6022_v24 = vpack.i.bf16 %v7542_v13, %v1044_v55  ;;  %v6037_v13 = vpack.i.bf16 %v7551_v34, %v7687_v30 }
 0x262   : > { %5908 = vrot.lane.b32.xlu0 %v5907_v52, %s9407_s23  ;;  %v5997_v52 = vpack.i.bf16 %v1040_v10, %v1074_v39 }
 0x263   : > { %5913 = vrot.lane.b32.xlu1 %v5912_v48, %s6779_s22  ;;  %v6002_v48 = vpack.i.bf16 %v1071_v1, %v7551_v34 }
 0x266   : > { %5918 = vrot.lane.b32.xlu0 %v5917_v33, %s6781_s12  ;;  %v6012_v33 = vpack.i.bf16 %v1041_v37, %v7672_v54 }
 0x267   : > { %5923 = vrot.lane.b32.xlu1 %v5922_v9, %s9407_s23  ;;  %v6017_v9 = vpack.i.bf16 %v1072_v35, %v7556_v36 }
 0x26a   : > { %5928 = vrot.lane.b32.xlu0 %v5927_v63, %s6779_s22  ;;  %v7681_v63 = vld [vmem:[#allocation2 + $0x109] sm:$0xff] }
 0x26b   : > { %5933 = vrot.lane.b32.xlu1 %v5932_v53, %s6781_s12  ;;  %v6027_v53 = vpack.i.bf16 %v1042_v42, %v7681_v63 }
 0x26e   : > { %5938 = vrot.lane.b32.xlu0 %v5937_v41, %s9407_s23  ;;  %v7690_v41 = vld [vmem:[#allocation2 + $0x111] sm:$0xff] }
 0x26f   : > { %5943 = vrot.lane.b32.xlu1 %v5942_v60, %s6779_s22  ;;  %v6042_v1 = vpack.i.bf16 %v1043_v21, %v7690_v41 }
 0x272   : > { %5948 = vrot.lane.b32.xlu0 %v5947_v6, %s6781_s12  ;;  %v7696_v6 = vld [vmem:[#allocation2 + $0x120] sm:$0xff] }
 0x273   : > { %5953 = vrot.lane.b32.xlu1 %v5952_v28, %s9407_s23  ;;  %v6052_v35 = vpack.i.bf16 %v7556_v36, %v7696_v6 }
 0x276   : > { %5958 = vrot.lane.b32.xlu0 %v5957_v12, %s6779_s22  ;;  %v833_v12 = vld [vmem:[#allocation2] sm:$0xff] }
 0x277   : > { %5963 = vrot.lane.b32.xlu1 %v5962_v31, %s6781_s12 }
 0x27a   : > { %5968 = vrot.lane.b32.xlu0 %v5967_v15, %s9407_s23  ;;  %v6047_v15 = vpack.i.bf16 %v1074_v39, %v7569_v3 }
 0x27b   : > { %5973 = vrot.lane.b32.xlu1 %v5972_v8, %s6779_s22 }
 0x27e   : > { %5978 = vrot.lane.b32.xlu0 %v5977_v61, %s6781_s12 }
 0x27f   : > { %5983 = vrot.lane.b32.xlu1 %v5982_v7, %s9407_s23  ;;  %v7703_v7 = vld [vmem:[#allocation2 + $0x121] sm:$0xff] }
 0x282   : > { %5988 = vrot.lane.b32.xlu0 %v5987_v44, %s6779_s22 }
 0x283   : > { %5993 = vrot.lane.b32.xlu1 %v5992_v16, %s6781_s12 }
 0x286   : > { %5998 = vrot.lane.b32.xlu0 %v5997_v52, %s9407_s23 }
 0x287   : > { %6003 = vrot.lane.b32.xlu1 %v6002_v48, %s6779_s22  ;;  %v834_v48 = vld [vmem:[#allocation2 + $0x8] sm:$0xff] }
 0x28a   : > { %6008 = vrot.lane.b32.xlu0 %v6007_v38, %s6781_s12 }
 0x28b   : > { %6013 = vrot.lane.b32.xlu1 %v6012_v33, %s9407_s23 }
 0x28e   : > { %6018 = vrot.lane.b32.xlu0 %v6017_v9, %s6779_s22  ;;  %v6057_v9 = vpack.i.bf16 %v1044_v55, %v7703_v7  ;;  %v7723_v55 = vld [vmem:[#allocation2 + $0x129] sm:$0xff] }
 0x28f   : > { %6023 = vrot.lane.b32.xlu1 %v6022_v24, %s6781_s12 }
 0x292   : > { %6028 = vrot.lane.b32.xlu0 %v6027_v53, %s9407_s23 }
 0x293   : > { %6033 = vrot.lane.b32.xlu1 %v6032_v27, %s6779_s22 }
 0x294   : > { %v5749_v60 = vpop.permute.xlu0 %5748 }
 0x295   : > { %v5759_v43 = vpop.permute.xlu1 %5758  ;;  %v5751_v28 = vunpack.i.h.bf16 %v5749_v60  ;;  %v5750_v10 = vunpack.i.l.bf16 %v5749_v60  ;;  %v7717_v60 = vld [vmem:[#allocation2 + $0x128] sm:$0xff] }
 0x296   : > { %6038 = vrot.lane.b32.xlu0 %v6037_v13, %s6781_s12  ;;  %v5761_v34 = vunpack.i.h.bf16 %v5759_v43  ;;  %v5760_v8 = vunpack.i.l.bf16 %v5759_v43 }
 0x297   : > { %6043 = vrot.lane.b32.xlu1 %v6042_v1, %s9407_s23  ;;  %v1988_v16 = vsel %vm304_vm0, %v7477_v49, %v5750_v10  ;;  %v1890_v36 = vsel %vm304_vm0, %v833_v12, %v5751_v28  ;;  %v6062_v49 = vpack.i.bf16 %v7672_v54, %v7575_v23 }
 0x298   : > { %v5754_v31 = vpop.permute.xlu0 %5753 }
 0x299   : > { %v5756_v37 = vunpack.i.h.bf16 %v5754_v31  ;;  %v5755_v57 = vunpack.i.l.bf16 %v5754_v31  ;;  %v5764_v61 = vpop.permute.xlu1 %5763 }
 0x29a   : > { %v5766_v42 = vunpack.i.h.bf16 %v5764_v61  ;;  %v5765_v44 = vunpack.i.l.bf16 %v5764_v61  ;;  %6048 = vrot.lane.b32.xlu0 %v6047_v15, %s6779_s22  ;;  %v6067_v15 = vpack.i.bf16 %v7564_v46, %v7717_v60 }
 0x29b   : > { %6053 = vrot.lane.b32.xlu1 %v6052_v35, %s6781_s12  ;;  %v2020_v39 = vsel %vm1922_vm5, %v1988_v16, %v5755_v57  ;;  %v1923_v52 = vsel %vm1922_vm5, %v1890_v36, %v5756_v37  ;;  %v6072_v37 = vpack.i.bf16 %v7687_v30, %v7723_v55  ;;  %v6077_v36 = vpack.i.bf16 %v7681_v63, %v7581_v19 }
 0x29c   : > { %v5769_v21 = vpop.permute.xlu0 %5768  ;;  %v2052_v38 = vsel %vm1955_vm6, %v2020_v39, %v5760_v8  ;;  %v1956_v33 = vsel %vm1955_vm6, %v1923_v52, %v5761_v34  ;;  %v1989_v1 = vsel %vm304_vm0, %v7504_v29, %v5765_v44  ;;  %v1891_v28 = vsel %vm304_vm0, %v834_v48, %v5766_v42  ;;  %v7735_v42 = vld [vmem:[#allocation2 + $0x138] sm:$0xff] }
 0x29d   : > { %v5771_v24 = vunpack.i.h.bf16 %v5769_v21  ;;  %v5770_v53 = vunpack.i.l.bf16 %v5769_v21  ;;  %v5774_v27 = vpop.permute.xlu1 %5773  ;;  %2244 = vmatprep.mubr.f32.mxu1 %v2052_v38  ;;  %v6082_v48 = vpack.i.bf16 %v7569_v3, %v7735_v42  ;;  %v7746_v21 = vld [vmem:[#allocation2 + $0x139] sm:$0xff] }
 0x29e   : > { %v5776_v13 = vunpack.i.h.bf16 %v5774_v27  ;;  %v5775_v43 = vunpack.i.l.bf16 %v5774_v27  ;;  %2245 = vmatmul.mubr.f32.vlgmr.msra.gmra.mrb[4].mxu1 %v1956_v33  ;;  %6058 = vrot.lane.b32.xlu0 %v6057_v9, %s9407_s23  ;;  %v6087_v3 = vpack.i.bf16 %v7696_v6, %v7746_v21 }
 0x29f   : > { %6063 = vrot.lane.b32.xlu1 %v6062_v49, %s6779_s22  ;;  %v2021_v10 = vsel %vm1922_vm5, %v1989_v1, %v5770_v53  ;;  %v1924_v54 = vsel %vm1922_vm5, %v1891_v28, %v5771_v24 }
 0x2a0   : > { %v5779_v12 = vpop.permute.xlu0 %5778  ;;  %v2053_v31 = vsel %vm1955_vm6, %v2021_v10, %v5775_v43  ;;  %v1957_v35 = vsel %vm1955_vm6, %v1924_v54, %v5776_v13  ;;  %v6092_v13 = vpack.i.bf16 %v7690_v41, %v7588_v4  ;;  %v7758_v43 = vld [vmem:[#allocation2 + $0x140] sm:$0xff] }
 0x2a1   : > { %v5784_v34 = vpop.permute.xlu1 %5783  ;;  %v5781_v29 = vunpack.i.h.bf16 %v5779_v12  ;;  %v5780_v8 = vunpack.i.l.bf16 %v5779_v12  ;;  %2249 = vmatprep.mubr.f32.mxu1 %v2053_v31  ;;  %v7763_v54 = vld [vmem:[#allocation2 + $0x141] sm:$0xff] }
 0x2a2   : > { %v5786_v57 = vunpack.i.h.bf16 %v5784_v34  ;;  %v5785_v61 = vunpack.i.l.bf16 %v5784_v34  ;;  %2250 = vmatmul.mubr.f32.gmra.mrb[6].mxu1 %v1957_v35  ;;  %6068 = vrot.lane.b32.xlu0 %v6067_v15, %s6781_s12  ;;  %v6097_v15 = vpack.i.bf16 %v7575_v23, %v7758_v43 }
 0x2a3   : > { %6073 = vrot.lane.b32.xlu1 %v6072_v37, %s9407_s23  ;;  %v1990_v44 = vsel %vm304_vm0, %v7416_v26, %v5780_v8  ;;  %v1892_v46 = vsel %vm304_vm0, %v7402_v18, %v5781_v29 }
 0x2a4   : > { %v5789_v16 = vpop.permute.xlu0 %5788  ;;  %v2022_v26 = vsel %vm1922_vm5, %v1990_v44, %v5785_v61  ;;  %v1925_v18 = vsel %vm1922_vm5, %v1892_v46, %v5786_v57  ;;  %v7777_v61 = vld [vmem:[#allocation2 + $0x150] sm:$0xff] }
 0x2a5   : > { %v5794_v30 = vpop.permute.xlu1 %5793  ;;  %v5791_v39 = vunpack.i.h.bf16 %v5789_v16  ;;  %v5790_v52 = vunpack.i.l.bf16 %v5789_v16  ;;  %v837_v44 = vld [vmem:[#allocation2 + $0x30] sm:$0xff] }
 0x2a6   : > { %v5796_v38 = vunpack.i.h.bf16 %v5794_v30  ;;  %v5795_v33 = vunpack.i.l.bf16 %v5794_v30  ;;  %6078 = vrot.lane.b32.xlu0 %v6077_v36, %s6779_s22  ;;  %v6107_v36 = vpack.i.bf16 %v7703_v7, %v7592_v25 }
 0x2a7   : > { %6083 = vrot.lane.b32.xlu1 %v6082_v48, %s6781_s12  ;;  %v2054_v63 = vsel %vm1955_vm6, %v2022_v26, %v5790_v52  ;;  %v1958_v9 = vsel %vm1955_vm6, %v1925_v18, %v5791_v39  ;;  %v6112_v52 = vpack.i.bf16 %v7581_v19, %v7777_v61  ;;  %v7787_v48 = vld [vmem:[#allocation2 + $0x151] sm:$0xff] }
 0x2a8   : > { %v5799_v24 = vpop.permute.xlu0 %5798  ;;  %2254 = vmatprep.mubr.f32.mxu1 %v2054_v63  ;;  %v1991_v10 = vsel %vm304_vm0, %v7459_v51, %v5795_v33  ;;  %v1893_v6 = vsel %vm304_vm0, %v7457_v40, %v5796_v38  ;;  %v6102_v40 = vpack.i.bf16 %v7717_v60, %v7763_v54  ;;  %v6117_v19 = vpack.i.bf16 %v7735_v42, %v7787_v48 }
 0x2a9   : > { %v5804_v53 = vpop.permute.xlu1 %5803  ;;  %v5801_v27 = vunpack.i.h.bf16 %v5799_v24  ;;  %v5800_v49 = vunpack.i.l.bf16 %v5799_v24  ;;  %2255 = vmatmul.mubr.f32.gmra.mrb[8].mxu1 %v1958_v9 }
 0x2aa   : > { %v5806_v1 = vunpack.i.h.bf16 %v5804_v53  ;;  %v5805_v28 = vunpack.i.l.bf16 %v5804_v53  ;;  %6088 = vrot.lane.b32.xlu0 %v6087_v3, %s9407_s23  ;;  %v6122_v53 = vpack.i.bf16 %v7723_v55, %v7600_v2 }
 0x2ab   : > { %6093 = vrot.lane.b32.xlu1 %v6092_v13, %s6779_s22  ;;  %v2023_v12 = vsel %vm1922_vm5, %v1991_v10, %v5800_v49  ;;  %v1926_v41 = vsel %vm1922_vm5, %v1893_v6, %v5801_v27  ;;  %v7799_v27 = vld [vmem:[#allocation2 + $0x158] sm:$0xff] }
 0x2ac   : > { %v5809_v31 = vpop.permute.xlu0 %5808  ;;  %v2055_v35 = vsel %vm1955_vm6, %v2023_v12, %v5805_v28  ;;  %v1959_v34 = vsel %vm1955_vm6, %v1926_v41, %v5806_v1  ;;  %v838_v49 = vld [vmem:[#allocation2 + $0x38] sm:$0xff] }
 0x2ad   : > { %v5814_v51 = vpop.permute.xlu1 %5813  ;;  %v5811_v29 = vunpack.i.h.bf16 %v5809_v31  ;;  %v5810_v8 = vunpack.i.l.bf16 %v5809_v31  ;;  %2259 = vmatprep.mubr.f32.mxu1 %v2055_v35  ;;  %v7804_v10 = vld [vmem:[#allocation2 + $0x159] sm:$0xff]  ;;  %v6127_v31 = vpack.i.bf16 %v7588_v4, %v7799_v27 }
 0x2ae   : > { %v5816_v37 = vunpack.i.h.bf16 %v5814_v51  ;;  %v5815_v57 = vunpack.i.l.bf16 %v5814_v51  ;;  %6098 = vrot.lane.b32.xlu0 %v6097_v15, %s6781_s12  ;;  %2260 = vmatmul.mubr.f32.gmra.mrb[10].mxu1 %v1959_v34  ;;  %v6132_v51 = vpack.i.bf16 %v7758_v43, %v7804_v10 }
 0x2af   : > { %6103 = vrot.lane.b32.xlu1 %v6102_v40, %s9407_s23  ;;  %v1992_v23 = vsel %vm304_vm0, %v7496_v22, %v5810_v8  ;;  %v1894_v46 = vsel %vm304_vm0, %v837_v44, %v5811_v29  ;;  %v7817_v40 = vld [vmem:[#allocation2 + $0x168] sm:$0xff] }
 0x2b0   : > { %v5819_v16 = vpop.permute.xlu0 %5818  ;;  %v2024_v22 = vsel %vm1922_vm5, %v1992_v23, %v5815_v57  ;;  %v1927_v26 = vsel %vm1922_vm5, %v1894_v46, %v5816_v37  ;;  %v839_v37 = vld [vmem:[#allocation2 + $0x48] sm:$0xff]  ;;  %v6137_v23 = vpack.i.bf16 %v7746_v21, %v7605_v17 }
 0x2b1   : > { %v5824_v60 = vpop.permute.xlu1 %5823  ;;  %v5821_v30 = vunpack.i.h.bf16 %v5819_v16  ;;  %v5820_v39 = vunpack.i.l.bf16 %v5819_v16 }
 0x2b2   : > { %v5826_v38 = vunpack.i.h.bf16 %v5824_v60  ;;  %v5825_v33 = vunpack.i.l.bf16 %v5824_v60  ;;  %6108 = vrot.lane.b32.xlu0 %v6107_v36, %s6779_s22  ;;  %v6142_v36 = vpack.i.bf16 %v7592_v25, %v7817_v40  ;;  %v7827_v60 = vld [vmem:[#allocation2 + $0x169] sm:$0xff] }
 0x2b3   : > { %6113 = vrot.lane.b32.xlu1 %v6112_v52, %s6781_s12  ;;  %v2056_v7 = vsel %vm1955_vm6, %v2024_v22, %v5820_v39  ;;  %v1960_v18 = vsel %vm1955_vm6, %v1927_v26, %v5821_v30  ;;  %v6147_v25 = vpack.i.bf16 %v7777_v61, %v7827_v60 }
 0x2b4   : > { %v5829_v63 = vpop.permute.xlu0 %5828  ;;  %2264 = vmatprep.mubr.f32.mxu1 %v2056_v7  ;;  %v1993_v28 = vsel %vm304_vm0, %v7521_v11, %v5825_v33  ;;  %v1895_v42 = vsel %vm304_vm0, %v838_v49, %v5826_v38  ;;  %v7843_v49 = vld [vmem:[#allocation2 + $0x171] sm:$0xff] }
 0x2b5   : > { %v5834_v9 = vpop.permute.xlu1 %5833  ;;  %v5831_v24 = vunpack.i.h.bf16 %v5829_v63  ;;  %v5830_v3 = vunpack.i.l.bf16 %v5829_v63  ;;  %2265 = vmatmul.mubr.f32.gmra.mrb[12].mxu1 %v1960_v18  ;;  %v6152_v18 = vpack.i.bf16 %v7763_v54, %v7611_v58  ;;  %v968_v63 = vld [vmem:[#allocation2 + $0x69] sm:$0xff] }
 0x2b6   : > { %v5836_v13 = vunpack.i.h.bf16 %v5834_v9  ;;  %v5835_v1 = vunpack.i.l.bf16 %v5834_v9  ;;  %6118 = vrot.lane.b32.xlu0 %v6117_v19, %s9407_s23  ;;  %v7839_v19 = vld [vmem:[#allocation2 + $0x170] sm:$0xff] }
 0x2b7   : > { %6123 = vrot.lane.b32.xlu1 %v6122_v53, %s6779_s22  ;;  %v2025_v6 = vsel %vm1922_vm5, %v1993_v28, %v5830_v3  ;;  %v1928_v55 = vsel %vm1922_vm5, %v1895_v42, %v5831_v24  ;;  %v840_v9 = vld [vmem:[#allocation2 + $0x50] sm:$0xff]  ;;  %v6157_v28 = vpack.i.bf16 %v7600_v2, %v7839_v19 }
 0x2b8   : > { %v5839_v12 = vpop.permute.xlu0 %5838  ;;  %v2057_v41 = vsel %vm1955_vm6, %v2025_v6, %v5835_v1  ;;  %v1961_v35 = vsel %vm1955_vm6, %v1928_v55, %v5836_v13 }
 0x2b9   : > { %v5844_v15 = vpop.permute.xlu1 %5843  ;;  %v5841_v11 = vunpack.i.h.bf16 %v5839_v12  ;;  %v5840_v34 = vunpack.i.l.bf16 %v5839_v12  ;;  %2269 = vmatprep.mubr.f32.mxu1 %v2057_v41  ;;  %v6162_v41 = vpack.i.bf16 %v7799_v27, %v7843_v49 }
 0x2ba   : > { %v5846_v29 = vunpack.i.h.bf16 %v5844_v15  ;;  %v5845_v8 = vunpack.i.l.bf16 %v5844_v15  ;;  %6128 = vrot.lane.b32.xlu0 %v6127_v31, %s6781_s12  ;;  %2270 = vmatmul.mubr.f32.gmra.mrb[14].mxu1 %v1961_v35  ;;  %v7856_v15 = vld [vmem:[#allocation2 + $0x180] sm:$0xff] }
 0x2bb   : > { %6133 = vrot.lane.b32.xlu1 %v6132_v51, %s9407_s23  ;;  %v1994_v4 = vsel %vm304_vm0, %v7545_v32, %v5840_v34  ;;  %v1896_v57 = vsel %vm304_vm0, %v839_v37, %v5841_v11  ;;  %v969_v11 = vld [vmem:[#allocation2 + $0x79] sm:$0xff] }
 0x2bc   : > { %v5849_v44 = vpop.permute.xlu0 %5848  ;;  %v2026_v32 = vsel %vm1922_vm5, %v1994_v4, %v5845_v8  ;;  %v1929_v52 = vsel %vm1922_vm5, %v1896_v57, %v5846_v29  ;;  %v841_v34 = vld [vmem:[#allocation2 + $0x60] sm:$0xff]  ;;  %v6167_v8 = vpack.i.bf16 %v7787_v48, %v7617_v47  ;;  %v6172_v57 = vpack.i.bf16 %v7605_v17, %v7856_v15 }
 0x2bd   : > { %v5854_v43 = vpop.permute.xlu1 %5853  ;;  %v5851_v46 = vunpack.i.h.bf16 %v5849_v44  ;;  %v5850_v16 = vunpack.i.l.bf16 %v5849_v44  ;;  %v7865_v44 = vld [vmem:[#allocation2 + $0x181] sm:$0xff] }
 0x2be   : > { %v5856_v30 = vunpack.i.h.bf16 %v5854_v43  ;;  %v5855_v39 = vunpack.i.l.bf16 %v5854_v43  ;;  %6138 = vrot.lane.b32.xlu0 %v6137_v23, %s6779_s22  ;;  %v6177_v17 = vpack.i.bf16 %v7817_v40, %v7865_v44 }
 0x2bf   : > { %6143 = vrot.lane.b32.xlu1 %v6142_v36, %s6781_s12  ;;  %v2058_v21 = vsel %vm1955_vm6, %v2026_v32, %v5850_v16  ;;  %v1962_v38 = vsel %vm1955_vm6, %v1929_v52, %v5851_v46 }
 0x2c0   : > { %v5859_v33 = vpop.permute.xlu0 %5858  ;;  %2274 = vmatprep.mubr.f32.mxu1 %v2058_v21  ;;  %v1995_v53 = vsel %vm304_vm0, %v968_v63, %v5855_v39  ;;  %v1897_v61 = vsel %vm304_vm0, %v840_v9, %v5856_v30  ;;  %v970_v30 = vld [vmem:[#allocation2 + $0x81] sm:$0xff]  ;;  %v6182_v21 = vpack.i.bf16 %v7804_v10, %v7624_v14 }
 0x2c1   : > { %v5864_v22 = vpop.permute.xlu1 %5863  ;;  %v5861_v26 = vunpack.i.h.bf16 %v5859_v33  ;;  %v5860_v7 = vunpack.i.l.bf16 %v5859_v33  ;;  %2275 = vmatmul.mubr.f32.gmra.mrb[16].mxu1 %v1962_v38  ;;  %v926_v38 = vld [vmem:[#allocation2 + $0x15a] sm:$0xff]  ;;  %v7877_v33 = vld [vmem:[#allocation2 + $0x188] sm:$0xff] }
 0x2c2   : > { %v5866_v24 = vunpack.i.h.bf16 %v5864_v22  ;;  %v5865_v3 = vunpack.i.l.bf16 %v5864_v22  ;;  %6148 = vrot.lane.b32.xlu0 %v6147_v25, %s9407_s23  ;;  %v842_v25 = vld [vmem:[#allocation2 + $0x68] sm:$0xff]  ;;  %v1120_v63 = vld [vmem:[#allocation2 + $0x19a] sm:$0xff] }
 0x2c3   : > { %6153 = vrot.lane.b32.xlu1 %v6152_v18, %s6779_s22  ;;  %v2027_v13 = vsel %vm1922_vm5, %v1995_v53, %v5860_v7  ;;  %v1930_v58 = vsel %vm1922_vm5, %v1897_v61, %v5861_v26  ;;  %v7881_v18 = vld [vmem:[#allocation2 + $0x189] sm:$0xff]  ;;  %5377 = vmatprep.mubr.msk.f32.mxu0 %vm304_vm0, %v1120_v63  ;;  %v6187_v53 = vpack.i.bf16 %v926_v38, %v7877_v33  ;;  %v844_v38 = vld [vmem:[#allocation2 + $0x80] sm:$0xff] }
 0x2c4   : > { %v5869_v54 = vpop.permute.xlu0 %5868  ;;  %v2059_v1 = vsel %vm1955_vm6, %v2027_v13, %v5865_v3  ;;  %v1963_v42 = vsel %vm1955_vm6, %v1930_v58, %v5866_v24  ;;  %v1121_v9 = vld [vmem:[#allocation2 + $0x1a2] sm:$0xff] }
 0x2c5   : > { %v5874_v6 = vpop.permute.xlu1 %5873  ;;  %v5871_v55 = vunpack.i.h.bf16 %v5869_v54  ;;  %v5870_v12 = vunpack.i.l.bf16 %v5869_v54  ;;  %2279 = vmatprep.mubr.f32.mxu1 %v2059_v1  ;;  %5378 = vmatmul.mubr.msk.f32.gmra.mrb[32].mxu0 %vm304_vm0, %v1121_v9  ;;  %v6192_v1 = vpack.i.bf16 %v7839_v19, %v7881_v18 }
 0x2c6   : > { %v5876_v31 = vunpack.i.h.bf16 %v5874_v6  ;;  %v5875_v35 = vunpack.i.l.bf16 %v5874_v6  ;;  %6158 = vrot.lane.b32.xlu0 %v6157_v28, %s6781_s12  ;;  %2280 = vmatmul.mubr.f32.gmra.mrb[18].mxu1 %v1963_v42  ;;  %v1056_v28 = vld [vmem:[#allocation2 + $0x198] sm:$0xff]  ;;  %v1023_v42 = vld [vmem:[#allocation2 + $0x182] sm:$0xff] }
 0x2c7   : > { %6163 = vrot.lane.b32.xlu1 %v6162_v41, %s9407_s23  ;;  %v1996_v2 = vsel %vm304_vm0, %v969_v11, %v5870_v12  ;;  %v1898_v51 = vsel %vm304_vm0, %v841_v34, %v5871_v55  ;;  %2798 = vmatprep.mubr.f32.mxu0 %v6775_v0  ;;  %v927_v12 = vld [vmem:[#allocation2 + $0x16a] sm:$0xff]  ;;  %v6197_v19 = vpack.i.bf16 %v7827_v60, %v1023_v42 }
 0x2c8   : > { %v5879_v29 = vpop.permute.xlu0 %5878  ;;  %v2028_v46 = vsel %vm1922_vm5, %v1996_v2, %v5875_v35  ;;  %v1931_v16 = vsel %vm1922_vm5, %v1898_v51, %v5876_v31  ;;  %v971_v41 = vld [vmem:[#allocation2 + $0x91] sm:$0xff] }
 0x2c9   : > { %v5884_v27 = vpop.permute.xlu1 %5883  ;;  %v5881_v37 = vunpack.i.h.bf16 %v5879_v29  ;;  %v5880_v4 = vunpack.i.l.bf16 %v5879_v29  ;;  %v843_v31 = vld [vmem:[#allocation2 + $0x78] sm:$0xff] }
 0x2ca   : > { %v5886_v23 = vunpack.i.h.bf16 %v5884_v27  ;;  %v5885_v43 = vunpack.i.l.bf16 %v5884_v27  ;;  %6168 = vrot.lane.b32.xlu0 %v6167_v8, %s6779_s22  ;;  %v6202_v8 = vpack.i.bf16 %v927_v12, %v1056_v28  ;;  %v1088_v27 = vld [vmem:[#allocation2 + $0x199] sm:$0xff]  ;;  %v845_v28 = vld [vmem:[#allocation2 + $0x90] sm:$0xff] }
 0x2cb   : > { %6173 = vrot.lane.b32.xlu1 %v6172_v57, %s6781_s12  ;;  %v2060_v47 = vsel %vm1955_vm6, %v2028_v46, %v5880_v4  ;;  %v1964_v48 = vsel %vm1955_vm6, %v1931_v16, %v5881_v37 }
 0x2cc   : > { %v5889_v36 = vpop.permute.xlu0 %5888  ;;  %2284 = vmatprep.mubr.f32.mxu1 %v2060_v47  ;;  %v1997_v7 = vsel %vm304_vm0, %v970_v30, %v5885_v43  ;;  %v1899_v40 = vsel %vm304_vm0, %v842_v25, %v5886_v23  ;;  %v1024_v43 = vld [vmem:[#allocation2 + $0x18a] sm:$0xff] }
 0x2cd   : > { %v5894_v39 = vpop.permute.xlu1 %5893  ;;  %v5891_v32 = vunpack.i.h.bf16 %v5889_v36  ;;  %v5890_v52 = vunpack.i.l.bf16 %v5889_v36  ;;  %2285 = vmatmul.mubr.f32.gmra.mrb[20].mxu1 %v1964_v48  ;;  %v6207_v48 = vpack.i.bf16 %v7856_v15, %v1088_v27  ;;  %v1057_v36 = vld [vmem:[#allocation2 + $0x1a0] sm:$0xff] }
 0x2ce   : > { %v5896_v22 = vunpack.i.h.bf16 %v5894_v39  ;;  %v5895_v26 = vunpack.i.l.bf16 %v5894_v39  ;;  %6178 = vrot.lane.b32.xlu0 %v6177_v17, %s9407_s23 }
 0x2cf   : > { %6183 = vrot.lane.b32.xlu1 %v6182_v21, %s6779_s22  ;;  %v2029_v14 = vsel %vm1922_vm5, %v1997_v7, %v5890_v52  ;;  %v1932_v10 = vsel %vm1922_vm5, %v1899_v40, %v5891_v32  ;;  %v6212_v32 = vpack.i.bf16 %v7843_v49, %v1024_v43  ;;  %v972_v52 = vld [vmem:[#allocation2 + $0x99] sm:$0xff]  ;;  %v1089_v7 = vld [vmem:[#allocation2 + $0x1a1] sm:$0xff] }
 0x2d0   : > { %v5899_v24 = vpop.permute.xlu0 %5898  ;;  %v2061_v3 = vsel %vm1955_vm6, %v2029_v14, %v5895_v26  ;;  %v1965_v61 = vsel %vm1955_vm6, %v1932_v10, %v5896_v22  ;;  %v928_v21 = vld [vmem:[#allocation2 + $0x172] sm:$0xff] }
 0x2d1   : > { %v5904_v13 = vpop.permute.xlu1 %5903  ;;  %v5901_v58 = vunpack.i.h.bf16 %v5899_v24  ;;  %v5900_v54 = vunpack.i.l.bf16 %v5899_v24  ;;  %2289 = vmatprep.mubr.f32.mxu1 %v2061_v3  ;;  %v6217_v10 = vpack.i.bf16 %v928_v21, %v1057_v36 }
 0x2d2   : > { %v5906_v6 = vunpack.i.h.bf16 %v5904_v13  ;;  %v5905_v55 = vunpack.i.l.bf16 %v5904_v13  ;;  %6188 = vrot.lane.b32.xlu0 %v6187_v53, %s6781_s12  ;;  %2290 = vmatmul.mubr.f32.gmra.mrb[22].mxu1 %v1965_v61  ;;  %v6222_v13 = vpack.i.bf16 %v7877_v33, %v1089_v7 }
 0x2d3   : > { %6193 = vrot.lane.b32.xlu1 %v6192_v1, %s9407_s23  ;;  %v1998_v35 = vsel %vm304_vm0, %v971_v41, %v5900_v54  ;;  %v1900_v11 = vsel %vm304_vm0, %v843_v31, %v5901_v58  ;;  %v973_v1 = vld [vmem:[#allocation2 + $0xa9] sm:$0xff] }
 0x2d4   : > { %v5909_v34 = vpop.permute.xlu0 %5908  ;;  %v2030_v57 = vsel %vm1922_vm5, %v1998_v35, %v5905_v55  ;;  %v1933_v23 = vsel %vm1922_vm5, %v1900_v11, %v5906_v6 }
 0x2d5   : > { %v5914_v2 = vpop.permute.xlu1 %5913  ;;  %v5911_v51 = vunpack.i.h.bf16 %v5909_v34  ;;  %v5910_v29 = vunpack.i.l.bf16 %v5909_v34 }
 0x2d6   : > { %v5916_v37 = vunpack.i.h.bf16 %v5914_v2  ;;  %v5915_v4 = vunpack.i.l.bf16 %v5914_v2  ;;  %6198 = vrot.lane.b32.xlu0 %v6197_v19, %s6779_s22 }
 0x2d7   : > { %6203 = vrot.lane.b32.xlu1 %v6202_v8, %s6781_s12  ;;  %v2062_v46 = vsel %vm1955_vm6, %v2030_v57, %v5910_v29  ;;  %v1966_v16 = vsel %vm1955_vm6, %v1933_v23, %v5911_v51 }
 0x2d8   : > { %v5919_v47 = vpop.permute.xlu0 %5918  ;;  %2294 = vmatprep.mubr.f32.mxu1 %v2062_v46  ;;  %v1999_v26 = vsel %vm304_vm0, %v972_v52, %v5915_v4  ;;  %v1901_v40 = vsel %vm304_vm0, %v844_v38, %v5916_v37  ;;  %v974_v37 = vld [vmem:[#allocation2 + $0xb1] sm:$0xff]  ;;  %v975_v38 = vld [vmem:[#allocation2 + $0xc1] sm:$0xff] }
 0x2d9   : > { %v5924_v17 = vpop.permute.xlu1 %5923  ;;  %v5921_v30 = vunpack.i.h.bf16 %v5919_v47  ;;  %v5920_v39 = vunpack.i.l.bf16 %v5919_v47  ;;  %2295 = vmatmul.mubr.f32.gmra.mrb[24].mxu1 %v1966_v16  ;;  %v846_v4 = vld [vmem:[#allocation2 + $0x98] sm:$0xff] }
 0x2da   : > { %v5926_v25 = vunpack.i.h.bf16 %v5924_v17  ;;  %v5925_v22 = vunpack.i.l.bf16 %v5924_v17  ;;  %6208 = vrot.lane.b32.xlu0 %v6207_v48, %s9407_s23 }
 0x2db   : > { %6213 = vrot.lane.b32.xlu1 %v6212_v32, %s6779_s22  ;;  %v2031_v15 = vsel %vm1922_vm5, %v1999_v26, %v5920_v39  ;;  %v1934_v63 = vsel %vm1922_vm5, %v1901_v40, %v5921_v30 }
 0x2dc   : > { %v5929_v9 = vpop.permute.xlu0 %5928  ;;  %v2063_v14 = vsel %vm1955_vm6, %v2031_v15, %v5925_v22  ;;  %v1967_v24 = vsel %vm1955_vm6, %v1934_v63, %v5926_v25  ;;  %v847_v25 = vld [vmem:[#allocation2 + $0xa8] sm:$0xff] }
 0x2dd   : > { %v5934_v3 = vpop.permute.xlu1 %5933  ;;  %v5931_v53 = vunpack.i.h.bf16 %v5929_v9  ;;  %v5930_v61 = vunpack.i.l.bf16 %v5929_v9  ;;  %2299 = vmatprep.mubr.f32.mxu1 %v2063_v14 }
 0x2de   : > { %v5936_v58 = vunpack.i.h.bf16 %v5934_v3  ;;  %v5935_v54 = vunpack.i.l.bf16 %v5934_v3  ;;  %6218 = vrot.lane.b32.xlu0 %v6217_v10, %s6781_s12  ;;  %2300 = vmatmul.mubr.f32.gmra.mrb[26].mxu1 %v1967_v24 }
 0x2df   : > { %6223 = vrot.lane.b32.xlu1 %v6222_v13, %s9407_s23  ;;  %v2000_v42 = vsel %vm304_vm0, %v973_v1, %v5930_v61  ;;  %v1902_v6 = vsel %vm304_vm0, %v845_v28, %v5931_v53  ;;  %v976_v1 = vld [vmem:[#allocation2 + $0xc9] sm:$0xff]  ;;  %s6715_s23 = sshll.u32 %s6782_s25, 4  ;;  %s6716_s23 = int_to_ptr.vmem [resolvable:$false] %s6715_s23 }
 0x2e0   : > { %v5939_v55 = vpop.permute.xlu0 %5938  ;;  %v2032_v33 = vsel %vm1922_vm5, %v2000_v42, %v5935_v54  ;;  %v1935_v34 = vsel %vm1922_vm5, %v1902_v6, %v5936_v58  ;;  %v848_v28 = vld [vmem:[#allocation2 + $0xb0] sm:$0xff]  ;;  %s6717_s26 = scalar_lea.vmem %s6716_s23, 8192 }
 0x2e1   : > { %v5944_v12 = vpop.permute.xlu1 %5943  ;;  %v5941_v41 = vunpack.i.h.bf16 %v5939_v55  ;;  %v5940_v31 = vunpack.i.l.bf16 %v5939_v55 }
 0x2e2   : > { %v5946_v35 = vunpack.i.h.bf16 %v5944_v12  ;;  %v5945_v11 = vunpack.i.l.bf16 %v5944_v12 }
 0x2e3   : > { %v2064_v19 = vsel %vm1955_vm6, %v2032_v33, %v5940_v31  ;;  %v1968_v2 = vsel %vm1955_vm6, %v1935_v34, %v5941_v41 }
 0x2e4   : > { %v5949_v51 = vpop.permute.xlu0 %5948  ;;  %2304 = vmatprep.mubr.f32.mxu1 %v2064_v19  ;;  %v2001_v43 = vsel %vm304_vm0, %v974_v37, %v5945_v11  ;;  %v1903_v46 = vsel %vm304_vm0, %v846_v4, %v5946_v35  ;;  %v977_v37 = vld [vmem:[#allocation2 + $0xd9] sm:$0xff] }
 0x2e5   : > { %v5954_v29 = vpop.permute.xlu1 %5953  ;;  %v5951_v8 = vunpack.i.h.bf16 %v5949_v51  ;;  %v5950_v27 = vunpack.i.l.bf16 %v5949_v51  ;;  %2305 = vmatmul.mubr.f32.gmra.mrb[28].mxu1 %v1968_v2  ;;  %v849_v4 = vld [vmem:[#allocation2 + $0xc0] sm:$0xff] }
 0x2e6   : > { %v5956_v57 = vunpack.i.h.bf16 %v5954_v29  ;;  %v5955_v23 = vunpack.i.l.bf16 %v5954_v29 }
 0x2e7   : > { %v2033_v16 = vsel %vm1922_vm5, %v2001_v43, %v5950_v27  ;;  %v1936_v47 = vsel %vm1922_vm5, %v1903_v46, %v5951_v8 }
 0x2e8   : > { %v5959_v48 = vpop.permute.xlu0 %5958  ;;  %v2065_v36 = vsel %vm1955_vm6, %v2033_v16, %v5955_v23  ;;  %v1969_v17 = vsel %vm1955_vm6, %v1936_v47, %v5956_v57 }
 0x2e9   : > { %v5964_v30 = vpop.permute.xlu1 %5963  ;;  %v5961_v39 = vunpack.i.h.bf16 %v5959_v48  ;;  %v5960_v32 = vunpack.i.l.bf16 %v5959_v48  ;;  %2309 = vmatprep.mubr.f32.mxu1 %v2065_v36 }
 0x2ea   : > { %v5966_v52 = vunpack.i.h.bf16 %v5964_v30  ;;  %v5965_v21 = vunpack.i.l.bf16 %v5964_v30  ;;  %2310 = vmatmul.mubr.f32.gmra.mrb[30].mxu1 %v1969_v17 }
 0x2eb   : > { %v2002_v22 = vsel %vm304_vm0, %v975_v38, %v5960_v32  ;;  %v1904_v26 = vsel %vm304_vm0, %v847_v25, %v5961_v39 }
 0x2ec   : > { %v5969_v7 = vpop.permute.xlu0 %5968  ;;  %v2034_v10 = vsel %vm1922_vm5, %v2002_v22, %v5965_v21  ;;  %v1937_v24 = vsel %vm1922_vm5, %v1904_v26, %v5966_v52 }
 0x2ed   : > { %v5974_v40 = vpop.permute.xlu1 %5973  ;;  %v5971_v15 = vunpack.i.h.bf16 %v5969_v7  ;;  %v5970_v63 = vunpack.i.l.bf16 %v5969_v7 }
 0x2ee   : > { %v5976_v9 = vunpack.i.h.bf16 %v5974_v40  ;;  %v5975_v14 = vunpack.i.l.bf16 %v5974_v40 }
 0x2ef   : > { %v2066_v3 = vsel %vm1955_vm6, %v2034_v10, %v5970_v63  ;;  %v1970_v53 = vsel %vm1955_vm6, %v1937_v24, %v5971_v15  ;;  %v978_v15 = vld [vmem:[#allocation2 + $0xe1] sm:$0xff] }
 0x2f0   : > { %v5979_v61 = vpop.permute.xlu0 %5978  ;;  %2314 = vmatprep.mubr.f32.mxu1 %v2066_v3  ;;  %v2003_v55 = vsel %vm304_vm0, %v976_v1, %v5975_v14  ;;  %v1905_v12 = vsel %vm304_vm0, %v848_v28, %v5976_v9  ;;  %v850_v63 = vld [vmem:[#allocation2 + $0xc8] sm:$0xff] }
 0x2f1   : > { %v5984_v13 = vpop.permute.xlu1 %5983  ;;  %v5981_v58 = vunpack.i.h.bf16 %v5979_v61  ;;  %v5980_v54 = vunpack.i.l.bf16 %v5979_v61  ;;  %2315 = vmatmul.mubr.f32.gmra.mrb[32].mxu1 %v1970_v53 }
 0x2f2   : > { %v5986_v42 = vunpack.i.h.bf16 %v5984_v13  ;;  %v5985_v6 = vunpack.i.l.bf16 %v5984_v13 }
 0x2f3   : > { %v2035_v41 = vsel %vm1922_vm5, %v2003_v55, %v5980_v54  ;;  %v1938_v31 = vsel %vm1922_vm5, %v1905_v12, %v5981_v58 }
 0x2f4   : > { %v5989_v11 = vpop.permute.xlu0 %5988  ;;  %v2067_v33 = vsel %vm1955_vm6, %v2035_v41, %v5985_v6  ;;  %v1971_v34 = vsel %vm1955_vm6, %v1938_v31, %v5986_v42  ;;  %v979_v41 = vld [vmem:[#allocation2 + $0xf1] sm:$0xff] }
 0x2f5   : > { %v7941_v35 = vpop.f32.mrb[2].mxu0  ;;  %v5994_v19 = vpop.permute.xlu1 %5993  ;;  %v5991_v2 = vunpack.i.h.bf16 %v5989_v11  ;;  %v5990_v51 = vunpack.i.l.bf16 %v5989_v11  ;;  %2319 = vmatprep.mubr.f32.mxu1 %v2067_v33  ;;  %v851_v31 = vld [vmem:[#allocation2 + $0xd8] sm:$0xff] }
 0x2f6   : > { %v7945_v29 = vpop.f32.mrb[3].mxu0  ;;  %v5996_v8 = vunpack.i.h.bf16 %v5994_v19  ;;  %v5995_v27 = vunpack.i.l.bf16 %v5994_v19  ;;  %2320 = vmatmul.mubr.f32.gmra.mrb[34].mxu1 %v1971_v34 }
 0x2f7   : > { %v2004_v57 = vsel %vm304_vm0, %v977_v37, %v5990_v51  ;;  %v1906_v23 = vsel %vm304_vm0, %v849_v4, %v5991_v2 }
 0x2f8   : > { %v5999_v46 = vpop.permute.xlu0 %5998  ;;  %v2036_v39 = vsel %vm1922_vm5, %v2004_v57, %v5995_v27  ;;  %v1939_v32 = vsel %vm1922_vm5, %v1906_v23, %v5996_v8 }
 0x2f9   : > { %v7949_v43 = vpop.f32.mrb[4].mxu0  ;;  %v6004_v16 = vpop.permute.xlu1 %6003  ;;  %v6001_v47 = vunpack.i.h.bf16 %v5999_v46  ;;  %v6000_v48 = vunpack.i.l.bf16 %v5999_v46 }
 0x2fa   : > { %v7951_v36 = vpop.f32.mrb[5].mxu0  ;;  %v6006_v17 = vunpack.i.h.bf16 %v6004_v16  ;;  %v6005_v30 = vunpack.i.l.bf16 %v6004_v16 }
 0x2fb   : > { %v2068_v52 = vsel %vm1955_vm6, %v2036_v39, %v6000_v48  ;;  %v1972_v21 = vsel %vm1955_vm6, %v1939_v32, %v6001_v47 }
 0x2fc   : > { %v6009_v25 = vpop.permute.xlu0 %6008  ;;  %2324 = vmatprep.mubr.f32.mxu1 %v2068_v52  ;;  %v2005_v10 = vsel %vm304_vm0, %v978_v15, %v6005_v30  ;;  %v1907_v24 = vsel %vm304_vm0, %v850_v63, %v6006_v17  ;;  %v980_v52 = vld [vmem:[#allocation2 + $0xf9] sm:$0xff] }
 0x2fd   : > { %v7957_v38 = vpop.f32.mrb[6].mxu0  ;;  %v6014_v22 = vpop.permute.xlu1 %6013  ;;  %v6011_v26 = vunpack.i.h.bf16 %v6009_v25  ;;  %v6010_v7 = vunpack.i.l.bf16 %v6009_v25  ;;  %2325 = vmatmul.mubr.f32.gmra.mrb[36].mxu1 %v1972_v21  ;;  %v852_v21 = vld [vmem:[#allocation2 + $0xe0] sm:$0xff] }
 0x2fe   : > { %v7959_v40 = vpop.f32.mrb[7].mxu0  ;;  %v6016_v9 = vunpack.i.h.bf16 %v6014_v22  ;;  %v6015_v14 = vunpack.i.l.bf16 %v6014_v22 }
 0x2ff   : > { %v2037_v3 = vsel %vm1922_vm5, %v2005_v10, %v6010_v7  ;;  %v1940_v53 = vsel %vm1922_vm5, %v1907_v24, %v6011_v26 }
 0x300   : > { %v6019_v13 = vpop.permute.xlu0 %6018  ;;  %v2069_v58 = vsel %vm1955_vm6, %v2037_v3, %v6015_v14  ;;  %v1973_v54 = vsel %vm1955_vm6, %v1940_v53, %v6016_v9 }
 0x301   : > { %v7965_v61 = vpop.f32.mrb[8].mxu0  ;;  %v6024_v1 = vpop.permute.xlu1 %6023  ;;  %v6021_v28 = vunpack.i.h.bf16 %v6019_v13  ;;  %v6020_v42 = vunpack.i.l.bf16 %v6019_v13  ;;  %2329 = vmatprep.mubr.f32.mxu1 %v2069_v58 }
 0x302   : > { %v7969_v6 = vpop.f32.mrb[9].mxu0  ;;  %v6026_v55 = vunpack.i.h.bf16 %v6024_v1  ;;  %v6025_v12 = vunpack.i.l.bf16 %v6024_v1  ;;  %2330 = vmatmul.mubr.f32.gmra.mrb[38].mxu1 %v1973_v54 }
 0x303   : > { %v2006_v11 = vsel %vm304_vm0, %v979_v41, %v6020_v42  ;;  %v1908_v33 = vsel %vm304_vm0, %v851_v31, %v6021_v28  ;;  %v981_v28 = vld [vmem:[#allocation2 + $0x109] sm:$0xff] }
 0x304   : > { %v6029_v19 = vpop.permute.xlu0 %6028  ;;  %v2038_v57 = vsel %vm1922_vm5, %v2006_v11, %v6025_v12  ;;  %v1941_v23 = vsel %vm1922_vm5, %v1908_v33, %v6026_v55  ;;  %v853_v42 = vld [vmem:[#allocation2 + $0xf0] sm:$0xff] }
 0x305   : > { %v7973_v34 = vpop.f32.mrb[10].mxu0  ;;  %v6034_v2 = vpop.permute.xlu1 %6033  ;;  %v6031_v51 = vunpack.i.h.bf16 %v6029_v19  ;;  %v6030_v8 = vunpack.i.l.bf16 %v6029_v19 }
 0x306   : > { %v7975_v27 = vpop.f32.mrb[11].mxu0  ;;  %v6036_v37 = vunpack.i.h.bf16 %v6034_v2  ;;  %v6035_v4 = vunpack.i.l.bf16 %v6034_v2 }
 0x307   : > { %v2070_v46 = vsel %vm1955_vm6, %v2038_v57, %v6030_v8  ;;  %v1974_v16 = vsel %vm1955_vm6, %v1941_v23, %v6031_v51 }
 0x308   : > { %v6039_v48 = vpop.permute.xlu0 %6038  ;;  %2334 = vmatprep.mubr.f32.mxu1 %v2070_v46  ;;  %v2007_v26 = vsel %vm304_vm0, %v980_v52, %v6035_v4  ;;  %v1909_v7 = vsel %vm304_vm0, %v852_v21, %v6036_v37  ;;  %v982_v52 = vld [vmem:[#allocation2 + $0x111] sm:$0xff] }
 0x309   : > { %v7981_v47 = vpop.f32.mrb[12].mxu0  ;;  %v6044_v17 = vpop.permute.xlu1 %6043  ;;  %v6041_v30 = vunpack.i.h.bf16 %v6039_v48  ;;  %v6040_v39 = vunpack.i.l.bf16 %v6039_v48  ;;  %2335 = vmatmul.mubr.f32.gmra.mrb[40].mxu1 %v1974_v16  ;;  %v854_v21 = vld [vmem:[#allocation2 + $0xf8] sm:$0xff] }
 0x30a   : > { %v7983_v32 = vpop.f32.mrb[13].mxu0  ;;  %v6046_v25 = vunpack.i.h.bf16 %v6044_v17  ;;  %v6045_v22 = vunpack.i.l.bf16 %v6044_v17 }
 0x30b   : > { %v2039_v15 = vsel %vm1922_vm5, %v2007_v26, %v6040_v39  ;;  %v1942_v63 = vsel %vm1922_vm5, %v1909_v7, %v6041_v30 }
 0x30c   : > { %v6049_v14 = vpop.permute.xlu0 %6048  ;;  %v2071_v10 = vsel %vm1955_vm6, %v2039_v15, %v6045_v22  ;;  %v1975_v24 = vsel %vm1955_vm6, %v1942_v63, %v6046_v25 }
 0x30d   : > { %v7989_v9 = vpop.f32.mrb[14].mxu0  ;;  %v6054_v3 = vpop.permute.xlu1 %6053  ;;  %v6051_v53 = vunpack.i.h.bf16 %v6049_v14  ;;  %v6050_v13 = vunpack.i.l.bf16 %v6049_v14  ;;  %2339 = vmatprep.mubr.f32.mxu1 %v2071_v10 }
 0x30e   : > { %v7993_v58 = vpop.f32.mrb[15].mxu0  ;;  %v6056_v54 = vunpack.i.h.bf16 %v6054_v3  ;;  %v6055_v1 = vunpack.i.l.bf16 %v6054_v3  ;;  %2340 = vmatmul.mubr.f32.gmra.mrb[42].mxu1 %v1975_v24 }
 0x30f   : > { %v2008_v55 = vsel %vm304_vm0, %v981_v28, %v6050_v13  ;;  %v1910_v12 = vsel %vm304_vm0, %v853_v42, %v6051_v53 }
 0x310   : > { %v6059_v31 = vpop.permute.xlu0 %6058  ;;  %v2040_v37 = vsel %vm1922_vm5, %v2008_v55, %v6055_v1  ;;  %v1943_v4 = vsel %vm1922_vm5, %v1910_v12, %v6056_v54  ;;  %v983_v55 = vld [vmem:[#allocation2 + $0x121] sm:$0xff] }
 0x311   : > { %v7997_v41 = vpop.f32.mrb[16].mxu0  ;;  %v6064_v11 = vpop.permute.xlu1 %6063  ;;  %v6061_v33 = vunpack.i.h.bf16 %v6059_v31  ;;  %v6060_v19 = vunpack.i.l.bf16 %v6059_v31  ;;  %v855_v12 = vld [vmem:[#allocation2 + $0x108] sm:$0xff] }
 0x312   : > { %v7999_v2 = vpop.f32.mrb[17].mxu0  ;;  %v6066_v51 = vunpack.i.h.bf16 %v6064_v11  ;;  %v6065_v8 = vunpack.i.l.bf16 %v6064_v11 }
 0x313   : > { %v2072_v57 = vsel %vm1955_vm6, %v2040_v37, %v6060_v19  ;;  %v1976_v23 = vsel %vm1955_vm6, %v1943_v4, %v6061_v33 }
 0x314   : > { %v6069_v16 = vpop.permute.xlu0 %6068  ;;  %2344 = vmatprep.mubr.f32.mxu1 %v2072_v57  ;;  %v2009_v26 = vsel %vm304_vm0, %v982_v52, %v6065_v8  ;;  %v1911_v7 = vsel %vm304_vm0, %v854_v21, %v6066_v51 }
 0x315   : > { %v8005_v46 = vpop.f32.mrb[18].mxu0  ;;  %v6074_v48 = vpop.permute.xlu1 %6073  ;;  %v6071_v17 = vunpack.i.h.bf16 %v6069_v16  ;;  %v6070_v30 = vunpack.i.l.bf16 %v6069_v16  ;;  %2345 = vmatmul.mubr.f32.gmra.mrb[44].mxu1 %v1976_v23 }
 0x316   : > { %v8007_v39 = vpop.f32.mrb[19].mxu0  ;;  %v6076_v25 = vunpack.i.h.bf16 %v6074_v48  ;;  %v6075_v22 = vunpack.i.l.bf16 %v6074_v48 }
 0x317   : > { %v2041_v15 = vsel %vm1922_vm5, %v2009_v26, %v6070_v30  ;;  %v1944_v63 = vsel %vm1922_vm5, %v1911_v7, %v6071_v17 }
 0x318   : > { %v6079_v10 = vpop.permute.xlu0 %6078  ;;  %v2073_v24 = vsel %vm1955_vm6, %v2041_v15, %v6075_v22  ;;  %v1977_v3 = vsel %vm1955_vm6, %v1944_v63, %v6076_v25  ;;  %v984_v15 = vld [vmem:[#allocation2 + $0x129] sm:$0xff] }
 0x319   : > { %v8013_v14 = vpop.f32.mrb[20].mxu0  ;;  %v6084_v53 = vpop.permute.xlu1 %6083  ;;  %v6081_v13 = vunpack.i.h.bf16 %v6079_v10  ;;  %v6080_v54 = vunpack.i.l.bf16 %v6079_v10  ;;  %2349 = vmatprep.mubr.f32.mxu1 %v2073_v24  ;;  %v856_v63 = vld [vmem:[#allocation2 + $0x110] sm:$0xff] }
 0x31a   : > { %v8017_v1 = vpop.f32.mrb[21].mxu0  ;;  %v6086_v28 = vunpack.i.h.bf16 %v6084_v53  ;;  %v6085_v42 = vunpack.i.l.bf16 %v6084_v53  ;;  %2350 = vmatmul.mubr.f32.gmra.mrb[46].mxu1 %v1977_v3 }
 0x31b   : > { %v2010_v31 = vsel %vm304_vm0, %v983_v55, %v6080_v54  ;;  %v1912_v11 = vsel %vm304_vm0, %v855_v12, %v6081_v13 }
 0x31c   : > { %v6089_v19 = vpop.permute.xlu0 %6088  ;;  %v2042_v16 = vsel %vm1922_vm5, %v2010_v31, %v6085_v42  ;;  %v1945_v48 = vsel %vm1922_vm5, %v1912_v11, %v6086_v28 }
 0x31d   : > { %v8021_v33 = vpop.f32.mrb[22].mxu0  ;;  %v6094_v51 = vpop.permute.xlu1 %6093  ;;  %v6091_v8 = vunpack.i.h.bf16 %v6089_v19  ;;  %v6090_v37 = vunpack.i.l.bf16 %v6089_v19 }
 0x31e   : > { %v8023_v4 = vpop.f32.mrb[23].mxu0  ;;  %v6096_v57 = vunpack.i.h.bf16 %v6094_v51  ;;  %v6095_v23 = vunpack.i.l.bf16 %v6094_v51 }
 0x31f   : > { %v2074_v17 = vsel %vm1955_vm6, %v2042_v16, %v6090_v37  ;;  %v1978_v30 = vsel %vm1955_vm6, %v1945_v48, %v6091_v8 }
 0x320   : > { %v6099_v21 = vpop.permute.xlu0 %6098  ;;  %2354 = vmatprep.mubr.f32.mxu1 %v2074_v17  ;;  %v2011_v3 = vsel %vm304_vm0, %v984_v15, %v6095_v23  ;;  %v1913_v53 = vsel %vm304_vm0, %v856_v63, %v6096_v57  ;;  %v985_v57 = vld [vmem:[#allocation2 + $0x139] sm:$0xff] }
 0x321   : > { %v8029_v52 = vpop.f32.mrb[24].mxu0  ;;  %v6104_v25 = vpop.permute.xlu1 %6103  ;;  %v6101_v22 = vunpack.i.h.bf16 %v6099_v21  ;;  %v6100_v26 = vunpack.i.l.bf16 %v6099_v21  ;;  %2355 = vmatmul.mubr.f32.gmra.mrb[48].mxu1 %v1978_v30  ;;  %v857_v23 = vld [vmem:[#allocation2 + $0x120] sm:$0xff] }
 0x322   : > { %v8031_v7 = vpop.f32.mrb[25].mxu0  ;;  %v6106_v10 = vunpack.i.h.bf16 %v6104_v25  ;;  %v6105_v24 = vunpack.i.l.bf16 %v6104_v25 }
 0x323   : > { %v2043_v13 = vsel %vm1922_vm5, %v2011_v3, %v6100_v26  ;;  %v1946_v54 = vsel %vm1922_vm5, %v1913_v53, %v6101_v22 }
 0x324   : > { %v6109_v42 = vpop.permute.xlu0 %6108  ;;  %v2075_v55 = vsel %vm1955_vm6, %v2043_v13, %v6105_v24  ;;  %v1979_v12 = vsel %vm1955_vm6, %v1946_v54, %v6106_v10 }
 0x325   : > { %v8037_v28 = vpop.f32.mrb[26].mxu0  ;;  %v6114_v31 = vpop.permute.xlu1 %6113  ;;  %v6111_v11 = vunpack.i.h.bf16 %v6109_v42  ;;  %v6110_v19 = vunpack.i.l.bf16 %v6109_v42  ;;  %2359 = vmatprep.mubr.f32.mxu1 %v2075_v55 }
 0x326   : > { %v8041_v51 = vpop.f32.mrb[27].mxu0  ;;  %v6116_v8 = vunpack.i.h.bf16 %v6114_v31  ;;  %v6115_v37 = vunpack.i.l.bf16 %v6114_v31  ;;  %2360 = vmatmul.mubr.f32.gmra.mrb[50].mxu1 %v1979_v12 }
 0x327   : > { %v2012_v16 = vsel %vm304_vm0, %v985_v57, %v6110_v19  ;;  %v1914_v48 = vsel %vm304_vm0, %v857_v23, %v6111_v11  ;;  %v986_v11 = vld [vmem:[#allocation2 + $0x141] sm:$0xff] }
 0x328   : > { %v6119_v30 = vpop.permute.xlu0 %6118  ;;  %v2044_v10 = vsel %vm1922_vm5, %v2012_v16, %v6115_v37  ;;  %v1947_v24 = vsel %vm1922_vm5, %v1914_v48, %v6116_v8  ;;  %v858_v19 = vld [vmem:[#allocation2 + $0x128] sm:$0xff] }
 0x329   : > { %v8045_v17 = vpop.f32.mrb[28].mxu0  ;;  %v6124_v21 = vpop.permute.xlu1 %6123  ;;  %v6121_v25 = vunpack.i.h.bf16 %v6119_v30  ;;  %v6120_v22 = vunpack.i.l.bf16 %v6119_v30 }
 0x32a   : > { %v8047_v26 = vpop.f32.mrb[29].mxu0  ;;  %v6126_v15 = vunpack.i.h.bf16 %v6124_v21  ;;  %v6125_v63 = vunpack.i.l.bf16 %v6124_v21 }
 0x32b   : > { %v2076_v3 = vsel %vm1955_vm6, %v2044_v10, %v6120_v22  ;;  %v1980_v53 = vsel %vm1955_vm6, %v1947_v24, %v6121_v25 }
 0x32c   : > { %v6129_v54 = vpop.permute.xlu0 %6128  ;;  %2364 = vmatprep.mubr.f32.mxu1 %v2076_v3  ;;  %v2013_v8 = vsel %vm304_vm0, %v986_v11, %v6125_v63  ;;  %v1915_v23 = vsel %vm304_vm0, %v858_v19, %v6126_v15  ;;  %v859_v63 = vld [vmem:[#allocation2 + $0x138] sm:$0xff] }
 0x32d   : > { %v8053_v13 = vpop.f32.mrb[30].mxu0  ;;  %v6134_v42 = vpop.permute.xlu1 %6133  ;;  %v6131_v55 = vunpack.i.h.bf16 %v6129_v54  ;;  %v6130_v12 = vunpack.i.l.bf16 %v6129_v54  ;;  %2365 = vmatmul.mubr.f32.gmra.mrb[52].mxu1 %v1980_v53  ;;  %v987_v54 = vld [vmem:[#allocation2 + $0x151] sm:$0xff] }
 0x32e   : > { %v8055_v31 = vpop.f32.mrb[31].mxu0  ;;  %v6136_v57 = vunpack.i.h.bf16 %v6134_v42  ;;  %v6135_v37 = vunpack.i.l.bf16 %v6134_v42 }
 0x32f   : > { %v2045_v16 = vsel %vm1922_vm5, %v2013_v8, %v6130_v12  ;;  %v1948_v48 = vsel %vm1922_vm5, %v1915_v23, %v6131_v55 }
 0x330   : > { %v6139_v30 = vpop.permute.xlu0 %6138  ;;  %v2077_v21 = vsel %vm1955_vm6, %v2045_v16, %v6135_v37  ;;  %v1981_v25 = vsel %vm1955_vm6, %v1948_v48, %v6136_v57 }
 0x331   : > { %v6144_v22 = vpop.permute.xlu1 %6143  ;;  %v6141_v10 = vunpack.i.h.bf16 %v6139_v30  ;;  %v6140_v24 = vunpack.i.l.bf16 %v6139_v30  ;;  %2369 = vmatprep.mubr.f32.mxu1 %v2077_v21 }
 0x332   : > { %v6146_v3 = vunpack.i.h.bf16 %v6144_v22  ;;  %v6145_v53 = vunpack.i.l.bf16 %v6144_v22  ;;  %2370 = vmatmul.mubr.f32.gmra.mrb[54].mxu1 %v1981_v25 }
 0x333   : > { %v2014_v15 = vsel %vm304_vm0, %v987_v54, %v6140_v24  ;;  %v1916_v42 = vsel %vm304_vm0, %v859_v63, %v6141_v10  ;;  %v988_v10 = vld [vmem:[#allocation2 + $0x159] sm:$0xff] }
 0x334   : > { %v6149_v12 = vpop.permute.xlu0 %6148  ;;  %v2046_v57 = vsel %vm1922_vm5, %v2014_v15, %v6145_v53  ;;  %v1949_v23 = vsel %vm1922_vm5, %v1916_v42, %v6146_v3  ;;  %v860_v24 = vld [vmem:[#allocation2 + $0x140] sm:$0xff] }
 0x335   : > { %v6154_v55 = vpop.permute.xlu1 %6153  ;;  %v6151_v11 = vunpack.i.h.bf16 %v6149_v12  ;;  %v6150_v19 = vunpack.i.l.bf16 %v6149_v12 }
 0x336   : > { %v6156_v37 = vunpack.i.h.bf16 %v6154_v55  ;;  %v6155_v8 = vunpack.i.l.bf16 %v6154_v55 }
 0x337   : > { %v2078_v16 = vsel %vm1955_vm6, %v2046_v57, %v6150_v19  ;;  %v1982_v48 = vsel %vm1955_vm6, %v1949_v23, %v6151_v11 }
 0x338   : > { %v6159_v30 = vpop.permute.xlu0 %6158  ;;  %2374 = vmatprep.mubr.f32.mxu1 %v2078_v16  ;;  %v2015_v12 = vsel %vm304_vm0, %v988_v10, %v6155_v8  ;;  %v1917_v53 = vsel %vm304_vm0, %v860_v24, %v6156_v37 }
 0x339   : > { %v6164_v21 = vpop.permute.xlu1 %6163  ;;  %v6161_v25 = vunpack.i.h.bf16 %v6159_v30  ;;  %v6160_v22 = vunpack.i.l.bf16 %v6159_v30  ;;  %2375 = vmatmul.mubr.f32.gmra.mrb[56].mxu1 %v1982_v48  ;;  %v861_v30 = vld [vmem:[#allocation2 + $0x150] sm:$0xff] }
 0x33a   : > { %v6166_v54 = vunpack.i.h.bf16 %v6164_v21  ;;  %v6165_v63 = vunpack.i.l.bf16 %v6164_v21 }
 0x33b   : > { %v2047_v3 = vsel %vm1922_vm5, %v2015_v12, %v6160_v22  ;;  %v1950_v15 = vsel %vm1922_vm5, %v1917_v53, %v6161_v25 }
 0x33c   : > { %v6169_v42 = vpop.permute.xlu0 %6168  ;;  %v2079_v55 = vsel %vm1955_vm6, %v2047_v3, %v6165_v63  ;;  %v1983_v11 = vsel %vm1955_vm6, %v1950_v15, %v6166_v54 }
 0x33d   : > { %v6174_v19 = vpop.permute.xlu1 %6173  ;;  %v6171_v57 = vunpack.i.h.bf16 %v6169_v42  ;;  %v6170_v23 = vunpack.i.l.bf16 %v6169_v42  ;;  %2379 = vmatprep.mubr.f32.mxu1 %v2079_v55 }
 0x33e   : > { %v6176_v16 = vunpack.i.h.bf16 %v6174_v19  ;;  %v6175_v48 = vunpack.i.l.bf16 %v6174_v19  ;;  %2380 = vmatmul.mubr.f32.gmra.mrb[58].mxu1 %v1983_v11  ;;  %v862_v11 = vld [vmem:[#allocation2 + $0x158] sm:$0xff] }
 0x33f   : > { %v2016_v37 = vsel %vm304_vm0, %v7827_v60, %v6170_v23  ;;  %v1918_v8 = vsel %vm304_vm0, %v861_v30, %v6171_v57 }
 0x340   : > { %v6179_v21 = vpop.permute.xlu0 %6178  ;;  %v2048_v54 = vsel %vm1922_vm5, %v2016_v37, %v6175_v48  ;;  %v1951_v12 = vsel %vm1922_vm5, %v1918_v8, %v6176_v16 }
 0x341   : > { %v6184_v25 = vpop.permute.xlu1 %6183  ;;  %v6181_v22 = vunpack.i.h.bf16 %v6179_v21  ;;  %v6180_v10 = vunpack.i.l.bf16 %v6179_v21 }
 0x342   : > { %v6186_v24 = vunpack.i.h.bf16 %v6184_v25  ;;  %v6185_v63 = vunpack.i.l.bf16 %v6184_v25 }
 0x343   : > { %v2080_v53 = vsel %vm1955_vm6, %v2048_v54, %v6180_v10  ;;  %v1984_v3 = vsel %vm1955_vm6, %v1951_v12, %v6181_v22 }
 0x344   : > { %v6189_v15 = vpop.permute.xlu0 %6188  ;;  %2384 = vmatprep.mubr.f32.mxu1 %v2080_v53  ;;  %v2017_v23 = vsel %vm304_vm0, %v7843_v49, %v6185_v63  ;;  %v1919_v48 = vsel %vm304_vm0, %v862_v11, %v6186_v24  ;;  %v863_v53 = vld [vmem:[#allocation2 + $0x168] sm:$0xff] }
 0x345   : > { %v6194_v42 = vpop.permute.xlu1 %6193  ;;  %v6191_v60 = vunpack.i.h.bf16 %v6189_v15  ;;  %v6190_v55 = vunpack.i.l.bf16 %v6189_v15  ;;  %2385 = vmatmul.mubr.f32.gmra.mrb[60].mxu1 %v1984_v3 }
 0x346   : > { %v6196_v19 = vunpack.i.h.bf16 %v6194_v42  ;;  %v6195_v57 = vunpack.i.l.bf16 %v6194_v42 }
 0x347   : > { %v2049_v16 = vsel %vm1922_vm5, %v2017_v23, %v6190_v55  ;;  %v1952_v30 = vsel %vm1922_vm5, %v1919_v48, %v6191_v60 }
 0x348   : > { %v6199_v37 = vpop.permute.xlu0 %6198  ;;  %v2081_v8 = vsel %vm1955_vm6, %v2049_v16, %v6195_v57  ;;  %v1985_v21 = vsel %vm1955_vm6, %v1952_v30, %v6196_v19 }
 0x349   : > { %v6204_v25 = vpop.permute.xlu1 %6203  ;;  %v6201_v22 = vunpack.i.h.bf16 %v6199_v37  ;;  %v6200_v10 = vunpack.i.l.bf16 %v6199_v37  ;;  %2389 = vmatprep.mubr.f32.mxu1 %v2081_v8  ;;  %v864_v37 = vld [vmem:[#allocation2 + $0x170] sm:$0xff] }
 0x34a   : > { %v6206_v54 = vunpack.i.h.bf16 %v6204_v25  ;;  %v6205_v12 = vunpack.i.l.bf16 %v6204_v25  ;;  %2390 = vmatmul.mubr.f32.gmra.mrb[62].mxu1 %v1985_v21 }
 0x34b   : > { %v2018_v49 = vsel %vm304_vm0, %v7865_v44, %v6200_v10  ;;  %v1920_v24 = vsel %vm304_vm0, %v863_v53, %v6201_v22 }
 0x34c   : > { %v6209_v63 = vpop.permute.xlu0 %6208  ;;  %v2050_v11 = vsel %vm1922_vm5, %v2018_v49, %v6205_v12  ;;  %v1953_v19 = vsel %vm1922_vm5, %v1920_v24, %v6206_v54 }
 0x34d   : > { %v6214_v3 = vpop.permute.xlu1 %6213  ;;  %v6211_v15 = vunpack.i.h.bf16 %v6209_v63  ;;  %v6210_v42 = vunpack.i.l.bf16 %v6209_v63 }
 0x34e   : > { %v6216_v60 = vunpack.i.h.bf16 %v6214_v3  ;;  %v6215_v55 = vunpack.i.l.bf16 %v6214_v3 }
 0x34f   : > { %v2082_v57 = vsel %vm1955_vm6, %v2050_v11, %v6210_v42  ;;  %v1986_v23 = vsel %vm1955_vm6, %v1953_v19, %v6211_v15 }
 0x350   : > { %v6219_v48 = vpop.permute.xlu0 %6218  ;;  %2394 = vmatprep.mubr.f32.mxu1 %v2082_v57  ;;  %v2019_v25 = vsel %vm304_vm0, %v7881_v18, %v6215_v55  ;;  %v1921_v22 = vsel %vm304_vm0, %v864_v37, %v6216_v60 }
 0x351   : > { %v6224_v16 = vpop.permute.xlu1 %6223  ;;  %v6221_v44 = vunpack.i.h.bf16 %v6219_v48  ;;  %v6220_v30 = vunpack.i.l.bf16 %v6219_v48  ;;  %2395 = vmatmul.mubr.f32.gmra.mrb[64].mxu1 %v1986_v23 }
 0x352   : > { %v6226_v8 = vunpack.i.h.bf16 %v6224_v16  ;;  %v6225_v21 = vunpack.i.l.bf16 %v6224_v16 }
 0x353   : > { %v2051_v10 = vsel %vm1922_vm5, %v2019_v25, %v6220_v30  ;;  %v1954_v54 = vsel %vm1922_vm5, %v1921_v22, %v6221_v44 }
 0x354   : > { %v2083_v12 = vsel %vm1955_vm6, %v2051_v10, %v6225_v21  ;;  %v1987_v53 = vsel %vm1955_vm6, %v1954_v54, %v6226_v8 }
 0x355   : > { %2399 = vmatprep.mubr.f32.mxu1 %v2083_v12 }
 0x356   : > { %2400 = vmatmul.mubr.f32.gmra.mrb[66].mxu1 %v1987_v53 }
 0x357   : > { %2696 = vmatprep.mubr.f32.mxu1 %v6775_v0 }
 0x371   : > { %v2246_v49 = vpop.f32.mrb[4].mxu1 }
 0x372   : > { %v8105_v24 = vadd.f32 %v7945_v29, %v2246_v49  ;;  %v2248_v63 = vpop.f32.mrb[5].mxu1 }
 0x375   : > { %v2251_v18 = vpop.f32.mrb[6].mxu1 }
 0x376   : > { %v8108_v3 = vadd.f32 %v7941_v35, %v2251_v18  ;;  %v2253_v15 = vpop.f32.mrb[7].mxu1 }
 0x37c   : > { %v2256_v42 = vpop.f32.mrb[8].mxu1 }
 0x37d   : > { %v8111_v60 = vadd.f32 %v7951_v36, %v2256_v42  ;;  %v2258_v55 = vpop.f32.mrb[9].mxu1 }
 0x381   : > { %v2261_v11 = vpop.f32.mrb[10].mxu1 }
 0x382   : > { %v8114_v19 = vadd.f32 %v7949_v43, %v2261_v11  ;;  %v2263_v57 = vpop.f32.mrb[11].mxu1 }
 0x388   : > { %v2266_v23 = vpop.f32.mrb[12].mxu1 }
 0x389   : > { %v8117_v29 = vadd.f32 %v7959_v40, %v2266_v23  ;;  %v2268_v48 = vpop.f32.mrb[13].mxu1 }
 0x38d   : > { %v2271_v16 = vpop.f32.mrb[14].mxu1 }
 0x38e   : > { %v8120_v35 = vadd.f32 %v7957_v38, %v2271_v16  ;;  %v2273_v44 = vpop.f32.mrb[15].mxu1 }
 0x394   : > { %v2276_v30 = vpop.f32.mrb[16].mxu1 }
 0x395   : > { %v8123_v36 = vadd.f32 %v7969_v6, %v2276_v30  ;;  %v2278_v37 = vpop.f32.mrb[17].mxu1 }
 0x398   : > { %v8131_v10 = vpop.f32.mrb[32].mxu0 }
 0x399   : > { %v2281_v8 = vpop.f32.mrb[18].mxu1  ;;  %v8133_v38 = vpop.f32.mrb[33].mxu0 }
 0x39a   : > { %v8126_v43 = vadd.f32 %v7965_v61, %v2281_v8  ;;  %v2283_v21 = vpop.f32.mrb[19].mxu1 }
 0x3a0   : > { %v2286_v25 = vpop.f32.mrb[20].mxu1 }
 0x3a1   : > { %v8129_v40 = vadd.f32 %v7975_v27, %v2286_v25  ;;  %v2288_v22 = vpop.f32.mrb[21].mxu1 }
 0x3a5   : > { %v2291_v54 = vpop.f32.mrb[22].mxu1 }
 0x3a6   : > { %v8136_v12 = vadd.f32 %v7973_v34, %v2291_v54  ;;  %v2293_v6 = vpop.f32.mrb[23].mxu1 }
 0x3ac   : > { %v2296_v53 = vpop.f32.mrb[24].mxu1 }
 0x3ad   : > { %v8139_v49 = vadd.f32 %v7983_v32, %v2296_v53  ;;  %v2298_v61 = vpop.f32.mrb[25].mxu1 }
 0x3b1   : > { %v2301_v63 = vpop.f32.mrb[26].mxu1 }
 0x3b2   : > { %v8142_v18 = vadd.f32 %v7981_v47, %v2301_v63  ;;  %v2303_v27 = vpop.f32.mrb[27].mxu1 }
 0x3b8   : > { %v2306_v15 = vpop.f32.mrb[28].mxu1 }
 0x3b9   : > { %v8145_v42 = vadd.f32 %v7993_v58, %v2306_v15  ;;  %v2308_v55 = vpop.f32.mrb[29].mxu1 }
 0x3bd   : > { %v2311_v11 = vpop.f32.mrb[30].mxu1 }
 0x3be   : > { %v8148_v34 = vadd.f32 %v7989_v9, %v2311_v11  ;;  %v2313_v57 = vpop.f32.mrb[31].mxu1  ;;  %v2705_v11 = vmul.f32 %v8114_v19, %v8114_v19 }
 0x3c4   : > { %v2316_v23 = vpop.f32.mrb[32].mxu1 }
 0x3c5   : > { %v8151_v32 = vadd.f32 %v7999_v2, %v2316_v23  ;;  %v2318_v48 = vpop.f32.mrb[33].mxu1  ;;  %v2703_v2 = vmul.f32 %v8108_v3, %v8108_v3 }
 0x3c6   : > { %v2704_v48 = vmul.f32 %v8111_v60, %v8111_v60 }
 0x3c9   : > { %v2321_v16 = vpop.f32.mrb[34].mxu1 }
 0x3ca   : > { %v8154_v47 = vadd.f32 %v7997_v41, %v2321_v16  ;;  %v2323_v44 = vpop.f32.mrb[35].mxu1 }
 0x3cb   : > { %v5611_v44 = vpack.c.bf16 %v2705_v11, %v2704_v48 }
 0x3d0   : > { %v2326_v30 = vpop.f32.mrb[36].mxu1 }
 0x3d1   : > { %v8157_v58 = vadd.f32 %v8007_v39, %v2326_v30  ;;  %v2328_v37 = vpop.f32.mrb[37].mxu1  ;;  %v2702_v39 = vmul.f32 %v8105_v24, %v8105_v24 }
 0x3d3   : > { %v2718_v25 = vmul.f32 %v8157_v58, %v8157_v58  ;;  %v5607_v6 = vpack.c.bf16 %v2703_v2, %v2702_v39 }
 0x3d5   : > { %v2331_v8 = vpop.f32.mrb[38].mxu1 }
 0x3d6   : > { %v8160_v9 = vadd.f32 %v8005_v46, %v2331_v8  ;;  %v2333_v21 = vpop.f32.mrb[39].mxu1  ;;  %v5575_v46 = vpack.c.bf16 %v8108_v3, %v8105_v24 }
 0x3d8   : > { %v2719_v41 = vmul.f32 %v8160_v9, %v8160_v9  ;;  %v5573_v22 = vpack.c.bf16 %v8160_v9, %v8157_v58 }
 0x3da   : > { %5574 = vmatprep.subr.bf16.mxu1 %v5573_v22  ;;  %v5605_v54 = vpack.c.bf16 %v2719_v41, %v2718_v25  ;;  %v2707_v41 = vmul.f32 %v8120_v35, %v8120_v35 }
 0x3db   : > { %5576 = vmatpush3.bf16.msra.mxu1 %v5575_v46  ;;  %v2706_v46 = vmul.f32 %v8117_v29, %v8117_v29 }
 0x3dc   : > { %v2336_v53 = vpop.f32.mrb[40].mxu1  ;;  %5606 = vmatprep.subr.bf16.mxu0 %v5605_v54 }
 0x3dd   : > { %v8175_v61 = vadd.f32 %v8017_v1, %v2336_v53  ;;  %v2338_v63 = vpop.f32.mrb[41].mxu1  ;;  %5608 = vmatpush3.bf16.msra.mxu0 %v5607_v6  ;;  %v5615_v6 = vpack.c.bf16 %v2707_v41, %v2706_v46 }
 0x3df   : > { %v2720_v57 = vmul.f32 %v8175_v61, %v8175_v61 }
 0x3e1   : > { %v2341_v27 = vpop.f32.mrb[42].mxu1 }
 0x3e2   : > { %v8178_v15 = vadd.f32 %v8013_v14, %v2341_v27  ;;  %v2343_v55 = vpop.f32.mrb[43].mxu1  ;;  %v5579_v14 = vpack.c.bf16 %v8114_v19, %v8111_v60 }
 0x3e4   : > { %v2721_v23 = vmul.f32 %v8178_v15, %v8178_v15  ;;  %v5577_v1 = vpack.c.bf16 %v8178_v15, %v8175_v61 }
 0x3e6   : > { %5578 = vmatprep.subr.bf16.mxu1 %v5577_v1  ;;  %v5609_v16 = vpack.c.bf16 %v2721_v23, %v2720_v57  ;;  %v2709_v23 = vmul.f32 %v8126_v43, %v8126_v43 }
 0x3e7   : > { %5580 = vmatpush3.bf16.msra.mxu1 %v5579_v14  ;;  %v2708_v14 = vmul.f32 %v8123_v36, %v8123_v36 }
 0x3e8   : > { %v2346_v30 = vpop.f32.mrb[44].mxu1  ;;  %5610 = vmatprep.subr.bf16.mxu0 %v5609_v16 }
 0x3e9   : > { %v8193_v37 = vadd.f32 %v8023_v4, %v2346_v30  ;;  %v2348_v8 = vpop.f32.mrb[45].mxu1  ;;  %5612 = vmatpush3.bf16.msra.mxu0 %v5611_v44  ;;  %v5619_v44 = vpack.c.bf16 %v2709_v23, %v2708_v14 }
 0x3eb   : > { %v2722_v22 = vmul.f32 %v8193_v37, %v8193_v37 }
 0x3ed   : > { %v2351_v21 = vpop.f32.mrb[46].mxu1 }
 0x3ee   : > { %v8196_v2 = vadd.f32 %v8021_v33, %v2351_v21  ;;  %v2353_v25 = vpop.f32.mrb[47].mxu1  ;;  %v5583_v33 = vpack.c.bf16 %v8120_v35, %v8117_v29 }
 0x3f0   : > { %v2723_v39 = vmul.f32 %v8196_v2, %v8196_v2  ;;  %v5581_v4 = vpack.c.bf16 %v8196_v2, %v8193_v37 }
 0x3f2   : > { %5582 = vmatprep.subr.bf16.mxu1 %v5581_v4  ;;  %v5613_v54 = vpack.c.bf16 %v2723_v39, %v2722_v22  ;;  %v2711_v39 = vmul.f32 %v8136_v12, %v8136_v12 }
 0x3f3   : > { %5584 = vmatpush3.bf16.msra.mxu1 %v5583_v33  ;;  %v2710_v33 = vmul.f32 %v8129_v40, %v8129_v40 }
 0x3f4   : > { %v2356_v53 = vpop.f32.mrb[48].mxu1  ;;  %5614 = vmatprep.subr.bf16.mxu0 %v5613_v54 }
 0x3f5   : > { %v8211_v63 = vadd.f32 %v8031_v7, %v2356_v53  ;;  %v2358_v27 = vpop.f32.mrb[49].mxu1  ;;  %5616 = vmatpush3.bf16.msra.mxu0 %v5615_v6  ;;  %v5623_v6 = vpack.c.bf16 %v2711_v39, %v2710_v33 }
 0x3f7   : > { %v2724_v1 = vmul.f32 %v8211_v63, %v8211_v63 }
 0x3f9   : > { %v2361_v55 = vpop.f32.mrb[50].mxu1 }
 0x3fa   : > { %v8214_v11 = vadd.f32 %v8029_v52, %v2361_v55  ;;  %v2363_v57 = vpop.f32.mrb[51].mxu1  ;;  %v5587_v52 = vpack.c.bf16 %v8126_v43, %v8123_v36 }
 0x3fc   : > { %v2725_v48 = vmul.f32 %v8214_v11, %v8214_v11  ;;  %v5585_v7 = vpack.c.bf16 %v8214_v11, %v8211_v63 }
 0x3fe   : > { %5586 = vmatprep.subr.bf16.mxu1 %v5585_v7  ;;  %v5617_v16 = vpack.c.bf16 %v2725_v48, %v2724_v1  ;;  %v2713_v48 = vmul.f32 %v8142_v18, %v8142_v18 }
 0x3ff   : > { %5588 = vmatpush3.bf16.msra.mxu1 %v5587_v52  ;;  %v2712_v52 = vmul.f32 %v8139_v49, %v8139_v49 }
 0x400   : > { %v2366_v30 = vpop.f32.mrb[52].mxu1  ;;  %5618 = vmatprep.subr.bf16.mxu0 %v5617_v16 }
 0x401   : > { %v8229_v8 = vadd.f32 %v8041_v51, %v2366_v30  ;;  %v2368_v21 = vpop.f32.mrb[53].mxu1  ;;  %5620 = vmatpush3.bf16.msra.mxu0 %v5619_v44  ;;  %v5627_v44 = vpack.c.bf16 %v2713_v48, %v2712_v52 }
 0x403   : > { %v2726_v4 = vmul.f32 %v8229_v8, %v8229_v8 }
 0x405   : > { %v2371_v25 = vpop.f32.mrb[54].mxu1 }
 0x406   : > { %v8232_v41 = vadd.f32 %v8037_v28, %v2371_v25  ;;  %v2373_v22 = vpop.f32.mrb[55].mxu1  ;;  %v5591_v28 = vpack.c.bf16 %v8136_v12, %v8129_v40 }
 0x408   : > { %v2727_v46 = vmul.f32 %v8232_v41, %v8232_v41  ;;  %v5589_v51 = vpack.c.bf16 %v8232_v41, %v8229_v8 }
 0x40a   : > { %5590 = vmatprep.subr.bf16.mxu1 %v5589_v51  ;;  %v5621_v54 = vpack.c.bf16 %v2727_v46, %v2726_v4  ;;  %v2715_v46 = vmul.f32 %v8148_v34, %v8148_v34 }
 0x40b   : > { %5592 = vmatpush3.bf16.msra.mxu1 %v5591_v28  ;;  %v2714_v28 = vmul.f32 %v8145_v42, %v8145_v42 }
 0x40c   : > { %v2376_v53 = vpop.f32.mrb[56].mxu1  ;;  %5622 = vmatprep.subr.bf16.mxu0 %v5621_v54 }
 0x40d   : > { %v8247_v27 = vadd.f32 %v8047_v26, %v2376_v53  ;;  %v2378_v55 = vpop.f32.mrb[57].mxu1  ;;  %5624 = vmatpush3.bf16.msra.mxu0 %v5623_v6  ;;  %v5631_v6 = vpack.c.bf16 %v2715_v46, %v2714_v28  ;;  %v3074_v28 = vld [vmem:[%s9405_s7 + $0x118] sm:$0xff] }
 0x40f   : > { %v2728_v7 = vmul.f32 %v8247_v27, %v8247_v27 }
 0x411   : > { %v2381_v57 = vpop.f32.mrb[58].mxu1 }
 0x412   : > { %v8250_v23 = vadd.f32 %v8045_v17, %v2381_v57  ;;  %v2383_v1 = vpop.f32.mrb[59].mxu1  ;;  %v5595_v17 = vpack.c.bf16 %v8142_v18, %v8139_v49 }
 0x414   : > { %v2729_v14 = vmul.f32 %v8250_v23, %v8250_v23  ;;  %v5593_v26 = vpack.c.bf16 %v8250_v23, %v8247_v27 }
 0x416   : > { %5594 = vmatprep.subr.bf16.mxu1 %v5593_v26  ;;  %v5625_v16 = vpack.c.bf16 %v2729_v14, %v2728_v7  ;;  %v2717_v14 = vmul.f32 %v8154_v47, %v8154_v47 }
 0x417   : > { %5596 = vmatpush3.bf16.msra.mxu1 %v5595_v17  ;;  %v2716_v17 = vmul.f32 %v8151_v32, %v8151_v32 }
 0x418   : > { %v2386_v30 = vpop.f32.mrb[60].mxu1  ;;  %5626 = vmatprep.subr.bf16.mxu0 %v5625_v16 }
 0x419   : > { %v8265_v21 = vadd.f32 %v8055_v31, %v2386_v30  ;;  %v2388_v25 = vpop.f32.mrb[61].mxu1  ;;  %5628 = vmatpush3.bf16.msra.mxu0 %v5627_v44  ;;  %v5635_v44 = vpack.c.bf16 %v2717_v14, %v2716_v17  ;;  %v3043_v14 = vld [vmem:[%s9405_s7 + $0x20] sm:$0xff]  ;;  %v3046_v17 = vld [vmem:[%s9405_s7 + $0x38] sm:$0xff] }
 0x41b   : > { %v2730_v51 = vmul.f32 %v8265_v21, %v8265_v21 }
 0x41d   : > { %v2391_v22 = vpop.f32.mrb[62].mxu1 }
 0x41e   : > { %v8268_v39 = vadd.f32 %v8053_v13, %v2391_v22  ;;  %v2393_v4 = vpop.f32.mrb[63].mxu1  ;;  %v5599_v13 = vpack.c.bf16 %v8148_v34, %v8145_v42 }
 0x420   : > { %v2731_v33 = vmul.f32 %v8268_v39, %v8268_v39  ;;  %v5597_v31 = vpack.c.bf16 %v8268_v39, %v8265_v21 }
 0x422   : > { %5598 = vmatprep.subr.bf16.mxu1 %v5597_v31  ;;  %v5629_v54 = vpack.c.bf16 %v2731_v33, %v2730_v51  ;;  %v3073_v31 = vld [vmem:[%s9405_s7 + $0x110] sm:$0xff] }
 0x423   : > { %5600 = vmatpush3.bf16.msra.mxu1 %v5599_v13  ;;  %v5695_v13 = vpack.c.bf16 %v3074_v28, %v3073_v31  ;;  %v3052_v31 = vld [vmem:[%s9405_s7 + $0x68] sm:$0xff] }
 0x424   : > { %v2396_v53 = vpop.f32.mrb[64].mxu1  ;;  %5630 = vmatprep.subr.bf16.mxu0 %v5629_v54  ;;  %v3039_v54 = vld [vmem:[%s9405_s7] sm:$0xff] }
 0x425   : > { %v8283_v55 = vadd.f32 %v8133_v38, %v2396_v53  ;;  %v2398_v57 = vpop.f32.mrb[65].mxu1  ;;  %5632 = vmatpush3.bf16.msra.mxu0 %v5631_v6  ;;  %v3040_v6 = vld [vmem:[%s9405_s7 + $0x8] sm:$0xff] }
 0x426   : > { %v5644_v53 = vpack.c.bf16 %v3040_v6, %v3039_v54  ;;  %v3041_v57 = vld [vmem:[%s9405_s7 + $0x10] sm:$0xff]  ;;  %v3054_v6 = vld [vmem:[%s9405_s7 + $0x78] sm:$0xff] }
 0x427   : > { %v2732_v26 = vmul.f32 %v8283_v55, %v8283_v55  ;;  %v3053_v54 = vld [vmem:[%s9405_s7 + $0x70] sm:$0xff] }
 0x429   : > { %v2401_v1 = vpop.f32.mrb[66].mxu1 }
 0x42a   : > { %v8286_v48 = vadd.f32 %v8131_v10, %v2401_v1  ;;  %v2403_v7 = vpop.f32.mrb[67].mxu1  ;;  %v5603_v10 = vpack.c.bf16 %v8154_v47, %v8151_v32  ;;  %v3042_v1 = vld [vmem:[%s9405_s7 + $0x18] sm:$0xff] }
 0x42b   : > { %v5647_v7 = vpack.c.bf16 %v3042_v1, %v3041_v57  ;;  %v3055_v57 = vld [vmem:[%s9405_s7 + $0x80] sm:$0xff]  ;;  %v3056_v1 = vld [vmem:[%s9405_s7 + $0x88] sm:$0xff] }
 0x42c   : > { %v2733_v52 = vmul.f32 %v8286_v48, %v8286_v48  ;;  %v5601_v38 = vpack.c.bf16 %v8286_v48, %v8283_v55 }
 0x42e   : > { %5602 = vmatprep.subr.bf16.mxu1 %v5601_v38  ;;  %v5633_v16 = vpack.c.bf16 %v2733_v52, %v2732_v26  ;;  %v3044_v26 = vld [vmem:[%s9405_s7 + $0x28] sm:$0xff]  ;;  %v3045_v38 = vld [vmem:[%s9405_s7 + $0x30] sm:$0xff] }
 0x42f   : > { %5604 = vmatpush3.bf16.msra.mxu1 %v5603_v10  ;;  %v5650_v52 = vpack.c.bf16 %v3044_v26, %v3043_v14  ;;  %v5653_v10 = vpack.c.bf16 %v3046_v17, %v3045_v38  ;;  %v5051_v14 = vld [vmem:[%s9403_s5] ss:$0 sm:$0xff]  ;;  %v3057_v26 = vld [vmem:[%s9405_s7 + $0x90] sm:$0xff] }
 0x430   : > { %5634 = vmatprep.subr.bf16.mxu0 %v5633_v16 }
 0x431   : > { %5636 = vmatpush3.bf16.msra.mxu0 %v5635_v44  ;;  %v3047_v44 = vld [vmem:[%s9405_s7 + $0x40] sm:$0xff] }
 0x432   : > { %2697 = vmatmul.mubr.f32.vlgmr.msra.gmra.mrb[68].mxu1 %v6775_v0  ;;  %5637 = vmatprep.subr.bf16.mxu0 %v6776_v56 }
 0x434   : > { %2799 = vmatmul.mubr.f32.vlgmr.msra.gmra.mrb[34].mxu0 %v6775_v0 }
 0x435   : > { %5639 = vmatpush3.bf16.msra.mxu0 %v7088_v59  ;;  %5388 = vmatprep.mubr.msk.f32.mxu0 %vm6777_vm1, %v6778_v5  ;;  %v3071_v59 = vld [vmem:[%s9405_s7 + $0x100] sm:$0xff] }
 0x436   : > { %5640 = vmatprep.subr.bf16.mxu0 %v6776_v56 }
 0x439   : > { %5642 = vmatpush3.bf16.msra.mxu0 %v7098_v62  ;;  %v3072_v62 = vld [vmem:[%s9405_s7 + $0x108] sm:$0xff] }
 0x43a   : > { %5643 = vmatprep.subr.bf16.mxu0 %v6776_v56  ;;  %v5691_v5 = vpack.c.bf16 %v3072_v62, %v3071_v59 }
 0x43c   : > { %5692 = vmatprep.subr.bf16.mxu1 %v5691_v5 }
 0x43d   : > { %5694 = vmatpush3.bf16.msra.mxu1 %v5691_v5  ;;  %v3051_v5 = vld [vmem:[%s9405_s7 + $0x60] sm:$0xff] }
 0x43e   : > { %5696 = vmatprep.subr.bf16.mxu1 %v5695_v13 }
 0x441   : > { %5698 = vmatpush3.bf16.msra.mxu1 %v5695_v13  ;;  %v5662_v13 = vpack.c.bf16 %v3052_v31, %v3051_v5 }
 0x505   : > { %v5234_v30 = vpop.f32.mrb[68].mxu1 }
 0x506   : > { %v5235_v25 = vpop.f32.mrb[69].mxu1 }
 0x507   : > { %v5269_v22 = vpop.f32.mrb[34].mxu0  ;;  %v5236_v4 = vadd.f32 %v5235_v25, %v5234_v30  ;;  %v3048_v30 = vld [vmem:[%s9405_s7 + $0x48] sm:$0xff] }
 0x508   : > { %v5270_v46 = vpop.f32.mrb[35].mxu0 }
 0x509   : > { %v5271_v51 = vadd.f32 %v5270_v46, %v5269_v22 }
 0x50b   : > { %v2805_v33 = vrot.slane %v5271_v51, 7  ;;  %v3049_v51 = vld [vmem:[%s9405_s7 + $0x50] sm:$0xff] }
 0x50d   : > { %v2807_v0 = vsel %vm563_vm2, %v5236_v4, %v2805_v33  ;;  %v5656_v4 = vpack.c.bf16 %v3048_v30, %v3047_v44  ;;  %v3050_v33 = vld [vmem:[%s9405_s7 + $0x58] sm:$0xff]  ;;  %v3059_v30 = vld [vmem:[%s9405_s7 + $0xa0] sm:$0xff] }
 0x50e   : > { %5389 = vmatmul.mubr.msk.f32.vlgmr.msra.gmra.mrb[36].mxu0 %vm304_vm0, %v2807_v0  ;;  %v5659_v59 = vpack.c.bf16 %v3050_v33, %v3049_v51 }
 0x50f   : > { %5645 = vmatpush1.bf16.msra.mxu0 %v5644_v53  ;;  %v5665_v53 = vpack.c.bf16 %v3054_v6, %v3053_v54 }
 0x510   : > { %5646 = vmatprep.subr.bf16.mxu0 %v6776_v56 }
 0x513   : > { %5648 = vmatpush1.bf16.msra.mxu0 %v5647_v7  ;;  %v5668_v7 = vpack.c.bf16 %v3056_v1, %v3055_v57 }
 0x514   : > { %5649 = vmatprep.subr.bf16.mxu0 %v6776_v56 }
 0x517   : > { %5651 = vmatpush1.bf16.msra.mxu0 %v5650_v52  ;;  %v3058_v52 = vld [vmem:[%s9405_s7 + $0x98] sm:$0xff] }
 0x518   : > { %5652 = vmatprep.subr.bf16.mxu0 %v6776_v56  ;;  %v5671_v17 = vpack.c.bf16 %v3058_v52, %v3057_v26 }
 0x51b   : > { %5654 = vmatpush1.bf16.msra.mxu0 %v5653_v10 }
 0x51c   : > { %5655 = vmatprep.subr.bf16.mxu0 %v6776_v56 }
 0x51f   : > { %5657 = vmatpush1.bf16.msra.mxu0 %v5656_v4  ;;  %v2631_v4 = vld [vmem:[%s9404_s6] sm:$0x1] }
 0x520   : > { %5658 = vmatprep.subr.bf16.mxu0 %v6776_v56 }
 0x523   : > { %5660 = vmatpush1.bf16.msra.mxu0 %v5659_v59 }
 0x524   : > { %5661 = vmatprep.subr.bf16.mxu0 %v6776_v56 }
 0x527   : > { %5663 = vmatpush1.bf16.msra.mxu0 %v5662_v13 }
 0x528   : > { %5664 = vmatprep.subr.bf16.mxu0 %v6776_v56 }
 0x52b   : > { %5666 = vmatpush1.bf16.msra.mxu0 %v5665_v53 }
 0x52c   : > { %5667 = vmatprep.subr.bf16.mxu0 %v6776_v56 }
 0x52f   : > { %5669 = vmatpush1.bf16.msra.mxu0 %v5668_v7 }
 0x530   : > { %5670 = vmatprep.subr.bf16.mxu0 %v6776_v56 }
 0x533   : > { %5672 = vmatpush1.bf16.msra.mxu0 %v5671_v17 }
 0x534   : > { %5673 = vmatprep.subr.bf16.mxu0 %v6776_v56 }
 0x5e1   : > { %v2877_v16 = vpop.f32.mrb[36].mxu0 }
 0x5e2   : > { %v2881_v25 = vmul.f32 0.001953125, %v2877_v16  ;;  %v5390_v22 = vpop.f32.mrb[37].mxu0 }
 0x5e3   : > { %v3060_v22 = vld [vmem:[%s9405_s7 + $0xa8] sm:$0xff] }
 0x5e4   : > { %v2882_v46 = vmul.f32 %v2881_v25, %v2881_v25 }
 0x5e6   : > { %v2884_v0 = vrot.slane %v2882_v46, 7  ;;  %v5674_v46 = vpack.c.bf16 %v3060_v22, %v3059_v30 }
 0x5e8   : > { %v2886_v62 = vsub.f32 %v2881_v25, %v2884_v0  ;;  %5675 = vmatpush1.bf16.msra.mxu0 %v5674_v46 }
 0x5e9   : > { %5676 = vmatprep.subr.bf16.mxu0 %v6776_v56 }
 0x5ea   : > { %v2887_v28 = vadd.f32 1e-05, %v2886_v62 }
 0x5ec   : > { %6709 = vrsqrt.f32 %v2887_v28 }
 0x5f6   : > { %v6710_v38 = vpop.eup %6709 }
 0x5f7   : > { %v2895_v10 = vmul.f32 %v6710_v38, %v5051_v14 }
 0x5f9   : > { %v2897_v16 = vrot.slane %v2895_v10, 1  ;;  %v2904_v44 = vrot.slane %v2895_v10, %v660_v50 }
 0x5fb   : > { %v2899_v51 = vmul.f32 %v2897_v16, %v2881_v25  ;;  %v2905_v33 = vmul.f32 %v2904_v44, %v8105_v24  ;;  %v2906_v50 = vmul.f32 %v2904_v44, %v8108_v3  ;;  %v2907_v0 = vmul.f32 %v2904_v44, %v8111_v60 }
 0x5fc   : > { %v2908_v59 = vmul.f32 %v2904_v44, %v8114_v19  ;;  %v2909_v62 = vmul.f32 %v2904_v44, %v8117_v29  ;;  %v2910_v5 = vmul.f32 %v2904_v44, %v8120_v35  ;;  %v2911_v31 = vmul.f32 %v2904_v44, %v8123_v36 }
 0x5fd   : > { %v2900_v28 = vsub.f32 %v2631_v4, %v2899_v51  ;;  %v2912_v13 = vmul.f32 %v2904_v44, %v8126_v43  ;;  %v2913_v25 = vmul.f32 %v2904_v44, %v8129_v40  ;;  %v2914_v24 = vmul.f32 %v2904_v44, %v8136_v12 }
 0x5fe   : > { %v2915_v3 = vmul.f32 %v2904_v44, %v8139_v49  ;;  %v2916_v60 = vmul.f32 %v2904_v44, %v8142_v18  ;;  %v2917_v19 = vmul.f32 %v2904_v44, %v8145_v42  ;;  %v2918_v29 = vmul.f32 %v2904_v44, %v8148_v34 }
 0x5ff   : > { %v2941_v35 = vrot.slane %v2900_v28, %v697_v20  ;;  %v2919_v36 = vmul.f32 %v2904_v44, %v8151_v32  ;;  %v2920_v43 = vmul.f32 %v2904_v44, %v8154_v47  ;;  %v2921_v40 = vmul.f32 %v2904_v44, %v8157_v58 }
 0x600   : > { %v2922_v12 = vmul.f32 %v2904_v44, %v8160_v9  ;;  %v2923_v54 = vmul.f32 %v2904_v44, %v8175_v61  ;;  %v2924_v49 = vmul.f32 %v2904_v44, %v8178_v15  ;;  %v2925_v18 = vmul.f32 %v2904_v44, %v8193_v37 }
 0x601   : > { %v2926_v42 = vmul.f32 %v2904_v44, %v8196_v2  ;;  %v2927_v34 = vmul.f32 %v2904_v44, %v8211_v63  ;;  %v2928_v45 = vmul.f32 %v2904_v44, %v8214_v11  ;;  %v2929_v20 = vmul.f32 %v2904_v44, %v8229_v8 }
 0x602   : > { %v2930_v32 = vmul.f32 %v2904_v44, %v8232_v41  ;;  %v2931_v47 = vmul.f32 %v2904_v44, %v8247_v27  ;;  %v2932_v58 = vmul.f32 %v2904_v44, %v8250_v23  ;;  %v2933_v9 = vmul.f32 %v2904_v44, %v8265_v21 }
 0x603   : > { %v2934_v61 = vmul.f32 %v2904_v44, %v8268_v39  ;;  %v2935_v15 = vmul.f32 %v2904_v44, %v8283_v55  ;;  %v2936_v37 = vmul.f32 %v2904_v44, %v8286_v48  ;;  %v2943_v2 = vadd.f32 %v2941_v35, %v2905_v33 }
 0x604   : > { %v2944_v63 = vadd.f32 %v2941_v35, %v2906_v50  ;;  %v2945_v6 = vadd.f32 %v2941_v35, %v2907_v0  ;;  %v2946_v11 = vadd.f32 %v2941_v35, %v2908_v59  ;;  %v2947_v53 = vadd.f32 %v2941_v35, %v2909_v62 }
 0x605   : > { %v2948_v8 = vadd.f32 %v2941_v35, %v2910_v5  ;;  %v2949_v57 = vadd.f32 %v2941_v35, %v2911_v31  ;;  %v2950_v41 = vadd.f32 %v2941_v35, %v2912_v13  ;;  %v2951_v1 = vadd.f32 %v2941_v35, %v2913_v25 }
 0x606   : > { %v2952_v27 = vadd.f32 %v2941_v35, %v2914_v24  ;;  %v2953_v7 = vadd.f32 %v2941_v35, %v2915_v3  ;;  %v2954_v23 = vadd.f32 %v2941_v35, %v2916_v60  ;;  %v2955_v14 = vadd.f32 %v2941_v35, %v2917_v19 }
 0x607   : > { %v2956_v21 = vadd.f32 %v2941_v35, %v2918_v29  ;;  %v2957_v26 = vadd.f32 %v2941_v35, %v2919_v36  ;;  %v2958_v39 = vadd.f32 %v2941_v35, %v2920_v43  ;;  %v2959_v52 = vadd.f32 %v2941_v35, %v2921_v40 }
 0x608   : > { %v8442_v55 = vadd.f32 %v2941_v35, %v2922_v12  ;;  %v8444_v48 = vadd.f32 %v2941_v35, %v2923_v54  ;;  %v8446_v38 = vadd.f32 %v2941_v35, %v2924_v49  ;;  %v8448_v17 = vadd.f32 %v2941_v35, %v2925_v18 }
 0x609   : > { %v8450_v10 = vadd.f32 %v2941_v35, %v2926_v42  ;;  %v8452_v16 = vadd.f32 %v2941_v35, %v2927_v34  ;;  %v8454_v44 = vadd.f32 %v2941_v35, %v2928_v45  ;;  %v8456_v30 = vadd.f32 %v2941_v35, %v2929_v20  ;;  %v3061_v34 = vld [vmem:[%s9405_s7 + $0xb0] sm:$0xff]  ;;  %v3062_v45 = vld [vmem:[%s9405_s7 + $0xb8] sm:$0xff] }
 0x60a   : > { %v8458_v22 = vadd.f32 %v2941_v35, %v2930_v32  ;;  %v8460_v4 = vadd.f32 %v2941_v35, %v2931_v47  ;;  %v8462_v46 = vadd.f32 %v2941_v35, %v2932_v58  ;;  %v8464_v51 = vadd.f32 %v2941_v35, %v2933_v9 }
 0x60b   : > { %v8466_v33 = vadd.f32 %v2941_v35, %v2934_v61  ;;  %v8468_v50 = vadd.f32 %v2941_v35, %v2935_v15  ;;  %v8470_v0 = vadd.f32 %v2941_v35, %v2936_v37  ;;  %v2975_v59 = vmax.f32 %v2943_v2, 0.0  ;;  %v3063_v2 = vld [vmem:[%s9405_s7 + $0xc0] sm:$0xff] }
 0x60c   : > { %v2976_v62 = vmax.f32 %v2944_v63, 0.0  ;;  %v2977_v5 = vmax.f32 %v2945_v6, 0.0  ;;  %v2978_v31 = vmax.f32 %v2946_v11, 0.0  ;;  %v2979_v28 = vmax.f32 %v2947_v53, 0.0  ;;  %v3064_v63 = vld [vmem:[%s9405_s7 + $0xc8] sm:$0xff] }
 0x60d   : > { %v2980_v13 = vmax.f32 %v2948_v8, 0.0  ;;  %v2981_v25 = vmax.f32 %v2949_v57, 0.0  ;;  %v2982_v24 = vmax.f32 %v2950_v41, 0.0  ;;  %v2983_v3 = vmax.f32 %v2951_v1, 0.0  ;;  %3007 = vst.msk [vmem:[#allocation2 + $0x19] sm:$0xff] %vm304_vm0, %v2975_v59  ;;  %v3139_v8 = vld [vmem:[#allocation2 + $0x2] sm:$0xff] }
 0x60e   : > { %v2984_v60 = vmax.f32 %v2952_v27, 0.0  ;;  %v2985_v19 = vmax.f32 %v2953_v7, 0.0  ;;  %v2986_v29 = vmax.f32 %v2954_v23, 0.0  ;;  %v2987_v36 = vmax.f32 %v2955_v14, 0.0  ;;  %3008 = vst.msk [vmem:[#allocation2 + $0x21] sm:$0xff] %vm304_vm0, %v2976_v62  ;;  %3009 = vst.msk [vmem:[#allocation2 + $0x31] sm:$0xff] %vm304_vm0, %v2977_v5 }
 0x60f   : > { %3010 = vst.msk [vmem:[#allocation2 + $0x39] sm:$0xff] %vm304_vm0, %v2978_v31  ;;  %3011 = vst.msk [vmem:[#allocation2 + $0x49] sm:$0xff] %vm304_vm0, %v2979_v28  ;;  %v2988_v35 = vmax.f32 %v2956_v21, 0.0  ;;  %v2989_v43 = vmax.f32 %v2957_v26, 0.0  ;;  %v2990_v40 = vmax.f32 %v2958_v39, 0.0  ;;  %v2991_v12 = vmax.f32 %v2959_v52, 0.0 }
 0x610   : > { %3012 = vst.msk [vmem:[#allocation2 + $0x51] sm:$0xff] %vm304_vm0, %v2980_v13  ;;  %3013 = vst.msk [vmem:[#allocation2 + $0x61] sm:$0xff] %vm304_vm0, %v2981_v25  ;;  %v2992_v54 = vmax.f32 %v8442_v55, 0.0  ;;  %v2993_v49 = vmax.f32 %v8444_v48, 0.0  ;;  %v2994_v18 = vmax.f32 %v8446_v38, 0.0  ;;  %v2995_v42 = vmax.f32 %v8448_v17, 0.0 }
 0x611   : > { %3014 = vst.msk [vmem:[#allocation2 + $0x69] sm:$0xff] %vm304_vm0, %v2982_v24  ;;  %3015 = vst.msk [vmem:[#allocation2 + $0x79] sm:$0xff] %vm304_vm0, %v2983_v3  ;;  %v2996_v20 = vmax.f32 %v8450_v10, 0.0  ;;  %v2997_v32 = vmax.f32 %v8452_v16, 0.0  ;;  %v2998_v47 = vmax.f32 %v8454_v44, 0.0  ;;  %v2999_v58 = vmax.f32 %v8456_v30, 0.0 }
 0x612   : > { %3016 = vst.msk [vmem:[#allocation2 + $0x81] sm:$0xff] %vm304_vm0, %v2984_v60  ;;  %3017 = vst.msk [vmem:[#allocation2 + $0x91] sm:$0xff] %vm304_vm0, %v2985_v19  ;;  %v3000_v9 = vmax.f32 %v8458_v22, 0.0  ;;  %v3001_v61 = vmax.f32 %v8460_v4, 0.0  ;;  %v3002_v15 = vmax.f32 %v8462_v46, 0.0  ;;  %v3003_v37 = vmax.f32 %v8464_v51, 0.0 }
 0x613   : > { %3018 = vst.msk [vmem:[#allocation2 + $0x99] sm:$0xff] %vm304_vm0, %v2986_v29  ;;  %3019 = vst.msk [vmem:[#allocation2 + $0xa9] sm:$0xff] %vm304_vm0, %v2987_v36  ;;  %v3004_v6 = vmax.f32 %v8466_v33, 0.0  ;;  %v3005_v11 = vmax.f32 %v8468_v50, 0.0  ;;  %v3006_v53 = vmax.f32 %v8470_v0, 0.0  ;;  %v5677_v57 = vpack.c.bf16 %v3062_v45, %v3061_v34  ;;  %v3107_v41 = vld [vmem:[#allocation2 + $0x1] sm:$0xff] }
 0x614   : > { %3020 = vst.msk [vmem:[#allocation2 + $0xb1] sm:$0xff] %vm304_vm0, %v2988_v35  ;;  %3021 = vst.msk [vmem:[#allocation2 + $0xc1] sm:$0xff] %vm304_vm0, %v2989_v43  ;;  %v5680_v23 = vpack.c.bf16 %v3064_v63, %v3063_v2  ;;  %v3065_v26 = vld [vmem:[%s9405_s7 + $0xd0] sm:$0xff]  ;;  %v3066_v39 = vld [vmem:[%s9405_s7 + $0xd8] sm:$0xff] }
 0x615   : > { %3022 = vst.msk [vmem:[#allocation2 + $0xc9] sm:$0xff] %vm304_vm0, %v2990_v40  ;;  %3023 = vst.msk [vmem:[#allocation2 + $0xd9] sm:$0xff] %vm304_vm0, %v2991_v12  ;;  %v8535_v7 = vld [vmem:[#allocation2 + $0x30] sm:$0xff]  ;;  %5678 = vmatpush1.bf16.msra.mxu0 %v5677_v57  ;;  %v3235_v21 = vld [vmem:[#allocation2 + $0x1a] sm:$0xff]  ;;  %v5683_v16 = vpack.c.bf16 %v3066_v39, %v3065_v26 }
 0x616   : > { %3024 = vst.msk [vmem:[#allocation2 + $0xe1] sm:$0xff] %vm304_vm0, %v2992_v54  ;;  %3025 = vst.msk [vmem:[#allocation2 + $0xf1] sm:$0xff] %vm304_vm0, %v2993_v49  ;;  %v8531_v1 = vld [vmem:[#allocation2 + $0x32] sm:$0xff]  ;;  %v8533_v27 = vld [vmem:[#allocation2 + $0x3a] sm:$0xff]  ;;  %v6232_v14 = vpack.i.bf16 %v3139_v8, %v8535_v7  ;;  %5679 = vmatprep.subr.bf16.mxu0 %v6776_v56  ;;  %v6227_v55 = vpack.i.bf16 %v3107_v41, %v3235_v21 }
 0x617   : > { %3026 = vst.msk [vmem:[#allocation2 + $0xf9] sm:$0xff] %vm304_vm0, %v2994_v18  ;;  %3027 = vst.msk [vmem:[#allocation2 + $0x109] sm:$0xff] %vm304_vm0, %v2995_v42  ;;  %5399 = vmatprep.mubr.msk.f32.mxu1 %vm304_vm0, %v8531_v1  ;;  %v8549_v52 = vld [vmem:[#allocation2 + $0x4a] sm:$0xff]  ;;  %v8551_v38 = vld [vmem:[#allocation2 + $0x22] sm:$0xff] }
 0x618   : > { %3028 = vst.msk [vmem:[#allocation2 + $0x111] sm:$0xff] %vm304_vm0, %v2996_v20  ;;  %3029 = vst.msk [vmem:[#allocation2 + $0x121] sm:$0xff] %vm304_vm0, %v2997_v32  ;;  %5400 = vmatmul.mubr.msk.f32.vlgmr.msra.gmra.mrb[70].mxu1 %vm304_vm0, %v8533_v27  ;;  %v3108_v48 = vld [vmem:[#allocation2 + $0x9] sm:$0xff]  ;;  %6233 = vrot.lane.b32.xlu1 %v6232_v14, %s6781_s12  ;;  %v8556_v17 = vld [vmem:[#allocation2 + $0x18] sm:$0xff] }
 0x619   : > { %3030 = vst.msk [vmem:[#allocation2 + $0x129] sm:$0xff] %vm304_vm0, %v2998_v47  ;;  %3031 = vst.msk [vmem:[#allocation2 + $0x139] sm:$0xff] %vm304_vm0, %v2999_v58  ;;  %5402 = vmatprep.mubr.msk.f32.mxu1 %vm304_vm0, %v8549_v52  ;;  %v8558_v10 = vld [vmem:[#allocation2 + $0x31] sm:$0xff]  ;;  %6228 = vrot.lane.b32.xlu0 %v6227_v55, %s6779_s22  ;;  %v6242_v30 = vpack.i.bf16 %v3108_v48, %v8551_v38  ;;  %v3067_v22 = vld [vmem:[%s9405_s7 + $0xe0] sm:$0xff] }
 0x61a   : > { %3032 = vst.msk [vmem:[#allocation2 + $0x141] sm:$0xff] %vm304_vm0, %v3000_v9  ;;  %3033 = vst.msk [vmem:[#allocation2 + $0x151] sm:$0xff] %vm304_vm0, %v3001_v61  ;;  %5681 = vmatpush1.bf16.msra.mxu0 %v5680_v23  ;;  %v8561_v44 = vld [vmem:[#allocation2 + $0x52] sm:$0xff]  ;;  %v3068_v4 = vld [vmem:[%s9405_s7 + $0xe8] sm:$0xff]  ;;  %v6237_v51 = vpack.i.bf16 %v8556_v17, %v8558_v10 }
 0x61b   : > { %3034 = vst.msk [vmem:[#allocation2 + $0x159] sm:$0xff] %vm304_vm0, %v3002_v15  ;;  %3035 = vst.msk [vmem:[#allocation2 + $0x169] sm:$0xff] %vm304_vm0, %v3003_v37  ;;  %5682 = vmatprep.subr.bf16.mxu0 %v6776_v56  ;;  %v8573_v46 = vld [vmem:[#allocation2 + $0x62] sm:$0xff]  ;;  %v8579_v50 = vld [vmem:[#allocation2 + $0x39] sm:$0xff]  ;;  %v5686_v62 = vpack.c.bf16 %v3068_v4, %v3067_v22  ;;  %v6287_v37 = vpack.i.bf16 %v8558_v10, %v8549_v52 }
 0x61c   : > { %3036 = vst.msk [vmem:[#allocation2 + $0x171] sm:$0xff] %vm304_vm0, %v3004_v6  ;;  %3037 = vst.msk [vmem:[#allocation2 + $0x181] sm:$0xff] %vm304_vm0, %v3005_v11  ;;  %5403 = vmatmul.mubr.msk.f32.gmra.mrb[72].mxu1 %vm304_vm0, %v8561_v44  ;;  %v8577_v33 = vld [vmem:[#allocation2 + $0x20] sm:$0xff]  ;;  %6243 = vrot.lane.b32.xlu1 %v6242_v30, %s6779_s22  ;;  %v3140_v0 = vld [vmem:[#allocation2 + $0xa] sm:$0xff]  ;;  %v6302_v6 = vpack.i.bf16 %v8579_v50, %v8561_v44 }
 0x61d   : > { %3038 = vst.msk [vmem:[#allocation2 + $0x189] sm:$0xff] %vm304_vm0, %v3006_v53  ;;  %5405 = vmatprep.mubr.msk.f32.mxu1 %vm304_vm0, %v8573_v46  ;;  %v3268_v59 = vld [vmem:[#allocation2 + $0x38] sm:$0xff]  ;;  %6238 = vrot.lane.b32.xlu0 %v6237_v51, %s9411_s24  ;;  %v8585_v5 = vld [vmem:[#allocation2 + $0x6a] sm:$0xff]  ;;  %v6252_v31 = vpack.i.bf16 %v8577_v33, %v8579_v50  ;;  %v8606_v29 = vld [vmem:[#allocation2 + $0x82] sm:$0xff] }
 0x61e   : > { %5684 = vmatpush1.bf16.msra.mxu0 %v5683_v16  ;;  %v3069_v28 = vld [vmem:[%s9405_s7 + $0xf0] sm:$0xff]  ;;  %v3070_v13 = vld [vmem:[%s9405_s7 + $0xf8] sm:$0xff]  ;;  %v6247_v24 = vpack.i.bf16 %v3140_v0, %v3268_v59  ;;  %v3269_v3 = vld [vmem:[#allocation2 + $0x48] sm:$0xff] }
 0x61f   : > { %5685 = vmatprep.subr.bf16.mxu0 %v6776_v56  ;;  %v8598_v25 = vld [vmem:[#allocation2 + $0x7a] sm:$0xff]  ;;  %v5689_v19 = vpack.c.bf16 %v3070_v13, %v3069_v28  ;;  %v6262_v36 = vpack.i.bf16 %v3235_v21, %v3269_v3  ;;  %v8611_v35 = vld [vmem:[#allocation2 + $0x92] sm:$0xff]  ;;  %v8620_v12 = vld [vmem:[#allocation2 + $0x49] sm:$0xff] }
 0x620   : > { %5406 = vmatmul.mubr.msk.f32.gmra.mrb[74].mxu1 %vm304_vm0, %v8585_v5  ;;  %6253 = vrot.lane.b32.xlu1 %v6252_v31, %s9411_s24  ;;  %v8603_v60 = vld [vmem:[#allocation2 + $0x19] sm:$0xff]  ;;  %v8615_v40 = vld [vmem:[#allocation2 + $0x21] sm:$0xff]  ;;  %v8629_v49 = vld [vmem:[#allocation2 + $0xaa] sm:$0xff]  ;;  %v6267_v18 = vpack.i.bf16 %v8535_v7, %v8620_v12 }
 0x621   : > { %5408 = vmatprep.mubr.msk.f32.mxu1 %vm304_vm0, %v8598_v25  ;;  %6248 = vrot.lane.b32.xlu0 %v6247_v24, %s6781_s12  ;;  %v6257_v43 = vpack.i.bf16 %v8603_v60, %v8531_v1  ;;  %v6272_v54 = vpack.i.bf16 %v8615_v40, %v8533_v27  ;;  %v8633_v42 = vld [vmem:[#allocation2 + $0x51] sm:$0xff]  ;;  %v8644_v32 = vld [vmem:[#allocation2 + $0xc2] sm:$0xff]  ;;  %v8656_v15 = vld [vmem:[#allocation2 + $0xda] sm:$0xff] }
 0x622   : > { %5687 = vmatpush1.bf16.msra.mxu0 %v5686_v62  ;;  %v3270_v34 = vld [vmem:[#allocation2 + $0x50] sm:$0xff]  ;;  %v6282_v20 = vpack.i.bf16 %v3268_v59, %v8633_v42  ;;  %v3271_v58 = vld [vmem:[#allocation2 + $0x60] sm:$0xff]  ;;  %v3272_v57 = vld [vmem:[#allocation2 + $0x68] sm:$0xff] }
 0x623   : > { %5688 = vmatprep.subr.bf16.mxu0 %v6776_v56  ;;  %v8623_v56 = vld [vmem:[#allocation2 + $0x9a] sm:$0xff]  ;;  %v8639_v45 = vld [vmem:[#allocation2 + $0xb2] sm:$0xff]  ;;  %v6277_v47 = vpack.i.bf16 %v8551_v38, %v3270_v34  ;;  %v8651_v9 = vld [vmem:[#allocation2 + $0xca] sm:$0xff]  ;;  %v6292_v61 = vpack.i.bf16 %v8531_v1, %v3271_v58  ;;  %v6307_v23 = vpack.i.bf16 %v8533_v27, %v3272_v57  ;;  %v6317_v27 = vpack.i.bf16 %v8620_v12, %v8573_v46 }
 0x624   : > { %5409 = vmatmul.mubr.msk.f32.gmra.mrb[76].mxu1 %vm304_vm0, %v8606_v29  ;;  %6263 = vrot.lane.b32.xlu1 %v6262_v36, %s6781_s12  ;;  %v8663_v2 = vld [vmem:[#allocation2 + $0x61] sm:$0xff]  ;;  %v8672_v11 = vld [vmem:[#allocation2 + $0xf2] sm:$0xff]  ;;  %v3304_v8 = vld [vmem:[#allocation2 + $0x69] sm:$0xff] }
 0x625   : > { %5411 = vmatprep.mubr.msk.f32.mxu1 %vm304_vm0, %v8611_v35  ;;  %6258 = vrot.lane.b32.xlu0 %v6257_v43, %s6779_s22  ;;  %v8666_v63 = vld [vmem:[#allocation2 + $0xe2] sm:$0xff]  ;;  %v6297_v53 = vpack.i.bf16 %v3269_v3, %v8663_v2  ;;  %v8679_v41 = vld [vmem:[#allocation2 + $0xfa] sm:$0xff]  ;;  %v6312_v1 = vpack.i.bf16 %v3270_v34, %v3304_v8  ;;  %v8683_v7 = vld [vmem:[#allocation2 + $0x10a] sm:$0xff] }
 0x626   : > { %5690 = vmatpush1.bf16.msra.mxu0 %v5689_v19  ;;  %v3273_v14 = vld [vmem:[#allocation2 + $0x78] sm:$0xff]  ;;  %v8695_v39 = vld [vmem:[#allocation2 + $0x122] sm:$0xff]  ;;  %v8703_v48 = vld [vmem:[#allocation2 + $0x12a] sm:$0xff] }
 0x627   : > { %v8690_v21 = vld [vmem:[#allocation2 + $0x112] sm:$0xff]  ;;  %v6322_v26 = vpack.i.bf16 %v8549_v52, %v3273_v14  ;;  %v6332_v52 = vpack.i.bf16 %v8633_v42, %v8585_v5  ;;  %v8709_v38 = vld [vmem:[#allocation2 + $0x13a] sm:$0xff]  ;;  %v8715_v4 = vld [vmem:[#allocation2 + $0x142] sm:$0xff] }
 0x628   : > { %5412 = vmatmul.mubr.msk.f32.gmra.mrb[78].mxu1 %vm304_vm0, %v8623_v56  ;;  %6273 = vrot.lane.b32.xlu1 %v6272_v54, %s6779_s22  ;;  %v3305_v55 = vld [vmem:[#allocation2 + $0x79] sm:$0xff]  ;;  %v3306_v30 = vld [vmem:[#allocation2 + $0x81] sm:$0xff]  ;;  %v3275_v62 = vld [vmem:[#allocation2 + $0x90] sm:$0xff] }
 0x629   : > { %5414 = vmatprep.mubr.msk.f32.mxu1 %vm304_vm0, %v8629_v49  ;;  %6268 = vrot.lane.b32.xlu0 %v6267_v18, %s9411_s24  ;;  %v6327_v16 = vpack.i.bf16 %v3271_v58, %v3305_v55  ;;  %v3274_v22 = vld [vmem:[#allocation2 + $0x80] sm:$0xff]  ;;  %v6342_v51 = vpack.i.bf16 %v3272_v57, %v3306_v30  ;;  %v8719_v0 = vld [vmem:[#allocation2 + $0x152] sm:$0xff]  ;;  %v6352_v28 = vpack.i.bf16 %v8573_v46, %v3275_v62  ;;  %v8731_v13 = vld [vmem:[#allocation2 + $0x16a] sm:$0xff] }
 0x62a   : > { %v6337_v59 = vpack.i.bf16 %v8561_v44, %v3274_v22  ;;  %v8726_v31 = vld [vmem:[#allocation2 + $0x15a] sm:$0xff]  ;;  %v6347_v44 = vpack.i.bf16 %v8663_v2, %v8598_v25  ;;  %v3307_v24 = vld [vmem:[#allocation2 + $0x91] sm:$0xff]  ;;  %v6362_v46 = vpack.i.bf16 %v3304_v8, %v8606_v29  ;;  %v3359_v19 = vld [vmem:[#allocation2 + $0x182] sm:$0xff] }
 0x62b   : > { %v8739_v3 = vld [vmem:[#allocation2 + $0x172] sm:$0xff]  ;;  %v6357_v36 = vpack.i.bf16 %v3273_v14, %v3307_v24  ;;  %v3360_v18 = vld [vmem:[#allocation2 + $0x18a] sm:$0xff]  ;;  %v6407_v14 = vpack.i.bf16 %v3307_v24, %v8629_v49 }
 0x62c   : > { %5415 = vmatmul.mubr.msk.f32.gmra.mrb[80].mxu1 %vm304_vm0, %v8639_v45  ;;  %6283 = vrot.lane.b32.xlu1 %v6282_v20, %s9411_s24  ;;  %v3308_v43 = vld [vmem:[#allocation2 + $0x99] sm:$0xff]  ;;  %v3310_v8 = vld [vmem:[#allocation2 + $0xb1] sm:$0xff] }
 0x62d   : > { %5417 = vmatprep.mubr.msk.f32.mxu1 %vm304_vm0, %v8644_v32  ;;  %6278 = vrot.lane.b32.xlu0 %v6277_v47, %s6781_s12  ;;  %v3276_v54 = vld [vmem:[#allocation2 + $0x98] sm:$0xff]  ;;  %v6372_v34 = vpack.i.bf16 %v3274_v22, %v3308_v43  ;;  %v3277_v47 = vld [vmem:[#allocation2 + $0xa8] sm:$0xff] }
 0x62e   : > { %v6367_v20 = vpack.i.bf16 %v8585_v5, %v3276_v54  ;;  %v6382_v58 = vpack.i.bf16 %v8598_v25, %v3277_v47  ;;  %v3278_v5 = vld [vmem:[#allocation2 + $0xb0] sm:$0xff]  ;;  %v6402_v57 = vpack.i.bf16 %v3276_v54, %v3310_v8  ;;  %v3279_v25 = vld [vmem:[#allocation2 + $0xc0] sm:$0xff] }
 0x630   : > { %5418 = vmatmul.mubr.msk.f32.gmra.mrb[82].mxu1 %vm304_vm0, %v8651_v9  ;;  %6293 = vrot.lane.b32.xlu1 %v6292_v61, %s6781_s12  ;;  %v6377_v61 = vpack.i.bf16 %v3305_v55, %v8611_v35 }
 0x631   : > { %5420 = vmatprep.mubr.msk.f32.mxu1 %vm304_vm0, %v8656_v15  ;;  %6288 = vrot.lane.b32.xlu0 %v6287_v37, %s6779_s22  ;;  %v3309_v37 = vld [vmem:[#allocation2 + $0xa9] sm:$0xff] }
 0x634   : > { %5421 = vmatmul.mubr.msk.f32.gmra.mrb[84].mxu1 %vm304_vm0, %v8666_v63  ;;  %6303 = vrot.lane.b32.xlu1 %v6302_v6, %s6779_s22  ;;  %v6392_v6 = vpack.i.bf16 %v3306_v30, %v8623_v56 }
 0x635   : > { %5423 = vmatprep.mubr.msk.f32.mxu1 %vm304_vm0, %v8672_v11  ;;  %6298 = vrot.lane.b32.xlu0 %v6297_v53, %s9411_s24  ;;  %v6387_v53 = vpack.i.bf16 %v3275_v62, %v3309_v37  ;;  %v6452_v62 = vpack.i.bf16 %v3310_v8, %v8651_v9  ;;  %v3286_v8 = vld [vmem:[#allocation2 + $0x110] sm:$0xff] }
 0x638   : > { %5424 = vmatmul.mubr.msk.f32.gmra.mrb[86].mxu1 %vm304_vm0, %v8679_v41  ;;  %6313 = vrot.lane.b32.xlu1 %v6312_v1, %s9411_s24  ;;  %v6397_v1 = vpack.i.bf16 %v8606_v29, %v3278_v5  ;;  %v3280_v29 = vld [vmem:[#allocation2 + $0xc8] sm:$0xff] }
 0x639   : > { %5426 = vmatprep.mubr.msk.f32.mxu1 %vm304_vm0, %v8683_v7  ;;  %6308 = vrot.lane.b32.xlu0 %v6307_v23, %s6781_s12  ;;  %v6412_v23 = vpack.i.bf16 %v8611_v35, %v3279_v25  ;;  %v6427_v30 = vpack.i.bf16 %v8623_v56, %v3280_v29  ;;  %v3281_v35 = vld [vmem:[#allocation2 + $0xd8] sm:$0xff]  ;;  %v3282_v56 = vld [vmem:[#allocation2 + $0xe0] sm:$0xff] }
 0x63a   : > { %v6442_v22 = vpack.i.bf16 %v8629_v49, %v3281_v35  ;;  %v3283_v49 = vld [vmem:[#allocation2 + $0xf0] sm:$0xff] }
 0x63c   : > { %5427 = vmatmul.mubr.msk.f32.gmra.mrb[88].mxu1 %vm304_vm0, %v8690_v21  ;;  %6323 = vrot.lane.b32.xlu1 %v6322_v26, %s6781_s12  ;;  %v3311_v26 = vld [vmem:[#allocation2 + $0xc1] sm:$0xff] }
 0x63d   : > { %5429 = vmatprep.mubr.msk.f32.mxu1 %vm304_vm0, %v8695_v39  ;;  %6318 = vrot.lane.b32.xlu0 %v6317_v27, %s6779_s22  ;;  %v6422_v27 = vpack.i.bf16 %v3308_v43, %v8639_v45  ;;  %v6417_v55 = vpack.i.bf16 %v3277_v47, %v3311_v26  ;;  %v3315_v43 = vld [vmem:[#allocation2 + $0xf1] sm:$0xff] }
 0x640   : > { %5430 = vmatmul.mubr.msk.f32.gmra.mrb[90].mxu1 %vm304_vm0, %v8703_v48  ;;  %6333 = vrot.lane.b32.xlu1 %v6332_v52, %s6779_s22  ;;  %v3312_v52 = vld [vmem:[#allocation2 + $0xc9] sm:$0xff] }
 0x641   : > { %5432 = vmatprep.mubr.msk.f32.mxu1 %vm304_vm0, %v8709_v38  ;;  %6328 = vrot.lane.b32.xlu0 %v6327_v16, %s9411_s24  ;;  %v6432_v16 = vpack.i.bf16 %v3278_v5, %v3312_v52  ;;  %v6482_v54 = vpack.i.bf16 %v3312_v52, %v8666_v63 }
 0x644   : > { %5433 = vmatmul.mubr.msk.f32.gmra.mrb[92].mxu1 %vm304_vm0, %v8715_v4  ;;  %6343 = vrot.lane.b32.xlu1 %v6342_v51, %s9411_s24  ;;  %v6437_v51 = vpack.i.bf16 %v3309_v37, %v8644_v32  ;;  %v8794_v37 = vld [vmem:[#allocation2 + $0x109] sm:$0xff] }
 0x645   : > { %5435 = vmatprep.mubr.msk.f32.mxu1 %vm304_vm0, %v8719_v0  ;;  %6338 = vrot.lane.b32.xlu0 %v6337_v59, %s6781_s12  ;;  %v3313_v59 = vld [vmem:[#allocation2 + $0xd9] sm:$0xff] }
 0x648   : > { %5436 = vmatmul.mubr.msk.f32.gmra.mrb[94].mxu1 %vm304_vm0, %v8726_v31  ;;  %6353 = vrot.lane.b32.xlu1 %v6352_v28, %s6781_s12  ;;  %v6447_v28 = vpack.i.bf16 %v3279_v25, %v3313_v59  ;;  %v6517_v25 = vpack.i.bf16 %v8666_v63, %v3286_v8 }
 0x649   : > { %5438 = vmatprep.mubr.msk.f32.mxu1 %vm304_vm0, %v8731_v13  ;;  %6348 = vrot.lane.b32.xlu0 %v6347_v44, %s6779_s22  ;;  %v3314_v44 = vld [vmem:[#allocation2 + $0xe1] sm:$0xff] }
 0x64a   : > { %v6462_v24 = vpack.i.bf16 %v3280_v29, %v3314_v44 }
 0x64c   : > { %5439 = vmatmul.mubr.msk.f32.gmra.mrb[96].mxu1 %vm304_vm0, %v8739_v3  ;;  %6363 = vrot.lane.b32.xlu1 %v6362_v46, %s6779_s22  ;;  %v6457_v46 = vpack.i.bf16 %v8639_v45, %v3282_v56  ;;  %v3284_v45 = vld [vmem:[#allocation2 + $0xf8] sm:$0xff] }
 0x64d   : > { %5441 = vmatprep.mubr.msk.f32.mxu1 %vm304_vm0, %v3359_v19  ;;  %6358 = vrot.lane.b32.xlu0 %v6357_v36, %s9411_s24  ;;  %v6472_v19 = vpack.i.bf16 %v8644_v32, %v3283_v49  ;;  %v6467_v36 = vpack.i.bf16 %v3311_v26, %v8656_v15  ;;  %v6487_v47 = vpack.i.bf16 %v8651_v9, %v3284_v45  ;;  %v3285_v32 = vld [vmem:[#allocation2 + $0x108] sm:$0xff]  ;;  %v8799_v9 = vld [vmem:[#allocation2 + $0x111] sm:$0xff] }
 0x64e   : > { %v6522_v5 = vpack.i.bf16 %v3284_v45, %v8799_v9 }
 0x650   : > { %5442 = vmatmul.mubr.msk.f32.gmra.mrb[98].mxu1 %vm304_vm0, %v3360_v18  ;;  %6373 = vrot.lane.b32.xlu1 %v6372_v34, %s9411_s24  ;;  %v6477_v18 = vpack.i.bf16 %v3281_v35, %v3315_v43  ;;  %v3316_v34 = vld [vmem:[#allocation2 + $0xf9] sm:$0xff]  ;;  %v6527_v35 = vpack.i.bf16 %v3315_v43, %v8683_v7 }
 0x651   : > { %6368 = vrot.lane.b32.xlu0 %v6367_v20, %s6781_s12  ;;  %v6492_v20 = vpack.i.bf16 %v3282_v56, %v3316_v34 }
 0x654   : > { %6383 = vrot.lane.b32.xlu1 %v6382_v58, %s6781_s12  ;;  %v6502_v58 = vpack.i.bf16 %v8656_v15, %v3285_v32 }
 0x655   : > { %6378 = vrot.lane.b32.xlu0 %v6377_v61, %s6779_s22  ;;  %v6497_v61 = vpack.i.bf16 %v3313_v59, %v8672_v11  ;;  %v8816_v59 = vld [vmem:[#allocation2 + $0x121] sm:$0xff] }
 0x658   : > { %6393 = vrot.lane.b32.xlu1 %v6392_v6, %s6779_s22  ;;  %v6512_v6 = vpack.i.bf16 %v3314_v44, %v8679_v41 }
 0x659   : > { %6388 = vrot.lane.b32.xlu0 %v6387_v53, %s9411_s24  ;;  %v6507_v53 = vpack.i.bf16 %v3283_v49, %v8794_v37  ;;  %v3076_v49 = vld [vmem:[#allocation2 + $0x8] sm:$0xff] }
 0x65c   : > { %6403 = vrot.lane.b32.xlu1 %v6402_v57, %s9411_s24  ;;  %v3075_v57 = vld [vmem:[#allocation2] sm:$0xff] }
 0x65d   : > { %6398 = vrot.lane.b32.xlu0 %v6397_v1, %s6781_s12 }
 0x660   : > { %6413 = vrot.lane.b32.xlu1 %v6412_v23, %s6781_s12  ;;  %v8805_v23 = vld [vmem:[#allocation2 + $0x120] sm:$0xff] }
 0x661   : > { %6408 = vrot.lane.b32.xlu0 %v6407_v14, %s6779_s22 }
 0x664   : > { %6423 = vrot.lane.b32.xlu1 %v6422_v27, %s6779_s22 }
 0x665   : > { %6418 = vrot.lane.b32.xlu0 %v6417_v55, %s9411_s24 }
 0x668   : > { %6433 = vrot.lane.b32.xlu1 %v6432_v16, %s9411_s24  ;;  %v6532_v16 = vpack.i.bf16 %v8672_v11, %v8805_v23 }
 0x669   : > { %6428 = vrot.lane.b32.xlu0 %v6427_v30, %s6781_s12 }
 0x66c   : > { %6443 = vrot.lane.b32.xlu1 %v6442_v22, %s6781_s12 }
 0x66d   : > { %6438 = vrot.lane.b32.xlu0 %v6437_v51, %s6779_s22 }
 0x670   : > { %6453 = vrot.lane.b32.xlu1 %v6452_v62, %s6779_s22 }
 0x671   : > { %6448 = vrot.lane.b32.xlu0 %v6447_v28, %s9411_s24 }
 0x674   : > { %6463 = vrot.lane.b32.xlu1 %v6462_v24, %s9411_s24 }
 0x675   : > { %6458 = vrot.lane.b32.xlu0 %v6457_v46, %s6781_s12  ;;  %v6542_v46 = vpack.i.bf16 %v3316_v34, %v8690_v21 }
 0x678   : > { %6473 = vrot.lane.b32.xlu1 %v6472_v19, %s6781_s12 }
 0x679   : > { %6468 = vrot.lane.b32.xlu0 %v6467_v36, %s6779_s22 }
 0x67c   : > { %6483 = vrot.lane.b32.xlu1 %v6482_v54, %s6779_s22  ;;  %v6537_v54 = vpack.i.bf16 %v3285_v32, %v8816_v59 }
 0x67d   : > { %6478 = vrot.lane.b32.xlu0 %v6477_v18, %s9411_s24  ;;  %v8825_v18 = vld [vmem:[#allocation2 + $0x129] sm:$0xff] }
 0x680   : > { %6493 = vrot.lane.b32.xlu1 %v6492_v20, %s9411_s24 }
 0x681   : > { %6488 = vrot.lane.b32.xlu0 %v6487_v47, %s6781_s12  ;;  %v8828_v47 = vld [vmem:[#allocation2 + $0x128] sm:$0xff] }
 0x684   : > { %6503 = vrot.lane.b32.xlu1 %v6502_v58, %s6781_s12 }
 0x685   : > { %6498 = vrot.lane.b32.xlu0 %v6497_v61, %s6779_s22 }
 0x688   : > { %6513 = vrot.lane.b32.xlu1 %v6512_v6, %s6779_s22 }
 0x689   : > { %6508 = vrot.lane.b32.xlu0 %v6507_v53, %s9411_s24  ;;  %v6552_v53 = vpack.i.bf16 %v3286_v8, %v8825_v18 }
 0x68a   : > { %v6234_v15 = vpop.permute.xlu1 %6233 }
 0x68b   : > { %v6229_v1 = vpop.permute.xlu0 %6228  ;;  %v6236_v27 = vunpack.i.h.bf16 %v6234_v15  ;;  %v6235_v55 = vunpack.i.l.bf16 %v6234_v15 }
 0x68c   : > { %v6231_v14 = vunpack.i.h.bf16 %v6229_v1  ;;  %v6230_v26 = vunpack.i.l.bf16 %v6229_v1  ;;  %6523 = vrot.lane.b32.xlu1 %v6522_v5, %s9411_s24  ;;  %v6547_v1 = vpack.i.bf16 %v8679_v41, %v8828_v47 }
 0x68d   : > { %6518 = vrot.lane.b32.xlu0 %v6517_v25, %s6781_s12  ;;  %v8841_v25 = vld [vmem:[#allocation2 + $0x138] sm:$0xff] }
 0x68e   : > { %v4131_v52 = vsel %vm304_vm0, %v3075_v57, %v6231_v14  ;;  %v6244_v29 = vpop.permute.xlu1 %6243  ;;  %v4227_v30 = vsel %vm304_vm0, %v8603_v60, %v6230_v26 }
 0x68f   : > { %v6239_v63 = vpop.permute.xlu0 %6238  ;;  %v6246_v62 = vunpack.i.h.bf16 %v6244_v29  ;;  %v6245_v28 = vunpack.i.l.bf16 %v6244_v29  ;;  %v4259_v44 = vsel %vm1922_vm5, %v4227_v30, %v6235_v55  ;;  %v4163_v11 = vsel %vm1922_vm5, %v4131_v52, %v6236_v27 }
 0x690   : > { %v6241_v22 = vunpack.i.h.bf16 %v6239_v63  ;;  %v6240_v51 = vunpack.i.l.bf16 %v6239_v63  ;;  %6533 = vrot.lane.b32.xlu1 %v6532_v16, %s6781_s12  ;;  %v6562_v55 = vpack.i.bf16 %v8683_v7, %v8841_v25  ;;  %v6557_v16 = vpack.i.bf16 %v8794_v37, %v8695_v39 }
 0x691   : > { %6528 = vrot.lane.b32.xlu0 %v6527_v35, %s6779_s22  ;;  %v4228_v34 = vsel %vm304_vm0, %v8615_v40, %v6245_v28  ;;  %v4132_v58 = vsel %vm304_vm0, %v3076_v49, %v6246_v62  ;;  %v8854_v35 = vld [vmem:[#allocation2 + $0x139] sm:$0xff]  ;;  %v6572_v37 = vpack.i.bf16 %v8799_v9, %v8703_v48 }
 0x692   : > { %v6254_v56 = vpop.permute.xlu1 %6253  ;;  %v4291_v60 = vsel %vm1955_vm6, %v4259_v44, %v6240_v51  ;;  %v4195_v24 = vsel %vm1955_vm6, %v4163_v11, %v6241_v22 }
 0x693   : > { %v6256_v19 = vunpack.i.h.bf16 %v6254_v56  ;;  %v6255_v36 = vunpack.i.l.bf16 %v6254_v56  ;;  %v6249_v43 = vpop.permute.xlu0 %6248  ;;  %4515 = vmatprep.mubr.f32.mxu0 %v4291_v60  ;;  %v6567_v60 = vpack.i.bf16 %v8805_v23, %v8854_v35 }
 0x694   : > { %v6251_v45 = vunpack.i.h.bf16 %v6249_v43  ;;  %v6250_v20 = vunpack.i.l.bf16 %v6249_v43  ;;  %4516 = vmatmul.mubr.f32.vlgmr.msra.gmra.mrb[38].mxu0 %v4195_v24  ;;  %6543 = vrot.lane.b32.xlu1 %v6542_v46, %s6779_s22  ;;  %v8865_v24 = vld [vmem:[#allocation2 + $0x141] sm:$0xff] }
 0x695   : > { %6538 = vrot.lane.b32.xlu0 %v6537_v54, %s9411_s24  ;;  %v6582_v54 = vpack.i.bf16 %v8828_v47, %v8865_v24  ;;  %v3079_v47 = vld [vmem:[#allocation2 + $0x30] sm:$0xff] }
 0x696   : > { %v6264_v61 = vpop.permute.xlu1 %6263  ;;  %v4260_v6 = vsel %vm1922_vm5, %v4228_v34, %v6250_v20  ;;  %v4164_v32 = vsel %vm1922_vm5, %v4132_v58, %v6251_v45 }
 0x697   : > { %v6259_v15 = vpop.permute.xlu0 %6258  ;;  %v4292_v5 = vsel %vm1955_vm6, %v4260_v6, %v6255_v36  ;;  %v4196_v57 = vsel %vm1955_vm6, %v4164_v32, %v6256_v19  ;;  %v6266_v26 = vunpack.i.h.bf16 %v6264_v61  ;;  %v6265_v27 = vunpack.i.l.bf16 %v6264_v61  ;;  %v8868_v19 = vld [vmem:[#allocation2 + $0x140] sm:$0xff] }
 0x698   : > { %v6261_v40 = vunpack.i.h.bf16 %v6259_v15  ;;  %v6260_v14 = vunpack.i.l.bf16 %v6259_v15  ;;  %4520 = vmatprep.mubr.f32.mxu0 %v4292_v5  ;;  %6553 = vrot.lane.b32.xlu1 %v6552_v53, %s9411_s24  ;;  %v6577_v58 = vpack.i.bf16 %v8690_v21, %v8868_v19 }
 0x699   : > { %4521 = vmatmul.mubr.f32.gmra.mrb[40].mxu0 %v4196_v57  ;;  %6548 = vrot.lane.b32.xlu0 %v6547_v1, %s6781_s12 }
 0x69a   : > { %v6274_v8 = vpop.permute.xlu1 %6273  ;;  %v4229_v52 = vsel %vm304_vm0, %v8558_v10, %v6260_v14  ;;  %v4133_v41 = vsel %vm304_vm0, %v8556_v17, %v6261_v40  ;;  %v6587_v40 = vpack.i.bf16 %v8816_v59, %v8709_v38  ;;  %v6602_v59 = vpack.i.bf16 %v8825_v18, %v8715_v4 }
 0x69b   : > { %v6269_v29 = vpop.permute.xlu0 %6268  ;;  %v6276_v22 = vunpack.i.h.bf16 %v6274_v8  ;;  %v6275_v51 = vunpack.i.l.bf16 %v6274_v8  ;;  %v4261_v7 = vsel %vm1922_vm5, %v4229_v52, %v6265_v27  ;;  %v4165_v10 = vsel %vm1922_vm5, %v4133_v41, %v6266_v26  ;;  %v8895_v27 = vld [vmem:[#allocation2 + $0x151] sm:$0xff] }
 0x69c   : > { %v6271_v30 = vunpack.i.h.bf16 %v6269_v29  ;;  %v6270_v63 = vunpack.i.l.bf16 %v6269_v29  ;;  %6563 = vrot.lane.b32.xlu1 %v6562_v55, %s6781_s12 }
 0x69d   : > { %6558 = vrot.lane.b32.xlu0 %v6557_v16, %s6779_s22  ;;  %v4230_v9 = vsel %vm304_vm0, %v8579_v50, %v6275_v51  ;;  %v4134_v36 = vsel %vm304_vm0, %v8577_v33, %v6276_v22  ;;  %v8883_v50 = vld [vmem:[#allocation2 + $0x150] sm:$0xff]  ;;  %v6597_v22 = vpack.i.bf16 %v8841_v25, %v8895_v27  ;;  %v8906_v51 = vld [vmem:[#allocation2 + $0x159] sm:$0xff] }
 0x69e   : > { %v6284_v62 = vpop.permute.xlu1 %6283  ;;  %v4293_v17 = vsel %vm1955_vm6, %v4261_v7, %v6270_v63  ;;  %v4197_v28 = vsel %vm1955_vm6, %v4165_v10, %v6271_v30  ;;  %v6592_v5 = vpack.i.bf16 %v8695_v39, %v8883_v50 }
 0x69f   : > { %v6286_v44 = vunpack.i.h.bf16 %v6284_v62  ;;  %v6285_v11 = vunpack.i.l.bf16 %v6284_v62  ;;  %v6279_v56 = vpop.permute.xlu0 %6278  ;;  %4525 = vmatprep.mubr.f32.mxu0 %v4293_v17  ;;  %v8909_v62 = vld [vmem:[#allocation2 + $0x158] sm:$0xff] }
 0x6a0   : > { %v6281_v46 = vunpack.i.h.bf16 %v6279_v56  ;;  %v6280_v49 = vunpack.i.l.bf16 %v6279_v56  ;;  %4526 = vmatmul.mubr.f32.gmra.mrb[42].mxu0 %v4197_v28  ;;  %6573 = vrot.lane.b32.xlu1 %v6572_v37, %s6779_s22  ;;  %v3080_v17 = vld [vmem:[#allocation2 + $0x38] sm:$0xff] }
 0x6a1   : > { %6568 = vrot.lane.b32.xlu0 %v6567_v60, %s9411_s24 }
 0x6a2   : > { %v6294_v43 = vpop.permute.xlu1 %6293  ;;  %v4262_v23 = vsel %vm1922_vm5, %v4230_v9, %v6280_v49  ;;  %v4166_v45 = vsel %vm1922_vm5, %v4134_v36, %v6281_v46  ;;  %v6607_v46 = vpack.i.bf16 %v8703_v48, %v8909_v62  ;;  %v8923_v9 = vld [vmem:[#allocation2 + $0x168] sm:$0xff] }
 0x6a3   : > { %v6289_v20 = vpop.permute.xlu0 %6288  ;;  %v4294_v34 = vsel %vm1955_vm6, %v4262_v23, %v6285_v11  ;;  %v4198_v61 = vsel %vm1955_vm6, %v4166_v45, %v6286_v44  ;;  %v6296_v32 = vunpack.i.h.bf16 %v6294_v43  ;;  %v6295_v53 = vunpack.i.l.bf16 %v6294_v43 }
 0x6a4   : > { %v6291_v6 = vunpack.i.h.bf16 %v6289_v20  ;;  %v6290_v33 = vunpack.i.l.bf16 %v6289_v20  ;;  %4530 = vmatprep.mubr.f32.mxu0 %v4294_v34  ;;  %6583 = vrot.lane.b32.xlu1 %v6582_v54, %s9411_s24  ;;  %v6612_v44 = vpack.i.bf16 %v8868_v19, %v8906_v51  ;;  %v3081_v19 = vld [vmem:[#allocation2 + $0x48] sm:$0xff]  ;;  %v6622_v45 = vpack.i.bf16 %v8709_v38, %v8923_v9 }
 0x6a5   : > { %6578 = vrot.lane.b32.xlu0 %v6577_v58, %s6781_s12  ;;  %4531 = vmatmul.mubr.f32.gmra.mrb[44].mxu0 %v4198_v61  ;;  %v6617_v58 = vpack.i.bf16 %v8854_v35, %v8719_v0  ;;  %v6632_v35 = vpack.i.bf16 %v8865_v24, %v8726_v31 }
 0x6a6   : > { %v6304_v15 = vpop.permute.xlu1 %6303  ;;  %v4231_v21 = vsel %vm304_vm0, %v8620_v12, %v6290_v33  ;;  %v4135_v57 = vsel %vm304_vm0, %v3079_v47, %v6291_v6  ;;  %v8935_v33 = vld [vmem:[#allocation2 + $0x169] sm:$0xff] }
 0x6a7   : > { %v6299_v1 = vpop.permute.xlu0 %6298  ;;  %v6306_v8 = vunpack.i.h.bf16 %v6304_v15  ;;  %v6305_v55 = vunpack.i.l.bf16 %v6304_v15  ;;  %v4263_v39 = vsel %vm1922_vm5, %v4231_v21, %v6295_v53  ;;  %v4167_v12 = vsel %vm1922_vm5, %v4135_v57, %v6296_v32 }
 0x6a8   : > { %v6301_v14 = vunpack.i.h.bf16 %v6299_v1  ;;  %v6300_v26 = vunpack.i.l.bf16 %v6299_v1  ;;  %6593 = vrot.lane.b32.xlu1 %v6592_v5, %s6781_s12 }
 0x6a9   : > { %6588 = vrot.lane.b32.xlu0 %v6587_v40, %s6779_s22  ;;  %v4232_v18 = vsel %vm304_vm0, %v8633_v42, %v6305_v55  ;;  %v4136_v28 = vsel %vm304_vm0, %v3080_v17, %v6306_v8  ;;  %v6627_v40 = vpack.i.bf16 %v8883_v50, %v8935_v33  ;;  %v3210_v55 = vld [vmem:[#allocation2 + $0x69] sm:$0xff] }
 0x6aa   : > { %v6314_v52 = vpop.permute.xlu1 %6313  ;;  %v4295_v41 = vsel %vm1955_vm6, %v4263_v39, %v6300_v26  ;;  %v4199_v29 = vsel %vm1955_vm6, %v4167_v12, %v6301_v14  ;;  %v8946_v14 = vld [vmem:[#allocation2 + $0x171] sm:$0xff] }
 0x6ab   : > { %v6316_v16 = vunpack.i.h.bf16 %v6314_v52  ;;  %v6315_v30 = vunpack.i.l.bf16 %v6314_v52  ;;  %v6309_v63 = vpop.permute.xlu0 %6308  ;;  %4535 = vmatprep.mubr.f32.mxu0 %v4295_v41  ;;  %v8949_v39 = vld [vmem:[#allocation2 + $0x170] sm:$0xff]  ;;  %v6642_v41 = vpack.i.bf16 %v8909_v62, %v8946_v14  ;;  %v3211_v62 = vld [vmem:[#allocation2 + $0x79] sm:$0xff] }
 0x6ac   : > { %v6311_v7 = vunpack.i.h.bf16 %v6309_v63  ;;  %v6310_v10 = vunpack.i.l.bf16 %v6309_v63  ;;  %4536 = vmatmul.mubr.f32.gmra.mrb[46].mxu0 %v4199_v29  ;;  %6603 = vrot.lane.b32.xlu1 %v6602_v59, %s6779_s22  ;;  %v3082_v12 = vld [vmem:[#allocation2 + $0x50] sm:$0xff] }
 0x6ad   : > { %6598 = vrot.lane.b32.xlu0 %v6597_v22, %s9411_s24  ;;  %v8962_v22 = vld [vmem:[#allocation2 + $0x180] sm:$0xff] }
 0x6ae   : > { %v6324_v37 = vpop.permute.xlu1 %6323  ;;  %v4264_v25 = vsel %vm1922_vm5, %v4232_v18, %v6310_v10  ;;  %v4168_v11 = vsel %vm1922_vm5, %v4136_v28, %v6311_v7  ;;  %v3083_v28 = vld [vmem:[#allocation2 + $0x60] sm:$0xff] }
 0x6af   : > { %v6319_v56 = vpop.permute.xlu0 %6318  ;;  %v4296_v60 = vsel %vm1955_vm6, %v4264_v25, %v6315_v30  ;;  %v4200_v49 = vsel %vm1955_vm6, %v4168_v11, %v6316_v16  ;;  %v6326_v43 = vunpack.i.h.bf16 %v6324_v37  ;;  %v6325_v23 = vunpack.i.l.bf16 %v6324_v37 }
 0x6b0   : > { %v6321_v42 = vunpack.i.h.bf16 %v6319_v56  ;;  %v6320_v36 = vunpack.i.l.bf16 %v6319_v56  ;;  %4540 = vmatprep.mubr.f32.mxu0 %v4296_v60  ;;  %6613 = vrot.lane.b32.xlu1 %v6612_v44, %s9411_s24  ;;  %v6637_v30 = vpack.i.bf16 %v8715_v4, %v8949_v39  ;;  %v6652_v4 = vpack.i.bf16 %v8719_v0, %v8962_v22 }
 0x6b1   : > { %6608 = vrot.lane.b32.xlu0 %v6607_v46, %s6781_s12  ;;  %4541 = vmatmul.mubr.f32.gmra.mrb[48].mxu0 %v4200_v49  ;;  %v6647_v56 = vpack.i.bf16 %v8895_v27, %v8731_v13  ;;  %v8973_v49 = vld [vmem:[#allocation2 + $0x181] sm:$0xff]  ;;  %v6662_v13 = vpack.i.bf16 %v8906_v51, %v8739_v3 }
 0x6b2   : > { %v6334_v54 = vpop.permute.xlu1 %6333  ;;  %v4233_v48 = vsel %vm304_vm0, %v8663_v2, %v6320_v36  ;;  %v4137_v20 = vsel %vm304_vm0, %v3081_v19, %v6321_v42 }
 0x6b3   : > { %v6329_v34 = vpop.permute.xlu0 %6328  ;;  %v6336_v32 = vunpack.i.h.bf16 %v6334_v54  ;;  %v6335_v53 = vunpack.i.l.bf16 %v6334_v54  ;;  %v4265_v38 = vsel %vm1922_vm5, %v4233_v48, %v6325_v23  ;;  %v4169_v2 = vsel %vm1922_vm5, %v4137_v20, %v6326_v43 }
 0x6b4   : > { %v6331_v61 = vunpack.i.h.bf16 %v6329_v34  ;;  %v6330_v6 = vunpack.i.l.bf16 %v6329_v34  ;;  %6623 = vrot.lane.b32.xlu1 %v6622_v45, %s6781_s12  ;;  %v6657_v20 = vpack.i.bf16 %v8923_v9, %v8973_v49  ;;  %v3212_v34 = vld [vmem:[#allocation2 + $0x81] sm:$0xff] }
 0x6b5   : > { %6618 = vrot.lane.b32.xlu0 %v6617_v58, %s6779_s22  ;;  %v4234_v31 = vsel %vm304_vm0, %v3210_v55, %v6335_v53  ;;  %v4138_v24 = vsel %vm304_vm0, %v3082_v12, %v6336_v32  ;;  %v8984_v58 = vld [vmem:[#allocation2 + $0x189] sm:$0xff]  ;;  %v3168_v32 = vld [vmem:[#allocation2 + $0x15a] sm:$0xff] }
 0x6b6   : > { %v6344_v47 = vpop.permute.xlu1 %6343  ;;  %v4297_v15 = vsel %vm1955_vm6, %v4265_v38, %v6330_v6  ;;  %v4201_v5 = vsel %vm1955_vm6, %v4169_v2, %v6331_v61  ;;  %v8987_v53 = vld [vmem:[#allocation2 + $0x188] sm:$0xff]  ;;  %v3361_v12 = vld [vmem:[#allocation2 + $0x19a] sm:$0xff] }
 0x6b7   : > { %v6346_v21 = vunpack.i.h.bf16 %v6344_v47  ;;  %v6345_v57 = vunpack.i.l.bf16 %v6344_v47  ;;  %v6339_v1 = vpop.permute.xlu0 %6338  ;;  %4545 = vmatprep.mubr.f32.mxu0 %v4297_v15  ;;  %v3084_v38 = vld [vmem:[#allocation2 + $0x68] sm:$0xff]  ;;  %v6672_v47 = vpack.i.bf16 %v8949_v39, %v8984_v58  ;;  %5444 = vmatprep.mubr.msk.f32.mxu1 %vm304_vm0, %v3361_v12 }
 0x6b8   : > { %v6341_v26 = vunpack.i.h.bf16 %v6339_v1  ;;  %v6340_v8 = vunpack.i.l.bf16 %v6339_v1  ;;  %4546 = vmatmul.mubr.f32.gmra.mrb[50].mxu0 %v4201_v5  ;;  %6633 = vrot.lane.b32.xlu1 %v6632_v35, %s6779_s22  ;;  %v3169_v1 = vld [vmem:[#allocation2 + $0x16a] sm:$0xff]  ;;  %v3265_v55 = vld [vmem:[#allocation2 + $0x182] sm:$0xff] }
 0x6b9   : > { %6628 = vrot.lane.b32.xlu0 %v6627_v40, %s9411_s24  ;;  %v3297_v40 = vld [vmem:[#allocation2 + $0x198] sm:$0xff] }
 0x6ba   : > { %v6354_v52 = vpop.permute.xlu1 %6353  ;;  %v4266_v50 = vsel %vm1922_vm5, %v4234_v31, %v6340_v8  ;;  %v4170_v29 = vsel %vm1922_vm5, %v4138_v24, %v6341_v26  ;;  %v3362_v31 = vld [vmem:[#allocation2 + $0x1a2] sm:$0xff] }
 0x6bb   : > { %v6349_v59 = vpop.permute.xlu0 %6348  ;;  %v4298_v16 = vsel %vm1955_vm6, %v4266_v50, %v6345_v57  ;;  %v4202_v63 = vsel %vm1955_vm6, %v4170_v29, %v6346_v21  ;;  %v6356_v17 = vunpack.i.h.bf16 %v6354_v52  ;;  %v6355_v18 = vunpack.i.l.bf16 %v6354_v52  ;;  %v3213_v52 = vld [vmem:[#allocation2 + $0x91] sm:$0xff]  ;;  %5445 = vmatmul.mubr.msk.f32.gmra.mrb[100].mxu1 %vm304_vm0, %v3362_v31 }
 0x6bc   : > { %v6351_v7 = vunpack.i.h.bf16 %v6349_v59  ;;  %v6350_v10 = vunpack.i.l.bf16 %v6349_v59  ;;  %4550 = vmatprep.mubr.f32.mxu0 %v4298_v16  ;;  %6643 = vrot.lane.b32.xlu1 %v6642_v41, %s9411_s24  ;;  %v6667_v21 = vpack.i.bf16 %v3168_v32, %v8987_v53  ;;  %v3085_v50 = vld [vmem:[#allocation2 + $0x78] sm:$0xff]  ;;  %v6682_v29 = vpack.i.bf16 %v3169_v1, %v3297_v40 }
 0x6bd   : > { %6638 = vrot.lane.b32.xlu0 %v6637_v30, %s6781_s12  ;;  %4551 = vmatmul.mubr.f32.gmra.mrb[52].mxu0 %v4202_v63  ;;  %v6677_v63 = vpack.i.bf16 %v8935_v33, %v3265_v55 }
 0x6be   : > { %v6364_v37 = vpop.permute.xlu1 %6363  ;;  %v4235_v25 = vsel %vm304_vm0, %v3211_v62, %v6350_v10  ;;  %v4139_v44 = vsel %vm304_vm0, %v3083_v28, %v6351_v7  ;;  %v3266_v7 = vld [vmem:[#allocation2 + $0x18a] sm:$0xff] }
 0x6bf   : > { %v6359_v11 = vpop.permute.xlu0 %6358  ;;  %v6366_v42 = vunpack.i.h.bf16 %v6364_v37  ;;  %v6365_v36 = vunpack.i.l.bf16 %v6364_v37  ;;  %v4267_v0 = vsel %vm1922_vm5, %v4235_v25, %v6355_v18  ;;  %v4171_v43 = vsel %vm1922_vm5, %v4139_v44, %v6356_v17  ;;  %v3329_v18 = vld [vmem:[#allocation2 + $0x199] sm:$0xff] }
 0x6c0   : > { %v6361_v60 = vunpack.i.h.bf16 %v6359_v11  ;;  %v6360_v46 = vunpack.i.l.bf16 %v6359_v11  ;;  %6653 = vrot.lane.b32.xlu1 %v6652_v4, %s6781_s12 }
 0x6c1   : > { %6648 = vrot.lane.b32.xlu0 %v6647_v56, %s6779_s22  ;;  %v4236_v3 = vsel %vm304_vm0, %v3212_v34, %v6365_v36  ;;  %v4140_v51 = vsel %vm304_vm0, %v3084_v38, %v6366_v42  ;;  %v6692_v56 = vpack.i.bf16 %v8946_v14, %v3266_v7  ;;  %v6687_v36 = vpack.i.bf16 %v8962_v22, %v3329_v18 }
 0x6c2   : > { %v6374_v23 = vpop.permute.xlu1 %6373  ;;  %v4299_v19 = vsel %vm1955_vm6, %v4267_v0, %v6360_v46  ;;  %v4203_v54 = vsel %vm1955_vm6, %v4171_v43, %v6361_v60  ;;  %v3330_v0 = vld [vmem:[#allocation2 + $0x1a1] sm:$0xff] }
 0x6c3   : > { %v6376_v27 = vunpack.i.h.bf16 %v6374_v23  ;;  %v6375_v45 = vunpack.i.l.bf16 %v6374_v23  ;;  %v6369_v48 = vpop.permute.xlu0 %6368  ;;  %4555 = vmatprep.mubr.f32.mxu0 %v4299_v19  ;;  %v3298_v43 = vld [vmem:[#allocation2 + $0x1a0] sm:$0xff]  ;;  %v6702_v22 = vpack.i.bf16 %v8987_v53, %v3330_v0  ;;  %v3087_v53 = vld [vmem:[#allocation2 + $0x90] sm:$0xff] }
 0x6c4   : > { %v6371_v61 = vunpack.i.h.bf16 %v6369_v48  ;;  %v6370_v6 = vunpack.i.l.bf16 %v6369_v48  ;;  %4556 = vmatmul.mubr.f32.gmra.mrb[54].mxu0 %v4203_v54  ;;  %6663 = vrot.lane.b32.xlu1 %v6662_v13, %s6779_s22  ;;  %v3214_v54 = vld [vmem:[#allocation2 + $0x99] sm:$0xff] }
 0x6c5   : > { %6658 = vrot.lane.b32.xlu0 %v6657_v20, %s9411_s24  ;;  %v3170_v13 = vld [vmem:[#allocation2 + $0x172] sm:$0xff] }
 0x6c6   : > { %v6384_v2 = vpop.permute.xlu1 %6383  ;;  %v4268_v9 = vsel %vm1922_vm5, %v4236_v3, %v6370_v6  ;;  %v4172_v15 = vsel %vm1922_vm5, %v4140_v51, %v6371_v61  ;;  %v6697_v38 = vpack.i.bf16 %v3170_v13, %v3298_v43 }
 0x6c7   : > { %v6379_v5 = vpop.permute.xlu0 %6378  ;;  %v4300_v35 = vsel %vm1955_vm6, %v4268_v9, %v6375_v45  ;;  %v4204_v57 = vsel %vm1955_vm6, %v4172_v15, %v6376_v27  ;;  %v6386_v39 = vunpack.i.h.bf16 %v6384_v2  ;;  %v6385_v24 = vunpack.i.l.bf16 %v6384_v2  ;;  %v3086_v27 = vld [vmem:[#allocation2 + $0x80] sm:$0xff]  ;;  %v3215_v15 = vld [vmem:[#allocation2 + $0xa9] sm:$0xff] }
 0x6c8   : > { %v6381_v26 = vunpack.i.h.bf16 %v6379_v5  ;;  %v6380_v8 = vunpack.i.l.bf16 %v6379_v5  ;;  %4560 = vmatprep.mubr.f32.mxu0 %v4300_v35  ;;  %6673 = vrot.lane.b32.xlu1 %v6672_v47, %s9411_s24 }
 0x6c9   : > { %6668 = vrot.lane.b32.xlu0 %v6667_v21, %s6781_s12  ;;  %4561 = vmatmul.mubr.f32.gmra.mrb[56].mxu0 %v4204_v57 }
 0x6ca   : > { %v6394_v41 = vpop.permute.xlu1 %6393  ;;  %v4237_v59 = vsel %vm304_vm0, %v3213_v52, %v6380_v8  ;;  %v4141_v16 = vsel %vm304_vm0, %v3085_v50, %v6381_v26 }
 0x6cb   : > { %v6389_v30 = vpop.permute.xlu0 %6388  ;;  %v6396_v62 = vunpack.i.h.bf16 %v6394_v41  ;;  %v6395_v28 = vunpack.i.l.bf16 %v6394_v41  ;;  %v4269_v37 = vsel %vm1922_vm5, %v4237_v59, %v6385_v24  ;;  %v4173_v4 = vsel %vm1922_vm5, %v4141_v16, %v6386_v39  ;;  %v3216_v16 = vld [vmem:[#allocation2 + $0xb1] sm:$0xff] }
 0x6cc   : > { %v6391_v10 = vunpack.i.h.bf16 %v6389_v30  ;;  %v6390_v17 = vunpack.i.l.bf16 %v6389_v30  ;;  %6683 = vrot.lane.b32.xlu1 %v6682_v29, %s6781_s12  ;;  %v3088_v30 = vld [vmem:[#allocation2 + $0x98] sm:$0xff] }
 0x6cd   : > { %6678 = vrot.lane.b32.xlu0 %v6677_v63, %s6779_s22  ;;  %v4238_v45 = vsel %vm304_vm0, %v3214_v54, %v6395_v28  ;;  %v4142_v48 = vsel %vm304_vm0, %v3086_v27, %v6396_v62 }
 0x6ce   : > { %v6404_v25 = vpop.permute.xlu1 %6403  ;;  %v4301_v44 = vsel %vm1955_vm6, %v4269_v37, %v6390_v17  ;;  %v4205_v11 = vsel %vm1955_vm6, %v4173_v4, %v6391_v10 }
 0x6cf   : > { %v6406_v60 = vunpack.i.h.bf16 %v6404_v25  ;;  %v6405_v46 = vunpack.i.l.bf16 %v6404_v25  ;;  %v6399_v42 = vpop.permute.xlu0 %6398  ;;  %4565 = vmatprep.mubr.f32.mxu0 %v4301_v44 }
 0x6d0   : > { %v6401_v23 = vunpack.i.h.bf16 %v6399_v42  ;;  %v6400_v19 = vunpack.i.l.bf16 %v6399_v42  ;;  %4566 = vmatmul.mubr.f32.gmra.mrb[58].mxu0 %v4205_v11  ;;  %6693 = vrot.lane.b32.xlu1 %v6692_v56, %s6779_s22  ;;  %v3217_v56 = vld [vmem:[#allocation2 + $0xc1] sm:$0xff]  ;;  %s296_s22 = sand.u32 1, %s6765_s28  }
 0x6d1   : > { %6688 = vrot.lane.b32.xlu0 %v6687_v36, %s9411_s24  ;;  %s9357_s9 = scalar_lea.sflag [#allocation4], %s296_s22 }
 0x6d2   : > { %v6414_v20 = vpop.permute.xlu1 %6413  ;;  %v4270_v34 = vsel %vm1922_vm5, %v4238_v45, %v6400_v19  ;;  %v4174_v61 = vsel %vm1922_vm5, %v4142_v48, %v6401_v23 }
 0x6d3   : > { %v6409_v6 = vpop.permute.xlu0 %6408  ;;  %v4302_v32 = vsel %vm1955_vm6, %v4270_v34, %v6405_v46  ;;  %v4206_v3 = vsel %vm1955_vm6, %v4174_v61, %v6406_v60  ;;  %v6416_v9 = vunpack.i.h.bf16 %v6414_v20  ;;  %v6415_v47 = vunpack.i.l.bf16 %v6414_v20  ;;  %v3089_v60 = vld [vmem:[#allocation2 + $0xa8] sm:$0xff] }
 0x6d4   : > { %v6411_v51 = vunpack.i.h.bf16 %v6409_v6  ;;  %v6410_v2 = vunpack.i.l.bf16 %v6409_v6  ;;  %4570 = vmatprep.mubr.f32.mxu0 %v4302_v32  ;;  %6703 = vrot.lane.b32.xlu1 %v6702_v22, %s9411_s24  ;;  %s9348_s24 = scalar_lea.hbm %s9406_s8, %s5090_s17 }
 0x6d5   : > { %6698 = vrot.lane.b32.xlu0 %v6697_v38, %s6781_s12  ;;  %4571 = vmatmul.mubr.f32.gmra.mrb[60].mxu0 %v4206_v3  ;;  %v3218_v38 = vld [vmem:[#allocation2 + $0xc9] sm:$0xff]  ;;  %s5013_s12 = sshll.u32 %s296_s22, 8 }
 0x6d6   : > { %v6424_v5 = vpop.permute.xlu1 %6423  ;;  %v4239_v35 = vsel %vm304_vm0, %v3215_v15, %v6410_v2  ;;  %v4143_v21 = vsel %vm304_vm0, %v3087_v53, %v6411_v51  ;;  %v3090_v3 = vld [vmem:[#allocation2 + $0xb0] sm:$0xff]  ;;  %s9215_s13 = scalar_lea.vmem [#allocation3], %s5013_s12 }
 0x6d7   : > { %v6419_v57 = vpop.permute.xlu0 %6418  ;;  %v6426_v26 = vunpack.i.h.bf16 %v6424_v5  ;;  %v6425_v8 = vunpack.i.l.bf16 %v6424_v5  ;;  %v4271_v55 = vsel %vm1922_vm5, %v4239_v35, %v6415_v47  ;;  %v4175_v12 = vsel %vm1922_vm5, %v4143_v21, %v6416_v9  ;;  %s4947_s18 = sshll.u32 %s9215_s13, 4  ;;  %s9350_s18 = int_to_ptr.vmem [resolvable:$true] %s4947_s18 }
 0x6d8   : > { %v6421_v1 = vunpack.i.h.bf16 %v6419_v57  ;;  %v6420_v40 = vunpack.i.l.bf16 %v6419_v57  ;;  %p6718_p0 = scmp.lt.s32.totalorder %s9350_s18, %s6716_s23 }
 0x6d9   : > { %v4240_v63 = vsel %vm304_vm0, %v3216_v16, %v6425_v8  ;;  %v4144_v7 = vsel %vm304_vm0, %v3088_v30, %v6426_v26 }
 0x6da   : > { %v6434_v31 = vpop.permute.xlu1 %6433  ;;  %v4303_v39 = vsel %vm1955_vm6, %v4271_v55, %v6420_v40  ;;  %v4207_v24 = vsel %vm1955_vm6, %v4175_v12, %v6421_v1  ;;  %v3219_v55 = vld [vmem:[#allocation2 + $0xd9] sm:$0xff] }
 0x6db   : > { %v6436_v52 = vunpack.i.h.bf16 %v6434_v31  ;;  %v6435_v50 = vunpack.i.l.bf16 %v6434_v31  ;;  %v6429_v41 = vpop.permute.xlu0 %6428  ;;  %4575 = vmatprep.mubr.f32.mxu0 %v4303_v39  ;;  %v3091_v12 = vld [vmem:[#allocation2 + $0xc0] sm:$0xff] }
 0x6dc   : > { %v6431_v29 = vunpack.i.h.bf16 %v6429_v41  ;;  %v6430_v59 = vunpack.i.l.bf16 %v6429_v41  ;;  %4576 = vmatmul.mubr.f32.gmra.mrb[62].mxu0 %v4207_v24 }
 0x6de   : > { %v6444_v10 = vpop.permute.xlu1 %6443  ;;  %v4272_v17 = vsel %vm1922_vm5, %v4240_v63, %v6430_v59  ;;  %v4176_v18 = vsel %vm1922_vm5, %v4144_v7, %v6431_v29 }
 0x6df   : > { %v6439_v62 = vpop.permute.xlu0 %6438  ;;  %v4304_v28 = vsel %vm1955_vm6, %v4272_v17, %v6435_v50  ;;  %v4208_v37 = vsel %vm1955_vm6, %v4176_v18, %v6436_v52  ;;  %v6446_v44 = vunpack.i.h.bf16 %v6444_v10  ;;  %v6445_v11 = vunpack.i.l.bf16 %v6444_v10 }
 0x6e0   : > { %v6441_v4 = vunpack.i.h.bf16 %v6439_v62  ;;  %v6440_v25 = vunpack.i.l.bf16 %v6439_v62  ;;  %4580 = vmatprep.mubr.f32.mxu0 %v4304_v28 }
 0x6e1   : > { %4581 = vmatmul.mubr.f32.gmra.mrb[64].mxu0 %v4208_v37 }
 0x6e2   : > { %v6454_v46 = vpop.permute.xlu1 %6453  ;;  %v4241_v42 = vsel %vm304_vm0, %v3217_v56, %v6440_v25  ;;  %v4145_v36 = vsel %vm304_vm0, %v3089_v60, %v6441_v4  ;;  %v3220_v56 = vld [vmem:[#allocation2 + $0xe1] sm:$0xff] }
 0x6e3   : > { %v6449_v0 = vpop.permute.xlu0 %6448  ;;  %v6456_v19 = vunpack.i.h.bf16 %v6454_v46  ;;  %v6455_v54 = vunpack.i.l.bf16 %v6454_v46  ;;  %v4273_v13 = vsel %vm1922_vm5, %v4241_v42, %v6445_v11  ;;  %v4177_v27 = vsel %vm1922_vm5, %v4145_v36, %v6446_v44  ;;  %v3092_v60 = vld [vmem:[#allocation2 + $0xc8] sm:$0xff] }
 0x6e4   : > { %v6451_v43 = vunpack.i.h.bf16 %v6449_v0  ;;  %v6450_v23 = vunpack.i.l.bf16 %v6449_v0 }
 0x6e5   : > { %v4242_v51 = vsel %vm304_vm0, %v3218_v38, %v6455_v54  ;;  %v4146_v2 = vsel %vm304_vm0, %v3090_v3, %v6456_v19 }
 0x6e6   : > { %v6464_v45 = vpop.permute.xlu1 %6463  ;;  %v4305_v48 = vsel %vm1955_vm6, %v4273_v13, %v6450_v23  ;;  %v4209_v20 = vsel %vm1955_vm6, %v4177_v27, %v6451_v43 }
 0x6e7   : > { %v6466_v34 = vunpack.i.h.bf16 %v6464_v45  ;;  %v6465_v22 = vunpack.i.l.bf16 %v6464_v45  ;;  %v6459_v61 = vpop.permute.xlu0 %6458  ;;  %4585 = vmatprep.mubr.f32.mxu0 %v4305_v48 }
 0x6e8   : > { %v6461_v6 = vunpack.i.h.bf16 %v6459_v61  ;;  %v6460_v32 = vunpack.i.l.bf16 %v6459_v61  ;;  %4586 = vmatmul.mubr.f32.gmra.mrb[66].mxu0 %v4209_v20  ;;  %v3093_v61 = vld [vmem:[#allocation2 + $0xd8] sm:$0xff] }
 0x6ea   : > { %v6474_v47 = vpop.permute.xlu1 %6473  ;;  %v4274_v15 = vsel %vm1922_vm5, %v4242_v51, %v6460_v32  ;;  %v4178_v53 = vsel %vm1922_vm5, %v4146_v2, %v6461_v6 }
 0x6eb   : > { %v9045_v9 = vpop.f32.mrb[70].mxu1  ;;  %v6469_v5 = vpop.permute.xlu0 %6468  ;;  %v4306_v35 = vsel %vm1955_vm6, %v4274_v15, %v6465_v22  ;;  %v4210_v57 = vsel %vm1955_vm6, %v4178_v53, %v6466_v34  ;;  %v6476_v26 = vunpack.i.h.bf16 %v6474_v47  ;;  %v6475_v8 = vunpack.i.l.bf16 %v6474_v47  ;;  %v3221_v22 = vld [vmem:[#allocation2 + $0xf1] sm:$0xff] }
 0x6ec   : > { %v9050_v21 = vpop.f32.mrb[71].mxu1  ;;  %v6471_v1 = vunpack.i.h.bf16 %v6469_v5  ;;  %v6470_v40 = vunpack.i.l.bf16 %v6469_v5  ;;  %4590 = vmatprep.mubr.f32.mxu0 %v4306_v35 }
 0x6ed   : > { %4591 = vmatmul.mubr.f32.gmra.mrb[68].mxu0 %v4210_v57 }
 0x6ee   : > { %v6484_v39 = vpop.permute.xlu1 %6483  ;;  %v4243_v24 = vsel %vm304_vm0, %v3219_v55, %v6470_v40  ;;  %v4147_v52 = vsel %vm304_vm0, %v3091_v12, %v6471_v1 }
 0x6ef   : > { %v9053_v31 = vpop.f32.mrb[72].mxu1  ;;  %v6479_v50 = vpop.permute.xlu0 %6478  ;;  %v6486_v16 = vunpack.i.h.bf16 %v6484_v39  ;;  %v6485_v30 = vunpack.i.l.bf16 %v6484_v39  ;;  %v4275_v63 = vsel %vm1922_vm5, %v4243_v24, %v6475_v8  ;;  %v4179_v7 = vsel %vm1922_vm5, %v4147_v52, %v6476_v26 }
 0x6f0   : > { %v9057_v41 = vpop.f32.mrb[73].mxu1  ;;  %v6481_v29 = vunpack.i.h.bf16 %v6479_v50  ;;  %v6480_v59 = vunpack.i.l.bf16 %v6479_v50 }
 0x6f1   : > { %v4244_v46 = vsel %vm304_vm0, %v3220_v56, %v6485_v30  ;;  %v4148_v42 = vsel %vm304_vm0, %v3092_v60, %v6486_v16 }
 0x6f2   : > { %v6494_v17 = vpop.permute.xlu1 %6493  ;;  %v4307_v18 = vsel %vm1955_vm6, %v4275_v63, %v6480_v59  ;;  %v4211_v62 = vsel %vm1955_vm6, %v4179_v7, %v6481_v29  ;;  %v3222_v29 = vld [vmem:[#allocation2 + $0xf9] sm:$0xff] }
 0x6f3   : > { %v9061_v10 = vpop.f32.mrb[74].mxu1  ;;  %v6496_v28 = vunpack.i.h.bf16 %v6494_v17  ;;  %v6495_v37 = vunpack.i.l.bf16 %v6494_v17  ;;  %v6489_v4 = vpop.permute.xlu0 %6488  ;;  %4595 = vmatprep.mubr.f32.mxu0 %v4307_v18  ;;  %v3094_v59 = vld [vmem:[#allocation2 + $0xe0] sm:$0xff] }
 0x6f4   : > { %v9065_v25 = vpop.f32.mrb[75].mxu1  ;;  %v6491_v44 = vunpack.i.h.bf16 %v6489_v4  ;;  %v6490_v11 = vunpack.i.l.bf16 %v6489_v4  ;;  %4596 = vmatmul.mubr.f32.gmra.mrb[70].mxu0 %v4211_v62 }
 0x6f6   : > { %v6504_v0 = vpop.permute.xlu1 %6503  ;;  %v4276_v43 = vsel %vm1922_vm5, %v4244_v46, %v6490_v11  ;;  %v4180_v23 = vsel %vm1922_vm5, %v4148_v42, %v6491_v44  ;;  %v3223_v46 = vld [vmem:[#allocation2 + $0x109] sm:$0xff] }
 0x6f7   : > { %v9069_v36 = vpop.f32.mrb[76].mxu1  ;;  %v6499_v19 = vpop.permute.xlu0 %6498  ;;  %v4308_v54 = vsel %vm1955_vm6, %v4276_v43, %v6495_v37  ;;  %v4212_v27 = vsel %vm1955_vm6, %v4180_v23, %v6496_v28  ;;  %v6506_v20 = vunpack.i.h.bf16 %v6504_v0  ;;  %v6505_v34 = vunpack.i.l.bf16 %v6504_v0  ;;  %v3095_v42 = vld [vmem:[#allocation2 + $0xf0] sm:$0xff] }
 0x6f8   : > { %v9074_v13 = vpop.f32.mrb[77].mxu1  ;;  %v6501_v45 = vunpack.i.h.bf16 %v6499_v19  ;;  %v6500_v48 = vunpack.i.l.bf16 %v6499_v19  ;;  %4600 = vmatprep.mubr.f32.mxu0 %v4308_v54 }
 0x6f9   : > { %4601 = vmatmul.mubr.f32.gmra.mrb[72].mxu0 %v4212_v27 }
 0x6fa   : > { %v6514_v32 = vpop.permute.xlu1 %6513  ;;  %v4245_v38 = vsel %vm304_vm0, %v3221_v22, %v6500_v48  ;;  %v4149_v3 = vsel %vm304_vm0, %v3093_v61, %v6501_v45 }
 0x6fb   : > { %v9077_v6 = vpop.f32.mrb[78].mxu1  ;;  %v6509_v51 = vpop.permute.xlu0 %6508  ;;  %v6516_v53 = vunpack.i.h.bf16 %v6514_v32  ;;  %v6515_v5 = vunpack.i.l.bf16 %v6514_v32  ;;  %v4277_v35 = vsel %vm1922_vm5, %v4245_v38, %v6505_v34  ;;  %v4181_v57 = vsel %vm1922_vm5, %v4149_v3, %v6506_v20 }
 0x6fc   : > { %v9081_v2 = vpop.f32.mrb[79].mxu1  ;;  %v6511_v47 = vunpack.i.h.bf16 %v6509_v51  ;;  %v6510_v15 = vunpack.i.l.bf16 %v6509_v51 }
 0x6fd   : > { %v4246_v16 = vsel %vm304_vm0, %v3222_v29, %v6515_v5  ;;  %v4150_v30 = vsel %vm304_vm0, %v3094_v59, %v6516_v53 }
 0x6fe   : > { %v6524_v40 = vpop.permute.xlu1 %6523  ;;  %v4309_v26 = vsel %vm1955_vm6, %v4277_v35, %v6510_v15  ;;  %v4213_v8 = vsel %vm1955_vm6, %v4181_v57, %v6511_v47 }
 0x6ff   : > { %v9085_v1 = vpop.f32.mrb[80].mxu1  ;;  %v6526_v55 = vunpack.i.h.bf16 %v6524_v40  ;;  %v6525_v12 = vunpack.i.l.bf16 %v6524_v40  ;;  %v6519_v39 = vpop.permute.xlu0 %6518  ;;  %4605 = vmatprep.mubr.f32.mxu0 %v4309_v26  ;;  %v3224_v40 = vld [vmem:[#allocation2 + $0x111] sm:$0xff] }
 0x700   : > { %v9089_v24 = vpop.f32.mrb[81].mxu1  ;;  %v6521_v52 = vunpack.i.h.bf16 %v6519_v39  ;;  %v6520_v50 = vunpack.i.l.bf16 %v6519_v39  ;;  %4606 = vmatmul.mubr.f32.gmra.mrb[74].mxu0 %v4213_v8  ;;  %v3096_v26 = vld [vmem:[#allocation2 + $0xf8] sm:$0xff] }
 0x702   : > { %v6534_v7 = vpop.permute.xlu1 %6533  ;;  %v4278_v17 = vsel %vm1922_vm5, %v4246_v16, %v6520_v50  ;;  %v4182_v18 = vsel %vm1922_vm5, %v4150_v30, %v6521_v52 }
 0x703   : > { %v9093_v63 = vpop.f32.mrb[82].mxu1  ;;  %v6529_v62 = vpop.permute.xlu0 %6528  ;;  %v4310_v28 = vsel %vm1955_vm6, %v4278_v17, %v6525_v12  ;;  %v4214_v4 = vsel %vm1955_vm6, %v4182_v18, %v6526_v55  ;;  %v6536_v56 = vunpack.i.h.bf16 %v6534_v7  ;;  %v6535_v60 = vunpack.i.l.bf16 %v6534_v7 }
 0x704   : > { %v9098_v37 = vpop.f32.mrb[83].mxu1  ;;  %v6531_v44 = vunpack.i.h.bf16 %v6529_v62  ;;  %v6530_v11 = vunpack.i.l.bf16 %v6529_v62  ;;  %4610 = vmatprep.mubr.f32.mxu0 %v4310_v28  ;;  %v3225_v28 = vld [vmem:[#allocation2 + $0x121] sm:$0xff] }
 0x705   : > { %4611 = vmatmul.mubr.f32.gmra.mrb[76].mxu0 %v4214_v4  ;;  %v3097_v4 = vld [vmem:[#allocation2 + $0x108] sm:$0xff] }
 0x706   : > { %v6544_v43 = vpop.permute.xlu1 %6543  ;;  %v4247_v23 = vsel %vm304_vm0, %v3223_v46, %v6530_v11  ;;  %v4151_v19 = vsel %vm304_vm0, %v3095_v42, %v6531_v44 }
 0x707   : > { %v9101_v0 = vpop.f32.mrb[84].mxu1  ;;  %v6539_v54 = vpop.permute.xlu0 %6538  ;;  %v6546_v20 = vunpack.i.h.bf16 %v6544_v43  ;;  %v6545_v34 = vunpack.i.l.bf16 %v6544_v43  ;;  %v4279_v22 = vsel %vm1922_vm5, %v4247_v23, %v6535_v60  ;;  %v4183_v61 = vsel %vm1922_vm5, %v4151_v19, %v6536_v56 }
 0x708   : > { %v9105_v27 = vpop.f32.mrb[85].mxu1  ;;  %v6541_v45 = vunpack.i.h.bf16 %v6539_v54  ;;  %v6540_v48 = vunpack.i.l.bf16 %v6539_v54 }
 0x709   : > { %v4248_v8 = vsel %vm304_vm0, %v3224_v40, %v6545_v34  ;;  %v4152_v55 = vsel %vm304_vm0, %v3096_v26, %v6546_v20 }
 0x70a   : > { %v6554_v38 = vpop.permute.xlu1 %6553  ;;  %v4311_v3 = vsel %vm1955_vm6, %v4279_v22, %v6540_v48  ;;  %v4215_v51 = vsel %vm1955_vm6, %v4183_v61, %v6541_v45 }
 0x70b   : > { %v9109_v32 = vpop.f32.mrb[86].mxu1  ;;  %v6556_v47 = vunpack.i.h.bf16 %v6554_v38  ;;  %v6555_v15 = vunpack.i.l.bf16 %v6554_v38  ;;  %v6549_v53 = vpop.permute.xlu0 %6548  ;;  %4615 = vmatprep.mubr.f32.mxu0 %v4311_v3 }
 0x70c   : > { %v9113_v5 = vpop.f32.mrb[87].mxu1  ;;  %v6551_v35 = vunpack.i.h.bf16 %v6549_v53  ;;  %v6550_v57 = vunpack.i.l.bf16 %v6549_v53  ;;  %4616 = vmatmul.mubr.f32.gmra.mrb[78].mxu0 %v4215_v51 }
 0x70e   : > { %v6564_v39 = vpop.permute.xlu1 %6563  ;;  %v4280_v52 = vsel %vm1922_vm5, %v4248_v8, %v6550_v57  ;;  %v4184_v50 = vsel %vm1922_vm5, %v4152_v55, %v6551_v35  ;;  %v3226_v35 = vld [vmem:[#allocation2 + $0x129] sm:$0xff] }
 0x70f   : > { %v9117_v12 = vpop.f32.mrb[88].mxu1  ;;  %v6559_v29 = vpop.permute.xlu0 %6558  ;;  %v4312_v59 = vsel %vm1955_vm6, %v4280_v52, %v6555_v15  ;;  %v4216_v30 = vsel %vm1955_vm6, %v4184_v50, %v6556_v47  ;;  %v6566_v18 = vunpack.i.h.bf16 %v6564_v39  ;;  %v6565_v62 = vunpack.i.l.bf16 %v6564_v39  ;;  %v3098_v57 = vld [vmem:[#allocation2 + $0x110] sm:$0xff] }
 0x710   : > { %v9122_v16 = vpop.f32.mrb[89].mxu1  ;;  %v6561_v7 = vunpack.i.h.bf16 %v6559_v29  ;;  %v6560_v17 = vunpack.i.l.bf16 %v6559_v29  ;;  %4620 = vmatprep.mubr.f32.mxu0 %v4312_v59 }
 0x711   : > { %4621 = vmatmul.mubr.f32.gmra.mrb[80].mxu0 %v4216_v30 }
 0x712   : > { %v6574_v11 = vpop.permute.xlu1 %6573  ;;  %v4249_v56 = vsel %vm304_vm0, %v3225_v28, %v6560_v17  ;;  %v4153_v60 = vsel %vm304_vm0, %v3097_v4, %v6561_v7  ;;  %v3227_v28 = vld [vmem:[#allocation2 + $0x139] sm:$0xff] }
 0x713   : > { %v9125_v44 = vpop.f32.mrb[90].mxu1  ;;  %v6569_v46 = vpop.permute.xlu0 %6568  ;;  %v6576_v19 = vunpack.i.h.bf16 %v6574_v11  ;;  %v6575_v54 = vunpack.i.l.bf16 %v6574_v11  ;;  %v4281_v45 = vsel %vm1922_vm5, %v4249_v56, %v6565_v62  ;;  %v4185_v48 = vsel %vm1922_vm5, %v4153_v60, %v6566_v18  ;;  %v3099_v4 = vld [vmem:[#allocation2 + $0x120] sm:$0xff] }
 0x714   : > { %v9129_v42 = vpop.f32.mrb[91].mxu1  ;;  %v6571_v43 = vunpack.i.h.bf16 %v6569_v46  ;;  %v6570_v23 = vunpack.i.l.bf16 %v6569_v46 }
 0x715   : > { %v4250_v40 = vsel %vm304_vm0, %v3226_v35, %v6575_v54  ;;  %v4154_v26 = vsel %vm304_vm0, %v3098_v57, %v6576_v19 }
 0x716   : > { %v6584_v34 = vpop.permute.xlu1 %6583  ;;  %v4313_v22 = vsel %vm1955_vm6, %v4281_v45, %v6570_v23  ;;  %v4217_v61 = vsel %vm1955_vm6, %v4185_v48, %v6571_v43 }
 0x717   : > { %v9133_v20 = vpop.f32.mrb[92].mxu1  ;;  %v6586_v38 = vunpack.i.h.bf16 %v6584_v34  ;;  %v6585_v3 = vunpack.i.l.bf16 %v6584_v34  ;;  %v6579_v51 = vpop.permute.xlu0 %6578  ;;  %4625 = vmatprep.mubr.f32.mxu0 %v4313_v22 }
 0x718   : > { %v9137_v47 = vpop.f32.mrb[93].mxu1  ;;  %v6581_v15 = vunpack.i.h.bf16 %v6579_v51  ;;  %v6580_v53 = vunpack.i.l.bf16 %v6579_v51  ;;  %4626 = vmatmul.mubr.f32.gmra.mrb[82].mxu0 %v4217_v61 }
 0x71a   : > { %v6594_v55 = vpop.permute.xlu1 %6593  ;;  %v4282_v39 = vsel %vm1922_vm5, %v4250_v40, %v6580_v53  ;;  %v4186_v52 = vsel %vm1922_vm5, %v4154_v26, %v6581_v15 }
 0x71b   : > { %v9141_v8 = vpop.f32.mrb[94].mxu1  ;;  %v6589_v50 = vpop.permute.xlu0 %6588  ;;  %v4314_v29 = vsel %vm1955_vm6, %v4282_v39, %v6585_v3  ;;  %v4218_v30 = vsel %vm1955_vm6, %v4186_v52, %v6586_v38  ;;  %v6596_v18 = vunpack.i.h.bf16 %v6594_v55  ;;  %v6595_v62 = vunpack.i.l.bf16 %v6594_v55  ;;  %v3228_v55 = vld [vmem:[#allocation2 + $0x141] sm:$0xff] }
 0x71c   : > { %v9146_v59 = vpop.f32.mrb[95].mxu1  ;;  %v6591_v7 = vunpack.i.h.bf16 %v6589_v50  ;;  %v6590_v17 = vunpack.i.l.bf16 %v6589_v50  ;;  %4630 = vmatprep.mubr.f32.mxu0 %v4314_v29  ;;  %v3100_v39 = vld [vmem:[#allocation2 + $0x128] sm:$0xff] }
 0x71d   : > { %4631 = vmatmul.mubr.f32.gmra.mrb[84].mxu0 %v4218_v30 }
 0x71e   : > { %v6604_v56 = vpop.permute.xlu1 %6603  ;;  %v4251_v60 = vsel %vm304_vm0, %v3227_v28, %v6590_v17  ;;  %v4155_v46 = vsel %vm304_vm0, %v3099_v4, %v6591_v7 }
 0x71f   : > { %v9149_v11 = vpop.f32.mrb[96].mxu1  ;;  %v6599_v43 = vpop.permute.xlu0 %6598  ;;  %v6606_v45 = vunpack.i.h.bf16 %v6604_v56  ;;  %v6605_v48 = vunpack.i.l.bf16 %v6604_v56  ;;  %v4283_v34 = vsel %vm1922_vm5, %v4251_v60, %v6595_v62  ;;  %v4187_v22 = vsel %vm1922_vm5, %v4155_v46, %v6596_v18  ;;  %v3229_v46 = vld [vmem:[#allocation2 + $0x151] sm:$0xff] }
 0x720   : > { %v9153_v23 = vpop.f32.mrb[97].mxu1  ;;  %v6601_v19 = vunpack.i.h.bf16 %v6599_v43  ;;  %v6600_v54 = vunpack.i.l.bf16 %v6599_v43  ;;  %v3101_v43 = vld [vmem:[#allocation2 + $0x138] sm:$0xff] }
 0x721   : > { %v4252_v52 = vsel %vm304_vm0, %v3228_v55, %v6605_v48  ;;  %v4156_v50 = vsel %vm304_vm0, %v3100_v39, %v6606_v45 }
 0x722   : > { %v6614_v38 = vpop.permute.xlu1 %6613  ;;  %v4315_v3 = vsel %vm1955_vm6, %v4283_v34, %v6600_v54  ;;  %v4219_v51 = vsel %vm1955_vm6, %v4187_v22, %v6601_v19 }
 0x723   : > { %v9157_v61 = vpop.f32.mrb[98].mxu1  ;;  %v6616_v15 = vunpack.i.h.bf16 %v6614_v38  ;;  %v6615_v53 = vunpack.i.l.bf16 %v6614_v38  ;;  %v6609_v35 = vpop.permute.xlu0 %6608  ;;  %4635 = vmatprep.mubr.f32.mxu0 %v4315_v3 }
 0x724   : > { %v9161_v57 = vpop.f32.mrb[99].mxu1  ;;  %v6611_v40 = vunpack.i.h.bf16 %v6609_v35  ;;  %v6610_v26 = vunpack.i.l.bf16 %v6609_v35  ;;  %4636 = vmatmul.mubr.f32.gmra.mrb[86].mxu0 %v4219_v51 }
 0x726   : > { %v6624_v29 = vpop.permute.xlu1 %6623  ;;  %v4284_v30 = vsel %vm1922_vm5, %v4252_v52, %v6610_v26  ;;  %v4188_v7 = vsel %vm1922_vm5, %v4156_v50, %v6611_v40 }
 0x727   : > { %v6619_v17 = vpop.permute.xlu0 %6618  ;;  %v4316_v18 = vsel %vm1955_vm6, %v4284_v30, %v6615_v53  ;;  %v4220_v62 = vsel %vm1955_vm6, %v4188_v7, %v6616_v15  ;;  %v6626_v56 = vunpack.i.h.bf16 %v6624_v29  ;;  %v6625_v60 = vunpack.i.l.bf16 %v6624_v29  ;;  %v3230_v29 = vld [vmem:[#allocation2 + $0x159] sm:$0xff] }
 0x728   : > { %v6621_v28 = vunpack.i.h.bf16 %v6619_v17  ;;  %v6620_v4 = vunpack.i.l.bf16 %v6619_v17  ;;  %4640 = vmatprep.mubr.f32.mxu0 %v4316_v18  ;;  %v3102_v30 = vld [vmem:[#allocation2 + $0x140] sm:$0xff] }
 0x729   : > { %4641 = vmatmul.mubr.f32.gmra.mrb[88].mxu0 %v4220_v62 }
 0x72a   : > { %v6634_v19 = vpop.permute.xlu1 %6633  ;;  %v4253_v54 = vsel %vm304_vm0, %v3229_v46, %v6620_v4  ;;  %v4157_v45 = vsel %vm304_vm0, %v3101_v43, %v6621_v28 }
 0x72b   : > { %v6629_v48 = vpop.permute.xlu0 %6628  ;;  %v6636_v38 = vunpack.i.h.bf16 %v6634_v19  ;;  %v6635_v3 = vunpack.i.l.bf16 %v6634_v19  ;;  %v4285_v51 = vsel %vm1922_vm5, %v4253_v54, %v6625_v60  ;;  %v4189_v15 = vsel %vm1922_vm5, %v4157_v45, %v6626_v56  ;;  %v3103_v45 = vld [vmem:[#allocation2 + $0x150] sm:$0xff] }
 0x72c   : > { %v6631_v34 = vunpack.i.h.bf16 %v6629_v48  ;;  %v6630_v22 = vunpack.i.l.bf16 %v6629_v48 }
 0x72d   : > { %v4254_v7 = vsel %vm304_vm0, %v3230_v29, %v6635_v3  ;;  %v4158_v17 = vsel %vm304_vm0, %v3102_v30, %v6636_v38 }
 0x72e   : > { %v6644_v53 = vpop.permute.xlu1 %6643  ;;  %v4317_v35 = vsel %vm1955_vm6, %v4285_v51, %v6630_v22  ;;  %v4221_v40 = vsel %vm1955_vm6, %v4189_v15, %v6631_v34 }
 0x72f   : > { %v6646_v26 = vunpack.i.h.bf16 %v6644_v53  ;;  %v6645_v55 = vunpack.i.l.bf16 %v6644_v53  ;;  %v6639_v39 = vpop.permute.xlu0 %6638  ;;  %4645 = vmatprep.mubr.f32.mxu0 %v4317_v35 }
 0x730   : > { %v6641_v52 = vunpack.i.h.bf16 %v6639_v39  ;;  %v6640_v50 = vunpack.i.l.bf16 %v6639_v39  ;;  %4646 = vmatmul.mubr.f32.gmra.mrb[90].mxu0 %v4221_v40 }
 0x732   : > { %v6654_v18 = vpop.permute.xlu1 %6653  ;;  %v4286_v62 = vsel %vm1922_vm5, %v4254_v7, %v6640_v50  ;;  %v4190_v28 = vsel %vm1922_vm5, %v4158_v17, %v6641_v52  ;;  %v3104_v7 = vld [vmem:[#allocation2 + $0x158] sm:$0xff] }
 0x733   : > { %v6649_v4 = vpop.permute.xlu0 %6648  ;;  %v4318_v56 = vsel %vm1955_vm6, %v4286_v62, %v6645_v55  ;;  %v4222_v60 = vsel %vm1955_vm6, %v4190_v28, %v6646_v26  ;;  %v6656_v19 = vunpack.i.h.bf16 %v6654_v18  ;;  %v6655_v54 = vunpack.i.l.bf16 %v6654_v18 }
 0x734   : > { %v6651_v46 = vunpack.i.h.bf16 %v6649_v4  ;;  %v6650_v43 = vunpack.i.l.bf16 %v6649_v4  ;;  %4650 = vmatprep.mubr.f32.mxu0 %v4318_v56 }
 0x735   : > { %4651 = vmatmul.mubr.f32.gmra.mrb[92].mxu0 %v4222_v60 }
 0x736   : > { %v6664_v48 = vpop.permute.xlu1 %6663  ;;  %v4255_v34 = vsel %vm304_vm0, %v8935_v33, %v6650_v43  ;;  %v4159_v22 = vsel %vm304_vm0, %v3103_v45, %v6651_v46 }
 0x737   : > { %v6659_v38 = vpop.permute.xlu0 %6658  ;;  %v6666_v15 = vunpack.i.h.bf16 %v6664_v48  ;;  %v6665_v53 = vunpack.i.l.bf16 %v6664_v48  ;;  %v4287_v35 = vsel %vm1922_vm5, %v4255_v34, %v6655_v54  ;;  %v4191_v40 = vsel %vm1922_vm5, %v4159_v22, %v6656_v19  ;;  %v3105_v48 = vld [vmem:[#allocation2 + $0x168] sm:$0xff] }
 0x738   : > { %v6661_v3 = vunpack.i.h.bf16 %v6659_v38  ;;  %v6660_v51 = vunpack.i.l.bf16 %v6659_v38 }
 0x739   : > { %v4256_v17 = vsel %vm304_vm0, %v8946_v14, %v6665_v53  ;;  %v4160_v18 = vsel %vm304_vm0, %v3104_v7, %v6666_v15 }
 0x73a   : > { %v6674_v26 = vpop.permute.xlu1 %6673  ;;  %v4319_v55 = vsel %vm1955_vm6, %v4287_v35, %v6660_v51  ;;  %v4223_v39 = vsel %vm1955_vm6, %v4191_v40, %v6661_v3 }
 0x73b   : > { %v6676_v52 = vunpack.i.h.bf16 %v6674_v26  ;;  %v6675_v50 = vunpack.i.l.bf16 %v6674_v26  ;;  %v6669_v29 = vpop.permute.xlu0 %6668  ;;  %4655 = vmatprep.mubr.f32.mxu0 %v4319_v55 }
 0x73c   : > { %v6671_v33 = vunpack.i.h.bf16 %v6669_v29  ;;  %v6670_v30 = vunpack.i.l.bf16 %v6669_v29  ;;  %4656 = vmatmul.mubr.f32.gmra.mrb[94].mxu0 %v4223_v39 }
 0x73e   : > { %v6684_v62 = vpop.permute.xlu1 %6683  ;;  %v4288_v28 = vsel %vm1922_vm5, %v4256_v17, %v6670_v30  ;;  %v4192_v4 = vsel %vm1922_vm5, %v4160_v18, %v6671_v33  ;;  %v3106_v30 = vld [vmem:[#allocation2 + $0x170] sm:$0xff] }
 0x73f   : > { %v6679_v56 = vpop.permute.xlu0 %6678  ;;  %v4320_v60 = vsel %vm1955_vm6, %v4288_v28, %v6675_v50  ;;  %v4224_v46 = vsel %vm1955_vm6, %v4192_v4, %v6676_v52  ;;  %v6686_v54 = vunpack.i.h.bf16 %v6684_v62  ;;  %v6685_v45 = vunpack.i.l.bf16 %v6684_v62 }
 0x740   : > { %v6681_v43 = vunpack.i.h.bf16 %v6679_v56  ;;  %v6680_v19 = vunpack.i.l.bf16 %v6679_v56  ;;  %4660 = vmatprep.mubr.f32.mxu0 %v4320_v60  ;;  %v4323_v56 = vld [vmem:[%s6885_s21] sm:$0xff] }
 0x741   : > { %4661 = vmatmul.mubr.f32.gmra.mrb[96].mxu0 %v4224_v46 }
 0x742   : > { %v6694_v14 = vpop.permute.xlu1 %6693  ;;  %v4257_v34 = vsel %vm304_vm0, %v8973_v49, %v6680_v19  ;;  %v4161_v22 = vsel %vm304_vm0, %v3105_v48, %v6681_v43  ;;  %v4324_v19 = vld [vmem:[%s6885_s21 + $0x8] sm:$0xff] }
 0x743   : > { %v6689_v38 = vpop.permute.xlu0 %6688  ;;  %v6696_v15 = vunpack.i.h.bf16 %v6694_v14  ;;  %v6695_v53 = vunpack.i.l.bf16 %v6694_v14  ;;  %v4289_v35 = vsel %vm1922_vm5, %v4257_v34, %v6685_v45  ;;  %v4193_v40 = vsel %vm1922_vm5, %v4161_v22, %v6686_v54  ;;  %v4325_v34 = vld [vmem:[%s6885_s21 + $0x10] sm:$0xff] }
 0x744   : > { %v6691_v3 = vunpack.i.h.bf16 %v6689_v38  ;;  %v6690_v51 = vunpack.i.l.bf16 %v6689_v38 }
 0x745   : > { %v4258_v7 = vsel %vm304_vm0, %v8984_v58, %v6695_v53  ;;  %v4162_v17 = vsel %vm304_vm0, %v3106_v30, %v6696_v15 }
 0x746   : > { %v6704_v26 = vpop.permute.xlu1 %6703  ;;  %v4321_v55 = vsel %vm1955_vm6, %v4289_v35, %v6690_v51  ;;  %v4225_v39 = vsel %vm1955_vm6, %v4193_v40, %v6691_v3  ;;  %v4326_v51 = vld [vmem:[%s6885_s21 + $0x18] sm:$0xff]  ;;  %v4327_v40 = vld [vmem:[%s6885_s21 + $0x20] sm:$0xff] }
 0x747   : > { %v6706_v52 = vunpack.i.h.bf16 %v6704_v26  ;;  %v6705_v50 = vunpack.i.l.bf16 %v6704_v26  ;;  %v6699_v49 = vpop.permute.xlu0 %6698  ;;  %4665 = vmatprep.mubr.f32.mxu0 %v4321_v55 }
 0x748   : > { %v6701_v29 = vunpack.i.h.bf16 %v6699_v49  ;;  %v6700_v33 = vunpack.i.l.bf16 %v6699_v49  ;;  %4666 = vmatmul.mubr.f32.gmra.mrb[98].mxu0 %v4225_v39 }
 0x74a   : > { %v4290_v18 = vsel %vm1922_vm5, %v4258_v7, %v6700_v33  ;;  %v4194_v62 = vsel %vm1922_vm5, %v4162_v17, %v6701_v29  ;;  %v4329_v33 = vld [vmem:[%s6885_s21 + $0x30] sm:$0xff] }
 0x74b   : > { %v4322_v28 = vsel %vm1955_vm6, %v4290_v18, %v6705_v50  ;;  %v4226_v4 = vsel %vm1955_vm6, %v4194_v62, %v6706_v52  ;;  %v4328_v52 = vld [vmem:[%s6885_s21 + $0x28] sm:$0xff]  ;;  %v4330_v18 = vld [vmem:[%s6885_s21 + $0x38] sm:$0xff] }
 0x74c   : > { %4670 = vmatprep.mubr.f32.mxu0 %v4322_v28 }
 0x74d   : > { %4671 = vmatmul.mubr.f32.gmra.mrb[100].mxu0 %v4226_v4 }
 0x767   : > { %v4517_v60 = vpop.f32.mrb[38].mxu0 }
 0x768   : > { %v4518_v46 = vadd.f32 %v4517_v60, %v4323_v56  ;;  %v4519_v58 = vpop.f32.mrb[39].mxu0 }
 0x76a   : > { %v4743_v43 = vadd.f32 %v9050_v21, %v4518_v46 }
 0x76c   : > { %4901 = vst.msk [vmem:[%s9215_s13] sm:$0xff] %vm304_vm0, %v4743_v43  ;;  %v4522_v54 = vpop.f32.mrb[40].mxu0 }
 0x76d   : > { %v4523_v45 = vadd.f32 %v4522_v54, %v4324_v19  ;;  %v4524_v48 = vpop.f32.mrb[41].mxu0 }
 0x76f   : > { %v4748_v14 = vadd.f32 %v9045_v9, %v4523_v45 }
 0x771   : > { %4902 = vst.msk [vmem:[%s9215_s13 + $0x8] sm:$0xff] %vm304_vm0, %v4748_v14 }
 0x773   : > { %v4527_v22 = vpop.f32.mrb[42].mxu0 }
 0x774   : > { %v4528_v21 = vadd.f32 %v4527_v22, %v4325_v34  ;;  %v4529_v38 = vpop.f32.mrb[43].mxu0  ;;  %v4333_v34 = vld [vmem:[%s6885_s21 + $0x50] sm:$0xff] }
 0x776   : > { %v4753_v3 = vadd.f32 %v9057_v41, %v4528_v21 }
 0x778   : > { %4903 = vst.msk [vmem:[%s9215_s13 + $0x10] sm:$0xff] %vm304_vm0, %v4753_v3  ;;  %v4532_v15 = vpop.f32.mrb[44].mxu0  ;;  %v4334_v3 = vld [vmem:[%s6885_s21 + $0x58] sm:$0xff] }
 0x779   : > { %v4533_v53 = vadd.f32 %v4532_v15, %v4326_v51  ;;  %v4534_v35 = vpop.f32.mrb[45].mxu0 }
 0x77a   : > { %v4335_v35 = vld [vmem:[%s6885_s21 + $0x60] sm:$0xff] }
 0x77b   : > { %v4758_v9 = vadd.f32 %v9053_v31, %v4533_v53 }
 0x77d   : > { %4904 = vst.msk [vmem:[%s9215_s13 + $0x18] sm:$0xff] %vm304_vm0, %v4758_v9 }
 0x77f   : > { %v4537_v26 = vpop.f32.mrb[46].mxu0 }
 0x780   : > { %v4538_v55 = vadd.f32 %v4537_v26, %v4327_v40  ;;  %v4539_v39 = vpop.f32.mrb[47].mxu0 }
 0x782   : > { %v4763_v41 = vadd.f32 %v9065_v25, %v4538_v55  ;;  %v4336_v55 = vld [vmem:[%s6885_s21 + $0x68] sm:$0xff] }
 0x784   : > { %4905 = vst.msk [vmem:[%s9215_s13 + $0x20] sm:$0xff] %vm304_vm0, %v4763_v41  ;;  %v4542_v50 = vpop.f32.mrb[48].mxu0 }
 0x785   : > { %v4543_v49 = vadd.f32 %v4542_v50, %v4328_v52  ;;  %v4544_v29 = vpop.f32.mrb[49].mxu0  ;;  %v4337_v50 = vld [vmem:[%s6885_s21 + $0x70] sm:$0xff] }
 0x787   : > { %v4768_v31 = vadd.f32 %v9061_v10, %v4543_v49  ;;  %v4331_v10 = vld [vmem:[%s6885_s21 + $0x40] sm:$0xff] }
 0x789   : > { %4906 = vst.msk [vmem:[%s9215_s13 + $0x28] sm:$0xff] %vm304_vm0, %v4768_v31 }
 0x78b   : > { %v4547_v30 = vpop.f32.mrb[50].mxu0 }
 0x78c   : > { %v4548_v7 = vadd.f32 %v4547_v30, %v4329_v33  ;;  %v4549_v17 = vpop.f32.mrb[51].mxu0  ;;  %v4338_v33 = vld [vmem:[%s6885_s21 + $0x78] sm:$0xff] }
 0x78e   : > { %v4773_v25 = vadd.f32 %v9074_v13, %v4548_v7  ;;  %v4332_v13 = vld [vmem:[%s6885_s21 + $0x48] sm:$0xff]  ;;  %v9251_v48 = vpop.f32.mrb[100].mxu1 }
 0x78f   : > { %v9254_v14 = vpop.f32.mrb[101].mxu1 }
 0x790   : > { %4907 = vst.msk [vmem:[%s9215_s13 + $0x30] sm:$0xff] %vm304_vm0, %v4773_v25  ;;  %v4552_v62 = vpop.f32.mrb[52].mxu0  ;;  %v4339_v25 = vld [vmem:[%s6885_s21 + $0x80] sm:$0xff] }
 0x791   : > { %v4553_v28 = vadd.f32 %v4552_v62, %v4330_v18  ;;  %v4554_v4 = vpop.f32.mrb[53].mxu0 }
 0x792   : > { %v4340_v4 = vld [vmem:[%s6885_s21 + $0x88] sm:$0xff] }
 0x793   : > { %v4778_v56 = vadd.f32 %v9069_v36, %v4553_v28 }
 0x795   : > { %4908 = vst.msk [vmem:[%s9215_s13 + $0x38] sm:$0xff] %vm304_vm0, %v4778_v56 }
 0x797   : > { %v4557_v60 = vpop.f32.mrb[54].mxu0 }
 0x798   : > { %v4558_v46 = vadd.f32 %v4557_v60, %v4331_v10  ;;  %v4559_v58 = vpop.f32.mrb[55].mxu0 }
 0x79a   : > { %v4783_v43 = vadd.f32 %v9081_v2, %v4558_v46  ;;  %v4341_v46 = vld [vmem:[%s6885_s21 + $0x90] sm:$0xff] }
 0x79c   : > { %4909 = vst.msk [vmem:[%s9215_s13 + $0x40] sm:$0xff] %vm304_vm0, %v4783_v43  ;;  %v4562_v19 = vpop.f32.mrb[56].mxu0 }
 0x79d   : > { %v4563_v54 = vadd.f32 %v4562_v19, %v4332_v13  ;;  %v4564_v45 = vpop.f32.mrb[57].mxu0  ;;  %v4342_v19 = vld [vmem:[%s6885_s21 + $0x98] sm:$0xff] }
 0x79f   : > { %v4788_v36 = vadd.f32 %v9077_v6, %v4563_v54 }
 0x7a1   : > { %4910 = vst.msk [vmem:[%s9215_s13 + $0x48] sm:$0xff] %vm304_vm0, %v4788_v36 }
 0x7a3   : > { %v4567_v22 = vpop.f32.mrb[58].mxu0 }
 0x7a4   : > { %v4568_v2 = vadd.f32 %v4567_v22, %v4333_v34  ;;  %v4569_v21 = vpop.f32.mrb[59].mxu0  ;;  %v4343_v34 = vld [vmem:[%s6885_s21 + $0xa0] sm:$0xff] }
 0x7a6   : > { %v4793_v38 = vadd.f32 %v9089_v24, %v4568_v2 }
 0x7a8   : > { %4911 = vst.msk [vmem:[%s9215_s13 + $0x50] sm:$0xff] %vm304_vm0, %v4793_v38  ;;  %v4572_v51 = vpop.f32.mrb[60].mxu0  ;;  %v4344_v38 = vld [vmem:[%s6885_s21 + $0xa8] sm:$0xff] }
 0x7a9   : > { %v4573_v15 = vadd.f32 %v4572_v51, %v4334_v3  ;;  %v4574_v6 = vpop.f32.mrb[61].mxu0 }
 0x7aa   : > { %v4345_v6 = vld [vmem:[%s6885_s21 + $0xb0] sm:$0xff] }
 0x7ab   : > { %v4798_v53 = vadd.f32 %v9085_v1, %v4573_v15 }
 0x7ad   : > { %4912 = vst.msk [vmem:[%s9215_s13 + $0x58] sm:$0xff] %vm304_vm0, %v4798_v53 }
 0x7af   : > { %v4577_v9 = vpop.f32.mrb[62].mxu0 }
 0x7b0   : > { %v4578_v40 = vadd.f32 %v4577_v9, %v4335_v35  ;;  %v4579_v26 = vpop.f32.mrb[63].mxu0 }
 0x7b2   : > { %v4803_v24 = vadd.f32 %v9098_v37, %v4578_v40  ;;  %v4346_v40 = vld [vmem:[%s6885_s21 + $0xb8] sm:$0xff] }
 0x7b4   : > { %4913 = vst.msk [vmem:[%s9215_s13 + $0x60] sm:$0xff] %vm304_vm0, %v4803_v24  ;;  %v4582_v39 = vpop.f32.mrb[64].mxu0 }
 0x7b5   : > { %v4583_v41 = vadd.f32 %v4582_v39, %v4336_v55  ;;  %v4584_v52 = vpop.f32.mrb[65].mxu0  ;;  %v4347_v39 = vld [vmem:[%s6885_s21 + $0xc0] sm:$0xff] }
 0x7b7   : > { %v4808_v1 = vadd.f32 %v9093_v63, %v4583_v41 }
 0x7b9   : > { %4914 = vst.msk [vmem:[%s9215_s13 + $0x68] sm:$0xff] %vm304_vm0, %v4808_v1 }
 0x7bb   : > { %v4587_v49 = vpop.f32.mrb[66].mxu0 }
 0x7bc   : > { %v4588_v29 = vadd.f32 %v4587_v49, %v4337_v50  ;;  %v4589_v31 = vpop.f32.mrb[67].mxu0  ;;  %v4348_v50 = vld [vmem:[%s6885_s21 + $0xc8] sm:$0xff] }
 0x7be   : > { %v4813_v37 = vadd.f32 %v9105_v27, %v4588_v29 }
 0x7c0   : > { %4915 = vst.msk [vmem:[%s9215_s13 + $0x70] sm:$0xff] %vm304_vm0, %v4813_v37  ;;  %v4592_v30 = vpop.f32.mrb[68].mxu0  ;;  %v4349_v37 = vld [vmem:[%s6885_s21 + $0xd0] sm:$0xff] }
 0x7c1   : > { %v4593_v7 = vadd.f32 %v4592_v30, %v4338_v33  ;;  %v4594_v17 = vpop.f32.mrb[69].mxu0 }
 0x7c2   : > { %v4350_v17 = vld [vmem:[%s6885_s21 + $0xd8] sm:$0xff] }
 0x7c3   : > { %v4818_v63 = vadd.f32 %v9101_v0, %v4593_v7 }
 0x7c5   : > { %4916 = vst.msk [vmem:[%s9215_s13 + $0x78] sm:$0xff] %vm304_vm0, %v4818_v63 }
 0x7c7   : > { %v4597_v18 = vpop.f32.mrb[70].mxu0 }
 0x7c8   : > { %v4598_v62 = vadd.f32 %v4597_v18, %v4339_v25  ;;  %v4599_v28 = vpop.f32.mrb[71].mxu0 }
 0x7ca   : > { %v4823_v27 = vadd.f32 %v9113_v5, %v4598_v62  ;;  %v4351_v62 = vld [vmem:[%s6885_s21 + $0xe0] sm:$0xff] }
 0x7cc   : > { %4917 = vst.msk [vmem:[%s9215_s13 + $0x80] sm:$0xff] %vm304_vm0, %v4823_v27  ;;  %v4602_v56 = vpop.f32.mrb[72].mxu0 }
 0x7cd   : > { %v4603_v10 = vadd.f32 %v4602_v56, %v4340_v4  ;;  %v4604_v60 = vpop.f32.mrb[73].mxu0  ;;  %v4352_v56 = vld [vmem:[%s6885_s21 + $0xe8] sm:$0xff] }
 0x7cf   : > { %v4828_v0 = vadd.f32 %v9109_v32, %v4603_v10 }
 0x7d1   : > { %4918 = vst.msk [vmem:[%s9215_s13 + $0x88] sm:$0xff] %vm304_vm0, %v4828_v0 }
 0x7d3   : > { %v4607_v58 = vpop.f32.mrb[74].mxu0 }
 0x7d4   : > { %v4608_v43 = vadd.f32 %v4607_v58, %v4341_v46  ;;  %v4609_v13 = vpop.f32.mrb[75].mxu0  ;;  %v4353_v46 = vld [vmem:[%s6885_s21 + $0xf0] sm:$0xff] }
 0x7d6   : > { %v4833_v5 = vadd.f32 %v9122_v16, %v4608_v43 }
 0x7d8   : > { %4919 = vst.msk [vmem:[%s9215_s13 + $0x90] sm:$0xff] %vm304_vm0, %v4833_v5  ;;  %v4612_v54 = vpop.f32.mrb[76].mxu0  ;;  %v4354_v5 = vld [vmem:[%s6885_s21 + $0xf8] sm:$0xff]  ;;  %s6711_s21 = scalar_lea.vmem %s9350_s18, 4096 }
 0x7d9   : > { %v4613_v45 = vadd.f32 %v4612_v54, %v4342_v19  ;;  %v4614_v36 = vpop.f32.mrb[77].mxu0  ;;  %p6712_p11 = scmp.ne.s32.totalorder %s9350_s18, %s6711_s21  ;;  %p6719_p1 = scmp.lt.s32.totalorder %s6717_s26, %s6711_s21 }
 0x7db   : > { %v4838_v32 = vadd.f32 %v9117_v12, %v4613_v45  ;;  %p6713_p12 = pnand %p6712_p11, %p6868_p5  ;;  %p6720_p2 = por %p6719_p1, %p6718_p0 }
 0x7dd   : > { %4920 = vst.msk [vmem:[%s9215_s13 + $0x98] sm:$0xff] %vm304_vm0, %v4838_v32  ;;  %p6714_p13 = pneg %p6713_p12 }
 0x7df   : > { %v4617_v22 = vpop.f32.mrb[78].mxu0  ;;  %p6721_p3 = pnand %p6720_p2, %p6714_p13 }
 0x7e0   : > { %v4618_v2 = vadd.f32 %v4617_v22, %v4343_v34  ;;  %v4619_v21 = vpop.f32.mrb[79].mxu0 }
 0x7e2   : > { %v4843_v16 = vadd.f32 %v9129_v42, %v4618_v2 }
 0x7e4   : > { %4921 = vst.msk [vmem:[%s9215_s13 + $0xa0] sm:$0xff] %vm304_vm0, %v4843_v16  ;;  %v4622_v3 = vpop.f32.mrb[80].mxu0 }
 0x7e5   : > { %v4623_v51 = vadd.f32 %v4622_v3, %v4344_v38  ;;  %v4624_v15 = vpop.f32.mrb[81].mxu0 }
 0x7e7   : > { %v4848_v12 = vadd.f32 %v9125_v44, %v4623_v51 }
 0x7e9   : > { %4922 = vst.msk [vmem:[%s9215_s13 + $0xa8] sm:$0xff] %vm304_vm0, %v4848_v12 }
 0x7eb   : > { %v4627_v53 = vpop.f32.mrb[82].mxu0 }
 0x7ec   : > { %v4628_v35 = vadd.f32 %v4627_v53, %v4345_v6  ;;  %v4629_v9 = vpop.f32.mrb[83].mxu0 }
 0x7ee   : > { %v4853_v42 = vadd.f32 %v9137_v47, %v4628_v35 }
 0x7f0   : > { %4923 = vst.msk [vmem:[%s9215_s13 + $0xb0] sm:$0xff] %vm304_vm0, %v4853_v42  ;;  %v4632_v26 = vpop.f32.mrb[84].mxu0 }
 0x7f1   : > { %v4633_v24 = vadd.f32 %v4632_v26, %v4346_v40  ;;  %v4634_v55 = vpop.f32.mrb[85].mxu0 }
 0x7f3   : > { %v4858_v44 = vadd.f32 %v9133_v20, %v4633_v24 }
 0x7f5   : > { %4924 = vst.msk [vmem:[%s9215_s13 + $0xb8] sm:$0xff] %vm304_vm0, %v4858_v44 }
 0x7f7   : > { %v4637_v41 = vpop.f32.mrb[86].mxu0 }
 0x7f8   : > { %v4638_v52 = vadd.f32 %v4637_v41, %v4347_v39  ;;  %v4639_v1 = vpop.f32.mrb[87].mxu0 }
 0x7fa   : > { %v4863_v47 = vadd.f32 %v9146_v59, %v4638_v52 }
 0x7fc   : > { %4925 = vst.msk [vmem:[%s9215_s13 + $0xc0] sm:$0xff] %vm304_vm0, %v4863_v47  ;;  %v4642_v49 = vpop.f32.mrb[88].mxu0 }
 0x7fd   : > { %v4643_v29 = vadd.f32 %v4642_v49, %v4348_v50  ;;  %v4644_v31 = vpop.f32.mrb[89].mxu0 }
 0x7ff   : > { %v4868_v20 = vadd.f32 %v9141_v8, %v4643_v29 }
 0x801   : > { %4926 = vst.msk [vmem:[%s9215_s13 + $0xc8] sm:$0xff] %vm304_vm0, %v4868_v20 }
 0x803   : > { %v4647_v33 = vpop.f32.mrb[90].mxu0 }
 0x804   : > { %v4648_v30 = vadd.f32 %v4647_v33, %v4349_v37  ;;  %v4649_v7 = vpop.f32.mrb[91].mxu0 }
 0x806   : > { %v4873_v59 = vadd.f32 %v9153_v23, %v4648_v30 }
 0x808   : > { %4927 = vst.msk [vmem:[%s9215_s13 + $0xd0] sm:$0xff] %vm304_vm0, %v4873_v59  ;;  %v4652_v63 = vpop.f32.mrb[92].mxu0 }
 0x809   : > { %v4653_v25 = vadd.f32 %v4652_v63, %v4350_v17  ;;  %v4654_v18 = vpop.f32.mrb[93].mxu0 }
 0x80b   : > { %v4878_v8 = vadd.f32 %v9149_v11, %v4653_v25 }
 0x80d   : > { %4928 = vst.msk [vmem:[%s9215_s13 + $0xd8] sm:$0xff] %vm304_vm0, %v4878_v8 }
 0x80f   : > { %v4657_v28 = vpop.f32.mrb[94].mxu0 }
 0x810   : > { %v4658_v27 = vadd.f32 %v4657_v28, %v4351_v62  ;;  %v4659_v4 = vpop.f32.mrb[95].mxu0 }
 0x812   : > { %v4883_v23 = vadd.f32 %v9161_v57, %v4658_v27 }
 0x814   : > { %4929 = vst.msk [vmem:[%s9215_s13 + $0xe0] sm:$0xff] %vm304_vm0, %v4883_v23  ;;  %v4662_v10 = vpop.f32.mrb[96].mxu0 }
 0x815   : > { %v4663_v60 = vadd.f32 %v4662_v10, %v4352_v56  ;;  %v4664_v0 = vpop.f32.mrb[97].mxu0 }
 0x817   : > { %v4888_v11 = vadd.f32 %v9157_v61, %v4663_v60 }
 0x819   : > { %4930 = vst.msk [vmem:[%s9215_s13 + $0xe8] sm:$0xff] %vm304_vm0, %v4888_v11 }
 0x81b   : > { %v4667_v58 = vpop.f32.mrb[98].mxu0 }
 0x81c   : > { %v4668_v43 = vadd.f32 %v4667_v58, %v4353_v46  ;;  %v4669_v13 = vpop.f32.mrb[99].mxu0 }
 0x81e   : > { %v4893_v57 = vadd.f32 %v9254_v14, %v4668_v43 }
 0x820   : > { %4931 = vst.msk [vmem:[%s9215_s13 + $0xf0] sm:$0xff] %vm304_vm0, %v4893_v57  ;;  %v4672_v19 = vpop.f32.mrb[100].mxu0 }
 0x821   : > { %v4673_v54 = vadd.f32 %v4672_v19, %v4354_v5  ;;  %v4674_v45 = vpop.f32.mrb[101].mxu0 }
 0x823   : > { %v4898_v61 = vadd.f32 %v9251_v48, %v4673_v54 }
 0x825   : > { %4932 = vst.msk [vmem:[%s9215_s13 + $0xf8] sm:$0xff] %vm304_vm0, %v4898_v61 }
 0x826   : > { %6724 = shalt.err (!%p6721_p3)
}
 0x827   : > { %s6725_s10 = scalar_lea.hbm %s9348_s24, 4096  ;;  %s6729_s13 = scalar_lea.hbm %s9406_s8, 8192 }
 0x828   : > { %p6726_p4 = scmp.ne.s32.totalorder %s9348_s24, %s6725_s10  ;;  %p6730_p9 = scmp.lt.u32.totalorder %s9348_s24, %s9406_s8 }
 0x829   : > { %p6731_p10 = scmp.lt.u32.totalorder %s6729_s13, %s6725_s10  ;;  %p6733_p12 = scmp.lt.u32.totalorder %s6725_s10, %s9348_s24 }
 0x82a   : > { %p6727_p7 = pnand %p6726_p4, %p6868_p5 }
 0x82b   : > { %p6732_p11 = por %p6731_p10, %p6730_p9 }
 0x82c   : > { %p6728_p8 = pneg %p6727_p7 }
 0x82d   : > { %p6734_p13 = por %p6733_p12, %p6732_p11 }
 0x82f   : > { %p6735_p0 = pnand %p6734_p13, %p6728_p8 }
 0x831   : > { %6738 = shalt.err (!%p6735_p0)
}
 0x832   : > { %s6783_s20 = smov 128   ;;  %s6784_s21 = smov 8  }
 0x833   : > { %5699 = dma.vmem_to_hbm [thread:$0]  (%p6868_p5), %s9350_s18, 4096, %s9348_s24, %s9357_s9, %s6783_s20, %s6783_s20, %s6784_s21  }
 0x834 PF: > { %p5705_p1 = scmp.ge.s32.totalorder %s6773_s30, 2  ;;  %s4962_s25 = sand.u32 1, %s6761_s27  }
 0x835   : > { %s4963_s23 = scalar_lea.sflag [#allocation4], %s4962_s25 }
 0x836   : > { %p5702_p2 = pnand %p5705_p1, %p6872_p6 }
 0x838   : > { %6756 = dma.done.wait (!%p5702_p2), %s4963_s23, 4096  }
 0x839   : > { %6758 = vsyncadd (!%p5702_p2), %s4963_s23, 4294963200  ;;  %p18_p3 = scmp.ge.s32.totalorder %s6855_s11, 4   ;;  %s9412_s27 = smov %s6765_s28 }
 0x83a   : > { %s9413_s28 = smov %s6769_s29  ;;  %s9414_s29 = smov %s6866_s14 }
 0x83b   : > { %s9415_s30 = smov %s6855_s11  ;;  %20 = sbr.rel (!%p18_p3) target bundleno = 3 (0x3), region = 90 }
 0x842   :  { %4968 = vsyncpa [#allocation4], 1 }
 0x843   :  { %4970 = vsyncpa [#allocation4 + $0x1], 1 }

// kernel: tpu_custom_call.1
= control target key start
LH: loop header
LB: loop body
LE: loop exit
PB: predicated region body
PF: predicated region fallthrough
CT: control target
= control target key end

     0   :  { %13 = vsyncpa [#allocation4], 0  ;;  %s9398_s0 = inlined_call_operand.vmem [shape: f32[2,16,16,32], index: 0, kind: input, shape index: {}]   ;;  %s9399_s1 = inlined_call_operand.vmem [shape: f32[32,32], index: 1, kind: input, shape index: {}]   ;;  %s9400_s2 = inlined_call_operand.vmem [shape: f32[1,32], index: 2, kind: input, shape index: {}]   ;;  %s9401_s3 = inlined_call_operand.vmem [shape: f32[1,32], index: 3, kind: input, shape index: {}]   ;;  %s9402_s4 = inlined_call_operand.vmem [shape: f32[288,32], index: 4, kind: input, shape index: {}]   ;;  %s9403_s5 = inlined_call_operand.vmem [shape: f32[1,32], index: 5, kind: input, shape index: {}]   ;;  %s9404_s6 = inlined_call_operand.vmem [shape: f32[1,32], index: 6, kind: input, shape index: {}]   ;;  %s9405_s7 = inlined_call_operand.vmem [shape: f32[288,32], index: 7, kind: input, shape index: {}]   ;;  %s9406_s8 = inlined_call_operand.hbm [shape: f32[2,16,16,32], index: 8, kind: output, shape index: {}]  }
   0x1   :  { %15 = vsyncpa [#allocation4 + $0x1], 0  ;;  %s6830_s27 = smov 0   ;;  %s6832_s28 = smov 0  }
   0x2   :  { %s6834_s29 = smov 0   ;;  %s6836_s30 = smov 0  }
   0x3 LB: > { %s6851_s9 = sadd.s32 4294967295, %s6773_s30   ;;  %s5009_s10 = sadd.s32 4294967294, %s6773_s30   ;;  %s6773_s30 = sphi %s6836_s30, %s9415_s30   ;;  %s6769_s29 = sphi %s6834_s29, %s9414_s29   ;;  %s6765_s28 = sphi %s6832_s28, %s9413_s28   ;;  %s6761_s27 = sphi %s6830_s27, %s9412_s27  }
   0x4   : > { %s6855_s11 = sadd.s32 1, %s6773_s30   ;;  %s201_s12 = sadd.s32 1, %s6769_s29 }
   0x5   : > { %s198_s13 = ssub.s32 %s6773_s30, %s6855_s11  ;;  %p211_p0 = scmp.ne.s32.totalorder %s6769_s29, %s6765_s28 }
   0x6   : > { %p199_p1 = scmp.eq.s32.totalorder %s198_s13, 0  ;;  %p212_p2 = scmp.eq.s32.totalorder %s6851_s9, 1 }
   0x7   : > { %p217_p3 = scmp.ne.s32.totalorder %s6765_s28, %s6761_s27  ;;  %p218_p4 = scmp.eq.s32.totalorder %s5009_s10, 1 }
   0x8   : > { %s6866_s14 = scalar_select %p199_p1, %s6769_s29, %s201_s12  }
   0x9   : > { %p6868_p5 = por %p212_p2, %p211_p0  ;;  %p6872_p6 = por %p218_p4, %p217_p3 }
   0xa   : > { %p5012_p7 = scmp.ge.s32.totalorder %s6773_s30, 1  ;;  %p265_p8 = scmp.lt.s32.totalorder %s6773_s30, 3 }
   0xc   : > { %p266_p9 = pnand %p5012_p7, %p265_p8 }
   0xd   : > { %p299_p10 = scmp.lt.s32.totalorder (!%p266_p9), %s6851_s9, 1  ;;  %v6775_v0 = vmov (!%p266_p9), 1.0   ;;  %vm304_vm0 = vcmask (!%p266_p9), 261120   ;;  %vm6777_vm1 = vmmov (!%p266_p9), 0   ;;  %vm563_vm2 = vcmask (!%p266_p9), 1040384   ;;  %s6779_s22 = smov (!%p266_p9), 32  }
   0xe   : > { %269 = sbr.rel (%p266_p9) target bundleno = 2100 (0x834), region = 52  ;;  %554 = vmatprep.mubr.f32.mxu1 (!%p266_p9), %v6775_v0  ;;  %452 = vmatprep.mubr.f32.mxu0 (!%p266_p9), %v6775_v0  ;;  %vm307_vm3 = vcmask (!%p266_p9), 254976   ;;  %vm313_vm4 = vcmask (!%p266_p9), 253952   ;;  %s9407_s23 = smov (!%p266_p9), 96   ;;  %vm1922_vm5 = vcmask (!%p266_p9), 523264   ;;  %vm1955_vm6 = vcmask (!%p266_p9), 785408  }
   0xf   : > { %s6781_s12 = smov (!%p266_p9), 64   ;;  %s9411_s24 = smov (!%p266_p9), 96  }
  0x10   : > { %s6782_s25 = smov (!%p266_p9), [#allocation3]  }
  0x15   : > { %s300_s17 = scalar_select %p299_p10, %s6851_s9, 1 }
  0x17   : > { %s5089_s18 = sshll.u32 %s300_s17, 8  ;;  %s5090_s17 = sshll.u32 %s6851_s9, 12 }
  0x18   : > { %s6885_s21 = scalar_lea.vmem %s9398_s0, %s5089_s18 }
  0x19   : > { %v6888_v1 = vld [vmem:[%s6885_s21 + $0x80] sm:$0xff]  ;;  %v6891_v2 = vld [vmem:[%s6885_s21 + $0x88] sm:$0xff]  ;;  %v6908_v9 = vld [vmem:[%s6885_s21 + $0x90] sm:$0xff] }
  0x1a   : > { %v6894_v3 = vld [vmem:[%s6885_s21] sm:$0xff]  ;;  %v474_v4 = vmul.f32 %v6888_v1, %v6888_v1  ;;  %v475_v5 = vmul.f32 %v6891_v2, %v6891_v2  ;;  %v5447_v6 = vpack.c.bf16 %v6891_v2, %v6888_v1  ;;  %v6903_v7 = vld [vmem:[%s6885_s21 + $0x8] sm:$0xff]  ;;  %v6911_v10 = vld [vmem:[%s6885_s21 + $0x98] sm:$0xff]  ;;  %v476_v13 = vmul.f32 %v6908_v9, %v6908_v9 }
  0x1b   : > { %v458_v8 = vmul.f32 %v6894_v3, %v6894_v3  ;;  %v459_v11 = vmul.f32 %v6903_v7, %v6903_v7  ;;  %v5449_v12 = vpack.c.bf16 %v6903_v7, %v6894_v3  ;;  %v477_v14 = vmul.f32 %v6911_v10, %v6911_v10  ;;  %v6922_v15 = vld [vmem:[%s6885_s21 + $0x10] sm:$0xff]  ;;  %v6925_v16 = vld [vmem:[%s6885_s21 + $0x18] sm:$0xff]  ;;  %v6928_v17 = vld [vmem:[%s6885_s21 + $0xa0] sm:$0xff] }
  0x1c   : > { %v5479_v18 = vpack.c.bf16 %v475_v5, %v474_v4  ;;  %5448 = vmatprep.subr.bf16.mxu0 %v5447_v6  ;;  %v5451_v19 = vpack.c.bf16 %v6911_v10, %v6908_v9  ;;  %v460_v20 = vmul.f32 %v6922_v15, %v6922_v15  ;;  %v461_v21 = vmul.f32 %v6925_v16, %v6925_v16  ;;  %v6937_v22 = vld [vmem:[%s6885_s21 + $0xa8] sm:$0xff]  ;;  %v6940_v23 = vld [vmem:[%s6885_s21 + $0x20] sm:$0xff]  ;;  %v6950_v29 = vld [vmem:[%s6885_s21 + $0xb0] sm:$0xff] }
  0x1d   : > { %v6943_v24 = vld [vmem:[%s6885_s21 + $0x28] sm:$0xff]  ;;  %v5481_v25 = vpack.c.bf16 %v459_v11, %v458_v8  ;;  %5450 = vmatpush3.bf16.msra.mxu0 %v5449_v12  ;;  %v5483_v26 = vpack.c.bf16 %v477_v14, %v476_v13  ;;  %v5453_v27 = vpack.c.bf16 %v6925_v16, %v6922_v15  ;;  %v478_v28 = vmul.f32 %v6928_v17, %v6928_v17  ;;  %v6953_v30 = vld [vmem:[%s6885_s21 + $0xb8] sm:$0xff]  ;;  %v6968_v39 = vld [vmem:[%s6885_s21 + $0x30] sm:$0xff] }
  0x1e   : > { %5480 = vmatprep.subr.bf16.mxu1 %v5479_v18  ;;  %5452 = vmatprep.subr.bf16.mxu0 %v5451_v19  ;;  %v479_v31 = vmul.f32 %v6937_v22, %v6937_v22  ;;  %v5455_v32 = vpack.c.bf16 %v6937_v22, %v6928_v17  ;;  %v5485_v33 = vpack.c.bf16 %v461_v21, %v460_v20  ;;  %v6971_v40 = vld [vmem:[%s6885_s21 + $0x38] sm:$0xff]  ;;  %v6976_v42 = vld [vmem:[%s6885_s21 + $0xc0] sm:$0xff]  ;;  %v6979_v43 = vld [vmem:[%s6885_s21 + $0xc8] sm:$0xff] }
  0x1f   : > { %5482 = vmatpush3.bf16.msra.mxu1 %v5481_v25  ;;  %v462_v34 = vmul.f32 %v6940_v23, %v6940_v23  ;;  %v463_v35 = vmul.f32 %v6943_v24, %v6943_v24  ;;  %v480_v37 = vmul.f32 %v6950_v29, %v6950_v29  ;;  %v481_v38 = vmul.f32 %v6953_v30, %v6953_v30  ;;  %v6992_v51 = vld [vmem:[%s6885_s21 + $0x40] sm:$0xff]  ;;  %v6995_v52 = vld [vmem:[%s6885_s21 + $0x48] sm:$0xff]  ;;  %v7000_v54 = vld [vmem:[%s6885_s21 + $0xd0] sm:$0xff] }
  0x20   : > { %5484 = vmatprep.subr.bf16.mxu1 %v5483_v26  ;;  %v5487_v36 = vpack.c.bf16 %v479_v31, %v478_v28  ;;  %v5457_v41 = vpack.c.bf16 %v6943_v24, %v6940_v23  ;;  %v5459_v44 = vpack.c.bf16 %v6953_v30, %v6950_v29  ;;  %v464_v46 = vmul.f32 %v6968_v39, %v6968_v39  ;;  %v7003_v55 = vld [vmem:[%s6885_s21 + $0xd8] sm:$0xff]  ;;  %v7016_v63 = vld [vmem:[%s6885_s21 + $0x50] sm:$0xff]  ;;  %v7024_v6 = vld [vmem:[%s6885_s21 + $0xe0] sm:$0xff] }
  0x21   : > { %5454 = vmatpush3.bf16.msra.mxu0 %v5453_v27  ;;  %v5489_v45 = vpack.c.bf16 %v463_v35, %v462_v34  ;;  %v465_v47 = vmul.f32 %v6971_v40, %v6971_v40  ;;  %v5491_v48 = vpack.c.bf16 %v481_v38, %v480_v37  ;;  %v482_v49 = vmul.f32 %v6976_v42, %v6976_v42  ;;  %v7019_v4 = vld [vmem:[%s6885_s21 + $0x58] sm:$0xff]  ;;  %v7027_v8 = vld [vmem:[%s6885_s21 + $0xe8] sm:$0xff]  ;;  %v7040_v21 = vld [vmem:[%s6885_s21 + $0x60] sm:$0xff] }
  0x22   : > { %5456 = vmatprep.subr.bf16.mxu0 %v5455_v32  ;;  %v483_v50 = vmul.f32 %v6979_v43, %v6979_v43  ;;  %v5461_v53 = vpack.c.bf16 %v6971_v40, %v6968_v39  ;;  %v5463_v56 = vpack.c.bf16 %v6979_v43, %v6976_v42  ;;  %v466_v58 = vmul.f32 %v6992_v51, %v6992_v51  ;;  %v7043_v25 = vld [vmem:[%s6885_s21 + $0x68] sm:$0xff]  ;;  %v7048_v27 = vld [vmem:[%s6885_s21 + $0xf0] sm:$0xff]  ;;  %v7051_v28 = vld [vmem:[%s6885_s21 + $0xf8] sm:$0xff] }
  0x23   : > { %5486 = vmatpush3.bf16.msra.mxu1 %v5485_v33  ;;  %v5493_v57 = vpack.c.bf16 %v465_v47, %v464_v46  ;;  %v467_v59 = vmul.f32 %v6995_v52, %v6995_v52  ;;  %v484_v61 = vmul.f32 %v7000_v54, %v7000_v54  ;;  %v485_v62 = vmul.f32 %v7003_v55, %v7003_v55  ;;  %v7064_v38 = vld [vmem:[%s6885_s21 + $0x70] sm:$0xff] }
  0x24   : > { %5488 = vmatprep.subr.bf16.mxu1 %v5487_v36  ;;  %v5495_v60 = vpack.c.bf16 %v483_v50, %v482_v49  ;;  %v5465_v5 = vpack.c.bf16 %v6995_v52, %v6992_v51  ;;  %v5467_v11 = vpack.c.bf16 %v7003_v55, %v7000_v54  ;;  %v468_v13 = vmul.f32 %v7016_v63, %v7016_v63 }
  0x25   : > { %5458 = vmatpush3.bf16.msra.mxu0 %v5457_v41  ;;  %v5497_v12 = vpack.c.bf16 %v467_v59, %v466_v58  ;;  %v469_v14 = vmul.f32 %v7019_v4, %v7019_v4  ;;  %v5499_v18 = vpack.c.bf16 %v485_v62, %v484_v61  ;;  %v486_v19 = vmul.f32 %v7024_v6, %v7024_v6  ;;  %v7067_v41 = vld [vmem:[%s6885_s21 + $0x78] sm:$0xff]  ;;  %v351_v58 = vld [vmem:[%s9399_s1 + $0x8] sm:$0xff] }
  0x26   : > { %5460 = vmatprep.subr.bf16.mxu0 %v5459_v44  ;;  %v487_v20 = vmul.f32 %v7027_v8, %v7027_v8  ;;  %v5469_v26 = vpack.c.bf16 %v7019_v4, %v7016_v63  ;;  %v5471_v31 = vpack.c.bf16 %v7027_v8, %v7024_v6  ;;  %v470_v33 = vmul.f32 %v7040_v21, %v7040_v21  ;;  %v353_v61 = vld [vmem:[%s9399_s1 + $0x18] sm:$0xff] }
  0x27   : > { %5490 = vmatpush3.bf16.msra.mxu1 %v5489_v45  ;;  %v5501_v32 = vpack.c.bf16 %v469_v14, %v468_v13  ;;  %v471_v34 = vmul.f32 %v7043_v25, %v7043_v25  ;;  %v488_v36 = vmul.f32 %v7048_v27, %v7048_v27  ;;  %v489_v37 = vmul.f32 %v7051_v28, %v7051_v28 }
  0x28   : > { %5492 = vmatprep.subr.bf16.mxu1 %v5491_v48  ;;  %v5503_v35 = vpack.c.bf16 %v487_v20, %v486_v19  ;;  %v5473_v44 = vpack.c.bf16 %v7043_v25, %v7040_v21  ;;  %v5475_v45 = vpack.c.bf16 %v7051_v28, %v7048_v27  ;;  %v472_v47 = vmul.f32 %v7064_v38, %v7064_v38 }
  0x29   : > { %5462 = vmatpush3.bf16.msra.mxu0 %v5461_v53  ;;  %v5505_v46 = vpack.c.bf16 %v471_v34, %v470_v33  ;;  %v473_v48 = vmul.f32 %v7067_v41, %v7067_v41  ;;  %v5507_v49 = vpack.c.bf16 %v489_v37, %v488_v36  ;;  %v5477_v50 = vpack.c.bf16 %v7067_v41, %v7064_v38  ;;  %v831_v34 = vld [vmem:[%s9402_s4 + $0x110] sm:$0xff]  ;;  %v797_v37 = vld [vmem:[%s9402_s4] sm:$0xff] }
  0x2a   : > { %5464 = vmatprep.subr.bf16.mxu0 %v5463_v56  ;;  %v6776_v56 = vmov 0.0|0.0  }
  0x2b   : > { %5494 = vmatpush3.bf16.msra.mxu1 %v5493_v57  ;;  %v5509_v53 = vpack.c.bf16 %v473_v48, %v472_v47  ;;  %v350_v57 = vld [vmem:[%s9399_s1] sm:$0xff]  ;;  %v800_v47 = vld [vmem:[%s9402_s4 + $0x18] sm:$0xff] }
  0x2c   : > { %5496 = vmatprep.subr.bf16.mxu1 %v5495_v60  ;;  %v7088_v59 = vpack.c.bf16 %v351_v58, %v350_v57  ;;  %v352_v60 = vld [vmem:[%s9399_s1 + $0x10] sm:$0xff] }
  0x2d   : > { %5466 = vmatpush3.bf16.msra.mxu0 %v5465_v5  ;;  %v7098_v62 = vpack.c.bf16 %v353_v61, %v352_v60  ;;  %v6778_v5 = vmov 0.0   ;;  %v803_v58 = vld [vmem:[%s9402_s4 + $0x30] sm:$0xff]  ;;  %v804_v60 = vld [vmem:[%s9402_s4 + $0x38] sm:$0xff] }
  0x2e   : > { %5468 = vmatprep.subr.bf16.mxu0 %v5467_v11  ;;  %305 = vst.msk [vmem:[#allocation2] sm:$0xff] %vm304_vm0, %v6778_v5  ;;  %306 = vst.msk [vmem:[#allocation2 + $0x8] sm:$0xff] %vm304_vm0, %v6778_v5 }
  0x2f   : > { %5498 = vmatpush3.bf16.msra.mxu1 %v5497_v12  ;;  %310 = vst.msk [vmem:[#allocation2 + $0x198] sm:$0xff] %vm304_vm0, %v6778_v5  ;;  %311 = vst.msk [vmem:[#allocation2 + $0x1a0] sm:$0xff] %vm304_vm0, %v6778_v5 }
  0x30   : > { %5500 = vmatprep.subr.bf16.mxu1 %v5499_v18  ;;  %308 = vst.msk [vmem:[#allocation2 + $0x10] sm:$0x3] %vm307_vm3, %v6778_v5  ;;  %312 = vst.msk [vmem:[#allocation2 + $0x1a8] sm:$0x3] %vm307_vm3, %v6778_v5 }
  0x31   : > { %5470 = vmatpush3.bf16.msra.mxu0 %v5469_v26  ;;  %334 = vst.msk [vmem:[#allocation2 + $0x41] sm:$0x1] %vm313_vm4, %v6778_v5  ;;  %314 = vst.msk [vmem:[#allocation2] sm:$0x1] %vm313_vm4, %v6778_v5 }
  0x32   : > { %5472 = vmatprep.subr.bf16.mxu0 %v5471_v31  ;;  %v829_v31 = vld [vmem:[%s9402_s4 + $0x100] sm:$0xff]  ;;  %315 = vst.msk [vmem:[#allocation2 + $0x18] sm:$0x1] %vm313_vm4, %v6778_v5  ;;  %316 = vst.msk [vmem:[#allocation2 + $0x30] sm:$0x1] %vm313_vm4, %v6778_v5 }
  0x33   : > { %5502 = vmatpush3.bf16.msra.mxu1 %v5501_v32  ;;  %v830_v32 = vld [vmem:[%s9402_s4 + $0x108] sm:$0xff]  ;;  %317 = vst.msk [vmem:[#allocation2 + $0x48] sm:$0x1] %vm313_vm4, %v6778_v5  ;;  %318 = vst.msk [vmem:[#allocation2 + $0x60] sm:$0x1] %vm313_vm4, %v6778_v5 }
  0x34   : > { %5504 = vmatprep.subr.bf16.mxu1 %v5503_v35  ;;  %v5565_v33 = vpack.c.bf16 %v830_v32, %v829_v31  ;;  %v832_v35 = vld [vmem:[%s9402_s4 + $0x118] sm:$0xff]  ;;  %319 = vst.msk [vmem:[#allocation2 + $0x78] sm:$0x1] %vm313_vm4, %v6778_v5  ;;  %320 = vst.msk [vmem:[#allocation2 + $0x90] sm:$0x1] %vm313_vm4, %v6778_v5  ;;  %v807_v31 = vld [vmem:[%s9402_s4 + $0x50] sm:$0xff] }
  0x35   : > { %5474 = vmatpush3.bf16.msra.mxu0 %v5473_v44  ;;  %321 = vst.msk [vmem:[#allocation2 + $0xa8] sm:$0x1] %vm313_vm4, %v6778_v5  ;;  %322 = vst.msk [vmem:[#allocation2 + $0xc0] sm:$0x1] %vm313_vm4, %v6778_v5  ;;  %v5569_v36 = vpack.c.bf16 %v832_v35, %v831_v34  ;;  %v798_v44 = vld [vmem:[%s9402_s4 + $0x8] sm:$0xff]  ;;  %v808_v32 = vld [vmem:[%s9402_s4 + $0x58] sm:$0xff]  ;;  %v658_v35 = vlaneseq }
  0x36   : > { %5476 = vmatprep.subr.bf16.mxu0 %v5475_v45  ;;  %323 = vst.msk [vmem:[#allocation2 + $0xd8] sm:$0x1] %vm313_vm4, %v6778_v5  ;;  %324 = vst.msk [vmem:[#allocation2 + $0xf0] sm:$0x1] %vm313_vm4, %v6778_v5  ;;  %v5518_v45 = vpack.c.bf16 %v798_v44, %v797_v37  ;;  %v5533_v34 = vpack.c.bf16 %v808_v32, %v807_v31  ;;  %v810_v37 = vld [vmem:[%s9402_s4 + $0x68] sm:$0xff] }
  0x37   : > { %5506 = vmatpush3.bf16.msra.mxu1 %v5505_v46  ;;  %325 = vst.msk [vmem:[#allocation2 + $0x108] sm:$0x1] %vm313_vm4, %v6778_v5  ;;  %326 = vst.msk [vmem:[#allocation2 + $0x120] sm:$0x1] %vm313_vm4, %v6778_v5  ;;  %v799_v46 = vld [vmem:[%s9402_s4 + $0x10] sm:$0xff] }
  0x38   : > { %5508 = vmatprep.subr.bf16.mxu1 %v5507_v49  ;;  %327 = vst.msk [vmem:[#allocation2 + $0x138] sm:$0x1] %vm313_vm4, %v6778_v5  ;;  %328 = vst.msk [vmem:[#allocation2 + $0x150] sm:$0x1] %vm313_vm4, %v6778_v5  ;;  %v5521_v48 = vpack.c.bf16 %v800_v47, %v799_v46  ;;  %v801_v49 = vld [vmem:[%s9402_s4 + $0x20] sm:$0xff]  ;;  %v811_v46 = vld [vmem:[%s9402_s4 + $0x70] sm:$0xff] }
  0x39   : > { %5478 = vmatpush3.bf16.msra.mxu0 %v5477_v50  ;;  %329 = vst.msk [vmem:[#allocation2 + $0x168] sm:$0x1] %vm313_vm4, %v6778_v5  ;;  %330 = vst.msk [vmem:[#allocation2 + $0x180] sm:$0x1] %vm313_vm4, %v6778_v5  ;;  %v802_v50 = vld [vmem:[%s9402_s4 + $0x28] sm:$0xff]  ;;  %v812_v47 = vld [vmem:[%s9402_s4 + $0x78] sm:$0xff] }
  0x3a   : > { %5566 = vmatprep.subr.bf16.mxu0 %v5565_v33  ;;  %331 = vst.msk [vmem:[#allocation2 + $0x198] sm:$0x1] %vm313_vm4, %v6778_v5  ;;  %333 = vst.msk [vmem:[#allocation2 + $0x29] sm:$0x1] %vm313_vm4, %v6778_v5 }
  0x3b   : > { %5510 = vmatpush3.bf16.msra.mxu1 %v5509_v53  ;;  %335 = vst.msk [vmem:[#allocation2 + $0x59] sm:$0x1] %vm313_vm4, %v6778_v5  ;;  %336 = vst.msk [vmem:[#allocation2 + $0x71] sm:$0x1] %vm313_vm4, %v6778_v5  ;;  %v5524_v53 = vpack.c.bf16 %v802_v50, %v801_v49  ;;  %v5017_v49 = vld [vmem:[%s9400_s2] ss:$0 sm:$0xff] }
  0x3c   : > { %453 = vmatmul.mubr.f32.vlgmr.msra.gmra.mrb[0].mxu0 %v6775_v0  ;;  %5511 = vmatprep.subr.bf16.mxu1 %v6776_v56  ;;  %337 = vst.msk [vmem:[#allocation2 + $0x89] sm:$0x1] %vm313_vm4, %v6778_v5  ;;  %338 = vst.msk [vmem:[#allocation2 + $0xa1] sm:$0x1] %vm313_vm4, %v6778_v5 }
  0x3d   : > { %5568 = vmatpush3.bf16.msra.mxu0 %v5565_v33  ;;  %339 = vst.msk [vmem:[#allocation2 + $0xb9] sm:$0x1] %vm313_vm4, %v6778_v5  ;;  %340 = vst.msk [vmem:[#allocation2 + $0xd1] sm:$0x1] %vm313_vm4, %v6778_v5 }
  0x3e   : > { %555 = vmatmul.mubr.f32.vlgmr.msra.gmra.mrb[0].mxu1 %v6775_v0  ;;  %341 = vst.msk [vmem:[#allocation2 + $0xe9] sm:$0x1] %vm313_vm4, %v6778_v5  ;;  %342 = vst.msk [vmem:[#allocation2 + $0x101] sm:$0x1] %vm313_vm4, %v6778_v5  ;;  %5570 = vmatprep.subr.bf16.mxu0 %v5569_v36 }
  0x3f   : > { %5513 = vmatpush3.bf16.msra.mxu1 %v7088_v59  ;;  %5321 = vmatprep.mubr.msk.f32.mxu1 %vm6777_vm1, %v6778_v5  ;;  %343 = vst.msk [vmem:[#allocation2 + $0x119] sm:$0x1] %vm313_vm4, %v6778_v5  ;;  %344 = vst.msk [vmem:[#allocation2 + $0x131] sm:$0x1] %vm313_vm4, %v6778_v5 }
  0x40   : > { %5514 = vmatprep.subr.bf16.mxu1 %v6776_v56  ;;  %345 = vst.msk [vmem:[#allocation2 + $0x149] sm:$0x1] %vm313_vm4, %v6778_v5  ;;  %346 = vst.msk [vmem:[#allocation2 + $0x161] sm:$0x1] %vm313_vm4, %v6778_v5 }
  0x41   : > { %347 = vst.msk [vmem:[#allocation2 + $0x179] sm:$0x1] %vm313_vm4, %v6778_v5  ;;  %348 = vst.msk [vmem:[#allocation2 + $0x191] sm:$0x1] %vm313_vm4, %v6778_v5  ;;  %5572 = vmatpush3.bf16.msra.mxu0 %v5569_v36  ;;  %v809_v36 = vld [vmem:[%s9402_s4 + $0x60] sm:$0xff] }
  0x42   : > { %332 = vst.msk [vmem:[#allocation2 + $0x11] sm:$0x1] %vm313_vm4, %v6778_v5  ;;  %349 = vst.msk [vmem:[#allocation2 + $0x1a9] sm:$0x1] %vm313_vm4, %v6778_v5  ;;  %v5536_v44 = vpack.c.bf16 %v810_v37, %v809_v36 }
  0x43   : > { %5516 = vmatpush3.bf16.msra.mxu1 %v7098_v62 }
  0x44   : > { %5517 = vmatprep.subr.bf16.mxu1 %v6776_v56 }
 0x10f   : > { %v5123_v11 = vpop.f32.mrb[0].mxu0 }
 0x110   : > { %v5124_v12 = vpop.f32.mrb[1].mxu0 }
 0x111   : > { %v5158_v13 = vpop.f32.mrb[0].mxu1  ;;  %v5125_v14 = vadd.f32 %v5124_v12, %v5123_v11  ;;  %v5527_v12 = vpack.c.bf16 %v804_v60, %v803_v58 }
 0x112   : > { %v5159_v18 = vpop.f32.mrb[1].mxu1 }
 0x113   : > { %v5160_v19 = vadd.f32 %v5159_v18, %v5158_v13  ;;  %v806_v18 = vld [vmem:[%s9402_s4 + $0x48] sm:$0xff] }
 0x115   : > { %v561_v20 = vrot.slane %v5160_v19, 7 }
 0x117   : > { %v564_v26 = vsel %vm563_vm2, %v5125_v14, %v561_v20  ;;  %v805_v14 = vld [vmem:[%s9402_s4 + $0x40] sm:$0xff] }
 0x118   : > { %5322 = vmatmul.mubr.msk.f32.vlgmr.msra.gmra.mrb[2].mxu1 %vm304_vm0, %v564_v26  ;;  %v5530_v20 = vpack.c.bf16 %v806_v18, %v805_v14  ;;  %v815_v14 = vld [vmem:[%s9402_s4 + $0x90] sm:$0xff]  ;;  %v816_v18 = vld [vmem:[%s9402_s4 + $0x98] sm:$0xff] }
 0x119   : > { %5519 = vmatpush1.bf16.msra.mxu1 %v5518_v45  ;;  %v7248_v45 = vshrl.u32 %v658_v35, 7 }
 0x11a   : > { %5520 = vmatprep.subr.bf16.mxu1 %v6776_v56 }
 0x11b   : > { %v660_v50 = vsub.s32 1, %v7248_v45 }
 0x11d   : > { %5522 = vmatpush1.bf16.msra.mxu1 %v5521_v48  ;;  %v5539_v48 = vpack.c.bf16 %v812_v47, %v811_v46 }
 0x11e   : > { %5523 = vmatprep.subr.bf16.mxu1 %v6776_v56 }
 0x121   : > { %5525 = vmatpush1.bf16.msra.mxu1 %v5524_v53  ;;  %v813_v53 = vld [vmem:[%s9402_s4 + $0x80] sm:$0xff] }
 0x122   : > { %5526 = vmatprep.subr.bf16.mxu1 %v6776_v56 }
 0x125   : > { %5528 = vmatpush1.bf16.msra.mxu1 %v5527_v12 }
 0x126   : > { %5529 = vmatprep.subr.bf16.mxu1 %v6776_v56 }
 0x129   : > { %5531 = vmatpush1.bf16.msra.mxu1 %v5530_v20  ;;  %v697_v20 = vsub.s32 0, %v7248_v45 }
 0x12a   : > { %5532 = vmatprep.subr.bf16.mxu1 %v6776_v56 }
 0x12d   : > { %5534 = vmatpush1.bf16.msra.mxu1 %v5533_v34 }
 0x12e   : > { %5535 = vmatprep.subr.bf16.mxu1 %v6776_v56 }
 0x131   : > { %5537 = vmatpush1.bf16.msra.mxu1 %v5536_v44 }
 0x132   : > { %5538 = vmatprep.subr.bf16.mxu1 %v6776_v56 }
 0x135   : > { %5540 = vmatpush1.bf16.msra.mxu1 %v5539_v48 }
 0x136   : > { %5541 = vmatprep.subr.bf16.mxu1 %v6776_v56 }
 0x1eb   : > { %v634_v57 = vpop.f32.mrb[2].mxu1 }
 0x1ec   : > { %v638_v61 = vmul.f32 0.001953125, %v634_v57  ;;  %v5323_v11 = vpop.f32.mrb[3].mxu1  ;;  %v814_v57 = vld [vmem:[%s9402_s4 + $0x88] sm:$0xff] }
 0x1ed   : > { %v5542_v60 = vpack.c.bf16 %v814_v57, %v813_v53 }
 0x1ee   : > { %v639_v13 = vmul.f32 %v638_v61, %v638_v61 }
 0x1ef   : > { %5543 = vmatpush1.bf16.msra.mxu1 %v5542_v60 }
 0x1f0   : > { %v641_v19 = vrot.slane %v639_v13, 7  ;;  %5544 = vmatprep.subr.bf16.mxu1 %v6776_v56 }
 0x1f2   : > { %v643_v26 = vsub.f32 %v638_v61, %v641_v19  ;;  %v387_v19 = vld [vmem:[%s9401_s3] sm:$0x1] }
 0x1f4   : > { %v644_v33 = vadd.f32 1e-05, %v643_v26  ;;  %v5545_v26 = vpack.c.bf16 %v816_v18, %v815_v14 }
 0x1f6   : > { %6707 = vrsqrt.f32 %v644_v33  ;;  %5546 = vmatpush1.bf16.msra.mxu1 %v5545_v26 }
 0x1f7   : > { %5547 = vmatprep.subr.bf16.mxu1 %v6776_v56 }
 0x200   : > { %v6708_v58 = vpop.eup %6707 }
 0x201   : > { %v652_v11 = vmul.f32 %v6708_v58, %v5017_v49 }
 0x203   : > { %v654_v12 = vrot.slane %v652_v11, 1  ;;  %v661_v13 = vrot.slane %v652_v11, %v660_v50 }
 0x205   : > { %v656_v31 = vmul.f32 %v654_v12, %v638_v61  ;;  %v662_v32 = vmul.f32 %v661_v13, %v6894_v3  ;;  %v663_v33 = vmul.f32 %v661_v13, %v6903_v7  ;;  %v664_v34 = vmul.f32 %v661_v13, %v6922_v15 }
 0x206   : > { %v665_v35 = vmul.f32 %v661_v13, %v6925_v16  ;;  %v666_v36 = vmul.f32 %v661_v13, %v6940_v23  ;;  %v667_v37 = vmul.f32 %v661_v13, %v6943_v24  ;;  %v668_v44 = vmul.f32 %v661_v13, %v6968_v39 }
 0x207   : > { %v657_v46 = vsub.f32 %v387_v19, %v656_v31  ;;  %v669_v47 = vmul.f32 %v661_v13, %v6971_v40  ;;  %v670_v61 = vmul.f32 %v661_v13, %v6992_v51  ;;  %v671_v3 = vmul.f32 %v661_v13, %v6995_v52 }
 0x208   : > { %v672_v7 = vmul.f32 %v661_v13, %v7016_v63  ;;  %v673_v15 = vmul.f32 %v661_v13, %v7019_v4  ;;  %v674_v16 = vmul.f32 %v661_v13, %v7040_v21  ;;  %v675_v23 = vmul.f32 %v661_v13, %v7043_v25 }
 0x209   : > { %v698_v24 = vrot.slane %v657_v46, %v697_v20  ;;  %v676_v39 = vmul.f32 %v661_v13, %v7064_v38  ;;  %v677_v40 = vmul.f32 %v661_v13, %v7067_v41  ;;  %v678_v51 = vmul.f32 %v661_v13, %v6888_v1 }
 0x20a   : > { %v679_v52 = vmul.f32 %v661_v13, %v6891_v2  ;;  %v680_v48 = vmul.f32 %v661_v13, %v6908_v9  ;;  %v681_v63 = vmul.f32 %v661_v13, %v6911_v10  ;;  %v682_v4 = vmul.f32 %v661_v13, %v6928_v17 }
 0x20b   : > { %v683_v21 = vmul.f32 %v661_v13, %v6937_v22  ;;  %v684_v25 = vmul.f32 %v661_v13, %v6950_v29  ;;  %v685_v49 = vmul.f32 %v661_v13, %v6953_v30  ;;  %v686_v38 = vmul.f32 %v661_v13, %v6976_v42 }
 0x20c   : > { %v687_v41 = vmul.f32 %v661_v13, %v6979_v43  ;;  %v688_v1 = vmul.f32 %v661_v13, %v7000_v54  ;;  %v689_v2 = vmul.f32 %v661_v13, %v7003_v55  ;;  %v690_v9 = vmul.f32 %v661_v13, %v7024_v6 }
 0x20d   : > { %v691_v10 = vmul.f32 %v661_v13, %v7027_v8  ;;  %v692_v17 = vmul.f32 %v661_v13, %v7048_v27  ;;  %v693_v22 = vmul.f32 %v661_v13, %v7051_v28  ;;  %v700_v53 = vadd.f32 %v698_v24, %v662_v32 }
 0x20e   : > { %v701_v29 = vadd.f32 %v698_v24, %v663_v33  ;;  %v702_v57 = vadd.f32 %v698_v24, %v664_v34  ;;  %v703_v30 = vadd.f32 %v698_v24, %v665_v35  ;;  %v704_v58 = vadd.f32 %v698_v24, %v666_v36 }
 0x20f   : > { %v705_v42 = vadd.f32 %v698_v24, %v667_v37  ;;  %v706_v60 = vadd.f32 %v698_v24, %v668_v44  ;;  %v707_v43 = vadd.f32 %v698_v24, %v669_v47  ;;  %v708_v11 = vadd.f32 %v698_v24, %v670_v61 }
 0x210   : > { %v709_v54 = vadd.f32 %v698_v24, %v671_v3  ;;  %v710_v12 = vadd.f32 %v698_v24, %v672_v7  ;;  %v711_v55 = vadd.f32 %v698_v24, %v673_v15  ;;  %v712_v14 = vadd.f32 %v698_v24, %v674_v16 }
 0x211   : > { %v713_v6 = vadd.f32 %v698_v24, %v675_v23  ;;  %v714_v18 = vadd.f32 %v698_v24, %v676_v39  ;;  %v715_v8 = vadd.f32 %v698_v24, %v677_v40  ;;  %v716_v19 = vadd.f32 %v698_v24, %v678_v51 }
 0x212   : > { %v7316_v27 = vadd.f32 %v698_v24, %v679_v52  ;;  %v7318_v28 = vadd.f32 %v698_v24, %v680_v48  ;;  %v7320_v13 = vadd.f32 %v698_v24, %v681_v63  ;;  %v7322_v26 = vadd.f32 %v698_v24, %v682_v4 }
 0x213   : > { %v7324_v31 = vadd.f32 %v698_v24, %v683_v21  ;;  %v7326_v32 = vadd.f32 %v698_v24, %v684_v25  ;;  %v7328_v33 = vadd.f32 %v698_v24, %v685_v49  ;;  %v7330_v34 = vadd.f32 %v698_v24, %v686_v38 }
 0x214   : > { %v7332_v35 = vadd.f32 %v698_v24, %v687_v41  ;;  %v7334_v36 = vadd.f32 %v698_v24, %v688_v1  ;;  %v7336_v37 = vadd.f32 %v698_v24, %v689_v2  ;;  %v7338_v44 = vadd.f32 %v698_v24, %v690_v9 }
 0x215   : > { %v7340_v46 = vadd.f32 %v698_v24, %v691_v10  ;;  %v7342_v47 = vadd.f32 %v698_v24, %v692_v17  ;;  %v7344_v61 = vadd.f32 %v698_v24, %v693_v22  ;;  %v732_v3 = vmax.f32 %v700_v53, 0.0  ;;  %v817_v10 = vld [vmem:[%s9402_s4 + $0xa0] sm:$0xff]  ;;  %v818_v17 = vld [vmem:[%s9402_s4 + $0xa8] sm:$0xff] }
 0x216   : > { %v733_v7 = vmax.f32 %v701_v29, 0.0  ;;  %v734_v15 = vmax.f32 %v702_v57, 0.0  ;;  %v735_v16 = vmax.f32 %v703_v30, 0.0  ;;  %v736_v23 = vmax.f32 %v704_v58, 0.0 }
 0x217   : > { %v737_v39 = vmax.f32 %v705_v42, 0.0  ;;  %v738_v40 = vmax.f32 %v706_v60, 0.0  ;;  %v739_v51 = vmax.f32 %v707_v43, 0.0  ;;  %v740_v52 = vmax.f32 %v708_v11, 0.0  ;;  %765 = vst.msk [vmem:[#allocation2 + $0x19] sm:$0xff] %vm304_vm0, %v732_v3  ;;  %v819_v43 = vld [vmem:[%s9402_s4 + $0xb0] sm:$0xff] }
 0x218   : > { %v741_v48 = vmax.f32 %v709_v54, 0.0  ;;  %v742_v63 = vmax.f32 %v710_v12, 0.0  ;;  %v743_v4 = vmax.f32 %v711_v55, 0.0  ;;  %v744_v21 = vmax.f32 %v712_v14, 0.0  ;;  %766 = vst.msk [vmem:[#allocation2 + $0x21] sm:$0xff] %vm304_vm0, %v733_v7  ;;  %767 = vst.msk [vmem:[#allocation2 + $0x31] sm:$0xff] %vm304_vm0, %v734_v15 }
 0x219   : > { %768 = vst.msk [vmem:[#allocation2 + $0x39] sm:$0xff] %vm304_vm0, %v735_v16  ;;  %769 = vst.msk [vmem:[#allocation2 + $0x49] sm:$0xff] %vm304_vm0, %v736_v23  ;;  %v745_v24 = vmax.f32 %v713_v6, 0.0  ;;  %v746_v25 = vmax.f32 %v714_v18, 0.0  ;;  %v747_v49 = vmax.f32 %v715_v8, 0.0  ;;  %v748_v38 = vmax.f32 %v716_v19, 0.0 }
 0x21a   : > { %770 = vst.msk [vmem:[#allocation2 + $0x51] sm:$0xff] %vm304_vm0, %v737_v39  ;;  %771 = vst.msk [vmem:[#allocation2 + $0x61] sm:$0xff] %vm304_vm0, %v738_v40  ;;  %v749_v41 = vmax.f32 %v7316_v27, 0.0  ;;  %v750_v1 = vmax.f32 %v7318_v28, 0.0  ;;  %v751_v2 = vmax.f32 %v7320_v13, 0.0  ;;  %v752_v9 = vmax.f32 %v7322_v26, 0.0 }
 0x21b   : > { %772 = vst.msk [vmem:[#allocation2 + $0x69] sm:$0xff] %vm304_vm0, %v739_v51  ;;  %773 = vst.msk [vmem:[#allocation2 + $0x79] sm:$0xff] %vm304_vm0, %v740_v52  ;;  %v753_v22 = vmax.f32 %v7324_v31, 0.0  ;;  %v754_v53 = vmax.f32 %v7326_v32, 0.0  ;;  %v755_v29 = vmax.f32 %v7328_v33, 0.0  ;;  %v756_v57 = vmax.f32 %v7330_v34, 0.0 }
 0x21c   : > { %774 = vst.msk [vmem:[#allocation2 + $0x81] sm:$0xff] %vm304_vm0, %v741_v48  ;;  %775 = vst.msk [vmem:[#allocation2 + $0x91] sm:$0xff] %vm304_vm0, %v742_v63  ;;  %v757_v30 = vmax.f32 %v7332_v35, 0.0  ;;  %v758_v58 = vmax.f32 %v7334_v36, 0.0  ;;  %v759_v42 = vmax.f32 %v7336_v37, 0.0  ;;  %v760_v60 = vmax.f32 %v7338_v44, 0.0 }
 0x21d   : > { %776 = vst.msk [vmem:[#allocation2 + $0x99] sm:$0xff] %vm304_vm0, %v743_v4  ;;  %777 = vst.msk [vmem:[#allocation2 + $0xa9] sm:$0xff] %vm304_vm0, %v744_v21  ;;  %v820_v11 = vld [vmem:[%s9402_s4 + $0xb8] sm:$0xff]  ;;  %v761_v54 = vmax.f32 %v7340_v46, 0.0  ;;  %v762_v12 = vmax.f32 %v7342_v47, 0.0  ;;  %v763_v55 = vmax.f32 %v7344_v61, 0.0  ;;  %v5548_v6 = vpack.c.bf16 %v818_v17, %v817_v10 }
 0x21e   : > { %778 = vst.msk [vmem:[#allocation2 + $0xb1] sm:$0xff] %vm304_vm0, %v745_v24  ;;  %779 = vst.msk [vmem:[#allocation2 + $0xc1] sm:$0xff] %vm304_vm0, %v746_v25  ;;  %v865_v14 = vld [vmem:[#allocation2 + $0x1] sm:$0xff]  ;;  %v7402_v18 = vld [vmem:[#allocation2 + $0x18] sm:$0xff]  ;;  %v5551_v28 = vpack.c.bf16 %v820_v11, %v819_v43 }
 0x21f   : > { %780 = vst.msk [vmem:[#allocation2 + $0xc9] sm:$0xff] %vm304_vm0, %v747_v49  ;;  %781 = vst.msk [vmem:[#allocation2 + $0xd9] sm:$0xff] %vm304_vm0, %v748_v38  ;;  %v7411_v27 = vld [vmem:[#allocation2 + $0x1a] sm:$0xff]  ;;  %5549 = vmatpush1.bf16.msra.mxu1 %v5548_v6  ;;  %v7416_v26 = vld [vmem:[#allocation2 + $0x31] sm:$0xff] }
 0x220   : > { %782 = vst.msk [vmem:[#allocation2 + $0xe1] sm:$0xff] %vm304_vm0, %v749_v41  ;;  %783 = vst.msk [vmem:[#allocation2 + $0xf1] sm:$0xff] %vm304_vm0, %v750_v1  ;;  %v7407_v8 = vld [vmem:[#allocation2 + $0x32] sm:$0xff]  ;;  %v7409_v19 = vld [vmem:[#allocation2 + $0x3a] sm:$0xff]  ;;  %v5747_v13 = vpack.i.bf16 %v865_v14, %v7411_v27  ;;  %5550 = vmatprep.subr.bf16.mxu1 %v6776_v56  ;;  %v5757_v34 = vpack.i.bf16 %v7402_v18, %v7416_v26 }
 0x221   : > { %784 = vst.msk [vmem:[#allocation2 + $0xf9] sm:$0xff] %vm304_vm0, %v751_v2  ;;  %785 = vst.msk [vmem:[#allocation2 + $0x109] sm:$0xff] %vm304_vm0, %v752_v9  ;;  %5332 = vmatprep.mubr.msk.f32.mxu0 %vm304_vm0, %v7407_v8  ;;  %v821_v31 = vld [vmem:[%s9402_s4 + $0xc0] sm:$0xff]  ;;  %v822_v32 = vld [vmem:[%s9402_s4 + $0xc8] sm:$0xff] }
 0x222   : > { %786 = vst.msk [vmem:[#allocation2 + $0x111] sm:$0xff] %vm304_vm0, %v753_v22  ;;  %787 = vst.msk [vmem:[#allocation2 + $0x121] sm:$0xff] %vm304_vm0, %v754_v53  ;;  %5333 = vmatmul.mubr.msk.f32.vlgmr.msra.gmra.mrb[2].mxu0 %vm304_vm0, %v7409_v19  ;;  %v7427_v33 = vld [vmem:[#allocation2 + $0x4a] sm:$0xff]  ;;  %v897_v35 = vld [vmem:[#allocation2 + $0x2] sm:$0xff]  ;;  %5748 = vrot.lane.b32.xlu0 %v5747_v13, %s6779_s22  ;;  %v5554_v46 = vpack.c.bf16 %v822_v32, %v821_v31 }
 0x223   : > { %788 = vst.msk [vmem:[#allocation2 + $0x129] sm:$0xff] %vm304_vm0, %v755_v29  ;;  %789 = vst.msk [vmem:[#allocation2 + $0x139] sm:$0xff] %vm304_vm0, %v756_v57  ;;  %v7431_v36 = vld [vmem:[#allocation2 + $0x30] sm:$0xff]  ;;  %5335 = vmatprep.mubr.msk.f32.mxu0 %vm304_vm0, %v7427_v33  ;;  %v7436_v44 = vld [vmem:[#allocation2 + $0x22] sm:$0xff]  ;;  %5758 = vrot.lane.b32.xlu1 %v5757_v34, %s9407_s23 }
 0x224   : > { %790 = vst.msk [vmem:[#allocation2 + $0x141] sm:$0xff] %vm304_vm0, %v757_v30  ;;  %791 = vst.msk [vmem:[#allocation2 + $0x151] sm:$0xff] %vm304_vm0, %v758_v58  ;;  %v866_v37 = vld [vmem:[#allocation2 + $0x9] sm:$0xff]  ;;  %5552 = vmatpush1.bf16.msra.mxu1 %v5551_v28  ;;  %v7439_v47 = vld [vmem:[#allocation2 + $0x52] sm:$0xff]  ;;  %v5752_v61 = vpack.i.bf16 %v897_v35, %v7431_v36  ;;  %v5807_v28 = vpack.i.bf16 %v7416_v26, %v7427_v33 }
 0x225   : > { %792 = vst.msk [vmem:[#allocation2 + $0x159] sm:$0xff] %vm304_vm0, %v759_v42  ;;  %793 = vst.msk [vmem:[#allocation2 + $0x169] sm:$0xff] %vm304_vm0, %v760_v60  ;;  %5553 = vmatprep.subr.bf16.mxu1 %v6776_v56  ;;  %v823_v3 = vld [vmem:[%s9402_s4 + $0xd0] sm:$0xff]  ;;  %v824_v7 = vld [vmem:[%s9402_s4 + $0xd8] sm:$0xff]  ;;  %v5762_v16 = vpack.i.bf16 %v866_v37, %v7436_v44 }
 0x226   : > { %794 = vst.msk [vmem:[#allocation2 + $0x171] sm:$0xff] %vm304_vm0, %v761_v54  ;;  %795 = vst.msk [vmem:[#allocation2 + $0x181] sm:$0xff] %vm304_vm0, %v762_v12  ;;  %5336 = vmatmul.mubr.msk.f32.gmra.mrb[4].mxu0 %vm304_vm0, %v7439_v47  ;;  %v7451_v15 = vld [vmem:[#allocation2 + $0x62] sm:$0xff]  ;;  %v898_v23 = vld [vmem:[#allocation2 + $0xa] sm:$0xff]  ;;  %5753 = vrot.lane.b32.xlu0 %v5752_v61, %s6781_s12  ;;  %v5557_v52 = vpack.c.bf16 %v824_v7, %v823_v3 }
 0x227   : > { %796 = vst.msk [vmem:[#allocation2 + $0x189] sm:$0xff] %vm304_vm0, %v763_v55  ;;  %v1027_v39 = vld [vmem:[#allocation2 + $0x38] sm:$0xff]  ;;  %5338 = vmatprep.mubr.msk.f32.mxu0 %vm304_vm0, %v7451_v15  ;;  %v7457_v40 = vld [vmem:[#allocation2 + $0x20] sm:$0xff]  ;;  %5763 = vrot.lane.b32.xlu1 %v5762_v16, %s6779_s22  ;;  %v7462_v48 = vld [vmem:[#allocation2 + $0x6a] sm:$0xff] }
 0x228   : > { %v7459_v51 = vld [vmem:[#allocation2 + $0x39] sm:$0xff]  ;;  %5555 = vmatpush1.bf16.msra.mxu1 %v5554_v46  ;;  %v5767_v63 = vpack.i.bf16 %v898_v23, %v1027_v39  ;;  %v826_v21 = vld [vmem:[%s9402_s4 + $0xe8] sm:$0xff]  ;;  %v827_v9 = vld [vmem:[%s9402_s4 + $0xf0] sm:$0xff] }
 0x229   : > { %5556 = vmatprep.subr.bf16.mxu1 %v6776_v56  ;;  %v825_v4 = vld [vmem:[%s9402_s4 + $0xe0] sm:$0xff]  ;;  %v5772_v25 = vpack.i.bf16 %v7457_v40, %v7459_v51  ;;  %v1028_v38 = vld [vmem:[#allocation2 + $0x48] sm:$0xff]  ;;  %v7493_v10 = vld [vmem:[#allocation2 + $0x92] sm:$0xff] }
 0x22a   : > { %5339 = vmatmul.mubr.msk.f32.gmra.mrb[6].mxu0 %vm304_vm0, %v7462_v48  ;;  %v7473_v24 = vld [vmem:[#allocation2 + $0x7a] sm:$0xff]  ;;  %5768 = vrot.lane.b32.xlu0 %v5767_v63, %s6781_s12  ;;  %v5560_v41 = vpack.c.bf16 %v826_v21, %v825_v4  ;;  %v7483_v1 = vld [vmem:[#allocation2 + $0x82] sm:$0xff]  ;;  %v5782_v17 = vpack.i.bf16 %v7411_v27, %v1028_v38  ;;  %v7514_v42 = vld [vmem:[#allocation2 + $0xaa] sm:$0xff] }
 0x22b   : > { %v7477_v49 = vld [vmem:[#allocation2 + $0x19] sm:$0xff]  ;;  %5341 = vmatprep.mubr.msk.f32.mxu0 %vm304_vm0, %v7473_v24  ;;  %5773 = vrot.lane.b32.xlu1 %v5772_v25, %s9407_s23  ;;  %v7496_v22 = vld [vmem:[#allocation2 + $0x49] sm:$0xff]  ;;  %v7504_v29 = vld [vmem:[#allocation2 + $0x21] sm:$0xff] }
 0x22c   : > { %5558 = vmatpush1.bf16.msra.mxu1 %v5557_v52  ;;  %v5777_v2 = vpack.i.bf16 %v7477_v49, %v7407_v8  ;;  %v828_v53 = vld [vmem:[%s9402_s4 + $0xf8] sm:$0xff]  ;;  %v5787_v30 = vpack.i.bf16 %v7431_v36, %v7496_v22  ;;  %v5792_v60 = vpack.i.bf16 %v7504_v29, %v7409_v19  ;;  %v1029_v43 = vld [vmem:[#allocation2 + $0x50] sm:$0xff]  ;;  %v7529_v55 = vld [vmem:[#allocation2 + $0xc2] sm:$0xff] }
 0x22d   : > { %5559 = vmatprep.subr.bf16.mxu1 %v6776_v56  ;;  %v7507_v57 = vld [vmem:[#allocation2 + $0x9a] sm:$0xff]  ;;  %v5563_v58 = vpack.c.bf16 %v828_v53, %v827_v9  ;;  %v7521_v11 = vld [vmem:[#allocation2 + $0x51] sm:$0xff]  ;;  %v5797_v12 = vpack.i.bf16 %v7436_v44, %v1029_v43  ;;  %v7551_v34 = vld [vmem:[#allocation2 + $0xe2] sm:$0xff] }
 0x22e   : > { %5342 = vmatmul.mubr.msk.f32.gmra.mrb[8].mxu0 %vm304_vm0, %v7483_v1  ;;  %5778 = vrot.lane.b32.xlu0 %v5777_v2, %s6779_s22  ;;  %v7524_v54 = vld [vmem:[#allocation2 + $0xb2] sm:$0xff]  ;;  %v5802_v14 = vpack.i.bf16 %v1027_v39, %v7521_v11  ;;  %v1030_v6 = vld [vmem:[#allocation2 + $0x60] sm:$0xff]  ;;  %v7536_v27 = vld [vmem:[#allocation2 + $0xca] sm:$0xff]  ;;  %v5837_v39 = vpack.i.bf16 %v7496_v22, %v7451_v15 }
 0x22f   : > { %5344 = vmatprep.mubr.msk.f32.mxu0 %vm304_vm0, %v7493_v10  ;;  %5783 = vrot.lane.b32.xlu1 %v5782_v17, %s6781_s12  ;;  %v7542_v13 = vld [vmem:[#allocation2 + $0xda] sm:$0xff]  ;;  %v5812_v31 = vpack.i.bf16 %v7407_v8, %v1030_v6  ;;  %v7556_v36 = vld [vmem:[#allocation2 + $0xf2] sm:$0xff]  ;;  %v5822_v8 = vpack.i.bf16 %v7459_v51, %v7439_v47  ;;  %v1031_v37 = vld [vmem:[#allocation2 + $0x68] sm:$0xff] }
 0x230   : > { %5561 = vmatpush1.bf16.msra.mxu1 %v5560_v41  ;;  %v7545_v32 = vld [vmem:[#allocation2 + $0x61] sm:$0xff]  ;;  %v1063_v44 = vld [vmem:[#allocation2 + $0x69] sm:$0xff]  ;;  %v5827_v61 = vpack.i.bf16 %v7409_v19, %v1031_v37  ;;  %v1032_v16 = vld [vmem:[#allocation2 + $0x78] sm:$0xff] }
 0x231   : > { %5562 = vmatprep.subr.bf16.mxu1 %v6776_v56  ;;  %v5817_v35 = vpack.i.bf16 %v1028_v38, %v7545_v32  ;;  %v7564_v46 = vld [vmem:[#allocation2 + $0xfa] sm:$0xff]  ;;  %v7569_v3 = vld [vmem:[#allocation2 + $0x10a] sm:$0xff]  ;;  %v5832_v7 = vpack.i.bf16 %v1029_v43, %v1063_v44  ;;  %v7575_v23 = vld [vmem:[#allocation2 + $0x112] sm:$0xff]  ;;  %v5842_v52 = vpack.i.bf16 %v7427_v33, %v1032_v16  ;;  %v5852_v38 = vpack.i.bf16 %v7521_v11, %v7462_v48 }
 0x232   : > { %5345 = vmatmul.mubr.msk.f32.gmra.mrb[10].mxu0 %vm304_vm0, %v7507_v57  ;;  %5788 = vrot.lane.b32.xlu0 %v5787_v30, %s9407_s23  ;;  %v7581_v19 = vld [vmem:[#allocation2 + $0x122] sm:$0xff]  ;;  %v1064_v63 = vld [vmem:[#allocation2 + $0x79] sm:$0xff]  ;;  %v7588_v4 = vld [vmem:[#allocation2 + $0x12a] sm:$0xff] }
 0x233   : > { %5347 = vmatprep.mubr.msk.f32.mxu0 %vm304_vm0, %v7514_v42  ;;  %5793 = vrot.lane.b32.xlu1 %v5792_v60, %s6779_s22  ;;  %v5847_v21 = vpack.i.bf16 %v1030_v6, %v1064_v63  ;;  %v7592_v25 = vld [vmem:[#allocation2 + $0x13a] sm:$0xff]  ;;  %v7600_v2 = vld [vmem:[#allocation2 + $0x142] sm:$0xff]  ;;  %v7605_v17 = vld [vmem:[#allocation2 + $0x152] sm:$0xff]  ;;  %v5867_v60 = vpack.i.bf16 %v7545_v32, %v7473_v24 }
 0x234   : > { %5564 = vmatpush1.bf16.msra.mxu1 %v5563_v58  ;;  %v1033_v33 = vld [vmem:[#allocation2 + $0x80] sm:$0xff]  ;;  %v1034_v30 = vld [vmem:[#allocation2 + $0x90] sm:$0xff] }
 0x235   : > { %v1065_v41 = vld [vmem:[#allocation2 + $0x81] sm:$0xff]  ;;  %v5857_v9 = vpack.i.bf16 %v7439_v47, %v1033_v33  ;;  %v7617_v47 = vld [vmem:[#allocation2 + $0x16a] sm:$0xff]  ;;  %v5872_v43 = vpack.i.bf16 %v7451_v15, %v1034_v30  ;;  %v1067_v15 = vld [vmem:[#allocation2 + $0x99] sm:$0xff] }
 0x236   : > { %5348 = vmatmul.mubr.msk.f32.gmra.mrb[12].mxu0 %vm304_vm0, %v7524_v54  ;;  %5798 = vrot.lane.b32.xlu0 %v5797_v12, %s6781_s12  ;;  %v5862_v53 = vpack.i.bf16 %v1031_v37, %v1065_v41  ;;  %v7611_v58 = vld [vmem:[#allocation2 + $0x15a] sm:$0xff]  ;;  %v1066_v12 = vld [vmem:[#allocation2 + $0x91] sm:$0xff] }
 0x237   : > { %5350 = vmatprep.mubr.msk.f32.mxu0 %vm304_vm0, %v7529_v55  ;;  %5803 = vrot.lane.b32.xlu1 %v5802_v14, %s9407_s23  ;;  %v7624_v14 = vld [vmem:[#allocation2 + $0x172] sm:$0xff]  ;;  %v5877_v6 = vpack.i.bf16 %v1032_v16, %v1066_v12 }
 0x23a   : > { %5351 = vmatmul.mubr.msk.f32.gmra.mrb[14].mxu0 %vm304_vm0, %v7536_v27  ;;  %5808 = vrot.lane.b32.xlu0 %v5807_v28, %s6779_s22  ;;  %v1118_v28 = vld [vmem:[#allocation2 + $0x182] sm:$0xff] }
 0x23b   : > { %5353 = vmatprep.mubr.msk.f32.mxu0 %vm304_vm0, %v7542_v13  ;;  %5813 = vrot.lane.b32.xlu1 %v5812_v31, %s6781_s12  ;;  %v5882_v31 = vpack.i.bf16 %v1063_v44, %v7483_v1  ;;  %v5897_v44 = vpack.i.bf16 %v1064_v63, %v7493_v10  ;;  %v5927_v63 = vpack.i.bf16 %v1066_v12, %v7514_v42 }
 0x23e   : > { %5354 = vmatmul.mubr.msk.f32.gmra.mrb[16].mxu0 %vm304_vm0, %v7551_v34  ;;  %5818 = vrot.lane.b32.xlu0 %v5817_v35, %s9407_s23  ;;  %v1035_v35 = vld [vmem:[#allocation2 + $0x98] sm:$0xff] }
 0x23f   : > { %5356 = vmatprep.mubr.msk.f32.mxu0 %vm304_vm0, %v7556_v36  ;;  %5823 = vrot.lane.b32.xlu1 %v5822_v8, %s6779_s22  ;;  %v1119_v8 = vld [vmem:[#allocation2 + $0x18a] sm:$0xff]  ;;  %v5887_v37 = vpack.i.bf16 %v7462_v48, %v1035_v35  ;;  %v5912_v48 = vpack.i.bf16 %v1065_v41, %v7507_v57 }
 0x242   : > { %5357 = vmatmul.mubr.msk.f32.gmra.mrb[18].mxu0 %vm304_vm0, %v7564_v46  ;;  %5828 = vrot.lane.b32.xlu0 %v5827_v61, %s6781_s12  ;;  %v5892_v61 = vpack.i.bf16 %v1033_v33, %v1067_v15 }
 0x243   : > { %5359 = vmatprep.mubr.msk.f32.mxu0 %vm304_vm0, %v7569_v3  ;;  %5833 = vrot.lane.b32.xlu1 %v5832_v7, %s9407_s23  ;;  %v1036_v7 = vld [vmem:[#allocation2 + $0xa8] sm:$0xff] }
 0x244   : > { %v5902_v16 = vpack.i.bf16 %v7473_v24, %v1036_v7  ;;  %v1038_v24 = vld [vmem:[#allocation2 + $0xc0] sm:$0xff] }
 0x246   : > { %5360 = vmatmul.mubr.msk.f32.gmra.mrb[20].mxu0 %vm304_vm0, %v7575_v23  ;;  %5838 = vrot.lane.b32.xlu0 %v5837_v39, %s6779_s22  ;;  %v1068_v39 = vld [vmem:[#allocation2 + $0xa9] sm:$0xff] }
 0x247   : > { %5362 = vmatprep.mubr.msk.f32.mxu0 %vm304_vm0, %v7581_v19  ;;  %5843 = vrot.lane.b32.xlu1 %v5842_v52, %s6781_s12  ;;  %v5907_v52 = vpack.i.bf16 %v1034_v30, %v1068_v39  ;;  %v1070_v30 = vld [vmem:[#allocation2 + $0xc1] sm:$0xff]  ;;  %v5957_v12 = vpack.i.bf16 %v1068_v39, %v7529_v55  ;;  %v1074_v39 = vld [vmem:[#allocation2 + $0xf1] sm:$0xff] }
 0x248   : > { %v5937_v41 = vpack.i.bf16 %v1036_v7, %v1070_v30 }
 0x24a   : > { %5363 = vmatmul.mubr.msk.f32.gmra.mrb[22].mxu0 %vm304_vm0, %v7588_v4  ;;  %5848 = vrot.lane.b32.xlu0 %v5847_v21, %s9407_s23  ;;  %v1037_v21 = vld [vmem:[#allocation2 + $0xb0] sm:$0xff] }
 0x24b   : > { %5365 = vmatprep.mubr.msk.f32.mxu0 %vm304_vm0, %v7592_v25  ;;  %5853 = vrot.lane.b32.xlu1 %v5852_v38, %s6779_s22  ;;  %v1069_v38 = vld [vmem:[#allocation2 + $0xb1] sm:$0xff]  ;;  %v5917_v33 = vpack.i.bf16 %v7483_v1, %v1037_v21  ;;  %v1071_v1 = vld [vmem:[#allocation2 + $0xc9] sm:$0xff] }
 0x24e   : > { %5366 = vmatmul.mubr.msk.f32.gmra.mrb[24].mxu0 %vm304_vm0, %v7600_v2  ;;  %5858 = vrot.lane.b32.xlu0 %v5857_v9, %s6781_s12  ;;  %v5922_v9 = vpack.i.bf16 %v1035_v35, %v1069_v38  ;;  %v1072_v35 = vld [vmem:[#allocation2 + $0xd9] sm:$0xff] }
 0x24f   : > { %5368 = vmatprep.mubr.msk.f32.mxu0 %vm304_vm0, %v7605_v17  ;;  %5863 = vrot.lane.b32.xlu1 %v5862_v53, %s9407_s23  ;;  %v5932_v53 = vpack.i.bf16 %v7493_v10, %v1038_v24  ;;  %v1040_v10 = vld [vmem:[#allocation2 + $0xd8] sm:$0xff] }
 0x252   : > { %5369 = vmatmul.mubr.msk.f32.gmra.mrb[26].mxu0 %vm304_vm0, %v7611_v58  ;;  %5868 = vrot.lane.b32.xlu0 %v5867_v60, %s6779_s22  ;;  %v5942_v60 = vpack.i.bf16 %v1067_v15, %v7524_v54  ;;  %v5967_v15 = vpack.i.bf16 %v1038_v24, %v1072_v35 }
 0x253   : > { %5371 = vmatprep.mubr.msk.f32.mxu0 %vm304_vm0, %v7617_v47  ;;  %5873 = vrot.lane.b32.xlu1 %v5872_v43, %s6781_s12  ;;  %v1039_v43 = vld [vmem:[#allocation2 + $0xc8] sm:$0xff] }
 0x256   : > { %5372 = vmatmul.mubr.msk.f32.gmra.mrb[28].mxu0 %vm304_vm0, %v7624_v14  ;;  %5878 = vrot.lane.b32.xlu0 %v5877_v6, %s9407_s23  ;;  %v5947_v6 = vpack.i.bf16 %v7507_v57, %v1039_v43  ;;  %v1073_v57 = vld [vmem:[#allocation2 + $0xe1] sm:$0xff] }
 0x257   : > { %5374 = vmatprep.mubr.msk.f32.mxu0 %vm304_vm0, %v1118_v28  ;;  %5883 = vrot.lane.b32.xlu1 %v5882_v31, %s6779_s22  ;;  %v5952_v28 = vpack.i.bf16 %v1037_v21, %v1071_v1  ;;  %v5962_v31 = vpack.i.bf16 %v7514_v42, %v1040_v10  ;;  %v5982_v7 = vpack.i.bf16 %v1039_v43, %v1073_v57  ;;  %v1042_v42 = vld [vmem:[#allocation2 + $0xf0] sm:$0xff]  ;;  %v1043_v21 = vld [vmem:[#allocation2 + $0xf8] sm:$0xff] }
 0x25a   : > { %5375 = vmatmul.mubr.msk.f32.gmra.mrb[30].mxu0 %vm304_vm0, %v1119_v8  ;;  %5888 = vrot.lane.b32.xlu0 %v5887_v37, %s6781_s12  ;;  %v5972_v8 = vpack.i.bf16 %v1069_v38, %v7536_v27  ;;  %v1041_v37 = vld [vmem:[#allocation2 + $0xe0] sm:$0xff]  ;;  %v6007_v38 = vpack.i.bf16 %v7536_v27, %v1043_v21  ;;  %v6032_v27 = vpack.i.bf16 %v1073_v57, %v7564_v46 }
 0x25b   : > { %5893 = vrot.lane.b32.xlu1 %v5892_v61, %s9407_s23  ;;  %v5977_v61 = vpack.i.bf16 %v7524_v54, %v1041_v37  ;;  %v7672_v54 = vld [vmem:[#allocation2 + $0xf9] sm:$0xff] }
 0x25e   : > { %5898 = vrot.lane.b32.xlu0 %v5897_v44, %s6779_s22  ;;  %v5987_v44 = vpack.i.bf16 %v1070_v30, %v7542_v13  ;;  %v7687_v30 = vld [vmem:[#allocation2 + $0x110] sm:$0xff] }
 0x25f   : > { %5903 = vrot.lane.b32.xlu1 %v5902_v16, %s6781_s12  ;;  %v5992_v16 = vpack.i.bf16 %v7529_v55, %v1042_v42  ;;  %v1044_v55 = vld [vmem:[#allocation2 + $0x108] sm:$0xff] }
 0x260   : > { %v6022_v24 = vpack.i.bf16 %v7542_v13, %v1044_v55  ;;  %v6037_v13 = vpack.i.bf16 %v7551_v34, %v7687_v30 }
 0x262   : > { %5908 = vrot.lane.b32.xlu0 %v5907_v52, %s9407_s23  ;;  %v5997_v52 = vpack.i.bf16 %v1040_v10, %v1074_v39 }
 0x263   : > { %5913 = vrot.lane.b32.xlu1 %v5912_v48, %s6779_s22  ;;  %v6002_v48 = vpack.i.bf16 %v1071_v1, %v7551_v34 }
 0x266   : > { %5918 = vrot.lane.b32.xlu0 %v5917_v33, %s6781_s12  ;;  %v6012_v33 = vpack.i.bf16 %v1041_v37, %v7672_v54 }
 0x267   : > { %5923 = vrot.lane.b32.xlu1 %v5922_v9, %s9407_s23  ;;  %v6017_v9 = vpack.i.bf16 %v1072_v35, %v7556_v36 }
 0x26a   : > { %5928 = vrot.lane.b32.xlu0 %v5927_v63, %s6779_s22  ;;  %v7681_v63 = vld [vmem:[#allocation2 + $0x109] sm:$0xff] }
 0x26b   : > { %5933 = vrot.lane.b32.xlu1 %v5932_v53, %s6781_s12  ;;  %v6027_v53 = vpack.i.bf16 %v1042_v42, %v7681_v63 }
 0x26e   : > { %5938 = vrot.lane.b32.xlu0 %v5937_v41, %s9407_s23  ;;  %v7690_v41 = vld [vmem:[#allocation2 + $0x111] sm:$0xff] }
 0x26f   : > { %5943 = vrot.lane.b32.xlu1 %v5942_v60, %s6779_s22  ;;  %v6042_v1 = vpack.i.bf16 %v1043_v21, %v7690_v41 }
 0x272   : > { %5948 = vrot.lane.b32.xlu0 %v5947_v6, %s6781_s12  ;;  %v7696_v6 = vld [vmem:[#allocation2 + $0x120] sm:$0xff] }
 0x273   : > { %5953 = vrot.lane.b32.xlu1 %v5952_v28, %s9407_s23  ;;  %v6052_v35 = vpack.i.bf16 %v7556_v36, %v7696_v6 }
 0x276   : > { %5958 = vrot.lane.b32.xlu0 %v5957_v12, %s6779_s22  ;;  %v833_v12 = vld [vmem:[#allocation2] sm:$0xff] }
 0x277   : > { %5963 = vrot.lane.b32.xlu1 %v5962_v31, %s6781_s12 }
 0x27a   : > { %5968 = vrot.lane.b32.xlu0 %v5967_v15, %s9407_s23  ;;  %v6047_v15 = vpack.i.bf16 %v1074_v39, %v7569_v3 }
 0x27b   : > { %5973 = vrot.lane.b32.xlu1 %v5972_v8, %s6779_s22 }
 0x27e   : > { %5978 = vrot.lane.b32.xlu0 %v5977_v61, %s6781_s12 }
 0x27f   : > { %5983 = vrot.lane.b32.xlu1 %v5982_v7, %s9407_s23  ;;  %v7703_v7 = vld [vmem:[#allocation2 + $0x121] sm:$0xff] }
 0x282   : > { %5988 = vrot.lane.b32.xlu0 %v5987_v44, %s6779_s22 }
 0x283   : > { %5993 = vrot.lane.b32.xlu1 %v5992_v16, %s6781_s12 }
 0x286   : > { %5998 = vrot.lane.b32.xlu0 %v5997_v52, %s9407_s23 }
 0x287   : > { %6003 = vrot.lane.b32.xlu1 %v6002_v48, %s6779_s22  ;;  %v834_v48 = vld [vmem:[#allocation2 + $0x8] sm:$0xff] }
 0x28a   : > { %6008 = vrot.lane.b32.xlu0 %v6007_v38, %s6781_s12 }
 0x28b   : > { %6013 = vrot.lane.b32.xlu1 %v6012_v33, %s9407_s23 }
 0x28e   : > { %6018 = vrot.lane.b32.xlu0 %v6017_v9, %s6779_s22  ;;  %v6057_v9 = vpack.i.bf16 %v1044_v55, %v7703_v7  ;;  %v7723_v55 = vld [vmem:[#allocation2 + $0x129] sm:$0xff] }
 0x28f   : > { %6023 = vrot.lane.b32.xlu1 %v6022_v24, %s6781_s12 }
 0x292   : > { %6028 = vrot.lane.b32.xlu0 %v6027_v53, %s9407_s23 }
 0x293   : > { %6033 = vrot.lane.b32.xlu1 %v6032_v27, %s6779_s22 }
 0x294   : > { %v5749_v60 = vpop.permute.xlu0 %5748 }
 0x295   : > { %v5759_v43 = vpop.permute.xlu1 %5758  ;;  %v5751_v28 = vunpack.i.h.bf16 %v5749_v60  ;;  %v5750_v10 = vunpack.i.l.bf16 %v5749_v60  ;;  %v7717_v60 = vld [vmem:[#allocation2 + $0x128] sm:$0xff] }
 0x296   : > { %6038 = vrot.lane.b32.xlu0 %v6037_v13, %s6781_s12  ;;  %v5761_v34 = vunpack.i.h.bf16 %v5759_v43  ;;  %v5760_v8 = vunpack.i.l.bf16 %v5759_v43 }
 0x297   : > { %6043 = vrot.lane.b32.xlu1 %v6042_v1, %s9407_s23  ;;  %v1988_v16 = vsel %vm304_vm0, %v7477_v49, %v5750_v10  ;;  %v1890_v36 = vsel %vm304_vm0, %v833_v12, %v5751_v28  ;;  %v6062_v49 = vpack.i.bf16 %v7672_v54, %v7575_v23 }
 0x298   : > { %v5754_v31 = vpop.permute.xlu0 %5753 }
 0x299   : > { %v5756_v37 = vunpack.i.h.bf16 %v5754_v31  ;;  %v5755_v57 = vunpack.i.l.bf16 %v5754_v31  ;;  %v5764_v61 = vpop.permute.xlu1 %5763 }
 0x29a   : > { %v5766_v42 = vunpack.i.h.bf16 %v5764_v61  ;;  %v5765_v44 = vunpack.i.l.bf16 %v5764_v61  ;;  %6048 = vrot.lane.b32.xlu0 %v6047_v15, %s6779_s22  ;;  %v6067_v15 = vpack.i.bf16 %v7564_v46, %v7717_v60 }
 0x29b   : > { %6053 = vrot.lane.b32.xlu1 %v6052_v35, %s6781_s12  ;;  %v2020_v39 = vsel %vm1922_vm5, %v1988_v16, %v5755_v57  ;;  %v1923_v52 = vsel %vm1922_vm5, %v1890_v36, %v5756_v37  ;;  %v6072_v37 = vpack.i.bf16 %v7687_v30, %v7723_v55  ;;  %v6077_v36 = vpack.i.bf16 %v7681_v63, %v7581_v19 }
 0x29c   : > { %v5769_v21 = vpop.permute.xlu0 %5768  ;;  %v2052_v38 = vsel %vm1955_vm6, %v2020_v39, %v5760_v8  ;;  %v1956_v33 = vsel %vm1955_vm6, %v1923_v52, %v5761_v34  ;;  %v1989_v1 = vsel %vm304_vm0, %v7504_v29, %v5765_v44  ;;  %v1891_v28 = vsel %vm304_vm0, %v834_v48, %v5766_v42  ;;  %v7735_v42 = vld [vmem:[#allocation2 + $0x138] sm:$0xff] }
 0x29d   : > { %v5771_v24 = vunpack.i.h.bf16 %v5769_v21  ;;  %v5770_v53 = vunpack.i.l.bf16 %v5769_v21  ;;  %v5774_v27 = vpop.permute.xlu1 %5773  ;;  %2244 = vmatprep.mubr.f32.mxu1 %v2052_v38  ;;  %v6082_v48 = vpack.i.bf16 %v7569_v3, %v7735_v42  ;;  %v7746_v21 = vld [vmem:[#allocation2 + $0x139] sm:$0xff] }
 0x29e   : > { %v5776_v13 = vunpack.i.h.bf16 %v5774_v27  ;;  %v5775_v43 = vunpack.i.l.bf16 %v5774_v27  ;;  %2245 = vmatmul.mubr.f32.vlgmr.msra.gmra.mrb[4].mxu1 %v1956_v33  ;;  %6058 = vrot.lane.b32.xlu0 %v6057_v9, %s9407_s23  ;;  %v6087_v3 = vpack.i.bf16 %v7696_v6, %v7746_v21 }
 0x29f   : > { %6063 = vrot.lane.b32.xlu1 %v6062_v49, %s6779_s22  ;;  %v2021_v10 = vsel %vm1922_vm5, %v1989_v1, %v5770_v53  ;;  %v1924_v54 = vsel %vm1922_vm5, %v1891_v28, %v5771_v24 }
 0x2a0   : > { %v5779_v12 = vpop.permute.xlu0 %5778  ;;  %v2053_v31 = vsel %vm1955_vm6, %v2021_v10, %v5775_v43  ;;  %v1957_v35 = vsel %vm1955_vm6, %v1924_v54, %v5776_v13  ;;  %v6092_v13 = vpack.i.bf16 %v7690_v41, %v7588_v4  ;;  %v7758_v43 = vld [vmem:[#allocation2 + $0x140] sm:$0xff] }
 0x2a1   : > { %v5784_v34 = vpop.permute.xlu1 %5783  ;;  %v5781_v29 = vunpack.i.h.bf16 %v5779_v12  ;;  %v5780_v8 = vunpack.i.l.bf16 %v5779_v12  ;;  %2249 = vmatprep.mubr.f32.mxu1 %v2053_v31  ;;  %v7763_v54 = vld [vmem:[#allocation2 + $0x141] sm:$0xff] }
 0x2a2   : > { %v5786_v57 = vunpack.i.h.bf16 %v5784_v34  ;;  %v5785_v61 = vunpack.i.l.bf16 %v5784_v34  ;;  %2250 = vmatmul.mubr.f32.gmra.mrb[6].mxu1 %v1957_v35  ;;  %6068 = vrot.lane.b32.xlu0 %v6067_v15, %s6781_s12  ;;  %v6097_v15 = vpack.i.bf16 %v7575_v23, %v7758_v43 }
 0x2a3   : > { %6073 = vrot.lane.b32.xlu1 %v6072_v37, %s9407_s23  ;;  %v1990_v44 = vsel %vm304_vm0, %v7416_v26, %v5780_v8  ;;  %v1892_v46 = vsel %vm304_vm0, %v7402_v18, %v5781_v29 }
 0x2a4   : > { %v5789_v16 = vpop.permute.xlu0 %5788  ;;  %v2022_v26 = vsel %vm1922_vm5, %v1990_v44, %v5785_v61  ;;  %v1925_v18 = vsel %vm1922_vm5, %v1892_v46, %v5786_v57  ;;  %v7777_v61 = vld [vmem:[#allocation2 + $0x150] sm:$0xff] }
 0x2a5   : > { %v5794_v30 = vpop.permute.xlu1 %5793  ;;  %v5791_v39 = vunpack.i.h.bf16 %v5789_v16  ;;  %v5790_v52 = vunpack.i.l.bf16 %v5789_v16  ;;  %v837_v44 = vld [vmem:[#allocation2 + $0x30] sm:$0xff] }
 0x2a6   : > { %v5796_v38 = vunpack.i.h.bf16 %v5794_v30  ;;  %v5795_v33 = vunpack.i.l.bf16 %v5794_v30  ;;  %6078 = vrot.lane.b32.xlu0 %v6077_v36, %s6779_s22  ;;  %v6107_v36 = vpack.i.bf16 %v7703_v7, %v7592_v25 }
 0x2a7   : > { %6083 = vrot.lane.b32.xlu1 %v6082_v48, %s6781_s12  ;;  %v2054_v63 = vsel %vm1955_vm6, %v2022_v26, %v5790_v52  ;;  %v1958_v9 = vsel %vm1955_vm6, %v1925_v18, %v5791_v39  ;;  %v6112_v52 = vpack.i.bf16 %v7581_v19, %v7777_v61  ;;  %v7787_v48 = vld [vmem:[#allocation2 + $0x151] sm:$0xff] }
 0x2a8   : > { %v5799_v24 = vpop.permute.xlu0 %5798  ;;  %2254 = vmatprep.mubr.f32.mxu1 %v2054_v63  ;;  %v1991_v10 = vsel %vm304_vm0, %v7459_v51, %v5795_v33  ;;  %v1893_v6 = vsel %vm304_vm0, %v7457_v40, %v5796_v38  ;;  %v6102_v40 = vpack.i.bf16 %v7717_v60, %v7763_v54  ;;  %v6117_v19 = vpack.i.bf16 %v7735_v42, %v7787_v48 }
 0x2a9   : > { %v5804_v53 = vpop.permute.xlu1 %5803  ;;  %v5801_v27 = vunpack.i.h.bf16 %v5799_v24  ;;  %v5800_v49 = vunpack.i.l.bf16 %v5799_v24  ;;  %2255 = vmatmul.mubr.f32.gmra.mrb[8].mxu1 %v1958_v9 }
 0x2aa   : > { %v5806_v1 = vunpack.i.h.bf16 %v5804_v53  ;;  %v5805_v28 = vunpack.i.l.bf16 %v5804_v53  ;;  %6088 = vrot.lane.b32.xlu0 %v6087_v3, %s9407_s23  ;;  %v6122_v53 = vpack.i.bf16 %v7723_v55, %v7600_v2 }
 0x2ab   : > { %6093 = vrot.lane.b32.xlu1 %v6092_v13, %s6779_s22  ;;  %v2023_v12 = vsel %vm1922_vm5, %v1991_v10, %v5800_v49  ;;  %v1926_v41 = vsel %vm1922_vm5, %v1893_v6, %v5801_v27  ;;  %v7799_v27 = vld [vmem:[#allocation2 + $0x158] sm:$0xff] }
 0x2ac   : > { %v5809_v31 = vpop.permute.xlu0 %5808  ;;  %v2055_v35 = vsel %vm1955_vm6, %v2023_v12, %v5805_v28  ;;  %v1959_v34 = vsel %vm1955_vm6, %v1926_v41, %v5806_v1  ;;  %v838_v49 = vld [vmem:[#allocation2 + $0x38] sm:$0xff] }
 0x2ad   : > { %v5814_v51 = vpop.permute.xlu1 %5813  ;;  %v5811_v29 = vunpack.i.h.bf16 %v5809_v31  ;;  %v5810_v8 = vunpack.i.l.bf16 %v5809_v31  ;;  %2259 = vmatprep.mubr.f32.mxu1 %v2055_v35  ;;  %v7804_v10 = vld [vmem:[#allocation2 + $0x159] sm:$0xff]  ;;  %v6127_v31 = vpack.i.bf16 %v7588_v4, %v7799_v27 }
 0x2ae   : > { %v5816_v37 = vunpack.i.h.bf16 %v5814_v51  ;;  %v5815_v57 = vunpack.i.l.bf16 %v5814_v51  ;;  %6098 = vrot.lane.b32.xlu0 %v6097_v15, %s6781_s12  ;;  %2260 = vmatmul.mubr.f32.gmra.mrb[10].mxu1 %v1959_v34  ;;  %v6132_v51 = vpack.i.bf16 %v7758_v43, %v7804_v10 }
 0x2af   : > { %6103 = vrot.lane.b32.xlu1 %v6102_v40, %s9407_s23  ;;  %v1992_v23 = vsel %vm304_vm0, %v7496_v22, %v5810_v8  ;;  %v1894_v46 = vsel %vm304_vm0, %v837_v44, %v5811_v29  ;;  %v7817_v40 = vld [vmem:[#allocation2 + $0x168] sm:$0xff] }
 0x2b0   : > { %v5819_v16 = vpop.permute.xlu0 %5818  ;;  %v2024_v22 = vsel %vm1922_vm5, %v1992_v23, %v5815_v57  ;;  %v1927_v26 = vsel %vm1922_vm5, %v1894_v46, %v5816_v37  ;;  %v839_v37 = vld [vmem:[#allocation2 + $0x48] sm:$0xff]  ;;  %v6137_v23 = vpack.i.bf16 %v7746_v21, %v7605_v17 }
 0x2b1   : > { %v5824_v60 = vpop.permute.xlu1 %5823  ;;  %v5821_v30 = vunpack.i.h.bf16 %v5819_v16  ;;  %v5820_v39 = vunpack.i.l.bf16 %v5819_v16 }
 0x2b2   : > { %v5826_v38 = vunpack.i.h.bf16 %v5824_v60  ;;  %v5825_v33 = vunpack.i.l.bf16 %v5824_v60  ;;  %6108 = vrot.lane.b32.xlu0 %v6107_v36, %s6779_s22  ;;  %v6142_v36 = vpack.i.bf16 %v7592_v25, %v7817_v40  ;;  %v7827_v60 = vld [vmem:[#allocation2 + $0x169] sm:$0xff] }
 0x2b3   : > { %6113 = vrot.lane.b32.xlu1 %v6112_v52, %s6781_s12  ;;  %v2056_v7 = vsel %vm1955_vm6, %v2024_v22, %v5820_v39  ;;  %v1960_v18 = vsel %vm1955_vm6, %v1927_v26, %v5821_v30  ;;  %v6147_v25 = vpack.i.bf16 %v7777_v61, %v7827_v60 }
 0x2b4   : > { %v5829_v63 = vpop.permute.xlu0 %5828  ;;  %2264 = vmatprep.mubr.f32.mxu1 %v2056_v7  ;;  %v1993_v28 = vsel %vm304_vm0, %v7521_v11, %v5825_v33  ;;  %v1895_v42 = vsel %vm304_vm0, %v838_v49, %v5826_v38  ;;  %v7843_v49 = vld [vmem:[#allocation2 + $0x171] sm:$0xff] }
 0x2b5   : > { %v5834_v9 = vpop.permute.xlu1 %5833  ;;  %v5831_v24 = vunpack.i.h.bf16 %v5829_v63  ;;  %v5830_v3 = vunpack.i.l.bf16 %v5829_v63  ;;  %2265 = vmatmul.mubr.f32.gmra.mrb[12].mxu1 %v1960_v18  ;;  %v6152_v18 = vpack.i.bf16 %v7763_v54, %v7611_v58  ;;  %v968_v63 = vld [vmem:[#allocation2 + $0x69] sm:$0xff] }
 0x2b6   : > { %v5836_v13 = vunpack.i.h.bf16 %v5834_v9  ;;  %v5835_v1 = vunpack.i.l.bf16 %v5834_v9  ;;  %6118 = vrot.lane.b32.xlu0 %v6117_v19, %s9407_s23  ;;  %v7839_v19 = vld [vmem:[#allocation2 + $0x170] sm:$0xff] }
 0x2b7   : > { %6123 = vrot.lane.b32.xlu1 %v6122_v53, %s6779_s22  ;;  %v2025_v6 = vsel %vm1922_vm5, %v1993_v28, %v5830_v3  ;;  %v1928_v55 = vsel %vm1922_vm5, %v1895_v42, %v5831_v24  ;;  %v840_v9 = vld [vmem:[#allocation2 + $0x50] sm:$0xff]  ;;  %v6157_v28 = vpack.i.bf16 %v7600_v2, %v7839_v19 }
 0x2b8   : > { %v5839_v12 = vpop.permute.xlu0 %5838  ;;  %v2057_v41 = vsel %vm1955_vm6, %v2025_v6, %v5835_v1  ;;  %v1961_v35 = vsel %vm1955_vm6, %v1928_v55, %v5836_v13 }
 0x2b9   : > { %v5844_v15 = vpop.permute.xlu1 %5843  ;;  %v5841_v11 = vunpack.i.h.bf16 %v5839_v12  ;;  %v5840_v34 = vunpack.i.l.bf16 %v5839_v12  ;;  %2269 = vmatprep.mubr.f32.mxu1 %v2057_v41  ;;  %v6162_v41 = vpack.i.bf16 %v7799_v27, %v7843_v49 }
 0x2ba   : > { %v5846_v29 = vunpack.i.h.bf16 %v5844_v15  ;;  %v5845_v8 = vunpack.i.l.bf16 %v5844_v15  ;;  %6128 = vrot.lane.b32.xlu0 %v6127_v31, %s6781_s12  ;;  %2270 = vmatmul.mubr.f32.gmra.mrb[14].mxu1 %v1961_v35  ;;  %v7856_v15 = vld [vmem:[#allocation2 + $0x180] sm:$0xff] }
 0x2bb   : > { %6133 = vrot.lane.b32.xlu1 %v6132_v51, %s9407_s23  ;;  %v1994_v4 = vsel %vm304_vm0, %v7545_v32, %v5840_v34  ;;  %v1896_v57 = vsel %vm304_vm0, %v839_v37, %v5841_v11  ;;  %v969_v11 = vld [vmem:[#allocation2 + $0x79] sm:$0xff] }
 0x2bc   : > { %v5849_v44 = vpop.permute.xlu0 %5848  ;;  %v2026_v32 = vsel %vm1922_vm5, %v1994_v4, %v5845_v8  ;;  %v1929_v52 = vsel %vm1922_vm5, %v1896_v57, %v5846_v29  ;;  %v841_v34 = vld [vmem:[#allocation2 + $0x60] sm:$0xff]  ;;  %v6167_v8 = vpack.i.bf16 %v7787_v48, %v7617_v47  ;;  %v6172_v57 = vpack.i.bf16 %v7605_v17, %v7856_v15 }
 0x2bd   : > { %v5854_v43 = vpop.permute.xlu1 %5853  ;;  %v5851_v46 = vunpack.i.h.bf16 %v5849_v44  ;;  %v5850_v16 = vunpack.i.l.bf16 %v5849_v44  ;;  %v7865_v44 = vld [vmem:[#allocation2 + $0x181] sm:$0xff] }
 0x2be   : > { %v5856_v30 = vunpack.i.h.bf16 %v5854_v43  ;;  %v5855_v39 = vunpack.i.l.bf16 %v5854_v43  ;;  %6138 = vrot.lane.b32.xlu0 %v6137_v23, %s6779_s22  ;;  %v6177_v17 = vpack.i.bf16 %v7817_v40, %v7865_v44 }
 0x2bf   : > { %6143 = vrot.lane.b32.xlu1 %v6142_v36, %s6781_s12  ;;  %v2058_v21 = vsel %vm1955_vm6, %v2026_v32, %v5850_v16  ;;  %v1962_v38 = vsel %vm1955_vm6, %v1929_v52, %v5851_v46 }
 0x2c0   : > { %v5859_v33 = vpop.permute.xlu0 %5858  ;;  %2274 = vmatprep.mubr.f32.mxu1 %v2058_v21  ;;  %v1995_v53 = vsel %vm304_vm0, %v968_v63, %v5855_v39  ;;  %v1897_v61 = vsel %vm304_vm0, %v840_v9, %v5856_v30  ;;  %v970_v30 = vld [vmem:[#allocation2 + $0x81] sm:$0xff]  ;;  %v6182_v21 = vpack.i.bf16 %v7804_v10, %v7624_v14 }
 0x2c1   : > { %v5864_v22 = vpop.permute.xlu1 %5863  ;;  %v5861_v26 = vunpack.i.h.bf16 %v5859_v33  ;;  %v5860_v7 = vunpack.i.l.bf16 %v5859_v33  ;;  %2275 = vmatmul.mubr.f32.gmra.mrb[16].mxu1 %v1962_v38  ;;  %v926_v38 = vld [vmem:[#allocation2 + $0x15a] sm:$0xff]  ;;  %v7877_v33 = vld [vmem:[#allocation2 + $0x188] sm:$0xff] }
 0x2c2   : > { %v5866_v24 = vunpack.i.h.bf16 %v5864_v22  ;;  %v5865_v3 = vunpack.i.l.bf16 %v5864_v22  ;;  %6148 = vrot.lane.b32.xlu0 %v6147_v25, %s9407_s23  ;;  %v842_v25 = vld [vmem:[#allocation2 + $0x68] sm:$0xff]  ;;  %v1120_v63 = vld [vmem:[#allocation2 + $0x19a] sm:$0xff] }
 0x2c3   : > { %6153 = vrot.lane.b32.xlu1 %v6152_v18, %s6779_s22  ;;  %v2027_v13 = vsel %vm1922_vm5, %v1995_v53, %v5860_v7  ;;  %v1930_v58 = vsel %vm1922_vm5, %v1897_v61, %v5861_v26  ;;  %v7881_v18 = vld [vmem:[#allocation2 + $0x189] sm:$0xff]  ;;  %5377 = vmatprep.mubr.msk.f32.mxu0 %vm304_vm0, %v1120_v63  ;;  %v6187_v53 = vpack.i.bf16 %v926_v38, %v7877_v33  ;;  %v844_v38 = vld [vmem:[#allocation2 + $0x80] sm:$0xff] }
 0x2c4   : > { %v5869_v54 = vpop.permute.xlu0 %5868  ;;  %v2059_v1 = vsel %vm1955_vm6, %v2027_v13, %v5865_v3  ;;  %v1963_v42 = vsel %vm1955_vm6, %v1930_v58, %v5866_v24  ;;  %v1121_v9 = vld [vmem:[#allocation2 + $0x1a2] sm:$0xff] }
 0x2c5   : > { %v5874_v6 = vpop.permute.xlu1 %5873  ;;  %v5871_v55 = vunpack.i.h.bf16 %v5869_v54  ;;  %v5870_v12 = vunpack.i.l.bf16 %v5869_v54  ;;  %2279 = vmatprep.mubr.f32.mxu1 %v2059_v1  ;;  %5378 = vmatmul.mubr.msk.f32.gmra.mrb[32].mxu0 %vm304_vm0, %v1121_v9  ;;  %v6192_v1 = vpack.i.bf16 %v7839_v19, %v7881_v18 }
 0x2c6   : > { %v5876_v31 = vunpack.i.h.bf16 %v5874_v6  ;;  %v5875_v35 = vunpack.i.l.bf16 %v5874_v6  ;;  %6158 = vrot.lane.b32.xlu0 %v6157_v28, %s6781_s12  ;;  %2280 = vmatmul.mubr.f32.gmra.mrb[18].mxu1 %v1963_v42  ;;  %v1056_v28 = vld [vmem:[#allocation2 + $0x198] sm:$0xff]  ;;  %v1023_v42 = vld [vmem:[#allocation2 + $0x182] sm:$0xff] }
 0x2c7   : > { %6163 = vrot.lane.b32.xlu1 %v6162_v41, %s9407_s23  ;;  %v1996_v2 = vsel %vm304_vm0, %v969_v11, %v5870_v12  ;;  %v1898_v51 = vsel %vm304_vm0, %v841_v34, %v5871_v55  ;;  %2798 = vmatprep.mubr.f32.mxu0 %v6775_v0  ;;  %v927_v12 = vld [vmem:[#allocation2 + $0x16a] sm:$0xff]  ;;  %v6197_v19 = vpack.i.bf16 %v7827_v60, %v1023_v42 }
 0x2c8   : > { %v5879_v29 = vpop.permute.xlu0 %5878  ;;  %v2028_v46 = vsel %vm1922_vm5, %v1996_v2, %v5875_v35  ;;  %v1931_v16 = vsel %vm1922_vm5, %v1898_v51, %v5876_v31  ;;  %v971_v41 = vld [vmem:[#allocation2 + $0x91] sm:$0xff] }
 0x2c9   : > { %v5884_v27 = vpop.permute.xlu1 %5883  ;;  %v5881_v37 = vunpack.i.h.bf16 %v5879_v29  ;;  %v5880_v4 = vunpack.i.l.bf16 %v5879_v29  ;;  %v843_v31 = vld [vmem:[#allocation2 + $0x78] sm:$0xff] }
 0x2ca   : > { %v5886_v23 = vunpack.i.h.bf16 %v5884_v27  ;;  %v5885_v43 = vunpack.i.l.bf16 %v5884_v27  ;;  %6168 = vrot.lane.b32.xlu0 %v6167_v8, %s6779_s22  ;;  %v6202_v8 = vpack.i.bf16 %v927_v12, %v1056_v28  ;;  %v1088_v27 = vld [vmem:[#allocation2 + $0x199] sm:$0xff]  ;;  %v845_v28 = vld [vmem:[#allocation2 + $0x90] sm:$0xff] }
 0x2cb   : > { %6173 = vrot.lane.b32.xlu1 %v6172_v57, %s6781_s12  ;;  %v2060_v47 = vsel %vm1955_vm6, %v2028_v46, %v5880_v4  ;;  %v1964_v48 = vsel %vm1955_vm6, %v1931_v16, %v5881_v37 }
 0x2cc   : > { %v5889_v36 = vpop.permute.xlu0 %5888  ;;  %2284 = vmatprep.mubr.f32.mxu1 %v2060_v47  ;;  %v1997_v7 = vsel %vm304_vm0, %v970_v30, %v5885_v43  ;;  %v1899_v40 = vsel %vm304_vm0, %v842_v25, %v5886_v23  ;;  %v1024_v43 = vld [vmem:[#allocation2 + $0x18a] sm:$0xff] }
 0x2cd   : > { %v5894_v39 = vpop.permute.xlu1 %5893  ;;  %v5891_v32 = vunpack.i.h.bf16 %v5889_v36  ;;  %v5890_v52 = vunpack.i.l.bf16 %v5889_v36  ;;  %2285 = vmatmul.mubr.f32.gmra.mrb[20].mxu1 %v1964_v48  ;;  %v6207_v48 = vpack.i.bf16 %v7856_v15, %v1088_v27  ;;  %v1057_v36 = vld [vmem:[#allocation2 + $0x1a0] sm:$0xff] }
 0x2ce   : > { %v5896_v22 = vunpack.i.h.bf16 %v5894_v39  ;;  %v5895_v26 = vunpack.i.l.bf16 %v5894_v39  ;;  %6178 = vrot.lane.b32.xlu0 %v6177_v17, %s9407_s23 }
 0x2cf   : > { %6183 = vrot.lane.b32.xlu1 %v6182_v21, %s6779_s22  ;;  %v2029_v14 = vsel %vm1922_vm5, %v1997_v7, %v5890_v52  ;;  %v1932_v10 = vsel %vm1922_vm5, %v1899_v40, %v5891_v32  ;;  %v6212_v32 = vpack.i.bf16 %v7843_v49, %v1024_v43  ;;  %v972_v52 = vld [vmem:[#allocation2 + $0x99] sm:$0xff]  ;;  %v1089_v7 = vld [vmem:[#allocation2 + $0x1a1] sm:$0xff] }
 0x2d0   : > { %v5899_v24 = vpop.permute.xlu0 %5898  ;;  %v2061_v3 = vsel %vm1955_vm6, %v2029_v14, %v5895_v26  ;;  %v1965_v61 = vsel %vm1955_vm6, %v1932_v10, %v5896_v22  ;;  %v928_v21 = vld [vmem:[#allocation2 + $0x172] sm:$0xff] }
 0x2d1   : > { %v5904_v13 = vpop.permute.xlu1 %5903  ;;  %v5901_v58 = vunpack.i.h.bf16 %v5899_v24  ;;  %v5900_v54 = vunpack.i.l.bf16 %v5899_v24  ;;  %2289 = vmatprep.mubr.f32.mxu1 %v2061_v3  ;;  %v6217_v10 = vpack.i.bf16 %v928_v21, %v1057_v36 }
 0x2d2   : > { %v5906_v6 = vunpack.i.h.bf16 %v5904_v13  ;;  %v5905_v55 = vunpack.i.l.bf16 %v5904_v13  ;;  %6188 = vrot.lane.b32.xlu0 %v6187_v53, %s6781_s12  ;;  %2290 = vmatmul.mubr.f32.gmra.mrb[22].mxu1 %v1965_v61  ;;  %v6222_v13 = vpack.i.bf16 %v7877_v33, %v1089_v7 }
 0x2d3   : > { %6193 = vrot.lane.b32.xlu1 %v6192_v1, %s9407_s23  ;;  %v1998_v35 = vsel %vm304_vm0, %v971_v41, %v5900_v54  ;;  %v1900_v11 = vsel %vm304_vm0, %v843_v31, %v5901_v58  ;;  %v973_v1 = vld [vmem:[#allocation2 + $0xa9] sm:$0xff] }
 0x2d4   : > { %v5909_v34 = vpop.permute.xlu0 %5908  ;;  %v2030_v57 = vsel %vm1922_vm5, %v1998_v35, %v5905_v55  ;;  %v1933_v23 = vsel %vm1922_vm5, %v1900_v11, %v5906_v6 }
 0x2d5   : > { %v5914_v2 = vpop.permute.xlu1 %5913  ;;  %v5911_v51 = vunpack.i.h.bf16 %v5909_v34  ;;  %v5910_v29 = vunpack.i.l.bf16 %v5909_v34 }
 0x2d6   : > { %v5916_v37 = vunpack.i.h.bf16 %v5914_v2  ;;  %v5915_v4 = vunpack.i.l.bf16 %v5914_v2  ;;  %6198 = vrot.lane.b32.xlu0 %v6197_v19, %s6779_s22 }
 0x2d7   : > { %6203 = vrot.lane.b32.xlu1 %v6202_v8, %s6781_s12  ;;  %v2062_v46 = vsel %vm1955_vm6, %v2030_v57, %v5910_v29  ;;  %v1966_v16 = vsel %vm1955_vm6, %v1933_v23, %v5911_v51 }
 0x2d8   : > { %v5919_v47 = vpop.permute.xlu0 %5918  ;;  %2294 = vmatprep.mubr.f32.mxu1 %v2062_v46  ;;  %v1999_v26 = vsel %vm304_vm0, %v972_v52, %v5915_v4  ;;  %v1901_v40 = vsel %vm304_vm0, %v844_v38, %v5916_v37  ;;  %v974_v37 = vld [vmem:[#allocation2 + $0xb1] sm:$0xff]  ;;  %v975_v38 = vld [vmem:[#allocation2 + $0xc1] sm:$0xff] }
 0x2d9   : > { %v5924_v17 = vpop.permute.xlu1 %5923  ;;  %v5921_v30 = vunpack.i.h.bf16 %v5919_v47  ;;  %v5920_v39 = vunpack.i.l.bf16 %v5919_v47  ;;  %2295 = vmatmul.mubr.f32.gmra.mrb[24].mxu1 %v1966_v16  ;;  %v846_v4 = vld [vmem:[#allocation2 + $0x98] sm:$0xff] }
 0x2da   : > { %v5926_v25 = vunpack.i.h.bf16 %v5924_v17  ;;  %v5925_v22 = vunpack.i.l.bf16 %v5924_v17  ;;  %6208 = vrot.lane.b32.xlu0 %v6207_v48, %s9407_s23 }
 0x2db   : > { %6213 = vrot.lane.b32.xlu1 %v6212_v32, %s6779_s22  ;;  %v2031_v15 = vsel %vm1922_vm5, %v1999_v26, %v5920_v39  ;;  %v1934_v63 = vsel %vm1922_vm5, %v1901_v40, %v5921_v30 }
 0x2dc   : > { %v5929_v9 = vpop.permute.xlu0 %5928  ;;  %v2063_v14 = vsel %vm1955_vm6, %v2031_v15, %v5925_v22  ;;  %v1967_v24 = vsel %vm1955_vm6, %v1934_v63, %v5926_v25  ;;  %v847_v25 = vld [vmem:[#allocation2 + $0xa8] sm:$0xff] }
 0x2dd   : > { %v5934_v3 = vpop.permute.xlu1 %5933  ;;  %v5931_v53 = vunpack.i.h.bf16 %v5929_v9  ;;  %v5930_v61 = vunpack.i.l.bf16 %v5929_v9  ;;  %2299 = vmatprep.mubr.f32.mxu1 %v2063_v14 }
 0x2de   : > { %v5936_v58 = vunpack.i.h.bf16 %v5934_v3  ;;  %v5935_v54 = vunpack.i.l.bf16 %v5934_v3  ;;  %6218 = vrot.lane.b32.xlu0 %v6217_v10, %s6781_s12  ;;  %2300 = vmatmul.mubr.f32.gmra.mrb[26].mxu1 %v1967_v24 }
 0x2df   : > { %6223 = vrot.lane.b32.xlu1 %v6222_v13, %s9407_s23  ;;  %v2000_v42 = vsel %vm304_vm0, %v973_v1, %v5930_v61  ;;  %v1902_v6 = vsel %vm304_vm0, %v845_v28, %v5931_v53  ;;  %v976_v1 = vld [vmem:[#allocation2 + $0xc9] sm:$0xff]  ;;  %s6715_s23 = sshll.u32 %s6782_s25, 4  ;;  %s6716_s23 = int_to_ptr.vmem [resolvable:$false] %s6715_s23 }
 0x2e0   : > { %v5939_v55 = vpop.permute.xlu0 %5938  ;;  %v2032_v33 = vsel %vm1922_vm5, %v2000_v42, %v5935_v54  ;;  %v1935_v34 = vsel %vm1922_vm5, %v1902_v6, %v5936_v58  ;;  %v848_v28 = vld [vmem:[#allocation2 + $0xb0] sm:$0xff]  ;;  %s6717_s26 = scalar_lea.vmem %s6716_s23, 8192 }
 0x2e1   : > { %v5944_v12 = vpop.permute.xlu1 %5943  ;;  %v5941_v41 = vunpack.i.h.bf16 %v5939_v55  ;;  %v5940_v31 = vunpack.i.l.bf16 %v5939_v55 }
 0x2e2   : > { %v5946_v35 = vunpack.i.h.bf16 %v5944_v12  ;;  %v5945_v11 = vunpack.i.l.bf16 %v5944_v12 }
 0x2e3   : > { %v2064_v19 = vsel %vm1955_vm6, %v2032_v33, %v5940_v31  ;;  %v1968_v2 = vsel %vm1955_vm6, %v1935_v34, %v5941_v41 }
 0x2e4   : > { %v5949_v51 = vpop.permute.xlu0 %5948  ;;  %2304 = vmatprep.mubr.f32.mxu1 %v2064_v19  ;;  %v2001_v43 = vsel %vm304_vm0, %v974_v37, %v5945_v11  ;;  %v1903_v46 = vsel %vm304_vm0, %v846_v4, %v5946_v35  ;;  %v977_v37 = vld [vmem:[#allocation2 + $0xd9] sm:$0xff] }
 0x2e5   : > { %v5954_v29 = vpop.permute.xlu1 %5953  ;;  %v5951_v8 = vunpack.i.h.bf16 %v5949_v51  ;;  %v5950_v27 = vunpack.i.l.bf16 %v5949_v51  ;;  %2305 = vmatmul.mubr.f32.gmra.mrb[28].mxu1 %v1968_v2  ;;  %v849_v4 = vld [vmem:[#allocation2 + $0xc0] sm:$0xff] }
 0x2e6   : > { %v5956_v57 = vunpack.i.h.bf16 %v5954_v29  ;;  %v5955_v23 = vunpack.i.l.bf16 %v5954_v29 }
 0x2e7   : > { %v2033_v16 = vsel %vm1922_vm5, %v2001_v43, %v5950_v27  ;;  %v1936_v47 = vsel %vm1922_vm5, %v1903_v46, %v5951_v8 }
 0x2e8   : > { %v5959_v48 = vpop.permute.xlu0 %5958  ;;  %v2065_v36 = vsel %vm1955_vm6, %v2033_v16, %v5955_v23  ;;  %v1969_v17 = vsel %vm1955_vm6, %v1936_v47, %v5956_v57 }
 0x2e9   : > { %v5964_v30 = vpop.permute.xlu1 %5963  ;;  %v5961_v39 = vunpack.i.h.bf16 %v5959_v48  ;;  %v5960_v32 = vunpack.i.l.bf16 %v5959_v48  ;;  %2309 = vmatprep.mubr.f32.mxu1 %v2065_v36 }
 0x2ea   : > { %v5966_v52 = vunpack.i.h.bf16 %v5964_v30  ;;  %v5965_v21 = vunpack.i.l.bf16 %v5964_v30  ;;  %2310 = vmatmul.mubr.f32.gmra.mrb[30].mxu1 %v1969_v17 }
 0x2eb   : > { %v2002_v22 = vsel %vm304_vm0, %v975_v38, %v5960_v32  ;;  %v1904_v26 = vsel %vm304_vm0, %v847_v25, %v5961_v39 }
 0x2ec   : > { %v5969_v7 = vpop.permute.xlu0 %5968  ;;  %v2034_v10 = vsel %vm1922_vm5, %v2002_v22, %v5965_v21  ;;  %v1937_v24 = vsel %vm1922_vm5, %v1904_v26, %v5966_v52 }
 0x2ed   : > { %v5974_v40 = vpop.permute.xlu1 %5973  ;;  %v5971_v15 = vunpack.i.h.bf16 %v5969_v7  ;;  %v5970_v63 = vunpack.i.l.bf16 %v5969_v7 }
 0x2ee   : > { %v5976_v9 = vunpack.i.h.bf16 %v5974_v40  ;;  %v5975_v14 = vunpack.i.l.bf16 %v5974_v40 }
 0x2ef   : > { %v2066_v3 = vsel %vm1955_vm6, %v2034_v10, %v5970_v63  ;;  %v1970_v53 = vsel %vm1955_vm6, %v1937_v24, %v5971_v15  ;;  %v978_v15 = vld [vmem:[#allocation2 + $0xe1] sm:$0xff] }
 0x2f0   : > { %v5979_v61 = vpop.permute.xlu0 %5978  ;;  %2314 = vmatprep.mubr.f32.mxu1 %v2066_v3  ;;  %v2003_v55 = vsel %vm304_vm0, %v976_v1, %v5975_v14  ;;  %v1905_v12 = vsel %vm304_vm0, %v848_v28, %v5976_v9  ;;  %v850_v63 = vld [vmem:[#allocation2 + $0xc8] sm:$0xff] }
 0x2f1   : > { %v5984_v13 = vpop.permute.xlu1 %5983  ;;  %v5981_v58 = vunpack.i.h.bf16 %v5979_v61  ;;  %v5980_v54 = vunpack.i.l.bf16 %v5979_v61  ;;  %2315 = vmatmul.mubr.f32.gmra.mrb[32].mxu1 %v1970_v53 }
 0x2f2   : > { %v5986_v42 = vunpack.i.h.bf16 %v5984_v13  ;;  %v5985_v6 = vunpack.i.l.bf16 %v5984_v13 }
 0x2f3   : > { %v2035_v41 = vsel %vm1922_vm5, %v2003_v55, %v5980_v54  ;;  %v1938_v31 = vsel %vm1922_vm5, %v1905_v12, %v5981_v58 }
 0x2f4   : > { %v5989_v11 = vpop.permute.xlu0 %5988  ;;  %v2067_v33 = vsel %vm1955_vm6, %v2035_v41, %v5985_v6  ;;  %v1971_v34 = vsel %vm1955_vm6, %v1938_v31, %v5986_v42  ;;  %v979_v41 = vld [vmem:[#allocation2 + $0xf1] sm:$0xff] }
 0x2f5   : > { %v7941_v35 = vpop.f32.mrb[2].mxu0  ;;  %v5994_v19 = vpop.permute.xlu1 %5993  ;;  %v5991_v2 = vunpack.i.h.bf16 %v5989_v11  ;;  %v5990_v51 = vunpack.i.l.bf16 %v5989_v11  ;;  %2319 = vmatprep.mubr.f32.mxu1 %v2067_v33  ;;  %v851_v31 = vld [vmem:[#allocation2 + $0xd8] sm:$0xff] }
 0x2f6   : > { %v7945_v29 = vpop.f32.mrb[3].mxu0  ;;  %v5996_v8 = vunpack.i.h.bf16 %v5994_v19  ;;  %v5995_v27 = vunpack.i.l.bf16 %v5994_v19  ;;  %2320 = vmatmul.mubr.f32.gmra.mrb[34].mxu1 %v1971_v34 }
 0x2f7   : > { %v2004_v57 = vsel %vm304_vm0, %v977_v37, %v5990_v51  ;;  %v1906_v23 = vsel %vm304_vm0, %v849_v4, %v5991_v2 }
 0x2f8   : > { %v5999_v46 = vpop.permute.xlu0 %5998  ;;  %v2036_v39 = vsel %vm1922_vm5, %v2004_v57, %v5995_v27  ;;  %v1939_v32 = vsel %vm1922_vm5, %v1906_v23, %v5996_v8 }
 0x2f9   : > { %v7949_v43 = vpop.f32.mrb[4].mxu0  ;;  %v6004_v16 = vpop.permute.xlu1 %6003  ;;  %v6001_v47 = vunpack.i.h.bf16 %v5999_v46  ;;  %v6000_v48 = vunpack.i.l.bf16 %v5999_v46 }
 0x2fa   : > { %v7951_v36 = vpop.f32.mrb[5].mxu0  ;;  %v6006_v17 = vunpack.i.h.bf16 %v6004_v16  ;;  %v6005_v30 = vunpack.i.l.bf16 %v6004_v16 }
 0x2fb   : > { %v2068_v52 = vsel %vm1955_vm6, %v2036_v39, %v6000_v48  ;;  %v1972_v21 = vsel %vm1955_vm6, %v1939_v32, %v6001_v47 }
 0x2fc   : > { %v6009_v25 = vpop.permute.xlu0 %6008  ;;  %2324 = vmatprep.mubr.f32.mxu1 %v2068_v52  ;;  %v2005_v10 = vsel %vm304_vm0, %v978_v15, %v6005_v30  ;;  %v1907_v24 = vsel %vm304_vm0, %v850_v63, %v6006_v17  ;;  %v980_v52 = vld [vmem:[#allocation2 + $0xf9] sm:$0xff] }
 0x2fd   : > { %v7957_v38 = vpop.f32.mrb[6].mxu0  ;;  %v6014_v22 = vpop.permute.xlu1 %6013  ;;  %v6011_v26 = vunpack.i.h.bf16 %v6009_v25  ;;  %v6010_v7 = vunpack.i.l.bf16 %v6009_v25  ;;  %2325 = vmatmul.mubr.f32.gmra.mrb[36].mxu1 %v1972_v21  ;;  %v852_v21 = vld [vmem:[#allocation2 + $0xe0] sm:$0xff] }
 0x2fe   : > { %v7959_v40 = vpop.f32.mrb[7].mxu0  ;;  %v6016_v9 = vunpack.i.h.bf16 %v6014_v22  ;;  %v6015_v14 = vunpack.i.l.bf16 %v6014_v22 }
 0x2ff   : > { %v2037_v3 = vsel %vm1922_vm5, %v2005_v10, %v6010_v7  ;;  %v1940_v53 = vsel %vm1922_vm5, %v1907_v24, %v6011_v26 }
 0x300   : > { %v6019_v13 = vpop.permute.xlu0 %6018  ;;  %v2069_v58 = vsel %vm1955_vm6, %v2037_v3, %v6015_v14  ;;  %v1973_v54 = vsel %vm1955_vm6, %v1940_v53, %v6016_v9 }
 0x301   : > { %v7965_v61 = vpop.f32.mrb[8].mxu0  ;;  %v6024_v1 = vpop.permute.xlu1 %6023  ;;  %v6021_v28 = vunpack.i.h.bf16 %v6019_v13  ;;  %v6020_v42 = vunpack.i.l.bf16 %v6019_v13  ;;  %2329 = vmatprep.mubr.f32.mxu1 %v2069_v58 }
 0x302   : > { %v7969_v6 = vpop.f32.mrb[9].mxu0  ;;  %v6026_v55 = vunpack.i.h.bf16 %v6024_v1  ;;  %v6025_v12 = vunpack.i.l.bf16 %v6024_v1  ;;  %2330 = vmatmul.mubr.f32.gmra.mrb[38].mxu1 %v1973_v54 }
 0x303   : > { %v2006_v11 = vsel %vm304_vm0, %v979_v41, %v6020_v42  ;;  %v1908_v33 = vsel %vm304_vm0, %v851_v31, %v6021_v28  ;;  %v981_v28 = vld [vmem:[#allocation2 + $0x109] sm:$0xff] }
 0x304   : > { %v6029_v19 = vpop.permute.xlu0 %6028  ;;  %v2038_v57 = vsel %vm1922_vm5, %v2006_v11, %v6025_v12  ;;  %v1941_v23 = vsel %vm1922_vm5, %v1908_v33, %v6026_v55  ;;  %v853_v42 = vld [vmem:[#allocation2 + $0xf0] sm:$0xff] }
 0x305   : > { %v7973_v34 = vpop.f32.mrb[10].mxu0  ;;  %v6034_v2 = vpop.permute.xlu1 %6033  ;;  %v6031_v51 = vunpack.i.h.bf16 %v6029_v19  ;;  %v6030_v8 = vunpack.i.l.bf16 %v6029_v19 }
 0x306   : > { %v7975_v27 = vpop.f32.mrb[11].mxu0  ;;  %v6036_v37 = vunpack.i.h.bf16 %v6034_v2  ;;  %v6035_v4 = vunpack.i.l.bf16 %v6034_v2 }
 0x307   : > { %v2070_v46 = vsel %vm1955_vm6, %v2038_v57, %v6030_v8  ;;  %v1974_v16 = vsel %vm1955_vm6, %v1941_v23, %v6031_v51 }
 0x308   : > { %v6039_v48 = vpop.permute.xlu0 %6038  ;;  %2334 = vmatprep.mubr.f32.mxu1 %v2070_v46  ;;  %v2007_v26 = vsel %vm304_vm0, %v980_v52, %v6035_v4  ;;  %v1909_v7 = vsel %vm304_vm0, %v852_v21, %v6036_v37  ;;  %v982_v52 = vld [vmem:[#allocation2 + $0x111] sm:$0xff] }
 0x309   : > { %v7981_v47 = vpop.f32.mrb[12].mxu0  ;;  %v6044_v17 = vpop.permute.xlu1 %6043  ;;  %v6041_v30 = vunpack.i.h.bf16 %v6039_v48  ;;  %v6040_v39 = vunpack.i.l.bf16 %v6039_v48  ;;  %2335 = vmatmul.mubr.f32.gmra.mrb[40].mxu1 %v1974_v16  ;;  %v854_v21 = vld [vmem:[#allocation2 + $0xf8] sm:$0xff] }
 0x30a   : > { %v7983_v32 = vpop.f32.mrb[13].mxu0  ;;  %v6046_v25 = vunpack.i.h.bf16 %v6044_v17  ;;  %v6045_v22 = vunpack.i.l.bf16 %v6044_v17 }
 0x30b   : > { %v2039_v15 = vsel %vm1922_vm5, %v2007_v26, %v6040_v39  ;;  %v1942_v63 = vsel %vm1922_vm5, %v1909_v7, %v6041_v30 }
 0x30c   : > { %v6049_v14 = vpop.permute.xlu0 %6048  ;;  %v2071_v10 = vsel %vm1955_vm6, %v2039_v15, %v6045_v22  ;;  %v1975_v24 = vsel %vm1955_vm6, %v1942_v63, %v6046_v25 }
 0x30d   : > { %v7989_v9 = vpop.f32.mrb[14].mxu0  ;;  %v6054_v3 = vpop.permute.xlu1 %6053  ;;  %v6051_v53 = vunpack.i.h.bf16 %v6049_v14  ;;  %v6050_v13 = vunpack.i.l.bf16 %v6049_v14  ;;  %2339 = vmatprep.mubr.f32.mxu1 %v2071_v10 }
 0x30e   : > { %v7993_v58 = vpop.f32.mrb[15].mxu0  ;;  %v6056_v54 = vunpack.i.h.bf16 %v6054_v3  ;;  %v6055_v1 = vunpack.i.l.bf16 %v6054_v3  ;;  %2340 = vmatmul.mubr.f32.gmra.mrb[42].mxu1 %v1975_v24 }
 0x30f   : > { %v2008_v55 = vsel %vm304_vm0, %v981_v28, %v6050_v13  ;;  %v1910_v12 = vsel %vm304_vm0, %v853_v42, %v6051_v53 }
 0x310   : > { %v6059_v31 = vpop.permute.xlu0 %6058  ;;  %v2040_v37 = vsel %vm1922_vm5, %v2008_v55, %v6055_v1  ;;  %v1943_v4 = vsel %vm1922_vm5, %v1910_v12, %v6056_v54  ;;  %v983_v55 = vld [vmem:[#allocation2 + $0x121] sm:$0xff] }
 0x311   : > { %v7997_v41 = vpop.f32.mrb[16].mxu0  ;;  %v6064_v11 = vpop.permute.xlu1 %6063  ;;  %v6061_v33 = vunpack.i.h.bf16 %v6059_v31  ;;  %v6060_v19 = vunpack.i.l.bf16 %v6059_v31  ;;  %v855_v12 = vld [vmem:[#allocation2 + $0x108] sm:$0xff] }
 0x312   : > { %v7999_v2 = vpop.f32.mrb[17].mxu0  ;;  %v6066_v51 = vunpack.i.h.bf16 %v6064_v11  ;;  %v6065_v8 = vunpack.i.l.bf16 %v6064_v11 }
 0x313   : > { %v2072_v57 = vsel %vm1955_vm6, %v2040_v37, %v6060_v19  ;;  %v1976_v23 = vsel %vm1955_vm6, %v1943_v4, %v6061_v33 }
 0x314   : > { %v6069_v16 = vpop.permute.xlu0 %6068  ;;  %2344 = vmatprep.mubr.f32.mxu1 %v2072_v57  ;;  %v2009_v26 = vsel %vm304_vm0, %v982_v52, %v6065_v8  ;;  %v1911_v7 = vsel %vm304_vm0, %v854_v21, %v6066_v51 }
 0x315   : > { %v8005_v46 = vpop.f32.mrb[18].mxu0  ;;  %v6074_v48 = vpop.permute.xlu1 %6073  ;;  %v6071_v17 = vunpack.i.h.bf16 %v6069_v16  ;;  %v6070_v30 = vunpack.i.l.bf16 %v6069_v16  ;;  %2345 = vmatmul.mubr.f32.gmra.mrb[44].mxu1 %v1976_v23 }
 0x316   : > { %v8007_v39 = vpop.f32.mrb[19].mxu0  ;;  %v6076_v25 = vunpack.i.h.bf16 %v6074_v48  ;;  %v6075_v22 = vunpack.i.l.bf16 %v6074_v48 }
 0x317   : > { %v2041_v15 = vsel %vm1922_vm5, %v2009_v26, %v6070_v30  ;;  %v1944_v63 = vsel %vm1922_vm5, %v1911_v7, %v6071_v17 }
 0x318   : > { %v6079_v10 = vpop.permute.xlu0 %6078  ;;  %v2073_v24 = vsel %vm1955_vm6, %v2041_v15, %v6075_v22  ;;  %v1977_v3 = vsel %vm1955_vm6, %v1944_v63, %v6076_v25  ;;  %v984_v15 = vld [vmem:[#allocation2 + $0x129] sm:$0xff] }
 0x319   : > { %v8013_v14 = vpop.f32.mrb[20].mxu0  ;;  %v6084_v53 = vpop.permute.xlu1 %6083  ;;  %v6081_v13 = vunpack.i.h.bf16 %v6079_v10  ;;  %v6080_v54 = vunpack.i.l.bf16 %v6079_v10  ;;  %2349 = vmatprep.mubr.f32.mxu1 %v2073_v24  ;;  %v856_v63 = vld [vmem:[#allocation2 + $0x110] sm:$0xff] }
 0x31a   : > { %v8017_v1 = vpop.f32.mrb[21].mxu0  ;;  %v6086_v28 = vunpack.i.h.bf16 %v6084_v53  ;;  %v6085_v42 = vunpack.i.l.bf16 %v6084_v53  ;;  %2350 = vmatmul.mubr.f32.gmra.mrb[46].mxu1 %v1977_v3 }
 0x31b   : > { %v2010_v31 = vsel %vm304_vm0, %v983_v55, %v6080_v54  ;;  %v1912_v11 = vsel %vm304_vm0, %v855_v12, %v6081_v13 }
 0x31c   : > { %v6089_v19 = vpop.permute.xlu0 %6088  ;;  %v2042_v16 = vsel %vm1922_vm5, %v2010_v31, %v6085_v42  ;;  %v1945_v48 = vsel %vm1922_vm5, %v1912_v11, %v6086_v28 }
 0x31d   : > { %v8021_v33 = vpop.f32.mrb[22].mxu0  ;;  %v6094_v51 = vpop.permute.xlu1 %6093  ;;  %v6091_v8 = vunpack.i.h.bf16 %v6089_v19  ;;  %v6090_v37 = vunpack.i.l.bf16 %v6089_v19 }
 0x31e   : > { %v8023_v4 = vpop.f32.mrb[23].mxu0  ;;  %v6096_v57 = vunpack.i.h.bf16 %v6094_v51  ;;  %v6095_v23 = vunpack.i.l.bf16 %v6094_v51 }
 0x31f   : > { %v2074_v17 = vsel %vm1955_vm6, %v2042_v16, %v6090_v37  ;;  %v1978_v30 = vsel %vm1955_vm6, %v1945_v48, %v6091_v8 }
 0x320   : > { %v6099_v21 = vpop.permute.xlu0 %6098  ;;  %2354 = vmatprep.mubr.f32.mxu1 %v2074_v17  ;;  %v2011_v3 = vsel %vm304_vm0, %v984_v15, %v6095_v23  ;;  %v1913_v53 = vsel %vm304_vm0, %v856_v63, %v6096_v57  ;;  %v985_v57 = vld [vmem:[#allocation2 + $0x139] sm:$0xff] }
 0x321   : > { %v8029_v52 = vpop.f32.mrb[24].mxu0  ;;  %v6104_v25 = vpop.permute.xlu1 %6103  ;;  %v6101_v22 = vunpack.i.h.bf16 %v6099_v21  ;;  %v6100_v26 = vunpack.i.l.bf16 %v6099_v21  ;;  %2355 = vmatmul.mubr.f32.gmra.mrb[48].mxu1 %v1978_v30  ;;  %v857_v23 = vld [vmem:[#allocation2 + $0x120] sm:$0xff] }
 0x322   : > { %v8031_v7 = vpop.f32.mrb[25].mxu0  ;;  %v6106_v10 = vunpack.i.h.bf16 %v6104_v25  ;;  %v6105_v24 = vunpack.i.l.bf16 %v6104_v25 }
 0x323   : > { %v2043_v13 = vsel %vm1922_vm5, %v2011_v3, %v6100_v26  ;;  %v1946_v54 = vsel %vm1922_vm5, %v1913_v53, %v6101_v22 }
 0x324   : > { %v6109_v42 = vpop.permute.xlu0 %6108  ;;  %v2075_v55 = vsel %vm1955_vm6, %v2043_v13, %v6105_v24  ;;  %v1979_v12 = vsel %vm1955_vm6, %v1946_v54, %v6106_v10 }
 0x325   : > { %v8037_v28 = vpop.f32.mrb[26].mxu0  ;;  %v6114_v31 = vpop.permute.xlu1 %6113  ;;  %v6111_v11 = vunpack.i.h.bf16 %v6109_v42  ;;  %v6110_v19 = vunpack.i.l.bf16 %v6109_v42  ;;  %2359 = vmatprep.mubr.f32.mxu1 %v2075_v55 }
 0x326   : > { %v8041_v51 = vpop.f32.mrb[27].mxu0  ;;  %v6116_v8 = vunpack.i.h.bf16 %v6114_v31  ;;  %v6115_v37 = vunpack.i.l.bf16 %v6114_v31  ;;  %2360 = vmatmul.mubr.f32.gmra.mrb[50].mxu1 %v1979_v12 }
 0x327   : > { %v2012_v16 = vsel %vm304_vm0, %v985_v57, %v6110_v19  ;;  %v1914_v48 = vsel %vm304_vm0, %v857_v23, %v6111_v11  ;;  %v986_v11 = vld [vmem:[#allocation2 + $0x141] sm:$0xff] }
 0x328   : > { %v6119_v30 = vpop.permute.xlu0 %6118  ;;  %v2044_v10 = vsel %vm1922_vm5, %v2012_v16, %v6115_v37  ;;  %v1947_v24 = vsel %vm1922_vm5, %v1914_v48, %v6116_v8  ;;  %v858_v19 = vld [vmem:[#allocation2 + $0x128] sm:$0xff] }
 0x329   : > { %v8045_v17 = vpop.f32.mrb[28].mxu0  ;;  %v6124_v21 = vpop.permute.xlu1 %6123  ;;  %v6121_v25 = vunpack.i.h.bf16 %v6119_v30  ;;  %v6120_v22 = vunpack.i.l.bf16 %v6119_v30 }
 0x32a   : > { %v8047_v26 = vpop.f32.mrb[29].mxu0  ;;  %v6126_v15 = vunpack.i.h.bf16 %v6124_v21  ;;  %v6125_v63 = vunpack.i.l.bf16 %v6124_v21 }
 0x32b   : > { %v2076_v3 = vsel %vm1955_vm6, %v2044_v10, %v6120_v22  ;;  %v1980_v53 = vsel %vm1955_vm6, %v1947_v24, %v6121_v25 }
 0x32c   : > { %v6129_v54 = vpop.permute.xlu0 %6128  ;;  %2364 = vmatprep.mubr.f32.mxu1 %v2076_v3  ;;  %v2013_v8 = vsel %vm304_vm0, %v986_v11, %v6125_v63  ;;  %v1915_v23 = vsel %vm304_vm0, %v858_v19, %v6126_v15  ;;  %v859_v63 = vld [vmem:[#allocation2 + $0x138] sm:$0xff] }
 0x32d   : > { %v8053_v13 = vpop.f32.mrb[30].mxu0  ;;  %v6134_v42 = vpop.permute.xlu1 %6133  ;;  %v6131_v55 = vunpack.i.h.bf16 %v6129_v54  ;;  %v6130_v12 = vunpack.i.l.bf16 %v6129_v54  ;;  %2365 = vmatmul.mubr.f32.gmra.mrb[52].mxu1 %v1980_v53  ;;  %v987_v54 = vld [vmem:[#allocation2 + $0x151] sm:$0xff] }
 0x32e   : > { %v8055_v31 = vpop.f32.mrb[31].mxu0  ;;  %v6136_v57 = vunpack.i.h.bf16 %v6134_v42  ;;  %v6135_v37 = vunpack.i.l.bf16 %v6134_v42 }
 0x32f   : > { %v2045_v16 = vsel %vm1922_vm5, %v2013_v8, %v6130_v12  ;;  %v1948_v48 = vsel %vm1922_vm5, %v1915_v23, %v6131_v55 }
 0x330   : > { %v6139_v30 = vpop.permute.xlu0 %6138  ;;  %v2077_v21 = vsel %vm1955_vm6, %v2045_v16, %v6135_v37  ;;  %v1981_v25 = vsel %vm1955_vm6, %v1948_v48, %v6136_v57 }
 0x331   : > { %v6144_v22 = vpop.permute.xlu1 %6143  ;;  %v6141_v10 = vunpack.i.h.bf16 %v6139_v30  ;;  %v6140_v24 = vunpack.i.l.bf16 %v6139_v30  ;;  %2369 = vmatprep.mubr.f32.mxu1 %v2077_v21 }
 0x332   : > { %v6146_v3 = vunpack.i.h.bf16 %v6144_v22  ;;  %v6145_v53 = vunpack.i.l.bf16 %v6144_v22  ;;  %2370 = vmatmul.mubr.f32.gmra.mrb[54].mxu1 %v1981_v25 }
 0x333   : > { %v2014_v15 = vsel %vm304_vm0, %v987_v54, %v6140_v24  ;;  %v1916_v42 = vsel %vm304_vm0, %v859_v63, %v6141_v10  ;;  %v988_v10 = vld [vmem:[#allocation2 + $0x159] sm:$0xff] }
 0x334   : > { %v6149_v12 = vpop.permute.xlu0 %6148  ;;  %v2046_v57 = vsel %vm1922_vm5, %v2014_v15, %v6145_v53  ;;  %v1949_v23 = vsel %vm1922_vm5, %v1916_v42, %v6146_v3  ;;  %v860_v24 = vld [vmem:[#allocation2 + $0x140] sm:$0xff] }
 0x335   : > { %v6154_v55 = vpop.permute.xlu1 %6153  ;;  %v6151_v11 = vunpack.i.h.bf16 %v6149_v12  ;;  %v6150_v19 = vunpack.i.l.bf16 %v6149_v12 }
 0x336   : > { %v6156_v37 = vunpack.i.h.bf16 %v6154_v55  ;;  %v6155_v8 = vunpack.i.l.bf16 %v6154_v55 }
 0x337   : > { %v2078_v16 = vsel %vm1955_vm6, %v2046_v57, %v6150_v19  ;;  %v1982_v48 = vsel %vm1955_vm6, %v1949_v23, %v6151_v11 }
 0x338   : > { %v6159_v30 = vpop.permute.xlu0 %6158  ;;  %2374 = vmatprep.mubr.f32.mxu1 %v2078_v16  ;;  %v2015_v12 = vsel %vm304_vm0, %v988_v10, %v6155_v8  ;;  %v1917_v53 = vsel %vm304_vm0, %v860_v24, %v6156_v37 }
 0x339   : > { %v6164_v21 = vpop.permute.xlu1 %6163  ;;  %v6161_v25 = vunpack.i.h.bf16 %v6159_v30  ;;  %v6160_v22 = vunpack.i.l.bf16 %v6159_v30  ;;  %2375 = vmatmul.mubr.f32.gmra.mrb[56].mxu1 %v1982_v48  ;;  %v861_v30 = vld [vmem:[#allocation2 + $0x150] sm:$0xff] }
 0x33a   : > { %v6166_v54 = vunpack.i.h.bf16 %v6164_v21  ;;  %v6165_v63 = vunpack.i.l.bf16 %v6164_v21 }
 0x33b   : > { %v2047_v3 = vsel %vm1922_vm5, %v2015_v12, %v6160_v22  ;;  %v1950_v15 = vsel %vm1922_vm5, %v1917_v53, %v6161_v25 }
 0x33c   : > { %v6169_v42 = vpop.permute.xlu0 %6168  ;;  %v2079_v55 = vsel %vm1955_vm6, %v2047_v3, %v6165_v63  ;;  %v1983_v11 = vsel %vm1955_vm6, %v1950_v15, %v6166_v54 }
 0x33d   : > { %v6174_v19 = vpop.permute.xlu1 %6173  ;;  %v6171_v57 = vunpack.i.h.bf16 %v6169_v42  ;;  %v6170_v23 = vunpack.i.l.bf16 %v6169_v42  ;;  %2379 = vmatprep.mubr.f32.mxu1 %v2079_v55 }
 0x33e   : > { %v6176_v16 = vunpack.i.h.bf16 %v6174_v19  ;;  %v6175_v48 = vunpack.i.l.bf16 %v6174_v19  ;;  %2380 = vmatmul.mubr.f32.gmra.mrb[58].mxu1 %v1983_v11  ;;  %v862_v11 = vld [vmem:[#allocation2 + $0x158] sm:$0xff] }
 0x33f   : > { %v2016_v37 = vsel %vm304_vm0, %v7827_v60, %v6170_v23  ;;  %v1918_v8 = vsel %vm304_vm0, %v861_v30, %v6171_v57 }
 0x340   : > { %v6179_v21 = vpop.permute.xlu0 %6178  ;;  %v2048_v54 = vsel %vm1922_vm5, %v2016_v37, %v6175_v48  ;;  %v1951_v12 = vsel %vm1922_vm5, %v1918_v8, %v6176_v16 }
 0x341   : > { %v6184_v25 = vpop.permute.xlu1 %6183  ;;  %v6181_v22 = vunpack.i.h.bf16 %v6179_v21  ;;  %v6180_v10 = vunpack.i.l.bf16 %v6179_v21 }
 0x342   : > { %v6186_v24 = vunpack.i.h.bf16 %v6184_v25  ;;  %v6185_v63 = vunpack.i.l.bf16 %v6184_v25 }
 0x343   : > { %v2080_v53 = vsel %vm1955_vm6, %v2048_v54, %v6180_v10  ;;  %v1984_v3 = vsel %vm1955_vm6, %v1951_v12, %v6181_v22 }
 0x344   : > { %v6189_v15 = vpop.permute.xlu0 %6188  ;;  %2384 = vmatprep.mubr.f32.mxu1 %v2080_v53  ;;  %v2017_v23 = vsel %vm304_vm0, %v7843_v49, %v6185_v63  ;;  %v1919_v48 = vsel %vm304_vm0, %v862_v11, %v6186_v24  ;;  %v863_v53 = vld [vmem:[#allocation2 + $0x168] sm:$0xff] }
 0x345   : > { %v6194_v42 = vpop.permute.xlu1 %6193  ;;  %v6191_v60 = vunpack.i.h.bf16 %v6189_v15  ;;  %v6190_v55 = vunpack.i.l.bf16 %v6189_v15  ;;  %2385 = vmatmul.mubr.f32.gmra.mrb[60].mxu1 %v1984_v3 }
 0x346   : > { %v6196_v19 = vunpack.i.h.bf16 %v6194_v42  ;;  %v6195_v57 = vunpack.i.l.bf16 %v6194_v42 }
 0x347   : > { %v2049_v16 = vsel %vm1922_vm5, %v2017_v23, %v6190_v55  ;;  %v1952_v30 = vsel %vm1922_vm5, %v1919_v48, %v6191_v60 }
 0x348   : > { %v6199_v37 = vpop.permute.xlu0 %6198  ;;  %v2081_v8 = vsel %vm1955_vm6, %v2049_v16, %v6195_v57  ;;  %v1985_v21 = vsel %vm1955_vm6, %v1952_v30, %v6196_v19 }
 0x349   : > { %v6204_v25 = vpop.permute.xlu1 %6203  ;;  %v6201_v22 = vunpack.i.h.bf16 %v6199_v37  ;;  %v6200_v10 = vunpack.i.l.bf16 %v6199_v37  ;;  %2389 = vmatprep.mubr.f32.mxu1 %v2081_v8  ;;  %v864_v37 = vld [vmem:[#allocation2 + $0x170] sm:$0xff] }
 0x34a   : > { %v6206_v54 = vunpack.i.h.bf16 %v6204_v25  ;;  %v6205_v12 = vunpack.i.l.bf16 %v6204_v25  ;;  %2390 = vmatmul.mubr.f32.gmra.mrb[62].mxu1 %v1985_v21 }
 0x34b   : > { %v2018_v49 = vsel %vm304_vm0, %v7865_v44, %v6200_v10  ;;  %v1920_v24 = vsel %vm304_vm0, %v863_v53, %v6201_v22 }
 0x34c   : > { %v6209_v63 = vpop.permute.xlu0 %6208  ;;  %v2050_v11 = vsel %vm1922_vm5, %v2018_v49, %v6205_v12  ;;  %v1953_v19 = vsel %vm1922_vm5, %v1920_v24, %v6206_v54 }
 0x34d   : > { %v6214_v3 = vpop.permute.xlu1 %6213  ;;  %v6211_v15 = vunpack.i.h.bf16 %v6209_v63  ;;  %v6210_v42 = vunpack.i.l.bf16 %v6209_v63 }
 0x34e   : > { %v6216_v60 = vunpack.i.h.bf16 %v6214_v3  ;;  %v6215_v55 = vunpack.i.l.bf16 %v6214_v3 }
 0x34f   : > { %v2082_v57 = vsel %vm1955_vm6, %v2050_v11, %v6210_v42  ;;  %v1986_v23 = vsel %vm1955_vm6, %v1953_v19, %v6211_v15 }
 0x350   : > { %v6219_v48 = vpop.permute.xlu0 %6218  ;;  %2394 = vmatprep.mubr.f32.mxu1 %v2082_v57  ;;  %v2019_v25 = vsel %vm304_vm0, %v7881_v18, %v6215_v55  ;;  %v1921_v22 = vsel %vm304_vm0, %v864_v37, %v6216_v60 }
 0x351   : > { %v6224_v16 = vpop.permute.xlu1 %6223  ;;  %v6221_v44 = vunpack.i.h.bf16 %v6219_v48  ;;  %v6220_v30 = vunpack.i.l.bf16 %v6219_v48  ;;  %2395 = vmatmul.mubr.f32.gmra.mrb[64].mxu1 %v1986_v23 }
 0x352   : > { %v6226_v8 = vunpack.i.h.bf16 %v6224_v16  ;;  %v6225_v21 = vunpack.i.l.bf16 %v6224_v16 }
 0x353   : > { %v2051_v10 = vsel %vm1922_vm5, %v2019_v25, %v6220_v30  ;;  %v1954_v54 = vsel %vm1922_vm5, %v1921_v22, %v6221_v44 }
 0x354   : > { %v2083_v12 = vsel %vm1955_vm6, %v2051_v10, %v6225_v21  ;;  %v1987_v53 = vsel %vm1955_vm6, %v1954_v54, %v6226_v8 }
 0x355   : > { %2399 = vmatprep.mubr.f32.mxu1 %v2083_v12 }
 0x356   : > { %2400 = vmatmul.mubr.f32.gmra.mrb[66].mxu1 %v1987_v53 }
 0x357   : > { %2696 = vmatprep.mubr.f32.mxu1 %v6775_v0 }
 0x371   : > { %v2246_v49 = vpop.f32.mrb[4].mxu1 }
 0x372   : > { %v8105_v24 = vadd.f32 %v7945_v29, %v2246_v49  ;;  %v2248_v63 = vpop.f32.mrb[5].mxu1 }
 0x375   : > { %v2251_v18 = vpop.f32.mrb[6].mxu1 }
 0x376   : > { %v8108_v3 = vadd.f32 %v7941_v35, %v2251_v18  ;;  %v2253_v15 = vpop.f32.mrb[7].mxu1 }
 0x37c   : > { %v2256_v42 = vpop.f32.mrb[8].mxu1 }
 0x37d   : > { %v8111_v60 = vadd.f32 %v7951_v36, %v2256_v42  ;;  %v2258_v55 = vpop.f32.mrb[9].mxu1 }
 0x381   : > { %v2261_v11 = vpop.f32.mrb[10].mxu1 }
 0x382   : > { %v8114_v19 = vadd.f32 %v7949_v43, %v2261_v11  ;;  %v2263_v57 = vpop.f32.mrb[11].mxu1 }
 0x388   : > { %v2266_v23 = vpop.f32.mrb[12].mxu1 }
 0x389   : > { %v8117_v29 = vadd.f32 %v7959_v40, %v2266_v23  ;;  %v2268_v48 = vpop.f32.mrb[13].mxu1 }
 0x38d   : > { %v2271_v16 = vpop.f32.mrb[14].mxu1 }
 0x38e   : > { %v8120_v35 = vadd.f32 %v7957_v38, %v2271_v16  ;;  %v2273_v44 = vpop.f32.mrb[15].mxu1 }
 0x394   : > { %v2276_v30 = vpop.f32.mrb[16].mxu1 }
 0x395   : > { %v8123_v36 = vadd.f32 %v7969_v6, %v2276_v30  ;;  %v2278_v37 = vpop.f32.mrb[17].mxu1 }
 0x398   : > { %v8131_v10 = vpop.f32.mrb[32].mxu0 }
 0x399   : > { %v2281_v8 = vpop.f32.mrb[18].mxu1  ;;  %v8133_v38 = vpop.f32.mrb[33].mxu0 }
 0x39a   : > { %v8126_v43 = vadd.f32 %v7965_v61, %v2281_v8  ;;  %v2283_v21 = vpop.f32.mrb[19].mxu1 }
 0x3a0   : > { %v2286_v25 = vpop.f32.mrb[20].mxu1 }
 0x3a1   : > { %v8129_v40 = vadd.f32 %v7975_v27, %v2286_v25  ;;  %v2288_v22 = vpop.f32.mrb[21].mxu1 }
 0x3a5   : > { %v2291_v54 = vpop.f32.mrb[22].mxu1 }
 0x3a6   : > { %v8136_v12 = vadd.f32 %v7973_v34, %v2291_v54  ;;  %v2293_v6 = vpop.f32.mrb[23].mxu1 }
 0x3ac   : > { %v2296_v53 = vpop.f32.mrb[24].mxu1 }
 0x3ad   : > { %v8139_v49 = vadd.f32 %v7983_v32, %v2296_v53  ;;  %v2298_v61 = vpop.f32.mrb[25].mxu1 }
 0x3b1   : > { %v2301_v63 = vpop.f32.mrb[26].mxu1 }
 0x3b2   : > { %v8142_v18 = vadd.f32 %v7981_v47, %v2301_v63  ;;  %v2303_v27 = vpop.f32.mrb[27].mxu1 }
 0x3b8   : > { %v2306_v15 = vpop.f32.mrb[28].mxu1 }
 0x3b9   : > { %v8145_v42 = vadd.f32 %v7993_v58, %v2306_v15  ;;  %v2308_v55 = vpop.f32.mrb[29].mxu1 }
 0x3bd   : > { %v2311_v11 = vpop.f32.mrb[30].mxu1 }
 0x3be   : > { %v8148_v34 = vadd.f32 %v7989_v9, %v2311_v11  ;;  %v2313_v57 = vpop.f32.mrb[31].mxu1  ;;  %v2705_v11 = vmul.f32 %v8114_v19, %v8114_v19 }
 0x3c4   : > { %v2316_v23 = vpop.f32.mrb[32].mxu1 }
 0x3c5   : > { %v8151_v32 = vadd.f32 %v7999_v2, %v2316_v23  ;;  %v2318_v48 = vpop.f32.mrb[33].mxu1  ;;  %v2703_v2 = vmul.f32 %v8108_v3, %v8108_v3 }
 0x3c6   : > { %v2704_v48 = vmul.f32 %v8111_v60, %v8111_v60 }
 0x3c9   : > { %v2321_v16 = vpop.f32.mrb[34].mxu1 }
 0x3ca   : > { %v8154_v47 = vadd.f32 %v7997_v41, %v2321_v16  ;;  %v2323_v44 = vpop.f32.mrb[35].mxu1 }
 0x3cb   : > { %v5611_v44 = vpack.c.bf16 %v2705_v11, %v2704_v48 }
 0x3d0   : > { %v2326_v30 = vpop.f32.mrb[36].mxu1 }
 0x3d1   : > { %v8157_v58 = vadd.f32 %v8007_v39, %v2326_v30  ;;  %v2328_v37 = vpop.f32.mrb[37].mxu1  ;;  %v2702_v39 = vmul.f32 %v8105_v24, %v8105_v24 }
 0x3d3   : > { %v2718_v25 = vmul.f32 %v8157_v58, %v8157_v58  ;;  %v5607_v6 = vpack.c.bf16 %v2703_v2, %v2702_v39 }
 0x3d5   : > { %v2331_v8 = vpop.f32.mrb[38].mxu1 }
 0x3d6   : > { %v8160_v9 = vadd.f32 %v8005_v46, %v2331_v8  ;;  %v2333_v21 = vpop.f32.mrb[39].mxu1  ;;  %v5575_v46 = vpack.c.bf16 %v8108_v3, %v8105_v24 }
 0x3d8   : > { %v2719_v41 = vmul.f32 %v8160_v9, %v8160_v9  ;;  %v5573_v22 = vpack.c.bf16 %v8160_v9, %v8157_v58 }
 0x3da   : > { %5574 = vmatprep.subr.bf16.mxu1 %v5573_v22  ;;  %v5605_v54 = vpack.c.bf16 %v2719_v41, %v2718_v25  ;;  %v2707_v41 = vmul.f32 %v8120_v35, %v8120_v35 }
 0x3db   : > { %5576 = vmatpush3.bf16.msra.mxu1 %v5575_v46  ;;  %v2706_v46 = vmul.f32 %v8117_v29, %v8117_v29 }
 0x3dc   : > { %v2336_v53 = vpop.f32.mrb[40].mxu1  ;;  %5606 = vmatprep.subr.bf16.mxu0 %v5605_v54 }
 0x3dd   : > { %v8175_v61 = vadd.f32 %v8017_v1, %v2336_v53  ;;  %v2338_v63 = vpop.f32.mrb[41].mxu1  ;;  %5608 = vmatpush3.bf16.msra.mxu0 %v5607_v6  ;;  %v5615_v6 = vpack.c.bf16 %v2707_v41, %v2706_v46 }
 0x3df   : > { %v2720_v57 = vmul.f32 %v8175_v61, %v8175_v61 }
 0x3e1   : > { %v2341_v27 = vpop.f32.mrb[42].mxu1 }
 0x3e2   : > { %v8178_v15 = vadd.f32 %v8013_v14, %v2341_v27  ;;  %v2343_v55 = vpop.f32.mrb[43].mxu1  ;;  %v5579_v14 = vpack.c.bf16 %v8114_v19, %v8111_v60 }
 0x3e4   : > { %v2721_v23 = vmul.f32 %v8178_v15, %v8178_v15  ;;  %v5577_v1 = vpack.c.bf16 %v8178_v15, %v8175_v61 }
 0x3e6   : > { %5578 = vmatprep.subr.bf16.mxu1 %v5577_v1  ;;  %v5609_v16 = vpack.c.bf16 %v2721_v23, %v2720_v57  ;;  %v2709_v23 = vmul.f32 %v8126_v43, %v8126_v43 }
 0x3e7   : > { %5580 = vmatpush3.bf16.msra.mxu1 %v5579_v14  ;;  %v2708_v14 = vmul.f32 %v8123_v36, %v8123_v36 }
 0x3e8   : > { %v2346_v30 = vpop.f32.mrb[44].mxu1  ;;  %5610 = vmatprep.subr.bf16.mxu0 %v5609_v16 }
 0x3e9   : > { %v8193_v37 = vadd.f32 %v8023_v4, %v2346_v30  ;;  %v2348_v8 = vpop.f32.mrb[45].mxu1  ;;  %5612 = vmatpush3.bf16.msra.mxu0 %v5611_v44  ;;  %v5619_v44 = vpack.c.bf16 %v2709_v23, %v2708_v14 }
 0x3eb   : > { %v2722_v22 = vmul.f32 %v8193_v37, %v8193_v37 }
 0x3ed   : > { %v2351_v21 = vpop.f32.mrb[46].mxu1 }
 0x3ee   : > { %v8196_v2 = vadd.f32 %v8021_v33, %v2351_v21  ;;  %v2353_v25 = vpop.f32.mrb[47].mxu1  ;;  %v5583_v33 = vpack.c.bf16 %v8120_v35, %v8117_v29 }
 0x3f0   : > { %v2723_v39 = vmul.f32 %v8196_v2, %v8196_v2  ;;  %v5581_v4 = vpack.c.bf16 %v8196_v2, %v8193_v37 }
 0x3f2   : > { %5582 = vmatprep.subr.bf16.mxu1 %v5581_v4  ;;  %v5613_v54 = vpack.c.bf16 %v2723_v39, %v2722_v22  ;;  %v2711_v39 = vmul.f32 %v8136_v12, %v8136_v12 }
 0x3f3   : > { %5584 = vmatpush3.bf16.msra.mxu1 %v5583_v33  ;;  %v2710_v33 = vmul.f32 %v8129_v40, %v8129_v40 }
 0x3f4   : > { %v2356_v53 = vpop.f32.mrb[48].mxu1  ;;  %5614 = vmatprep.subr.bf16.mxu0 %v5613_v54 }
 0x3f5   : > { %v8211_v63 = vadd.f32 %v8031_v7, %v2356_v53  ;;  %v2358_v27 = vpop.f32.mrb[49].mxu1  ;;  %5616 = vmatpush3.bf16.msra.mxu0 %v5615_v6  ;;  %v5623_v6 = vpack.c.bf16 %v2711_v39, %v2710_v33 }
 0x3f7   : > { %v2724_v1 = vmul.f32 %v8211_v63, %v8211_v63 }
 0x3f9   : > { %v2361_v55 = vpop.f32.mrb[50].mxu1 }
 0x3fa   : > { %v8214_v11 = vadd.f32 %v8029_v52, %v2361_v55  ;;  %v2363_v57 = vpop.f32.mrb[51].mxu1  ;;  %v5587_v52 = vpack.c.bf16 %v8126_v43, %v8123_v36 }
 0x3fc   : > { %v2725_v48 = vmul.f32 %v8214_v11, %v8214_v11  ;;  %v5585_v7 = vpack.c.bf16 %v8214_v11, %v8211_v63 }
 0x3fe   : > { %5586 = vmatprep.subr.bf16.mxu1 %v5585_v7  ;;  %v5617_v16 = vpack.c.bf16 %v2725_v48, %v2724_v1  ;;  %v2713_v48 = vmul.f32 %v8142_v18, %v8142_v18 }
 0x3ff   : > { %5588 = vmatpush3.bf16.msra.mxu1 %v5587_v52  ;;  %v2712_v52 = vmul.f32 %v8139_v49, %v8139_v49 }
 0x400   : > { %v2366_v30 = vpop.f32.mrb[52].mxu1  ;;  %5618 = vmatprep.subr.bf16.mxu0 %v5617_v16 }
 0x401   : > { %v8229_v8 = vadd.f32 %v8041_v51, %v2366_v30  ;;  %v2368_v21 = vpop.f32.mrb[53].mxu1  ;;  %5620 = vmatpush3.bf16.msra.mxu0 %v5619_v44  ;;  %v5627_v44 = vpack.c.bf16 %v2713_v48, %v2712_v52 }
 0x403   : > { %v2726_v4 = vmul.f32 %v8229_v8, %v8229_v8 }
 0x405   : > { %v2371_v25 = vpop.f32.mrb[54].mxu1 }
 0x406   : > { %v8232_v41 = vadd.f32 %v8037_v28, %v2371_v25  ;;  %v2373_v22 = vpop.f32.mrb[55].mxu1  ;;  %v5591_v28 = vpack.c.bf16 %v8136_v12, %v8129_v40 }
 0x408   : > { %v2727_v46 = vmul.f32 %v8232_v41, %v8232_v41  ;;  %v5589_v51 = vpack.c.bf16 %v8232_v41, %v8229_v8 }
 0x40a   : > { %5590 = vmatprep.subr.bf16.mxu1 %v5589_v51  ;;  %v5621_v54 = vpack.c.bf16 %v2727_v46, %v2726_v4  ;;  %v2715_v46 = vmul.f32 %v8148_v34, %v8148_v34 }
 0x40b   : > { %5592 = vmatpush3.bf16.msra.mxu1 %v5591_v28  ;;  %v2714_v28 = vmul.f32 %v8145_v42, %v8145_v42 }
 0x40c   : > { %v2376_v53 = vpop.f32.mrb[56].mxu1  ;;  %5622 = vmatprep.subr.bf16.mxu0 %v5621_v54 }
 0x40d   : > { %v8247_v27 = vadd.f32 %v8047_v26, %v2376_v53  ;;  %v2378_v55 = vpop.f32.mrb[57].mxu1  ;;  %5624 = vmatpush3.bf16.msra.mxu0 %v5623_v6  ;;  %v5631_v6 = vpack.c.bf16 %v2715_v46, %v2714_v28  ;;  %v3074_v28 = vld [vmem:[%s9405_s7 + $0x118] sm:$0xff] }
 0x40f   : > { %v2728_v7 = vmul.f32 %v8247_v27, %v8247_v27 }
 0x411   : > { %v2381_v57 = vpop.f32.mrb[58].mxu1 }
 0x412   : > { %v8250_v23 = vadd.f32 %v8045_v17, %v2381_v57  ;;  %v2383_v1 = vpop.f32.mrb[59].mxu1  ;;  %v5595_v17 = vpack.c.bf16 %v8142_v18, %v8139_v49 }
 0x414   : > { %v2729_v14 = vmul.f32 %v8250_v23, %v8250_v23  ;;  %v5593_v26 = vpack.c.bf16 %v8250_v23, %v8247_v27 }
 0x416   : > { %5594 = vmatprep.subr.bf16.mxu1 %v5593_v26  ;;  %v5625_v16 = vpack.c.bf16 %v2729_v14, %v2728_v7  ;;  %v2717_v14 = vmul.f32 %v8154_v47, %v8154_v47 }
 0x417   : > { %5596 = vmatpush3.bf16.msra.mxu1 %v5595_v17  ;;  %v2716_v17 = vmul.f32 %v8151_v32, %v8151_v32 }
 0x418   : > { %v2386_v30 = vpop.f32.mrb[60].mxu1  ;;  %5626 = vmatprep.subr.bf16.mxu0 %v5625_v16 }
 0x419   : > { %v8265_v21 = vadd.f32 %v8055_v31, %v2386_v30  ;;  %v2388_v25 = vpop.f32.mrb[61].mxu1  ;;  %5628 = vmatpush3.bf16.msra.mxu0 %v5627_v44  ;;  %v5635_v44 = vpack.c.bf16 %v2717_v14, %v2716_v17  ;;  %v3043_v14 = vld [vmem:[%s9405_s7 + $0x20] sm:$0xff]  ;;  %v3046_v17 = vld [vmem:[%s9405_s7 + $0x38] sm:$0xff] }
 0x41b   : > { %v2730_v51 = vmul.f32 %v8265_v21, %v8265_v21 }
 0x41d   : > { %v2391_v22 = vpop.f32.mrb[62].mxu1 }
 0x41e   : > { %v8268_v39 = vadd.f32 %v8053_v13, %v2391_v22  ;;  %v2393_v4 = vpop.f32.mrb[63].mxu1  ;;  %v5599_v13 = vpack.c.bf16 %v8148_v34, %v8145_v42 }
 0x420   : > { %v2731_v33 = vmul.f32 %v8268_v39, %v8268_v39  ;;  %v5597_v31 = vpack.c.bf16 %v8268_v39, %v8265_v21 }
 0x422   : > { %5598 = vmatprep.subr.bf16.mxu1 %v5597_v31  ;;  %v5629_v54 = vpack.c.bf16 %v2731_v33, %v2730_v51  ;;  %v3073_v31 = vld [vmem:[%s9405_s7 + $0x110] sm:$0xff] }
 0x423   : > { %5600 = vmatpush3.bf16.msra.mxu1 %v5599_v13  ;;  %v5695_v13 = vpack.c.bf16 %v3074_v28, %v3073_v31  ;;  %v3052_v31 = vld [vmem:[%s9405_s7 + $0x68] sm:$0xff] }
 0x424   : > { %v2396_v53 = vpop.f32.mrb[64].mxu1  ;;  %5630 = vmatprep.subr.bf16.mxu0 %v5629_v54  ;;  %v3039_v54 = vld [vmem:[%s9405_s7] sm:$0xff] }
 0x425   : > { %v8283_v55 = vadd.f32 %v8133_v38, %v2396_v53  ;;  %v2398_v57 = vpop.f32.mrb[65].mxu1  ;;  %5632 = vmatpush3.bf16.msra.mxu0 %v5631_v6  ;;  %v3040_v6 = vld [vmem:[%s9405_s7 + $0x8] sm:$0xff] }
 0x426   : > { %v5644_v53 = vpack.c.bf16 %v3040_v6, %v3039_v54  ;;  %v3041_v57 = vld [vmem:[%s9405_s7 + $0x10] sm:$0xff]  ;;  %v3054_v6 = vld [vmem:[%s9405_s7 + $0x78] sm:$0xff] }
 0x427   : > { %v2732_v26 = vmul.f32 %v8283_v55, %v8283_v55  ;;  %v3053_v54 = vld [vmem:[%s9405_s7 + $0x70] sm:$0xff] }
 0x429   : > { %v2401_v1 = vpop.f32.mrb[66].mxu1 }
 0x42a   : > { %v8286_v48 = vadd.f32 %v8131_v10, %v2401_v1  ;;  %v2403_v7 = vpop.f32.mrb[67].mxu1  ;;  %v5603_v10 = vpack.c.bf16 %v8154_v47, %v8151_v32  ;;  %v3042_v1 = vld [vmem:[%s9405_s7 + $0x18] sm:$0xff] }
 0x42b   : > { %v5647_v7 = vpack.c.bf16 %v3042_v1, %v3041_v57  ;;  %v3055_v57 = vld [vmem:[%s9405_s7 + $0x80] sm:$0xff]  ;;  %v3056_v1 = vld [vmem:[%s9405_s7 + $0x88] sm:$0xff] }
 0x42c   : > { %v2733_v52 = vmul.f32 %v8286_v48, %v8286_v48  ;;  %v5601_v38 = vpack.c.bf16 %v8286_v48, %v8283_v55 }
 0x42e   : > { %5602 = vmatprep.subr.bf16.mxu1 %v5601_v38  ;;  %v5633_v16 = vpack.c.bf16 %v2733_v52, %v2732_v26  ;;  %v3044_v26 = vld [vmem:[%s9405_s7 + $0x28] sm:$0xff]  ;;  %v3045_v38 = vld [vmem:[%s9405_s7 + $0x30] sm:$0xff] }
 0x42f   : > { %5604 = vmatpush3.bf16.msra.mxu1 %v5603_v10  ;;  %v5650_v52 = vpack.c.bf16 %v3044_v26, %v3043_v14  ;;  %v5653_v10 = vpack.c.bf16 %v3046_v17, %v3045_v38  ;;  %v5051_v14 = vld [vmem:[%s9403_s5] ss:$0 sm:$0xff]  ;;  %v3057_v26 = vld [vmem:[%s9405_s7 + $0x90] sm:$0xff] }
 0x430   : > { %5634 = vmatprep.subr.bf16.mxu0 %v5633_v16 }
 0x431   : > { %5636 = vmatpush3.bf16.msra.mxu0 %v5635_v44  ;;  %v3047_v44 = vld [vmem:[%s9405_s7 + $0x40] sm:$0xff] }
 0x432   : > { %2697 = vmatmul.mubr.f32.vlgmr.msra.gmra.mrb[68].mxu1 %v6775_v0  ;;  %5637 = vmatprep.subr.bf16.mxu0 %v6776_v56 }
 0x434   : > { %2799 = vmatmul.mubr.f32.vlgmr.msra.gmra.mrb[34].mxu0 %v6775_v0 }
 0x435   : > { %5639 = vmatpush3.bf16.msra.mxu0 %v7088_v59  ;;  %5388 = vmatprep.mubr.msk.f32.mxu0 %vm6777_vm1, %v6778_v5  ;;  %v3071_v59 = vld [vmem:[%s9405_s7 + $0x100] sm:$0xff] }
 0x436   : > { %5640 = vmatprep.subr.bf16.mxu0 %v6776_v56 }
 0x439   : > { %5642 = vmatpush3.bf16.msra.mxu0 %v7098_v62  ;;  %v3072_v62 = vld [vmem:[%s9405_s7 + $0x108] sm:$0xff] }
 0x43a   : > { %5643 = vmatprep.subr.bf16.mxu0 %v6776_v56  ;;  %v5691_v5 = vpack.c.bf16 %v3072_v62, %v3071_v59 }
 0x43c   : > { %5692 = vmatprep.subr.bf16.mxu1 %v5691_v5 }
 0x43d   : > { %5694 = vmatpush3.bf16.msra.mxu1 %v5691_v5  ;;  %v3051_v5 = vld [vmem:[%s9405_s7 + $0x60] sm:$0xff] }
 0x43e   : > { %5696 = vmatprep.subr.bf16.mxu1 %v5695_v13 }
 0x441   : > { %5698 = vmatpush3.bf16.msra.mxu1 %v5695_v13  ;;  %v5662_v13 = vpack.c.bf16 %v3052_v31, %v3051_v5 }
 0x505   : > { %v5234_v30 = vpop.f32.mrb[68].mxu1 }
 0x506   : > { %v5235_v25 = vpop.f32.mrb[69].mxu1 }
 0x507   : > { %v5269_v22 = vpop.f32.mrb[34].mxu0  ;;  %v5236_v4 = vadd.f32 %v5235_v25, %v5234_v30  ;;  %v3048_v30 = vld [vmem:[%s9405_s7 + $0x48] sm:$0xff] }
 0x508   : > { %v5270_v46 = vpop.f32.mrb[35].mxu0 }
 0x509   : > { %v5271_v51 = vadd.f32 %v5270_v46, %v5269_v22 }
 0x50b   : > { %v2805_v33 = vrot.slane %v5271_v51, 7  ;;  %v3049_v51 = vld [vmem:[%s9405_s7 + $0x50] sm:$0xff] }
 0x50d   : > { %v2807_v0 = vsel %vm563_vm2, %v5236_v4, %v2805_v33  ;;  %v5656_v4 = vpack.c.bf16 %v3048_v30, %v3047_v44  ;;  %v3050_v33 = vld [vmem:[%s9405_s7 + $0x58] sm:$0xff]  ;;  %v3059_v30 = vld [vmem:[%s9405_s7 + $0xa0] sm:$0xff] }
 0x50e   : > { %5389 = vmatmul.mubr.msk.f32.vlgmr.msra.gmra.mrb[36].mxu0 %vm304_vm0, %v2807_v0  ;;  %v5659_v59 = vpack.c.bf16 %v3050_v33, %v3049_v51 }
 0x50f   : > { %5645 = vmatpush1.bf16.msra.mxu0 %v5644_v53  ;;  %v5665_v53 = vpack.c.bf16 %v3054_v6, %v3053_v54 }
 0x510   : > { %5646 = vmatprep.subr.bf16.mxu0 %v6776_v56 }
 0x513   : > { %5648 = vmatpush1.bf16.msra.mxu0 %v5647_v7  ;;  %v5668_v7 = vpack.c.bf16 %v3056_v1, %v3055_v57 }
 0x514   : > { %5649 = vmatprep.subr.bf16.mxu0 %v6776_v56 }
 0x517   : > { %5651 = vmatpush1.bf16.msra.mxu0 %v5650_v52  ;;  %v3058_v52 = vld [vmem:[%s9405_s7 + $0x98] sm:$0xff] }
 0x518   : > { %5652 = vmatprep.subr.bf16.mxu0 %v6776_v56  ;;  %v5671_v17 = vpack.c.bf16 %v3058_v52, %v3057_v26 }
 0x51b   : > { %5654 = vmatpush1.bf16.msra.mxu0 %v5653_v10 }
 0x51c   : > { %5655 = vmatprep.subr.bf16.mxu0 %v6776_v56 }
 0x51f   : > { %5657 = vmatpush1.bf16.msra.mxu0 %v5656_v4  ;;  %v2631_v4 = vld [vmem:[%s9404_s6] sm:$0x1] }
 0x520   : > { %5658 = vmatprep.subr.bf16.mxu0 %v6776_v56 }
 0x523   : > { %5660 = vmatpush1.bf16.msra.mxu0 %v5659_v59 }
 0x524   : > { %5661 = vmatprep.subr.bf16.mxu0 %v6776_v56 }
 0x527   : > { %5663 = vmatpush1.bf16.msra.mxu0 %v5662_v13 }
 0x528   : > { %5664 = vmatprep.subr.bf16.mxu0 %v6776_v56 }
 0x52b   : > { %5666 = vmatpush1.bf16.msra.mxu0 %v5665_v53 }
 0x52c   : > { %5667 = vmatprep.subr.bf16.mxu0 %v6776_v56 }
 0x52f   : > { %5669 = vmatpush1.bf16.msra.mxu0 %v5668_v7 }
 0x530   : > { %5670 = vmatprep.subr.bf16.mxu0 %v6776_v56 }
 0x533   : > { %5672 = vmatpush1.bf16.msra.mxu0 %v5671_v17 }
 0x534   : > { %5673 = vmatprep.subr.bf16.mxu0 %v6776_v56 }
 0x5e1   : > { %v2877_v16 = vpop.f32.mrb[36].mxu0 }
 0x5e2   : > { %v2881_v25 = vmul.f32 0.001953125, %v2877_v16  ;;  %v5390_v22 = vpop.f32.mrb[37].mxu0 }
 0x5e3   : > { %v3060_v22 = vld [vmem:[%s9405_s7 + $0xa8] sm:$0xff] }
 0x5e4   : > { %v2882_v46 = vmul.f32 %v2881_v25, %v2881_v25 }
 0x5e6   : > { %v2884_v0 = vrot.slane %v2882_v46, 7  ;;  %v5674_v46 = vpack.c.bf16 %v3060_v22, %v3059_v30 }
 0x5e8   : > { %v2886_v62 = vsub.f32 %v2881_v25, %v2884_v0  ;;  %5675 = vmatpush1.bf16.msra.mxu0 %v5674_v46 }
 0x5e9   : > { %5676 = vmatprep.subr.bf16.mxu0 %v6776_v56 }
 0x5ea   : > { %v2887_v28 = vadd.f32 1e-05, %v2886_v62 }
 0x5ec   : > { %6709 = vrsqrt.f32 %v2887_v28 }
 0x5f6   : > { %v6710_v38 = vpop.eup %6709 }
 0x5f7   : > { %v2895_v10 = vmul.f32 %v6710_v38, %v5051_v14 }
 0x5f9   : > { %v2897_v16 = vrot.slane %v2895_v10, 1  ;;  %v2904_v44 = vrot.slane %v2895_v10, %v660_v50 }
 0x5fb   : > { %v2899_v51 = vmul.f32 %v2897_v16, %v2881_v25  ;;  %v2905_v33 = vmul.f32 %v2904_v44, %v8105_v24  ;;  %v2906_v50 = vmul.f32 %v2904_v44, %v8108_v3  ;;  %v2907_v0 = vmul.f32 %v2904_v44, %v8111_v60 }
 0x5fc   : > { %v2908_v59 = vmul.f32 %v2904_v44, %v8114_v19  ;;  %v2909_v62 = vmul.f32 %v2904_v44, %v8117_v29  ;;  %v2910_v5 = vmul.f32 %v2904_v44, %v8120_v35  ;;  %v2911_v31 = vmul.f32 %v2904_v44, %v8123_v36 }
 0x5fd   : > { %v2900_v28 = vsub.f32 %v2631_v4, %v2899_v51  ;;  %v2912_v13 = vmul.f32 %v2904_v44, %v8126_v43  ;;  %v2913_v25 = vmul.f32 %v2904_v44, %v8129_v40  ;;  %v2914_v24 = vmul.f32 %v2904_v44, %v8136_v12 }
 0x5fe   : > { %v2915_v3 = vmul.f32 %v2904_v44, %v8139_v49  ;;  %v2916_v60 = vmul.f32 %v2904_v44, %v8142_v18  ;;  %v2917_v19 = vmul.f32 %v2904_v44, %v8145_v42  ;;  %v2918_v29 = vmul.f32 %v2904_v44, %v8148_v34 }
 0x5ff   : > { %v2941_v35 = vrot.slane %v2900_v28, %v697_v20  ;;  %v2919_v36 = vmul.f32 %v2904_v44, %v8151_v32  ;;  %v2920_v43 = vmul.f32 %v2904_v44, %v8154_v47  ;;  %v2921_v40 = vmul.f32 %v2904_v44, %v8157_v58 }
 0x600   : > { %v2922_v12 = vmul.f32 %v2904_v44, %v8160_v9  ;;  %v2923_v54 = vmul.f32 %v2904_v44, %v8175_v61  ;;  %v2924_v49 = vmul.f32 %v2904_v44, %v8178_v15  ;;  %v2925_v18 = vmul.f32 %v2904_v44, %v8193_v37 }
 0x601   : > { %v2926_v42 = vmul.f32 %v2904_v44, %v8196_v2  ;;  %v2927_v34 = vmul.f32 %v2904_v44, %v8211_v63  ;;  %v2928_v45 = vmul.f32 %v2904_v44, %v8214_v11  ;;  %v2929_v20 = vmul.f32 %v2904_v44, %v8229_v8 }
 0x602   : > { %v2930_v32 = vmul.f32 %v2904_v44, %v8232_v41  ;;  %v2931_v47 = vmul.f32 %v2904_v44, %v8247_v27  ;;  %v2932_v58 = vmul.f32 %v2904_v44, %v8250_v23  ;;  %v2933_v9 = vmul.f32 %v2904_v44, %v8265_v21 }
 0x603   : > { %v2934_v61 = vmul.f32 %v2904_v44, %v8268_v39  ;;  %v2935_v15 = vmul.f32 %v2904_v44, %v8283_v55  ;;  %v2936_v37 = vmul.f32 %v2904_v44, %v8286_v48  ;;  %v2943_v2 = vadd.f32 %v2941_v35, %v2905_v33 }
 0x604   : > { %v2944_v63 = vadd.f32 %v2941_v35, %v2906_v50  ;;  %v2945_v6 = vadd.f32 %v2941_v35, %v2907_v0  ;;  %v2946_v11 = vadd.f32 %v2941_v35, %v2908_v59  ;;  %v2947_v53 = vadd.f32 %v2941_v35, %v2909_v62 }
 0x605   : > { %v2948_v8 = vadd.f32 %v2941_v35, %v2910_v5  ;;  %v2949_v57 = vadd.f32 %v2941_v35, %v2911_v31  ;;  %v2950_v41 = vadd.f32 %v2941_v35, %v2912_v13  ;;  %v2951_v1 = vadd.f32 %v2941_v35, %v2913_v25 }
 0x606   : > { %v2952_v27 = vadd.f32 %v2941_v35, %v2914_v24  ;;  %v2953_v7 = vadd.f32 %v2941_v35, %v2915_v3  ;;  %v2954_v23 = vadd.f32 %v2941_v35, %v2916_v60  ;;  %v2955_v14 = vadd.f32 %v2941_v35, %v2917_v19 }
 0x607   : > { %v2956_v21 = vadd.f32 %v2941_v35, %v2918_v29  ;;  %v2957_v26 = vadd.f32 %v2941_v35, %v2919_v36  ;;  %v2958_v39 = vadd.f32 %v2941_v35, %v2920_v43  ;;  %v2959_v52 = vadd.f32 %v2941_v35, %v2921_v40 }
 0x608   : > { %v8442_v55 = vadd.f32 %v2941_v35, %v2922_v12  ;;  %v8444_v48 = vadd.f32 %v2941_v35, %v2923_v54  ;;  %v8446_v38 = vadd.f32 %v2941_v35, %v2924_v49  ;;  %v8448_v17 = vadd.f32 %v2941_v35, %v2925_v18 }
 0x609   : > { %v8450_v10 = vadd.f32 %v2941_v35, %v2926_v42  ;;  %v8452_v16 = vadd.f32 %v2941_v35, %v2927_v34  ;;  %v8454_v44 = vadd.f32 %v2941_v35, %v2928_v45  ;;  %v8456_v30 = vadd.f32 %v2941_v35, %v2929_v20  ;;  %v3061_v34 = vld [vmem:[%s9405_s7 + $0xb0] sm:$0xff]  ;;  %v3062_v45 = vld [vmem:[%s9405_s7 + $0xb8] sm:$0xff] }
 0x60a   : > { %v8458_v22 = vadd.f32 %v2941_v35, %v2930_v32  ;;  %v8460_v4 = vadd.f32 %v2941_v35, %v2931_v47  ;;  %v8462_v46 = vadd.f32 %v2941_v35, %v2932_v58  ;;  %v8464_v51 = vadd.f32 %v2941_v35, %v2933_v9 }
 0x60b   : > { %v8466_v33 = vadd.f32 %v2941_v35, %v2934_v61  ;;  %v8468_v50 = vadd.f32 %v2941_v35, %v2935_v15  ;;  %v8470_v0 = vadd.f32 %v2941_v35, %v2936_v37  ;;  %v2975_v59 = vmax.f32 %v2943_v2, 0.0  ;;  %v3063_v2 = vld [vmem:[%s9405_s7 + $0xc0] sm:$0xff] }
 0x60c   : > { %v2976_v62 = vmax.f32 %v2944_v63, 0.0  ;;  %v2977_v5 = vmax.f32 %v2945_v6, 0.0  ;;  %v2978_v31 = vmax.f32 %v2946_v11, 0.0  ;;  %v2979_v28 = vmax.f32 %v2947_v53, 0.0  ;;  %v3064_v63 = vld [vmem:[%s9405_s7 + $0xc8] sm:$0xff] }
 0x60d   : > { %v2980_v13 = vmax.f32 %v2948_v8, 0.0  ;;  %v2981_v25 = vmax.f32 %v2949_v57, 0.0  ;;  %v2982_v24 = vmax.f32 %v2950_v41, 0.0  ;;  %v2983_v3 = vmax.f32 %v2951_v1, 0.0  ;;  %3007 = vst.msk [vmem:[#allocation2 + $0x19] sm:$0xff] %vm304_vm0, %v2975_v59  ;;  %v3139_v8 = vld [vmem:[#allocation2 + $0x2] sm:$0xff] }
 0x60e   : > { %v2984_v60 = vmax.f32 %v2952_v27, 0.0  ;;  %v2985_v19 = vmax.f32 %v2953_v7, 0.0  ;;  %v2986_v29 = vmax.f32 %v2954_v23, 0.0  ;;  %v2987_v36 = vmax.f32 %v2955_v14, 0.0  ;;  %3008 = vst.msk [vmem:[#allocation2 + $0x21] sm:$0xff] %vm304_vm0, %v2976_v62  ;;  %3009 = vst.msk [vmem:[#allocation2 + $0x31] sm:$0xff] %vm304_vm0, %v2977_v5 }
 0x60f   : > { %3010 = vst.msk [vmem:[#allocation2 + $0x39] sm:$0xff] %vm304_vm0, %v2978_v31  ;;  %3011 = vst.msk [vmem:[#allocation2 + $0x49] sm:$0xff] %vm304_vm0, %v2979_v28  ;;  %v2988_v35 = vmax.f32 %v2956_v21, 0.0  ;;  %v2989_v43 = vmax.f32 %v2957_v26, 0.0  ;;  %v2990_v40 = vmax.f32 %v2958_v39, 0.0  ;;  %v2991_v12 = vmax.f32 %v2959_v52, 0.0 }
 0x610   : > { %3012 = vst.msk [vmem:[#allocation2 + $0x51] sm:$0xff] %vm304_vm0, %v2980_v13  ;;  %3013 = vst.msk [vmem:[#allocation2 + $0x61] sm:$0xff] %vm304_vm0, %v2981_v25  ;;  %v2992_v54 = vmax.f32 %v8442_v55, 0.0  ;;  %v2993_v49 = vmax.f32 %v8444_v48, 0.0  ;;  %v2994_v18 = vmax.f32 %v8446_v38, 0.0  ;;  %v2995_v42 = vmax.f32 %v8448_v17, 0.0 }
 0x611   : > { %3014 = vst.msk [vmem:[#allocation2 + $0x69] sm:$0xff] %vm304_vm0, %v2982_v24  ;;  %3015 = vst.msk [vmem:[#allocation2 + $0x79] sm:$0xff] %vm304_vm0, %v2983_v3  ;;  %v2996_v20 = vmax.f32 %v8450_v10, 0.0  ;;  %v2997_v32 = vmax.f32 %v8452_v16, 0.0  ;;  %v2998_v47 = vmax.f32 %v8454_v44, 0.0  ;;  %v2999_v58 = vmax.f32 %v8456_v30, 0.0 }
 0x612   : > { %3016 = vst.msk [vmem:[#allocation2 + $0x81] sm:$0xff] %vm304_vm0, %v2984_v60  ;;  %3017 = vst.msk [vmem:[#allocation2 + $0x91] sm:$0xff] %vm304_vm0, %v2985_v19  ;;  %v3000_v9 = vmax.f32 %v8458_v22, 0.0  ;;  %v3001_v61 = vmax.f32 %v8460_v4, 0.0  ;;  %v3002_v15 = vmax.f32 %v8462_v46, 0.0  ;;  %v3003_v37 = vmax.f32 %v8464_v51, 0.0 }
 0x613   : > { %3018 = vst.msk [vmem:[#allocation2 + $0x99] sm:$0xff] %vm304_vm0, %v2986_v29  ;;  %3019 = vst.msk [vmem:[#allocation2 + $0xa9] sm:$0xff] %vm304_vm0, %v2987_v36  ;;  %v3004_v6 = vmax.f32 %v8466_v33, 0.0  ;;  %v3005_v11 = vmax.f32 %v8468_v50, 0.0  ;;  %v3006_v53 = vmax.f32 %v8470_v0, 0.0  ;;  %v5677_v57 = vpack.c.bf16 %v3062_v45, %v3061_v34  ;;  %v3107_v41 = vld [vmem:[#allocation2 + $0x1] sm:$0xff] }
 0x614   : > { %3020 = vst.msk [vmem:[#allocation2 + $0xb1] sm:$0xff] %vm304_vm0, %v2988_v35  ;;  %3021 = vst.msk [vmem:[#allocation2 + $0xc1] sm:$0xff] %vm304_vm0, %v2989_v43  ;;  %v5680_v23 = vpack.c.bf16 %v3064_v63, %v3063_v2  ;;  %v3065_v26 = vld [vmem:[%s9405_s7 + $0xd0] sm:$0xff]  ;;  %v3066_v39 = vld [vmem:[%s9405_s7 + $0xd8] sm:$0xff] }
 0x615   : > { %3022 = vst.msk [vmem:[#allocation2 + $0xc9] sm:$0xff] %vm304_vm0, %v2990_v40  ;;  %3023 = vst.msk [vmem:[#allocation2 + $0xd9] sm:$0xff] %vm304_vm0, %v2991_v12  ;;  %v8535_v7 = vld [vmem:[#allocation2 + $0x30] sm:$0xff]  ;;  %5678 = vmatpush1.bf16.msra.mxu0 %v5677_v57  ;;  %v3235_v21 = vld [vmem:[#allocation2 + $0x1a] sm:$0xff]  ;;  %v5683_v16 = vpack.c.bf16 %v3066_v39, %v3065_v26 }
 0x616   : > { %3024 = vst.msk [vmem:[#allocation2 + $0xe1] sm:$0xff] %vm304_vm0, %v2992_v54  ;;  %3025 = vst.msk [vmem:[#allocation2 + $0xf1] sm:$0xff] %vm304_vm0, %v2993_v49  ;;  %v8531_v1 = vld [vmem:[#allocation2 + $0x32] sm:$0xff]  ;;  %v8533_v27 = vld [vmem:[#allocation2 + $0x3a] sm:$0xff]  ;;  %v6232_v14 = vpack.i.bf16 %v3139_v8, %v8535_v7  ;;  %5679 = vmatprep.subr.bf16.mxu0 %v6776_v56  ;;  %v6227_v55 = vpack.i.bf16 %v3107_v41, %v3235_v21 }
 0x617   : > { %3026 = vst.msk [vmem:[#allocation2 + $0xf9] sm:$0xff] %vm304_vm0, %v2994_v18  ;;  %3027 = vst.msk [vmem:[#allocation2 + $0x109] sm:$0xff] %vm304_vm0, %v2995_v42  ;;  %5399 = vmatprep.mubr.msk.f32.mxu1 %vm304_vm0, %v8531_v1  ;;  %v8549_v52 = vld [vmem:[#allocation2 + $0x4a] sm:$0xff]  ;;  %v8551_v38 = vld [vmem:[#allocation2 + $0x22] sm:$0xff] }
 0x618   : > { %3028 = vst.msk [vmem:[#allocation2 + $0x111] sm:$0xff] %vm304_vm0, %v2996_v20  ;;  %3029 = vst.msk [vmem:[#allocation2 + $0x121] sm:$0xff] %vm304_vm0, %v2997_v32  ;;  %5400 = vmatmul.mubr.msk.f32.vlgmr.msra.gmra.mrb[70].mxu1 %vm304_vm0, %v8533_v27  ;;  %v3108_v48 = vld [vmem:[#allocation2 + $0x9] sm:$0xff]  ;;  %6233 = vrot.lane.b32.xlu1 %v6232_v14, %s6781_s12  ;;  %v8556_v17 = vld [vmem:[#allocation2 + $0x18] sm:$0xff] }
 0x619   : > { %3030 = vst.msk [vmem:[#allocation2 + $0x129] sm:$0xff] %vm304_vm0, %v2998_v47  ;;  %3031 = vst.msk [vmem:[#allocation2 + $0x139] sm:$0xff] %vm304_vm0, %v2999_v58  ;;  %5402 = vmatprep.mubr.msk.f32.mxu1 %vm304_vm0, %v8549_v52  ;;  %v8558_v10 = vld [vmem:[#allocation2 + $0x31] sm:$0xff]  ;;  %6228 = vrot.lane.b32.xlu0 %v6227_v55, %s6779_s22  ;;  %v6242_v30 = vpack.i.bf16 %v3108_v48, %v8551_v38  ;;  %v3067_v22 = vld [vmem:[%s9405_s7 + $0xe0] sm:$0xff] }
 0x61a   : > { %3032 = vst.msk [vmem:[#allocation2 + $0x141] sm:$0xff] %vm304_vm0, %v3000_v9  ;;  %3033 = vst.msk [vmem:[#allocation2 + $0x151] sm:$0xff] %vm304_vm0, %v3001_v61  ;;  %5681 = vmatpush1.bf16.msra.mxu0 %v5680_v23  ;;  %v8561_v44 = vld [vmem:[#allocation2 + $0x52] sm:$0xff]  ;;  %v3068_v4 = vld [vmem:[%s9405_s7 + $0xe8] sm:$0xff]  ;;  %v6237_v51 = vpack.i.bf16 %v8556_v17, %v8558_v10 }
 0x61b   : > { %3034 = vst.msk [vmem:[#allocation2 + $0x159] sm:$0xff] %vm304_vm0, %v3002_v15  ;;  %3035 = vst.msk [vmem:[#allocation2 + $0x169] sm:$0xff] %vm304_vm0, %v3003_v37  ;;  %5682 = vmatprep.subr.bf16.mxu0 %v6776_v56  ;;  %v8573_v46 = vld [vmem:[#allocation2 + $0x62] sm:$0xff]  ;;  %v8579_v50 = vld [vmem:[#allocation2 + $0x39] sm:$0xff]  ;;  %v5686_v62 = vpack.c.bf16 %v3068_v4, %v3067_v22  ;;  %v6287_v37 = vpack.i.bf16 %v8558_v10, %v8549_v52 }
 0x61c   : > { %3036 = vst.msk [vmem:[#allocation2 + $0x171] sm:$0xff] %vm304_vm0, %v3004_v6  ;;  %3037 = vst.msk [vmem:[#allocation2 + $0x181] sm:$0xff] %vm304_vm0, %v3005_v11  ;;  %5403 = vmatmul.mubr.msk.f32.gmra.mrb[72].mxu1 %vm304_vm0, %v8561_v44  ;;  %v8577_v33 = vld [vmem:[#allocation2 + $0x20] sm:$0xff]  ;;  %6243 = vrot.lane.b32.xlu1 %v6242_v30, %s6779_s22  ;;  %v3140_v0 = vld [vmem:[#allocation2 + $0xa] sm:$0xff]  ;;  %v6302_v6 = vpack.i.bf16 %v8579_v50, %v8561_v44 }
 0x61d   : > { %3038 = vst.msk [vmem:[#allocation2 + $0x189] sm:$0xff] %vm304_vm0, %v3006_v53  ;;  %5405 = vmatprep.mubr.msk.f32.mxu1 %vm304_vm0, %v8573_v46  ;;  %v3268_v59 = vld [vmem:[#allocation2 + $0x38] sm:$0xff]  ;;  %6238 = vrot.lane.b32.xlu0 %v6237_v51, %s9411_s24  ;;  %v8585_v5 = vld [vmem:[#allocation2 + $0x6a] sm:$0xff]  ;;  %v6252_v31 = vpack.i.bf16 %v8577_v33, %v8579_v50  ;;  %v8606_v29 = vld [vmem:[#allocation2 + $0x82] sm:$0xff] }
 0x61e   : > { %5684 = vmatpush1.bf16.msra.mxu0 %v5683_v16  ;;  %v3069_v28 = vld [vmem:[%s9405_s7 + $0xf0] sm:$0xff]  ;;  %v3070_v13 = vld [vmem:[%s9405_s7 + $0xf8] sm:$0xff]  ;;  %v6247_v24 = vpack.i.bf16 %v3140_v0, %v3268_v59  ;;  %v3269_v3 = vld [vmem:[#allocation2 + $0x48] sm:$0xff] }
 0x61f   : > { %5685 = vmatprep.subr.bf16.mxu0 %v6776_v56  ;;  %v8598_v25 = vld [vmem:[#allocation2 + $0x7a] sm:$0xff]  ;;  %v5689_v19 = vpack.c.bf16 %v3070_v13, %v3069_v28  ;;  %v6262_v36 = vpack.i.bf16 %v3235_v21, %v3269_v3  ;;  %v8611_v35 = vld [vmem:[#allocation2 + $0x92] sm:$0xff]  ;;  %v8620_v12 = vld [vmem:[#allocation2 + $0x49] sm:$0xff] }
 0x620   : > { %5406 = vmatmul.mubr.msk.f32.gmra.mrb[74].mxu1 %vm304_vm0, %v8585_v5  ;;  %6253 = vrot.lane.b32.xlu1 %v6252_v31, %s9411_s24  ;;  %v8603_v60 = vld [vmem:[#allocation2 + $0x19] sm:$0xff]  ;;  %v8615_v40 = vld [vmem:[#allocation2 + $0x21] sm:$0xff]  ;;  %v8629_v49 = vld [vmem:[#allocation2 + $0xaa] sm:$0xff]  ;;  %v6267_v18 = vpack.i.bf16 %v8535_v7, %v8620_v12 }
 0x621   : > { %5408 = vmatprep.mubr.msk.f32.mxu1 %vm304_vm0, %v8598_v25  ;;  %6248 = vrot.lane.b32.xlu0 %v6247_v24, %s6781_s12  ;;  %v6257_v43 = vpack.i.bf16 %v8603_v60, %v8531_v1  ;;  %v6272_v54 = vpack.i.bf16 %v8615_v40, %v8533_v27  ;;  %v8633_v42 = vld [vmem:[#allocation2 + $0x51] sm:$0xff]  ;;  %v8644_v32 = vld [vmem:[#allocation2 + $0xc2] sm:$0xff]  ;;  %v8656_v15 = vld [vmem:[#allocation2 + $0xda] sm:$0xff] }
 0x622   : > { %5687 = vmatpush1.bf16.msra.mxu0 %v5686_v62  ;;  %v3270_v34 = vld [vmem:[#allocation2 + $0x50] sm:$0xff]  ;;  %v6282_v20 = vpack.i.bf16 %v3268_v59, %v8633_v42  ;;  %v3271_v58 = vld [vmem:[#allocation2 + $0x60] sm:$0xff]  ;;  %v3272_v57 = vld [vmem:[#allocation2 + $0x68] sm:$0xff] }
 0x623   : > { %5688 = vmatprep.subr.bf16.mxu0 %v6776_v56  ;;  %v8623_v56 = vld [vmem:[#allocation2 + $0x9a] sm:$0xff]  ;;  %v8639_v45 = vld [vmem:[#allocation2 + $0xb2] sm:$0xff]  ;;  %v6277_v47 = vpack.i.bf16 %v8551_v38, %v3270_v34  ;;  %v8651_v9 = vld [vmem:[#allocation2 + $0xca] sm:$0xff]  ;;  %v6292_v61 = vpack.i.bf16 %v8531_v1, %v3271_v58  ;;  %v6307_v23 = vpack.i.bf16 %v8533_v27, %v3272_v57  ;;  %v6317_v27 = vpack.i.bf16 %v8620_v12, %v8573_v46 }
 0x624   : > { %5409 = vmatmul.mubr.msk.f32.gmra.mrb[76].mxu1 %vm304_vm0, %v8606_v29  ;;  %6263 = vrot.lane.b32.xlu1 %v6262_v36, %s6781_s12  ;;  %v8663_v2 = vld [vmem:[#allocation2 + $0x61] sm:$0xff]  ;;  %v8672_v11 = vld [vmem:[#allocation2 + $0xf2] sm:$0xff]  ;;  %v3304_v8 = vld [vmem:[#allocation2 + $0x69] sm:$0xff] }
 0x625   : > { %5411 = vmatprep.mubr.msk.f32.mxu1 %vm304_vm0, %v8611_v35  ;;  %6258 = vrot.lane.b32.xlu0 %v6257_v43, %s6779_s22  ;;  %v8666_v63 = vld [vmem:[#allocation2 + $0xe2] sm:$0xff]  ;;  %v6297_v53 = vpack.i.bf16 %v3269_v3, %v8663_v2  ;;  %v8679_v41 = vld [vmem:[#allocation2 + $0xfa] sm:$0xff]  ;;  %v6312_v1 = vpack.i.bf16 %v3270_v34, %v3304_v8  ;;  %v8683_v7 = vld [vmem:[#allocation2 + $0x10a] sm:$0xff] }
 0x626   : > { %5690 = vmatpush1.bf16.msra.mxu0 %v5689_v19  ;;  %v3273_v14 = vld [vmem:[#allocation2 + $0x78] sm:$0xff]  ;;  %v8695_v39 = vld [vmem:[#allocation2 + $0x122] sm:$0xff]  ;;  %v8703_v48 = vld [vmem:[#allocation2 + $0x12a] sm:$0xff] }
 0x627   : > { %v8690_v21 = vld [vmem:[#allocation2 + $0x112] sm:$0xff]  ;;  %v6322_v26 = vpack.i.bf16 %v8549_v52, %v3273_v14  ;;  %v6332_v52 = vpack.i.bf16 %v8633_v42, %v8585_v5  ;;  %v8709_v38 = vld [vmem:[#allocation2 + $0x13a] sm:$0xff]  ;;  %v8715_v4 = vld [vmem:[#allocation2 + $0x142] sm:$0xff] }
 0x628   : > { %5412 = vmatmul.mubr.msk.f32.gmra.mrb[78].mxu1 %vm304_vm0, %v8623_v56  ;;  %6273 = vrot.lane.b32.xlu1 %v6272_v54, %s6779_s22  ;;  %v3305_v55 = vld [vmem:[#allocation2 + $0x79] sm:$0xff]  ;;  %v3306_v30 = vld [vmem:[#allocation2 + $0x81] sm:$0xff]  ;;  %v3275_v62 = vld [vmem:[#allocation2 + $0x90] sm:$0xff] }
 0x629   : > { %5414 = vmatprep.mubr.msk.f32.mxu1 %vm304_vm0, %v8629_v49  ;;  %6268 = vrot.lane.b32.xlu0 %v6267_v18, %s9411_s24  ;;  %v6327_v16 = vpack.i.bf16 %v3271_v58, %v3305_v55  ;;  %v3274_v22 = vld [vmem:[#allocation2 + $0x80] sm:$0xff]  ;;  %v6342_v51 = vpack.i.bf16 %v3272_v57, %v3306_v30  ;;  %v8719_v0 = vld [vmem:[#allocation2 + $0x152] sm:$0xff]  ;;  %v6352_v28 = vpack.i.bf16 %v8573_v46, %v3275_v62  ;;  %v8731_v13 = vld [vmem:[#allocation2 + $0x16a] sm:$0xff] }
 0x62a   : > { %v6337_v59 = vpack.i.bf16 %v8561_v44, %v3274_v22  ;;  %v8726_v31 = vld [vmem:[#allocation2 + $0x15a] sm:$0xff]  ;;  %v6347_v44 = vpack.i.bf16 %v8663_v2, %v8598_v25  ;;  %v3307_v24 = vld [vmem:[#allocation2 + $0x91] sm:$0xff]  ;;  %v6362_v46 = vpack.i.bf16 %v3304_v8, %v8606_v29  ;;  %v3359_v19 = vld [vmem:[#allocation2 + $0x182] sm:$0xff] }
 0x62b   : > { %v8739_v3 = vld [vmem:[#allocation2 + $0x172] sm:$0xff]  ;;  %v6357_v36 = vpack.i.bf16 %v3273_v14, %v3307_v24  ;;  %v3360_v18 = vld [vmem:[#allocation2 + $0x18a] sm:$0xff]  ;;  %v6407_v14 = vpack.i.bf16 %v3307_v24, %v8629_v49 }
 0x62c   : > { %5415 = vmatmul.mubr.msk.f32.gmra.mrb[80].mxu1 %vm304_vm0, %v8639_v45  ;;  %6283 = vrot.lane.b32.xlu1 %v6282_v20, %s9411_s24  ;;  %v3308_v43 = vld [vmem:[#allocation2 + $0x99] sm:$0xff]  ;;  %v3310_v8 = vld [vmem:[#allocation2 + $0xb1] sm:$0xff] }
 0x62d   : > { %5417 = vmatprep.mubr.msk.f32.mxu1 %vm304_vm0, %v8644_v32  ;;  %6278 = vrot.lane.b32.xlu0 %v6277_v47, %s6781_s12  ;;  %v3276_v54 = vld [vmem:[#allocation2 + $0x98] sm:$0xff]  ;;  %v6372_v34 = vpack.i.bf16 %v3274_v22, %v3308_v43  ;;  %v3277_v47 = vld [vmem:[#allocation2 + $0xa8] sm:$0xff] }
 0x62e   : > { %v6367_v20 = vpack.i.bf16 %v8585_v5, %v3276_v54  ;;  %v6382_v58 = vpack.i.bf16 %v8598_v25, %v3277_v47  ;;  %v3278_v5 = vld [vmem:[#allocation2 + $0xb0] sm:$0xff]  ;;  %v6402_v57 = vpack.i.bf16 %v3276_v54, %v3310_v8  ;;  %v3279_v25 = vld [vmem:[#allocation2 + $0xc0] sm:$0xff] }
 0x630   : > { %5418 = vmatmul.mubr.msk.f32.gmra.mrb[82].mxu1 %vm304_vm0, %v8651_v9  ;;  %6293 = vrot.lane.b32.xlu1 %v6292_v61, %s6781_s12  ;;  %v6377_v61 = vpack.i.bf16 %v3305_v55, %v8611_v35 }
 0x631   : > { %5420 = vmatprep.mubr.msk.f32.mxu1 %vm304_vm0, %v8656_v15  ;;  %6288 = vrot.lane.b32.xlu0 %v6287_v37, %s6779_s22  ;;  %v3309_v37 = vld [vmem:[#allocation2 + $0xa9] sm:$0xff] }
 0x634   : > { %5421 = vmatmul.mubr.msk.f32.gmra.mrb[84].mxu1 %vm304_vm0, %v8666_v63  ;;  %6303 = vrot.lane.b32.xlu1 %v6302_v6, %s6779_s22  ;;  %v6392_v6 = vpack.i.bf16 %v3306_v30, %v8623_v56 }
 0x635   : > { %5423 = vmatprep.mubr.msk.f32.mxu1 %vm304_vm0, %v8672_v11  ;;  %6298 = vrot.lane.b32.xlu0 %v6297_v53, %s9411_s24  ;;  %v6387_v53 = vpack.i.bf16 %v3275_v62, %v3309_v37  ;;  %v6452_v62 = vpack.i.bf16 %v3310_v8, %v8651_v9  ;;  %v3286_v8 = vld [vmem:[#allocation2 + $0x110] sm:$0xff] }
 0x638   : > { %5424 = vmatmul.mubr.msk.f32.gmra.mrb[86].mxu1 %vm304_vm0, %v8679_v41  ;;  %6313 = vrot.lane.b32.xlu1 %v6312_v1, %s9411_s24  ;;  %v6397_v1 = vpack.i.bf16 %v8606_v29, %v3278_v5  ;;  %v3280_v29 = vld [vmem:[#allocation2 + $0xc8] sm:$0xff] }
 0x639   : > { %5426 = vmatprep.mubr.msk.f32.mxu1 %vm304_vm0, %v8683_v7  ;;  %6308 = vrot.lane.b32.xlu0 %v6307_v23, %s6781_s12  ;;  %v6412_v23 = vpack.i.bf16 %v8611_v35, %v3279_v25  ;;  %v6427_v30 = vpack.i.bf16 %v8623_v56, %v3280_v29  ;;  %v3281_v35 = vld [vmem:[#allocation2 + $0xd8] sm:$0xff]  ;;  %v3282_v56 = vld [vmem:[#allocation2 + $0xe0] sm:$0xff] }
 0x63a   : > { %v6442_v22 = vpack.i.bf16 %v8629_v49, %v3281_v35  ;;  %v3283_v49 = vld [vmem:[#allocation2 + $0xf0] sm:$0xff] }
 0x63c   : > { %5427 = vmatmul.mubr.msk.f32.gmra.mrb[88].mxu1 %vm304_vm0, %v8690_v21  ;;  %6323 = vrot.lane.b32.xlu1 %v6322_v26, %s6781_s12  ;;  %v3311_v26 = vld [vmem:[#allocation2 + $0xc1] sm:$0xff] }
 0x63d   : > { %5429 = vmatprep.mubr.msk.f32.mxu1 %vm304_vm0, %v8695_v39  ;;  %6318 = vrot.lane.b32.xlu0 %v6317_v27, %s6779_s22  ;;  %v6422_v27 = vpack.i.bf16 %v3308_v43, %v8639_v45  ;;  %v6417_v55 = vpack.i.bf16 %v3277_v47, %v3311_v26  ;;  %v3315_v43 = vld [vmem:[#allocation2 + $0xf1] sm:$0xff] }
 0x640   : > { %5430 = vmatmul.mubr.msk.f32.gmra.mrb[90].mxu1 %vm304_vm0, %v8703_v48  ;;  %6333 = vrot.lane.b32.xlu1 %v6332_v52, %s6779_s22  ;;  %v3312_v52 = vld [vmem:[#allocation2 + $0xc9] sm:$0xff] }
 0x641   : > { %5432 = vmatprep.mubr.msk.f32.mxu1 %vm304_vm0, %v8709_v38  ;;  %6328 = vrot.lane.b32.xlu0 %v6327_v16, %s9411_s24  ;;  %v6432_v16 = vpack.i.bf16 %v3278_v5, %v3312_v52  ;;  %v6482_v54 = vpack.i.bf16 %v3312_v52, %v8666_v63 }
 0x644   : > { %5433 = vmatmul.mubr.msk.f32.gmra.mrb[92].mxu1 %vm304_vm0, %v8715_v4  ;;  %6343 = vrot.lane.b32.xlu1 %v6342_v51, %s9411_s24  ;;  %v6437_v51 = vpack.i.bf16 %v3309_v37, %v8644_v32  ;;  %v8794_v37 = vld [vmem:[#allocation2 + $0x109] sm:$0xff] }
 0x645   : > { %5435 = vmatprep.mubr.msk.f32.mxu1 %vm304_vm0, %v8719_v0  ;;  %6338 = vrot.lane.b32.xlu0 %v6337_v59, %s6781_s12  ;;  %v3313_v59 = vld [vmem:[#allocation2 + $0xd9] sm:$0xff] }
 0x648   : > { %5436 = vmatmul.mubr.msk.f32.gmra.mrb[94].mxu1 %vm304_vm0, %v8726_v31  ;;  %6353 = vrot.lane.b32.xlu1 %v6352_v28, %s6781_s12  ;;  %v6447_v28 = vpack.i.bf16 %v3279_v25, %v3313_v59  ;;  %v6517_v25 = vpack.i.bf16 %v8666_v63, %v3286_v8 }
 0x649   : > { %5438 = vmatprep.mubr.msk.f32.mxu1 %vm304_vm0, %v8731_v13  ;;  %6348 = vrot.lane.b32.xlu0 %v6347_v44, %s6779_s22  ;;  %v3314_v44 = vld [vmem:[#allocation2 + $0xe1] sm:$0xff] }
 0x64a   : > { %v6462_v24 = vpack.i.bf16 %v3280_v29, %v3314_v44 }
 0x64c   : > { %5439 = vmatmul.mubr.msk.f32.gmra.mrb[96].mxu1 %vm304_vm0, %v8739_v3  ;;  %6363 = vrot.lane.b32.xlu1 %v6362_v46, %s6779_s22  ;;  %v6457_v46 = vpack.i.bf16 %v8639_v45, %v3282_v56  ;;  %v3284_v45 = vld [vmem:[#allocation2 + $0xf8] sm:$0xff] }
 0x64d   : > { %5441 = vmatprep.mubr.msk.f32.mxu1 %vm304_vm0, %v3359_v19  ;;  %6358 = vrot.lane.b32.xlu0 %v6357_v36, %s9411_s24  ;;  %v6472_v19 = vpack.i.bf16 %v8644_v32, %v3283_v49  ;;  %v6467_v36 = vpack.i.bf16 %v3311_v26, %v8656_v15  ;;  %v6487_v47 = vpack.i.bf16 %v8651_v9, %v3284_v45  ;;  %v3285_v32 = vld [vmem:[#allocation2 + $0x108] sm:$0xff]  ;;  %v8799_v9 = vld [vmem:[#allocation2 + $0x111] sm:$0xff] }
 0x64e   : > { %v6522_v5 = vpack.i.bf16 %v3284_v45, %v8799_v9 }
 0x650   : > { %5442 = vmatmul.mubr.msk.f32.gmra.mrb[98].mxu1 %vm304_vm0, %v3360_v18  ;;  %6373 = vrot.lane.b32.xlu1 %v6372_v34, %s9411_s24  ;;  %v6477_v18 = vpack.i.bf16 %v3281_v35, %v3315_v43  ;;  %v3316_v34 = vld [vmem:[#allocation2 + $0xf9] sm:$0xff]  ;;  %v6527_v35 = vpack.i.bf16 %v3315_v43, %v8683_v7 }
 0x651   : > { %6368 = vrot.lane.b32.xlu0 %v6367_v20, %s6781_s12  ;;  %v6492_v20 = vpack.i.bf16 %v3282_v56, %v3316_v34 }
 0x654   : > { %6383 = vrot.lane.b32.xlu1 %v6382_v58, %s6781_s12  ;;  %v6502_v58 = vpack.i.bf16 %v8656_v15, %v3285_v32 }
 0x655   : > { %6378 = vrot.lane.b32.xlu0 %v6377_v61, %s6779_s22  ;;  %v6497_v61 = vpack.i.bf16 %v3313_v59, %v8672_v11  ;;  %v8816_v59 = vld [vmem:[#allocation2 + $0x121] sm:$0xff] }
 0x658   : > { %6393 = vrot.lane.b32.xlu1 %v6392_v6, %s6779_s22  ;;  %v6512_v6 = vpack.i.bf16 %v3314_v44, %v8679_v41 }
 0x659   : > { %6388 = vrot.lane.b32.xlu0 %v6387_v53, %s9411_s24  ;;  %v6507_v53 = vpack.i.bf16 %v3283_v49, %v8794_v37  ;;  %v3076_v49 = vld [vmem:[#allocation2 + $0x8] sm:$0xff] }
 0x65c   : > { %6403 = vrot.lane.b32.xlu1 %v6402_v57, %s9411_s24  ;;  %v3075_v57 = vld [vmem:[#allocation2] sm:$0xff] }
 0x65d   : > { %6398 = vrot.lane.b32.xlu0 %v6397_v1, %s6781_s12 }
 0x660   : > { %6413 = vrot.lane.b32.xlu1 %v6412_v23, %s6781_s12  ;;  %v8805_v23 = vld [vmem:[#allocation2 + $0x120] sm:$0xff] }
 0x661   : > { %6408 = vrot.lane.b32.xlu0 %v6407_v14, %s6779_s22 }
 0x664   : > { %6423 = vrot.lane.b32.xlu1 %v6422_v27, %s6779_s22 }
 0x665   : > { %6418 = vrot.lane.b32.xlu0 %v6417_v55, %s9411_s24 }
 0x668   : > { %6433 = vrot.lane.b32.xlu1 %v6432_v16, %s9411_s24  ;;  %v6532_v16 = vpack.i.bf16 %v8672_v11, %v8805_v23 }
 0x669   : > { %6428 = vrot.lane.b32.xlu0 %v6427_v30, %s6781_s12 }
 0x66c   : > { %6443 = vrot.lane.b32.xlu1 %v6442_v22, %s6781_s12 }
 0x66d   : > { %6438 = vrot.lane.b32.xlu0 %v6437_v51, %s6779_s22 }
 0x670   : > { %6453 = vrot.lane.b32.xlu1 %v6452_v62, %s6779_s22 }
 0x671   : > { %6448 = vrot.lane.b32.xlu0 %v6447_v28, %s9411_s24 }
 0x674   : > { %6463 = vrot.lane.b32.xlu1 %v6462_v24, %s9411_s24 }
 0x675   : > { %6458 = vrot.lane.b32.xlu0 %v6457_v46, %s6781_s12  ;;  %v6542_v46 = vpack.i.bf16 %v3316_v34, %v8690_v21 }
 0x678   : > { %6473 = vrot.lane.b32.xlu1 %v6472_v19, %s6781_s12 }
 0x679   : > { %6468 = vrot.lane.b32.xlu0 %v6467_v36, %s6779_s22 }
 0x67c   : > { %6483 = vrot.lane.b32.xlu1 %v6482_v54, %s6779_s22  ;;  %v6537_v54 = vpack.i.bf16 %v3285_v32, %v8816_v59 }
 0x67d   : > { %6478 = vrot.lane.b32.xlu0 %v6477_v18, %s9411_s24  ;;  %v8825_v18 = vld [vmem:[#allocation2 + $0x129] sm:$0xff] }
 0x680   : > { %6493 = vrot.lane.b32.xlu1 %v6492_v20, %s9411_s24 }
 0x681   : > { %6488 = vrot.lane.b32.xlu0 %v6487_v47, %s6781_s12  ;;  %v8828_v47 = vld [vmem:[#allocation2 + $0x128] sm:$0xff] }
 0x684   : > { %6503 = vrot.lane.b32.xlu1 %v6502_v58, %s6781_s12 }
 0x685   : > { %6498 = vrot.lane.b32.xlu0 %v6497_v61, %s6779_s22 }
 0x688   : > { %6513 = vrot.lane.b32.xlu1 %v6512_v6, %s6779_s22 }
 0x689   : > { %6508 = vrot.lane.b32.xlu0 %v6507_v53, %s9411_s24  ;;  %v6552_v53 = vpack.i.bf16 %v3286_v8, %v8825_v18 }
 0x68a   : > { %v6234_v15 = vpop.permute.xlu1 %6233 }
 0x68b   : > { %v6229_v1 = vpop.permute.xlu0 %6228  ;;  %v6236_v27 = vunpack.i.h.bf16 %v6234_v15  ;;  %v6235_v55 = vunpack.i.l.bf16 %v6234_v15 }
 0x68c   : > { %v6231_v14 = vunpack.i.h.bf16 %v6229_v1  ;;  %v6230_v26 = vunpack.i.l.bf16 %v6229_v1  ;;  %6523 = vrot.lane.b32.xlu1 %v6522_v5, %s9411_s24  ;;  %v6547_v1 = vpack.i.bf16 %v8679_v41, %v8828_v47 }
 0x68d   : > { %6518 = vrot.lane.b32.xlu0 %v6517_v25, %s6781_s12  ;;  %v8841_v25 = vld [vmem:[#allocation2 + $0x138] sm:$0xff] }
 0x68e   : > { %v4131_v52 = vsel %vm304_vm0, %v3075_v57, %v6231_v14  ;;  %v6244_v29 = vpop.permute.xlu1 %6243  ;;  %v4227_v30 = vsel %vm304_vm0, %v8603_v60, %v6230_v26 }
 0x68f   : > { %v6239_v63 = vpop.permute.xlu0 %6238  ;;  %v6246_v62 = vunpack.i.h.bf16 %v6244_v29  ;;  %v6245_v28 = vunpack.i.l.bf16 %v6244_v29  ;;  %v4259_v44 = vsel %vm1922_vm5, %v4227_v30, %v6235_v55  ;;  %v4163_v11 = vsel %vm1922_vm5, %v4131_v52, %v6236_v27 }
 0x690   : > { %v6241_v22 = vunpack.i.h.bf16 %v6239_v63  ;;  %v6240_v51 = vunpack.i.l.bf16 %v6239_v63  ;;  %6533 = vrot.lane.b32.xlu1 %v6532_v16, %s6781_s12  ;;  %v6562_v55 = vpack.i.bf16 %v8683_v7, %v8841_v25  ;;  %v6557_v16 = vpack.i.bf16 %v8794_v37, %v8695_v39 }
 0x691   : > { %6528 = vrot.lane.b32.xlu0 %v6527_v35, %s6779_s22  ;;  %v4228_v34 = vsel %vm304_vm0, %v8615_v40, %v6245_v28  ;;  %v4132_v58 = vsel %vm304_vm0, %v3076_v49, %v6246_v62  ;;  %v8854_v35 = vld [vmem:[#allocation2 + $0x139] sm:$0xff]  ;;  %v6572_v37 = vpack.i.bf16 %v8799_v9, %v8703_v48 }
 0x692   : > { %v6254_v56 = vpop.permute.xlu1 %6253  ;;  %v4291_v60 = vsel %vm1955_vm6, %v4259_v44, %v6240_v51  ;;  %v4195_v24 = vsel %vm1955_vm6, %v4163_v11, %v6241_v22 }
 0x693   : > { %v6256_v19 = vunpack.i.h.bf16 %v6254_v56  ;;  %v6255_v36 = vunpack.i.l.bf16 %v6254_v56  ;;  %v6249_v43 = vpop.permute.xlu0 %6248  ;;  %4515 = vmatprep.mubr.f32.mxu0 %v4291_v60  ;;  %v6567_v60 = vpack.i.bf16 %v8805_v23, %v8854_v35 }
 0x694   : > { %v6251_v45 = vunpack.i.h.bf16 %v6249_v43  ;;  %v6250_v20 = vunpack.i.l.bf16 %v6249_v43  ;;  %4516 = vmatmul.mubr.f32.vlgmr.msra.gmra.mrb[38].mxu0 %v4195_v24  ;;  %6543 = vrot.lane.b32.xlu1 %v6542_v46, %s6779_s22  ;;  %v8865_v24 = vld [vmem:[#allocation2 + $0x141] sm:$0xff] }
 0x695   : > { %6538 = vrot.lane.b32.xlu0 %v6537_v54, %s9411_s24  ;;  %v6582_v54 = vpack.i.bf16 %v8828_v47, %v8865_v24  ;;  %v3079_v47 = vld [vmem:[#allocation2 + $0x30] sm:$0xff] }
 0x696   : > { %v6264_v61 = vpop.permute.xlu1 %6263  ;;  %v4260_v6 = vsel %vm1922_vm5, %v4228_v34, %v6250_v20  ;;  %v4164_v32 = vsel %vm1922_vm5, %v4132_v58, %v6251_v45 }
 0x697   : > { %v6259_v15 = vpop.permute.xlu0 %6258  ;;  %v4292_v5 = vsel %vm1955_vm6, %v4260_v6, %v6255_v36  ;;  %v4196_v57 = vsel %vm1955_vm6, %v4164_v32, %v6256_v19  ;;  %v6266_v26 = vunpack.i.h.bf16 %v6264_v61  ;;  %v6265_v27 = vunpack.i.l.bf16 %v6264_v61  ;;  %v8868_v19 = vld [vmem:[#allocation2 + $0x140] sm:$0xff] }
 0x698   : > { %v6261_v40 = vunpack.i.h.bf16 %v6259_v15  ;;  %v6260_v14 = vunpack.i.l.bf16 %v6259_v15  ;;  %4520 = vmatprep.mubr.f32.mxu0 %v4292_v5  ;;  %6553 = vrot.lane.b32.xlu1 %v6552_v53, %s9411_s24  ;;  %v6577_v58 = vpack.i.bf16 %v8690_v21, %v8868_v19 }
 0x699   : > { %4521 = vmatmul.mubr.f32.gmra.mrb[40].mxu0 %v4196_v57  ;;  %6548 = vrot.lane.b32.xlu0 %v6547_v1, %s6781_s12 }
 0x69a   : > { %v6274_v8 = vpop.permute.xlu1 %6273  ;;  %v4229_v52 = vsel %vm304_vm0, %v8558_v10, %v6260_v14  ;;  %v4133_v41 = vsel %vm304_vm0, %v8556_v17, %v6261_v40  ;;  %v6587_v40 = vpack.i.bf16 %v8816_v59, %v8709_v38  ;;  %v6602_v59 = vpack.i.bf16 %v8825_v18, %v8715_v4 }
 0x69b   : > { %v6269_v29 = vpop.permute.xlu0 %6268  ;;  %v6276_v22 = vunpack.i.h.bf16 %v6274_v8  ;;  %v6275_v51 = vunpack.i.l.bf16 %v6274_v8  ;;  %v4261_v7 = vsel %vm1922_vm5, %v4229_v52, %v6265_v27  ;;  %v4165_v10 = vsel %vm1922_vm5, %v4133_v41, %v6266_v26  ;;  %v8895_v27 = vld [vmem:[#allocation2 + $0x151] sm:$0xff] }
 0x69c   : > { %v6271_v30 = vunpack.i.h.bf16 %v6269_v29  ;;  %v6270_v63 = vunpack.i.l.bf16 %v6269_v29  ;;  %6563 = vrot.lane.b32.xlu1 %v6562_v55, %s6781_s12 }
 0x69d   : > { %6558 = vrot.lane.b32.xlu0 %v6557_v16, %s6779_s22  ;;  %v4230_v9 = vsel %vm304_vm0, %v8579_v50, %v6275_v51  ;;  %v4134_v36 = vsel %vm304_vm0, %v8577_v33, %v6276_v22  ;;  %v8883_v50 = vld [vmem:[#allocation2 + $0x150] sm:$0xff]  ;;  %v6597_v22 = vpack.i.bf16 %v8841_v25, %v8895_v27  ;;  %v8906_v51 = vld [vmem:[#allocation2 + $0x159] sm:$0xff] }
 0x69e   : > { %v6284_v62 = vpop.permute.xlu1 %6283  ;;  %v4293_v17 = vsel %vm1955_vm6, %v4261_v7, %v6270_v63  ;;  %v4197_v28 = vsel %vm1955_vm6, %v4165_v10, %v6271_v30  ;;  %v6592_v5 = vpack.i.bf16 %v8695_v39, %v8883_v50 }
 0x69f   : > { %v6286_v44 = vunpack.i.h.bf16 %v6284_v62  ;;  %v6285_v11 = vunpack.i.l.bf16 %v6284_v62  ;;  %v6279_v56 = vpop.permute.xlu0 %6278  ;;  %4525 = vmatprep.mubr.f32.mxu0 %v4293_v17  ;;  %v8909_v62 = vld [vmem:[#allocation2 + $0x158] sm:$0xff] }
 0x6a0   : > { %v6281_v46 = vunpack.i.h.bf16 %v6279_v56  ;;  %v6280_v49 = vunpack.i.l.bf16 %v6279_v56  ;;  %4526 = vmatmul.mubr.f32.gmra.mrb[42].mxu0 %v4197_v28  ;;  %6573 = vrot.lane.b32.xlu1 %v6572_v37, %s6779_s22  ;;  %v3080_v17 = vld [vmem:[#allocation2 + $0x38] sm:$0xff] }
 0x6a1   : > { %6568 = vrot.lane.b32.xlu0 %v6567_v60, %s9411_s24 }
 0x6a2   : > { %v6294_v43 = vpop.permute.xlu1 %6293  ;;  %v4262_v23 = vsel %vm1922_vm5, %v4230_v9, %v6280_v49  ;;  %v4166_v45 = vsel %vm1922_vm5, %v4134_v36, %v6281_v46  ;;  %v6607_v46 = vpack.i.bf16 %v8703_v48, %v8909_v62  ;;  %v8923_v9 = vld [vmem:[#allocation2 + $0x168] sm:$0xff] }
 0x6a3   : > { %v6289_v20 = vpop.permute.xlu0 %6288  ;;  %v4294_v34 = vsel %vm1955_vm6, %v4262_v23, %v6285_v11  ;;  %v4198_v61 = vsel %vm1955_vm6, %v4166_v45, %v6286_v44  ;;  %v6296_v32 = vunpack.i.h.bf16 %v6294_v43  ;;  %v6295_v53 = vunpack.i.l.bf16 %v6294_v43 }
 0x6a4   : > { %v6291_v6 = vunpack.i.h.bf16 %v6289_v20  ;;  %v6290_v33 = vunpack.i.l.bf16 %v6289_v20  ;;  %4530 = vmatprep.mubr.f32.mxu0 %v4294_v34  ;;  %6583 = vrot.lane.b32.xlu1 %v6582_v54, %s9411_s24  ;;  %v6612_v44 = vpack.i.bf16 %v8868_v19, %v8906_v51  ;;  %v3081_v19 = vld [vmem:[#allocation2 + $0x48] sm:$0xff]  ;;  %v6622_v45 = vpack.i.bf16 %v8709_v38, %v8923_v9 }
 0x6a5   : > { %6578 = vrot.lane.b32.xlu0 %v6577_v58, %s6781_s12  ;;  %4531 = vmatmul.mubr.f32.gmra.mrb[44].mxu0 %v4198_v61  ;;  %v6617_v58 = vpack.i.bf16 %v8854_v35, %v8719_v0  ;;  %v6632_v35 = vpack.i.bf16 %v8865_v24, %v8726_v31 }
 0x6a6   : > { %v6304_v15 = vpop.permute.xlu1 %6303  ;;  %v4231_v21 = vsel %vm304_vm0, %v8620_v12, %v6290_v33  ;;  %v4135_v57 = vsel %vm304_vm0, %v3079_v47, %v6291_v6  ;;  %v8935_v33 = vld [vmem:[#allocation2 + $0x169] sm:$0xff] }
 0x6a7   : > { %v6299_v1 = vpop.permute.xlu0 %6298  ;;  %v6306_v8 = vunpack.i.h.bf16 %v6304_v15  ;;  %v6305_v55 = vunpack.i.l.bf16 %v6304_v15  ;;  %v4263_v39 = vsel %vm1922_vm5, %v4231_v21, %v6295_v53  ;;  %v4167_v12 = vsel %vm1922_vm5, %v4135_v57, %v6296_v32 }
 0x6a8   : > { %v6301_v14 = vunpack.i.h.bf16 %v6299_v1  ;;  %v6300_v26 = vunpack.i.l.bf16 %v6299_v1  ;;  %6593 = vrot.lane.b32.xlu1 %v6592_v5, %s6781_s12 }
 0x6a9   : > { %6588 = vrot.lane.b32.xlu0 %v6587_v40, %s6779_s22  ;;  %v4232_v18 = vsel %vm304_vm0, %v8633_v42, %v6305_v55  ;;  %v4136_v28 = vsel %vm304_vm0, %v3080_v17, %v6306_v8  ;;  %v6627_v40 = vpack.i.bf16 %v8883_v50, %v8935_v33  ;;  %v3210_v55 = vld [vmem:[#allocation2 + $0x69] sm:$0xff] }
 0x6aa   : > { %v6314_v52 = vpop.permute.xlu1 %6313  ;;  %v4295_v41 = vsel %vm1955_vm6, %v4263_v39, %v6300_v26  ;;  %v4199_v29 = vsel %vm1955_vm6, %v4167_v12, %v6301_v14  ;;  %v8946_v14 = vld [vmem:[#allocation2 + $0x171] sm:$0xff] }
 0x6ab   : > { %v6316_v16 = vunpack.i.h.bf16 %v6314_v52  ;;  %v6315_v30 = vunpack.i.l.bf16 %v6314_v52  ;;  %v6309_v63 = vpop.permute.xlu0 %6308  ;;  %4535 = vmatprep.mubr.f32.mxu0 %v4295_v41  ;;  %v8949_v39 = vld [vmem:[#allocation2 + $0x170] sm:$0xff]  ;;  %v6642_v41 = vpack.i.bf16 %v8909_v62, %v8946_v14  ;;  %v3211_v62 = vld [vmem:[#allocation2 + $0x79] sm:$0xff] }
 0x6ac   : > { %v6311_v7 = vunpack.i.h.bf16 %v6309_v63  ;;  %v6310_v10 = vunpack.i.l.bf16 %v6309_v63  ;;  %4536 = vmatmul.mubr.f32.gmra.mrb[46].mxu0 %v4199_v29  ;;  %6603 = vrot.lane.b32.xlu1 %v6602_v59, %s6779_s22  ;;  %v3082_v12 = vld [vmem:[#allocation2 + $0x50] sm:$0xff] }
 0x6ad   : > { %6598 = vrot.lane.b32.xlu0 %v6597_v22, %s9411_s24  ;;  %v8962_v22 = vld [vmem:[#allocation2 + $0x180] sm:$0xff] }
 0x6ae   : > { %v6324_v37 = vpop.permute.xlu1 %6323  ;;  %v4264_v25 = vsel %vm1922_vm5, %v4232_v18, %v6310_v10  ;;  %v4168_v11 = vsel %vm1922_vm5, %v4136_v28, %v6311_v7  ;;  %v3083_v28 = vld [vmem:[#allocation2 + $0x60] sm:$0xff] }
 0x6af   : > { %v6319_v56 = vpop.permute.xlu0 %6318  ;;  %v4296_v60 = vsel %vm1955_vm6, %v4264_v25, %v6315_v30  ;;  %v4200_v49 = vsel %vm1955_vm6, %v4168_v11, %v6316_v16  ;;  %v6326_v43 = vunpack.i.h.bf16 %v6324_v37  ;;  %v6325_v23 = vunpack.i.l.bf16 %v6324_v37 }
 0x6b0   : > { %v6321_v42 = vunpack.i.h.bf16 %v6319_v56  ;;  %v6320_v36 = vunpack.i.l.bf16 %v6319_v56  ;;  %4540 = vmatprep.mubr.f32.mxu0 %v4296_v60  ;;  %6613 = vrot.lane.b32.xlu1 %v6612_v44, %s9411_s24  ;;  %v6637_v30 = vpack.i.bf16 %v8715_v4, %v8949_v39  ;;  %v6652_v4 = vpack.i.bf16 %v8719_v0, %v8962_v22 }
 0x6b1   : > { %6608 = vrot.lane.b32.xlu0 %v6607_v46, %s6781_s12  ;;  %4541 = vmatmul.mubr.f32.gmra.mrb[48].mxu0 %v4200_v49  ;;  %v6647_v56 = vpack.i.bf16 %v8895_v27, %v8731_v13  ;;  %v8973_v49 = vld [vmem:[#allocation2 + $0x181] sm:$0xff]  ;;  %v6662_v13 = vpack.i.bf16 %v8906_v51, %v8739_v3 }
 0x6b2   : > { %v6334_v54 = vpop.permute.xlu1 %6333  ;;  %v4233_v48 = vsel %vm304_vm0, %v8663_v2, %v6320_v36  ;;  %v4137_v20 = vsel %vm304_vm0, %v3081_v19, %v6321_v42 }
 0x6b3   : > { %v6329_v34 = vpop.permute.xlu0 %6328  ;;  %v6336_v32 = vunpack.i.h.bf16 %v6334_v54  ;;  %v6335_v53 = vunpack.i.l.bf16 %v6334_v54  ;;  %v4265_v38 = vsel %vm1922_vm5, %v4233_v48, %v6325_v23  ;;  %v4169_v2 = vsel %vm1922_vm5, %v4137_v20, %v6326_v43 }
 0x6b4   : > { %v6331_v61 = vunpack.i.h.bf16 %v6329_v34  ;;  %v6330_v6 = vunpack.i.l.bf16 %v6329_v34  ;;  %6623 = vrot.lane.b32.xlu1 %v6622_v45, %s6781_s12  ;;  %v6657_v20 = vpack.i.bf16 %v8923_v9, %v8973_v49  ;;  %v3212_v34 = vld [vmem:[#allocation2 + $0x81] sm:$0xff] }
 0x6b5   : > { %6618 = vrot.lane.b32.xlu0 %v6617_v58, %s6779_s22  ;;  %v4234_v31 = vsel %vm304_vm0, %v3210_v55, %v6335_v53  ;;  %v4138_v24 = vsel %vm304_vm0, %v3082_v12, %v6336_v32  ;;  %v8984_v58 = vld [vmem:[#allocation2 + $0x189] sm:$0xff]  ;;  %v3168_v32 = vld [vmem:[#allocation2 + $0x15a] sm:$0xff] }
 0x6b6   : > { %v6344_v47 = vpop.permute.xlu1 %6343  ;;  %v4297_v15 = vsel %vm1955_vm6, %v4265_v38, %v6330_v6  ;;  %v4201_v5 = vsel %vm1955_vm6, %v4169_v2, %v6331_v61  ;;  %v8987_v53 = vld [vmem:[#allocation2 + $0x188] sm:$0xff]  ;;  %v3361_v12 = vld [vmem:[#allocation2 + $0x19a] sm:$0xff] }
 0x6b7   : > { %v6346_v21 = vunpack.i.h.bf16 %v6344_v47  ;;  %v6345_v57 = vunpack.i.l.bf16 %v6344_v47  ;;  %v6339_v1 = vpop.permute.xlu0 %6338  ;;  %4545 = vmatprep.mubr.f32.mxu0 %v4297_v15  ;;  %v3084_v38 = vld [vmem:[#allocation2 + $0x68] sm:$0xff]  ;;  %v6672_v47 = vpack.i.bf16 %v8949_v39, %v8984_v58  ;;  %5444 = vmatprep.mubr.msk.f32.mxu1 %vm304_vm0, %v3361_v12 }
 0x6b8   : > { %v6341_v26 = vunpack.i.h.bf16 %v6339_v1  ;;  %v6340_v8 = vunpack.i.l.bf16 %v6339_v1  ;;  %4546 = vmatmul.mubr.f32.gmra.mrb[50].mxu0 %v4201_v5  ;;  %6633 = vrot.lane.b32.xlu1 %v6632_v35, %s6779_s22  ;;  %v3169_v1 = vld [vmem:[#allocation2 + $0x16a] sm:$0xff]  ;;  %v3265_v55 = vld [vmem:[#allocation2 + $0x182] sm:$0xff] }
 0x6b9   : > { %6628 = vrot.lane.b32.xlu0 %v6627_v40, %s9411_s24  ;;  %v3297_v40 = vld [vmem:[#allocation2 + $0x198] sm:$0xff] }
 0x6ba   : > { %v6354_v52 = vpop.permute.xlu1 %6353  ;;  %v4266_v50 = vsel %vm1922_vm5, %v4234_v31, %v6340_v8  ;;  %v4170_v29 = vsel %vm1922_vm5, %v4138_v24, %v6341_v26  ;;  %v3362_v31 = vld [vmem:[#allocation2 + $0x1a2] sm:$0xff] }
 0x6bb   : > { %v6349_v59 = vpop.permute.xlu0 %6348  ;;  %v4298_v16 = vsel %vm1955_vm6, %v4266_v50, %v6345_v57  ;;  %v4202_v63 = vsel %vm1955_vm6, %v4170_v29, %v6346_v21  ;;  %v6356_v17 = vunpack.i.h.bf16 %v6354_v52  ;;  %v6355_v18 = vunpack.i.l.bf16 %v6354_v52  ;;  %v3213_v52 = vld [vmem:[#allocation2 + $0x91] sm:$0xff]  ;;  %5445 = vmatmul.mubr.msk.f32.gmra.mrb[100].mxu1 %vm304_vm0, %v3362_v31 }
 0x6bc   : > { %v6351_v7 = vunpack.i.h.bf16 %v6349_v59  ;;  %v6350_v10 = vunpack.i.l.bf16 %v6349_v59  ;;  %4550 = vmatprep.mubr.f32.mxu0 %v4298_v16  ;;  %6643 = vrot.lane.b32.xlu1 %v6642_v41, %s9411_s24  ;;  %v6667_v21 = vpack.i.bf16 %v3168_v32, %v8987_v53  ;;  %v3085_v50 = vld [vmem:[#allocation2 + $0x78] sm:$0xff]  ;;  %v6682_v29 = vpack.i.bf16 %v3169_v1, %v3297_v40 }
 0x6bd   : > { %6638 = vrot.lane.b32.xlu0 %v6637_v30, %s6781_s12  ;;  %4551 = vmatmul.mubr.f32.gmra.mrb[52].mxu0 %v4202_v63  ;;  %v6677_v63 = vpack.i.bf16 %v8935_v33, %v3265_v55 }
 0x6be   : > { %v6364_v37 = vpop.permute.xlu1 %6363  ;;  %v4235_v25 = vsel %vm304_vm0, %v3211_v62, %v6350_v10  ;;  %v4139_v44 = vsel %vm304_vm0, %v3083_v28, %v6351_v7  ;;  %v3266_v7 = vld [vmem:[#allocation2 + $0x18a] sm:$0xff] }
 0x6bf   : > { %v6359_v11 = vpop.permute.xlu0 %6358  ;;  %v6366_v42 = vunpack.i.h.bf16 %v6364_v37  ;;  %v6365_v36 = vunpack.i.l.bf16 %v6364_v37  ;;  %v4267_v0 = vsel %vm1922_vm5, %v4235_v25, %v6355_v18  ;;  %v4171_v43 = vsel %vm1922_vm5, %v4139_v44, %v6356_v17  ;;  %v3329_v18 = vld [vmem:[#allocation2 + $0x199] sm:$0xff] }
 0x6c0   : > { %v6361_v60 = vunpack.i.h.bf16 %v6359_v11  ;;  %v6360_v46 = vunpack.i.l.bf16 %v6359_v11  ;;  %6653 = vrot.lane.b32.xlu1 %v6652_v4, %s6781_s12 }
 0x6c1   : > { %6648 = vrot.lane.b32.xlu0 %v6647_v56, %s6779_s22  ;;  %v4236_v3 = vsel %vm304_vm0, %v3212_v34, %v6365_v36  ;;  %v4140_v51 = vsel %vm304_vm0, %v3084_v38, %v6366_v42  ;;  %v6692_v56 = vpack.i.bf16 %v8946_v14, %v3266_v7  ;;  %v6687_v36 = vpack.i.bf16 %v8962_v22, %v3329_v18 }
 0x6c2   : > { %v6374_v23 = vpop.permute.xlu1 %6373  ;;  %v4299_v19 = vsel %vm1955_vm6, %v4267_v0, %v6360_v46  ;;  %v4203_v54 = vsel %vm1955_vm6, %v4171_v43, %v6361_v60  ;;  %v3330_v0 = vld [vmem:[#allocation2 + $0x1a1] sm:$0xff] }
 0x6c3   : > { %v6376_v27 = vunpack.i.h.bf16 %v6374_v23  ;;  %v6375_v45 = vunpack.i.l.bf16 %v6374_v23  ;;  %v6369_v48 = vpop.permute.xlu0 %6368  ;;  %4555 = vmatprep.mubr.f32.mxu0 %v4299_v19  ;;  %v3298_v43 = vld [vmem:[#allocation2 + $0x1a0] sm:$0xff]  ;;  %v6702_v22 = vpack.i.bf16 %v8987_v53, %v3330_v0  ;;  %v3087_v53 = vld [vmem:[#allocation2 + $0x90] sm:$0xff] }
 0x6c4   : > { %v6371_v61 = vunpack.i.h.bf16 %v6369_v48  ;;  %v6370_v6 = vunpack.i.l.bf16 %v6369_v48  ;;  %4556 = vmatmul.mubr.f32.gmra.mrb[54].mxu0 %v4203_v54  ;;  %6663 = vrot.lane.b32.xlu1 %v6662_v13, %s6779_s22  ;;  %v3214_v54 = vld [vmem:[#allocation2 + $0x99] sm:$0xff] }
 0x6c5   : > { %6658 = vrot.lane.b32.xlu0 %v6657_v20, %s9411_s24  ;;  %v3170_v13 = vld [vmem:[#allocation2 + $0x172] sm:$0xff] }
 0x6c6   : > { %v6384_v2 = vpop.permute.xlu1 %6383  ;;  %v4268_v9 = vsel %vm1922_vm5, %v4236_v3, %v6370_v6  ;;  %v4172_v15 = vsel %vm1922_vm5, %v4140_v51, %v6371_v61  ;;  %v6697_v38 = vpack.i.bf16 %v3170_v13, %v3298_v43 }
 0x6c7   : > { %v6379_v5 = vpop.permute.xlu0 %6378  ;;  %v4300_v35 = vsel %vm1955_vm6, %v4268_v9, %v6375_v45  ;;  %v4204_v57 = vsel %vm1955_vm6, %v4172_v15, %v6376_v27  ;;  %v6386_v39 = vunpack.i.h.bf16 %v6384_v2  ;;  %v6385_v24 = vunpack.i.l.bf16 %v6384_v2  ;;  %v3086_v27 = vld [vmem:[#allocation2 + $0x80] sm:$0xff]  ;;  %v3215_v15 = vld [vmem:[#allocation2 + $0xa9] sm:$0xff] }
 0x6c8   : > { %v6381_v26 = vunpack.i.h.bf16 %v6379_v5  ;;  %v6380_v8 = vunpack.i.l.bf16 %v6379_v5  ;;  %4560 = vmatprep.mubr.f32.mxu0 %v4300_v35  ;;  %6673 = vrot.lane.b32.xlu1 %v6672_v47, %s9411_s24 }
 0x6c9   : > { %6668 = vrot.lane.b32.xlu0 %v6667_v21, %s6781_s12  ;;  %4561 = vmatmul.mubr.f32.gmra.mrb[56].mxu0 %v4204_v57 }
 0x6ca   : > { %v6394_v41 = vpop.permute.xlu1 %6393  ;;  %v4237_v59 = vsel %vm304_vm0, %v3213_v52, %v6380_v8  ;;  %v4141_v16 = vsel %vm304_vm0, %v3085_v50, %v6381_v26 }
 0x6cb   : > { %v6389_v30 = vpop.permute.xlu0 %6388  ;;  %v6396_v62 = vunpack.i.h.bf16 %v6394_v41  ;;  %v6395_v28 = vunpack.i.l.bf16 %v6394_v41  ;;  %v4269_v37 = vsel %vm1922_vm5, %v4237_v59, %v6385_v24  ;;  %v4173_v4 = vsel %vm1922_vm5, %v4141_v16, %v6386_v39  ;;  %v3216_v16 = vld [vmem:[#allocation2 + $0xb1] sm:$0xff] }
 0x6cc   : > { %v6391_v10 = vunpack.i.h.bf16 %v6389_v30  ;;  %v6390_v17 = vunpack.i.l.bf16 %v6389_v30  ;;  %6683 = vrot.lane.b32.xlu1 %v6682_v29, %s6781_s12  ;;  %v3088_v30 = vld [vmem:[#allocation2 + $0x98] sm:$0xff] }
 0x6cd   : > { %6678 = vrot.lane.b32.xlu0 %v6677_v63, %s6779_s22  ;;  %v4238_v45 = vsel %vm304_vm0, %v3214_v54, %v6395_v28  ;;  %v4142_v48 = vsel %vm304_vm0, %v3086_v27, %v6396_v62 }
 0x6ce   : > { %v6404_v25 = vpop.permute.xlu1 %6403  ;;  %v4301_v44 = vsel %vm1955_vm6, %v4269_v37, %v6390_v17  ;;  %v4205_v11 = vsel %vm1955_vm6, %v4173_v4, %v6391_v10 }
 0x6cf   : > { %v6406_v60 = vunpack.i.h.bf16 %v6404_v25  ;;  %v6405_v46 = vunpack.i.l.bf16 %v6404_v25  ;;  %v6399_v42 = vpop.permute.xlu0 %6398  ;;  %4565 = vmatprep.mubr.f32.mxu0 %v4301_v44 }
 0x6d0   : > { %v6401_v23 = vunpack.i.h.bf16 %v6399_v42  ;;  %v6400_v19 = vunpack.i.l.bf16 %v6399_v42  ;;  %4566 = vmatmul.mubr.f32.gmra.mrb[58].mxu0 %v4205_v11  ;;  %6693 = vrot.lane.b32.xlu1 %v6692_v56, %s6779_s22  ;;  %v3217_v56 = vld [vmem:[#allocation2 + $0xc1] sm:$0xff]  ;;  %s296_s22 = sand.u32 1, %s6765_s28  }
 0x6d1   : > { %6688 = vrot.lane.b32.xlu0 %v6687_v36, %s9411_s24  ;;  %s9357_s9 = scalar_lea.sflag [#allocation4], %s296_s22 }
 0x6d2   : > { %v6414_v20 = vpop.permute.xlu1 %6413  ;;  %v4270_v34 = vsel %vm1922_vm5, %v4238_v45, %v6400_v19  ;;  %v4174_v61 = vsel %vm1922_vm5, %v4142_v48, %v6401_v23 }
 0x6d3   : > { %v6409_v6 = vpop.permute.xlu0 %6408  ;;  %v4302_v32 = vsel %vm1955_vm6, %v4270_v34, %v6405_v46  ;;  %v4206_v3 = vsel %vm1955_vm6, %v4174_v61, %v6406_v60  ;;  %v6416_v9 = vunpack.i.h.bf16 %v6414_v20  ;;  %v6415_v47 = vunpack.i.l.bf16 %v6414_v20  ;;  %v3089_v60 = vld [vmem:[#allocation2 + $0xa8] sm:$0xff] }
 0x6d4   : > { %v6411_v51 = vunpack.i.h.bf16 %v6409_v6  ;;  %v6410_v2 = vunpack.i.l.bf16 %v6409_v6  ;;  %4570 = vmatprep.mubr.f32.mxu0 %v4302_v32  ;;  %6703 = vrot.lane.b32.xlu1 %v6702_v22, %s9411_s24  ;;  %s9348_s24 = scalar_lea.hbm %s9406_s8, %s5090_s17 }
 0x6d5   : > { %6698 = vrot.lane.b32.xlu0 %v6697_v38, %s6781_s12  ;;  %4571 = vmatmul.mubr.f32.gmra.mrb[60].mxu0 %v4206_v3  ;;  %v3218_v38 = vld [vmem:[#allocation2 + $0xc9] sm:$0xff]  ;;  %s5013_s12 = sshll.u32 %s296_s22, 8 }
 0x6d6   : > { %v6424_v5 = vpop.permute.xlu1 %6423  ;;  %v4239_v35 = vsel %vm304_vm0, %v3215_v15, %v6410_v2  ;;  %v4143_v21 = vsel %vm304_vm0, %v3087_v53, %v6411_v51  ;;  %v3090_v3 = vld [vmem:[#allocation2 + $0xb0] sm:$0xff]  ;;  %s9215_s13 = scalar_lea.vmem [#allocation3], %s5013_s12 }
 0x6d7   : > { %v6419_v57 = vpop.permute.xlu0 %6418  ;;  %v6426_v26 = vunpack.i.h.bf16 %v6424_v5  ;;  %v6425_v8 = vunpack.i.l.bf16 %v6424_v5  ;;  %v4271_v55 = vsel %vm1922_vm5, %v4239_v35, %v6415_v47  ;;  %v4175_v12 = vsel %vm1922_vm5, %v4143_v21, %v6416_v9  ;;  %s4947_s18 = sshll.u32 %s9215_s13, 4  ;;  %s9350_s18 = int_to_ptr.vmem [resolvable:$true] %s4947_s18 }
 0x6d8   : > { %v6421_v1 = vunpack.i.h.bf16 %v6419_v57  ;;  %v6420_v40 = vunpack.i.l.bf16 %v6419_v57  ;;  %p6718_p0 = scmp.lt.s32.totalorder %s9350_s18, %s6716_s23 }
 0x6d9   : > { %v4240_v63 = vsel %vm304_vm0, %v3216_v16, %v6425_v8  ;;  %v4144_v7 = vsel %vm304_vm0, %v3088_v30, %v6426_v26 }
 0x6da   : > { %v6434_v31 = vpop.permute.xlu1 %6433  ;;  %v4303_v39 = vsel %vm1955_vm6, %v4271_v55, %v6420_v40  ;;  %v4207_v24 = vsel %vm1955_vm6, %v4175_v12, %v6421_v1  ;;  %v3219_v55 = vld [vmem:[#allocation2 + $0xd9] sm:$0xff] }
 0x6db   : > { %v6436_v52 = vunpack.i.h.bf16 %v6434_v31  ;;  %v6435_v50 = vunpack.i.l.bf16 %v6434_v31  ;;  %v6429_v41 = vpop.permute.xlu0 %6428  ;;  %4575 = vmatprep.mubr.f32.mxu0 %v4303_v39  ;;  %v3091_v12 = vld [vmem:[#allocation2 + $0xc0] sm:$0xff] }
 0x6dc   : > { %v6431_v29 = vunpack.i.h.bf16 %v6429_v41  ;;  %v6430_v59 = vunpack.i.l.bf16 %v6429_v41  ;;  %4576 = vmatmul.mubr.f32.gmra.mrb[62].mxu0 %v4207_v24 }
 0x6de   : > { %v6444_v10 = vpop.permute.xlu1 %6443  ;;  %v4272_v17 = vsel %vm1922_vm5, %v4240_v63, %v6430_v59  ;;  %v4176_v18 = vsel %vm1922_vm5, %v4144_v7, %v6431_v29 }
 0x6df   : > { %v6439_v62 = vpop.permute.xlu0 %6438  ;;  %v4304_v28 = vsel %vm1955_vm6, %v4272_v17, %v6435_v50  ;;  %v4208_v37 = vsel %vm1955_vm6, %v4176_v18, %v6436_v52  ;;  %v6446_v44 = vunpack.i.h.bf16 %v6444_v10  ;;  %v6445_v11 = vunpack.i.l.bf16 %v6444_v10 }
 0x6e0   : > { %v6441_v4 = vunpack.i.h.bf16 %v6439_v62  ;;  %v6440_v25 = vunpack.i.l.bf16 %v6439_v62  ;;  %4580 = vmatprep.mubr.f32.mxu0 %v4304_v28 }
 0x6e1   : > { %4581 = vmatmul.mubr.f32.gmra.mrb[64].mxu0 %v4208_v37 }
 0x6e2   : > { %v6454_v46 = vpop.permute.xlu1 %6453  ;;  %v4241_v42 = vsel %vm304_vm0, %v3217_v56, %v6440_v25  ;;  %v4145_v36 = vsel %vm304_vm0, %v3089_v60, %v6441_v4  ;;  %v3220_v56 = vld [vmem:[#allocation2 + $0xe1] sm:$0xff] }
 0x6e3   : > { %v6449_v0 = vpop.permute.xlu0 %6448  ;;  %v6456_v19 = vunpack.i.h.bf16 %v6454_v46  ;;  %v6455_v54 = vunpack.i.l.bf16 %v6454_v46  ;;  %v4273_v13 = vsel %vm1922_vm5, %v4241_v42, %v6445_v11  ;;  %v4177_v27 = vsel %vm1922_vm5, %v4145_v36, %v6446_v44  ;;  %v3092_v60 = vld [vmem:[#allocation2 + $0xc8] sm:$0xff] }
 0x6e4   : > { %v6451_v43 = vunpack.i.h.bf16 %v6449_v0  ;;  %v6450_v23 = vunpack.i.l.bf16 %v6449_v0 }
 0x6e5   : > { %v4242_v51 = vsel %vm304_vm0, %v3218_v38, %v6455_v54  ;;  %v4146_v2 = vsel %vm304_vm0, %v3090_v3, %v6456_v19 }
 0x6e6   : > { %v6464_v45 = vpop.permute.xlu1 %6463  ;;  %v4305_v48 = vsel %vm1955_vm6, %v4273_v13, %v6450_v23  ;;  %v4209_v20 = vsel %vm1955_vm6, %v4177_v27, %v6451_v43 }
 0x6e7   : > { %v6466_v34 = vunpack.i.h.bf16 %v6464_v45  ;;  %v6465_v22 = vunpack.i.l.bf16 %v6464_v45  ;;  %v6459_v61 = vpop.permute.xlu0 %6458  ;;  %4585 = vmatprep.mubr.f32.mxu0 %v4305_v48 }
 0x6e8   : > { %v6461_v6 = vunpack.i.h.bf16 %v6459_v61  ;;  %v6460_v32 = vunpack.i.l.bf16 %v6459_v61  ;;  %4586 = vmatmul.mubr.f32.gmra.mrb[66].mxu0 %v4209_v20  ;;  %v3093_v61 = vld [vmem:[#allocation2 + $0xd8] sm:$0xff] }
 0x6ea   : > { %v6474_v47 = vpop.permute.xlu1 %6473  ;;  %v4274_v15 = vsel %vm1922_vm5, %v4242_v51, %v6460_v32  ;;  %v4178_v53 = vsel %vm1922_vm5, %v4146_v2, %v6461_v6 }
 0x6eb   : > { %v9045_v9 = vpop.f32.mrb[70].mxu1  ;;  %v6469_v5 = vpop.permute.xlu0 %6468  ;;  %v4306_v35 = vsel %vm1955_vm6, %v4274_v15, %v6465_v22  ;;  %v4210_v57 = vsel %vm1955_vm6, %v4178_v53, %v6466_v34  ;;  %v6476_v26 = vunpack.i.h.bf16 %v6474_v47  ;;  %v6475_v8 = vunpack.i.l.bf16 %v6474_v47  ;;  %v3221_v22 = vld [vmem:[#allocation2 + $0xf1] sm:$0xff] }
 0x6ec   : > { %v9050_v21 = vpop.f32.mrb[71].mxu1  ;;  %v6471_v1 = vunpack.i.h.bf16 %v6469_v5  ;;  %v6470_v40 = vunpack.i.l.bf16 %v6469_v5  ;;  %4590 = vmatprep.mubr.f32.mxu0 %v4306_v35 }
 0x6ed   : > { %4591 = vmatmul.mubr.f32.gmra.mrb[68].mxu0 %v4210_v57 }
 0x6ee   : > { %v6484_v39 = vpop.permute.xlu1 %6483  ;;  %v4243_v24 = vsel %vm304_vm0, %v3219_v55, %v6470_v40  ;;  %v4147_v52 = vsel %vm304_vm0, %v3091_v12, %v6471_v1 }
 0x6ef   : > { %v9053_v31 = vpop.f32.mrb[72].mxu1  ;;  %v6479_v50 = vpop.permute.xlu0 %6478  ;;  %v6486_v16 = vunpack.i.h.bf16 %v6484_v39  ;;  %v6485_v30 = vunpack.i.l.bf16 %v6484_v39  ;;  %v4275_v63 = vsel %vm1922_vm5, %v4243_v24, %v6475_v8  ;;  %v4179_v7 = vsel %vm1922_vm5, %v4147_v52, %v6476_v26 }
 0x6f0   : > { %v9057_v41 = vpop.f32.mrb[73].mxu1  ;;  %v6481_v29 = vunpack.i.h.bf16 %v6479_v50  ;;  %v6480_v59 = vunpack.i.l.bf16 %v6479_v50 }
 0x6f1   : > { %v4244_v46 = vsel %vm304_vm0, %v3220_v56, %v6485_v30  ;;  %v4148_v42 = vsel %vm304_vm0, %v3092_v60, %v6486_v16 }
 0x6f2   : > { %v6494_v17 = vpop.permute.xlu1 %6493  ;;  %v4307_v18 = vsel %vm1955_vm6, %v4275_v63, %v6480_v59  ;;  %v4211_v62 = vsel %vm1955_vm6, %v4179_v7, %v6481_v29  ;;  %v3222_v29 = vld [vmem:[#allocation2 + $0xf9] sm:$0xff] }
 0x6f3   : > { %v9061_v10 = vpop.f32.mrb[74].mxu1  ;;  %v6496_v28 = vunpack.i.h.bf16 %v6494_v17  ;;  %v6495_v37 = vunpack.i.l.bf16 %v6494_v17  ;;  %v6489_v4 = vpop.permute.xlu0 %6488  ;;  %4595 = vmatprep.mubr.f32.mxu0 %v4307_v18  ;;  %v3094_v59 = vld [vmem:[#allocation2 + $0xe0] sm:$0xff] }
 0x6f4   : > { %v9065_v25 = vpop.f32.mrb[75].mxu1  ;;  %v6491_v44 = vunpack.i.h.bf16 %v6489_v4  ;;  %v6490_v11 = vunpack.i.l.bf16 %v6489_v4  ;;  %4596 = vmatmul.mubr.f32.gmra.mrb[70].mxu0 %v4211_v62 }
 0x6f6   : > { %v6504_v0 = vpop.permute.xlu1 %6503  ;;  %v4276_v43 = vsel %vm1922_vm5, %v4244_v46, %v6490_v11  ;;  %v4180_v23 = vsel %vm1922_vm5, %v4148_v42, %v6491_v44  ;;  %v3223_v46 = vld [vmem:[#allocation2 + $0x109] sm:$0xff] }
 0x6f7   : > { %v9069_v36 = vpop.f32.mrb[76].mxu1  ;;  %v6499_v19 = vpop.permute.xlu0 %6498  ;;  %v4308_v54 = vsel %vm1955_vm6, %v4276_v43, %v6495_v37  ;;  %v4212_v27 = vsel %vm1955_vm6, %v4180_v23, %v6496_v28  ;;  %v6506_v20 = vunpack.i.h.bf16 %v6504_v0  ;;  %v6505_v34 = vunpack.i.l.bf16 %v6504_v0  ;;  %v3095_v42 = vld [vmem:[#allocation2 + $0xf0] sm:$0xff] }
 0x6f8   : > { %v9074_v13 = vpop.f32.mrb[77].mxu1  ;;  %v6501_v45 = vunpack.i.h.bf16 %v6499_v19  ;;  %v6500_v48 = vunpack.i.l.bf16 %v6499_v19  ;;  %4600 = vmatprep.mubr.f32.mxu0 %v4308_v54 }
 0x6f9   : > { %4601 = vmatmul.mubr.f32.gmra.mrb[72].mxu0 %v4212_v27 }
 0x6fa   : > { %v6514_v32 = vpop.permute.xlu1 %6513  ;;  %v4245_v38 = vsel %vm304_vm0, %v3221_v22, %v6500_v48  ;;  %v4149_v3 = vsel %vm304_vm0, %v3093_v61, %v6501_v45 }
 0x6fb   : > { %v9077_v6 = vpop.f32.mrb[78].mxu1  ;;  %v6509_v51 = vpop.permute.xlu0 %6508  ;;  %v6516_v53 = vunpack.i.h.bf16 %v6514_v32  ;;  %v6515_v5 = vunpack.i.l.bf16 %v6514_v32  ;;  %v4277_v35 = vsel %vm1922_vm5, %v4245_v38, %v6505_v34  ;;  %v4181_v57 = vsel %vm1922_vm5, %v4149_v3, %v6506_v20 }
 0x6fc   : > { %v9081_v2 = vpop.f32.mrb[79].mxu1  ;;  %v6511_v47 = vunpack.i.h.bf16 %v6509_v51  ;;  %v6510_v15 = vunpack.i.l.bf16 %v6509_v51 }
 0x6fd   : > { %v4246_v16 = vsel %vm304_vm0, %v3222_v29, %v6515_v5  ;;  %v4150_v30 = vsel %vm304_vm0, %v3094_v59, %v6516_v53 }
 0x6fe   : > { %v6524_v40 = vpop.permute.xlu1 %6523  ;;  %v4309_v26 = vsel %vm1955_vm6, %v4277_v35, %v6510_v15  ;;  %v4213_v8 = vsel %vm1955_vm6, %v4181_v57, %v6511_v47 }
 0x6ff   : > { %v9085_v1 = vpop.f32.mrb[80].mxu1  ;;  %v6526_v55 = vunpack.i.h.bf16 %v6524_v40  ;;  %v6525_v12 = vunpack.i.l.bf16 %v6524_v40  ;;  %v6519_v39 = vpop.permute.xlu0 %6518  ;;  %4605 = vmatprep.mubr.f32.mxu0 %v4309_v26  ;;  %v3224_v40 = vld [vmem:[#allocation2 + $0x111] sm:$0xff] }
 0x700   : > { %v9089_v24 = vpop.f32.mrb[81].mxu1  ;;  %v6521_v52 = vunpack.i.h.bf16 %v6519_v39  ;;  %v6520_v50 = vunpack.i.l.bf16 %v6519_v39  ;;  %4606 = vmatmul.mubr.f32.gmra.mrb[74].mxu0 %v4213_v8  ;;  %v3096_v26 = vld [vmem:[#allocation2 + $0xf8] sm:$0xff] }
 0x702   : > { %v6534_v7 = vpop.permute.xlu1 %6533  ;;  %v4278_v17 = vsel %vm1922_vm5, %v4246_v16, %v6520_v50  ;;  %v4182_v18 = vsel %vm1922_vm5, %v4150_v30, %v6521_v52 }
 0x703   : > { %v9093_v63 = vpop.f32.mrb[82].mxu1  ;;  %v6529_v62 = vpop.permute.xlu0 %6528  ;;  %v4310_v28 = vsel %vm1955_vm6, %v4278_v17, %v6525_v12  ;;  %v4214_v4 = vsel %vm1955_vm6, %v4182_v18, %v6526_v55  ;;  %v6536_v56 = vunpack.i.h.bf16 %v6534_v7  ;;  %v6535_v60 = vunpack.i.l.bf16 %v6534_v7 }
 0x704   : > { %v9098_v37 = vpop.f32.mrb[83].mxu1  ;;  %v6531_v44 = vunpack.i.h.bf16 %v6529_v62  ;;  %v6530_v11 = vunpack.i.l.bf16 %v6529_v62  ;;  %4610 = vmatprep.mubr.f32.mxu0 %v4310_v28  ;;  %v3225_v28 = vld [vmem:[#allocation2 + $0x121] sm:$0xff] }
 0x705   : > { %4611 = vmatmul.mubr.f32.gmra.mrb[76].mxu0 %v4214_v4  ;;  %v3097_v4 = vld [vmem:[#allocation2 + $0x108] sm:$0xff] }
 0x706   : > { %v6544_v43 = vpop.permute.xlu1 %6543  ;;  %v4247_v23 = vsel %vm304_vm0, %v3223_v46, %v6530_v11  ;;  %v4151_v19 = vsel %vm304_vm0, %v3095_v42, %v6531_v44 }
 0x707   : > { %v9101_v0 = vpop.f32.mrb[84].mxu1  ;;  %v6539_v54 = vpop.permute.xlu0 %6538  ;;  %v6546_v20 = vunpack.i.h.bf16 %v6544_v43  ;;  %v6545_v34 = vunpack.i.l.bf16 %v6544_v43  ;;  %v4279_v22 = vsel %vm1922_vm5, %v4247_v23, %v6535_v60  ;;  %v4183_v61 = vsel %vm1922_vm5, %v4151_v19, %v6536_v56 }
 0x708   : > { %v9105_v27 = vpop.f32.mrb[85].mxu1  ;;  %v6541_v45 = vunpack.i.h.bf16 %v6539_v54  ;;  %v6540_v48 = vunpack.i.l.bf16 %v6539_v54 }
 0x709   : > { %v4248_v8 = vsel %vm304_vm0, %v3224_v40, %v6545_v34  ;;  %v4152_v55 = vsel %vm304_vm0, %v3096_v26, %v6546_v20 }
 0x70a   : > { %v6554_v38 = vpop.permute.xlu1 %6553  ;;  %v4311_v3 = vsel %vm1955_vm6, %v4279_v22, %v6540_v48  ;;  %v4215_v51 = vsel %vm1955_vm6, %v4183_v61, %v6541_v45 }
 0x70b   : > { %v9109_v32 = vpop.f32.mrb[86].mxu1  ;;  %v6556_v47 = vunpack.i.h.bf16 %v6554_v38  ;;  %v6555_v15 = vunpack.i.l.bf16 %v6554_v38  ;;  %v6549_v53 = vpop.permute.xlu0 %6548  ;;  %4615 = vmatprep.mubr.f32.mxu0 %v4311_v3 }
 0x70c   : > { %v9113_v5 = vpop.f32.mrb[87].mxu1  ;;  %v6551_v35 = vunpack.i.h.bf16 %v6549_v53  ;;  %v6550_v57 = vunpack.i.l.bf16 %v6549_v53  ;;  %4616 = vmatmul.mubr.f32.gmra.mrb[78].mxu0 %v4215_v51 }
 0x70e   : > { %v6564_v39 = vpop.permute.xlu1 %6563  ;;  %v4280_v52 = vsel %vm1922_vm5, %v4248_v8, %v6550_v57  ;;  %v4184_v50 = vsel %vm1922_vm5, %v4152_v55, %v6551_v35  ;;  %v3226_v35 = vld [vmem:[#allocation2 + $0x129] sm:$0xff] }
 0x70f   : > { %v9117_v12 = vpop.f32.mrb[88].mxu1  ;;  %v6559_v29 = vpop.permute.xlu0 %6558  ;;  %v4312_v59 = vsel %vm1955_vm6, %v4280_v52, %v6555_v15  ;;  %v4216_v30 = vsel %vm1955_vm6, %v4184_v50, %v6556_v47  ;;  %v6566_v18 = vunpack.i.h.bf16 %v6564_v39  ;;  %v6565_v62 = vunpack.i.l.bf16 %v6564_v39  ;;  %v3098_v57 = vld [vmem:[#allocation2 + $0x110] sm:$0xff] }
 0x710   : > { %v9122_v16 = vpop.f32.mrb[89].mxu1  ;;  %v6561_v7 = vunpack.i.h.bf16 %v6559_v29  ;;  %v6560_v17 = vunpack.i.l.bf16 %v6559_v29  ;;  %4620 = vmatprep.mubr.f32.mxu0 %v4312_v59 }
 0x711   : > { %4621 = vmatmul.mubr.f32.gmra.mrb[80].mxu0 %v4216_v30 }
 0x712   : > { %v6574_v11 = vpop.permute.xlu1 %6573  ;;  %v4249_v56 = vsel %vm304_vm0, %v3225_v28, %v6560_v17  ;;  %v4153_v60 = vsel %vm304_vm0, %v3097_v4, %v6561_v7  ;;  %v3227_v28 = vld [vmem:[#allocation2 + $0x139] sm:$0xff] }
 0x713   : > { %v9125_v44 = vpop.f32.mrb[90].mxu1  ;;  %v6569_v46 = vpop.permute.xlu0 %6568  ;;  %v6576_v19 = vunpack.i.h.bf16 %v6574_v11  ;;  %v6575_v54 = vunpack.i.l.bf16 %v6574_v11  ;;  %v4281_v45 = vsel %vm1922_vm5, %v4249_v56, %v6565_v62  ;;  %v4185_v48 = vsel %vm1922_vm5, %v4153_v60, %v6566_v18  ;;  %v3099_v4 = vld [vmem:[#allocation2 + $0x120] sm:$0xff] }
 0x714   : > { %v9129_v42 = vpop.f32.mrb[91].mxu1  ;;  %v6571_v43 = vunpack.i.h.bf16 %v6569_v46  ;;  %v6570_v23 = vunpack.i.l.bf16 %v6569_v46 }
 0x715   : > { %v4250_v40 = vsel %vm304_vm0, %v3226_v35, %v6575_v54  ;;  %v4154_v26 = vsel %vm304_vm0, %v3098_v57, %v6576_v19 }
 0x716   : > { %v6584_v34 = vpop.permute.xlu1 %6583  ;;  %v4313_v22 = vsel %vm1955_vm6, %v4281_v45, %v6570_v23  ;;  %v4217_v61 = vsel %vm1955_vm6, %v4185_v48, %v6571_v43 }
 0x717   : > { %v9133_v20 = vpop.f32.mrb[92].mxu1  ;;  %v6586_v38 = vunpack.i.h.bf16 %v6584_v34  ;;  %v6585_v3 = vunpack.i.l.bf16 %v6584_v34  ;;  %v6579_v51 = vpop.permute.xlu0 %6578  ;;  %4625 = vmatprep.mubr.f32.mxu0 %v4313_v22 }
 0x718   : > { %v9137_v47 = vpop.f32.mrb[93].mxu1  ;;  %v6581_v15 = vunpack.i.h.bf16 %v6579_v51  ;;  %v6580_v53 = vunpack.i.l.bf16 %v6579_v51  ;;  %4626 = vmatmul.mubr.f32.gmra.mrb[82].mxu0 %v4217_v61 }
 0x71a   : > { %v6594_v55 = vpop.permute.xlu1 %6593  ;;  %v4282_v39 = vsel %vm1922_vm5, %v4250_v40, %v6580_v53  ;;  %v4186_v52 = vsel %vm1922_vm5, %v4154_v26, %v6581_v15 }
 0x71b   : > { %v9141_v8 = vpop.f32.mrb[94].mxu1  ;;  %v6589_v50 = vpop.permute.xlu0 %6588  ;;  %v4314_v29 = vsel %vm1955_vm6, %v4282_v39, %v6585_v3  ;;  %v4218_v30 = vsel %vm1955_vm6, %v4186_v52, %v6586_v38  ;;  %v6596_v18 = vunpack.i.h.bf16 %v6594_v55  ;;  %v6595_v62 = vunpack.i.l.bf16 %v6594_v55  ;;  %v3228_v55 = vld [vmem:[#allocation2 + $0x141] sm:$0xff] }
 0x71c   : > { %v9146_v59 = vpop.f32.mrb[95].mxu1  ;;  %v6591_v7 = vunpack.i.h.bf16 %v6589_v50  ;;  %v6590_v17 = vunpack.i.l.bf16 %v6589_v50  ;;  %4630 = vmatprep.mubr.f32.mxu0 %v4314_v29  ;;  %v3100_v39 = vld [vmem:[#allocation2 + $0x128] sm:$0xff] }
 0x71d   : > { %4631 = vmatmul.mubr.f32.gmra.mrb[84].mxu0 %v4218_v30 }
 0x71e   : > { %v6604_v56 = vpop.permute.xlu1 %6603  ;;  %v4251_v60 = vsel %vm304_vm0, %v3227_v28, %v6590_v17  ;;  %v4155_v46 = vsel %vm304_vm0, %v3099_v4, %v6591_v7 }
 0x71f   : > { %v9149_v11 = vpop.f32.mrb[96].mxu1  ;;  %v6599_v43 = vpop.permute.xlu0 %6598  ;;  %v6606_v45 = vunpack.i.h.bf16 %v6604_v56  ;;  %v6605_v48 = vunpack.i.l.bf16 %v6604_v56  ;;  %v4283_v34 = vsel %vm1922_vm5, %v4251_v60, %v6595_v62  ;;  %v4187_v22 = vsel %vm1922_vm5, %v4155_v46, %v6596_v18  ;;  %v3229_v46 = vld [vmem:[#allocation2 + $0x151] sm:$0xff] }
 0x720   : > { %v9153_v23 = vpop.f32.mrb[97].mxu1  ;;  %v6601_v19 = vunpack.i.h.bf16 %v6599_v43  ;;  %v6600_v54 = vunpack.i.l.bf16 %v6599_v43  ;;  %v3101_v43 = vld [vmem:[#allocation2 + $0x138] sm:$0xff] }
 0x721   : > { %v4252_v52 = vsel %vm304_vm0, %v3228_v55, %v6605_v48  ;;  %v4156_v50 = vsel %vm304_vm0, %v3100_v39, %v6606_v45 }
 0x722   : > { %v6614_v38 = vpop.permute.xlu1 %6613  ;;  %v4315_v3 = vsel %vm1955_vm6, %v4283_v34, %v6600_v54  ;;  %v4219_v51 = vsel %vm1955_vm6, %v4187_v22, %v6601_v19 }
 0x723   : > { %v9157_v61 = vpop.f32.mrb[98].mxu1  ;;  %v6616_v15 = vunpack.i.h.bf16 %v6614_v38  ;;  %v6615_v53 = vunpack.i.l.bf16 %v6614_v38  ;;  %v6609_v35 = vpop.permute.xlu0 %6608  ;;  %4635 = vmatprep.mubr.f32.mxu0 %v4315_v3 }
 0x724   : > { %v9161_v57 = vpop.f32.mrb[99].mxu1  ;;  %v6611_v40 = vunpack.i.h.bf16 %v6609_v35  ;;  %v6610_v26 = vunpack.i.l.bf16 %v6609_v35  ;;  %4636 = vmatmul.mubr.f32.gmra.mrb[86].mxu0 %v4219_v51 }
 0x726   : > { %v6624_v29 = vpop.permute.xlu1 %6623  ;;  %v4284_v30 = vsel %vm1922_vm5, %v4252_v52, %v6610_v26  ;;  %v4188_v7 = vsel %vm1922_vm5, %v4156_v50, %v6611_v40 }
 0x727   : > { %v6619_v17 = vpop.permute.xlu0 %6618  ;;  %v4316_v18 = vsel %vm1955_vm6, %v4284_v30, %v6615_v53  ;;  %v4220_v62 = vsel %vm1955_vm6, %v4188_v7, %v6616_v15  ;;  %v6626_v56 = vunpack.i.h.bf16 %v6624_v29  ;;  %v6625_v60 = vunpack.i.l.bf16 %v6624_v29  ;;  %v3230_v29 = vld [vmem:[#allocation2 + $0x159] sm:$0xff] }
 0x728   : > { %v6621_v28 = vunpack.i.h.bf16 %v6619_v17  ;;  %v6620_v4 = vunpack.i.l.bf16 %v6619_v17  ;;  %4640 = vmatprep.mubr.f32.mxu0 %v4316_v18  ;;  %v3102_v30 = vld [vmem:[#allocation2 + $0x140] sm:$0xff] }
 0x729   : > { %4641 = vmatmul.mubr.f32.gmra.mrb[88].mxu0 %v4220_v62 }
 0x72a   : > { %v6634_v19 = vpop.permute.xlu1 %6633  ;;  %v4253_v54 = vsel %vm304_vm0, %v3229_v46, %v6620_v4  ;;  %v4157_v45 = vsel %vm304_vm0, %v3101_v43, %v6621_v28 }
 0x72b   : > { %v6629_v48 = vpop.permute.xlu0 %6628  ;;  %v6636_v38 = vunpack.i.h.bf16 %v6634_v19  ;;  %v6635_v3 = vunpack.i.l.bf16 %v6634_v19  ;;  %v4285_v51 = vsel %vm1922_vm5, %v4253_v54, %v6625_v60  ;;  %v4189_v15 = vsel %vm1922_vm5, %v4157_v45, %v6626_v56  ;;  %v3103_v45 = vld [vmem:[#allocation2 + $0x150] sm:$0xff] }
 0x72c   : > { %v6631_v34 = vunpack.i.h.bf16 %v6629_v48  ;;  %v6630_v22 = vunpack.i.l.bf16 %v6629_v48 }
 0x72d   : > { %v4254_v7 = vsel %vm304_vm0, %v3230_v29, %v6635_v3  ;;  %v4158_v17 = vsel %vm304_vm0, %v3102_v30, %v6636_v38 }
 0x72e   : > { %v6644_v53 = vpop.permute.xlu1 %6643  ;;  %v4317_v35 = vsel %vm1955_vm6, %v4285_v51, %v6630_v22  ;;  %v4221_v40 = vsel %vm1955_vm6, %v4189_v15, %v6631_v34 }
 0x72f   : > { %v6646_v26 = vunpack.i.h.bf16 %v6644_v53  ;;  %v6645_v55 = vunpack.i.l.bf16 %v6644_v53  ;;  %v6639_v39 = vpop.permute.xlu0 %6638  ;;  %4645 = vmatprep.mubr.f32.mxu0 %v4317_v35 }
 0x730   : > { %v6641_v52 = vunpack.i.h.bf16 %v6639_v39  ;;  %v6640_v50 = vunpack.i.l.bf16 %v6639_v39  ;;  %4646 = vmatmul.mubr.f32.gmra.mrb[90].mxu0 %v4221_v40 }
 0x732   : > { %v6654_v18 = vpop.permute.xlu1 %6653  ;;  %v4286_v62 = vsel %vm1922_vm5, %v4254_v7, %v6640_v50  ;;  %v4190_v28 = vsel %vm1922_vm5, %v4158_v17, %v6641_v52  ;;  %v3104_v7 = vld [vmem:[#allocation2 + $0x158] sm:$0xff] }
 0x733   : > { %v6649_v4 = vpop.permute.xlu0 %6648  ;;  %v4318_v56 = vsel %vm1955_vm6, %v4286_v62, %v6645_v55  ;;  %v4222_v60 = vsel %vm1955_vm6, %v4190_v28, %v6646_v26  ;;  %v6656_v19 = vunpack.i.h.bf16 %v6654_v18  ;;  %v6655_v54 = vunpack.i.l.bf16 %v6654_v18 }
 0x734   : > { %v6651_v46 = vunpack.i.h.bf16 %v6649_v4  ;;  %v6650_v43 = vunpack.i.l.bf16 %v6649_v4  ;;  %4650 = vmatprep.mubr.f32.mxu0 %v4318_v56 }
 0x735   : > { %4651 = vmatmul.mubr.f32.gmra.mrb[92].mxu0 %v4222_v60 }
 0x736   : > { %v6664_v48 = vpop.permute.xlu1 %6663  ;;  %v4255_v34 = vsel %vm304_vm0, %v8935_v33, %v6650_v43  ;;  %v4159_v22 = vsel %vm304_vm0, %v3103_v45, %v6651_v46 }
 0x737   : > { %v6659_v38 = vpop.permute.xlu0 %6658  ;;  %v6666_v15 = vunpack.i.h.bf16 %v6664_v48  ;;  %v6665_v53 = vunpack.i.l.bf16 %v6664_v48  ;;  %v4287_v35 = vsel %vm1922_vm5, %v4255_v34, %v6655_v54  ;;  %v4191_v40 = vsel %vm1922_vm5, %v4159_v22, %v6656_v19  ;;  %v3105_v48 = vld [vmem:[#allocation2 + $0x168] sm:$0xff] }
 0x738   : > { %v6661_v3 = vunpack.i.h.bf16 %v6659_v38  ;;  %v6660_v51 = vunpack.i.l.bf16 %v6659_v38 }
 0x739   : > { %v4256_v17 = vsel %vm304_vm0, %v8946_v14, %v6665_v53  ;;  %v4160_v18 = vsel %vm304_vm0, %v3104_v7, %v6666_v15 }
 0x73a   : > { %v6674_v26 = vpop.permute.xlu1 %6673  ;;  %v4319_v55 = vsel %vm1955_vm6, %v4287_v35, %v6660_v51  ;;  %v4223_v39 = vsel %vm1955_vm6, %v4191_v40, %v6661_v3 }
 0x73b   : > { %v6676_v52 = vunpack.i.h.bf16 %v6674_v26  ;;  %v6675_v50 = vunpack.i.l.bf16 %v6674_v26  ;;  %v6669_v29 = vpop.permute.xlu0 %6668  ;;  %4655 = vmatprep.mubr.f32.mxu0 %v4319_v55 }
 0x73c   : > { %v6671_v33 = vunpack.i.h.bf16 %v6669_v29  ;;  %v6670_v30 = vunpack.i.l.bf16 %v6669_v29  ;;  %4656 = vmatmul.mubr.f32.gmra.mrb[94].mxu0 %v4223_v39 }
 0x73e   : > { %v6684_v62 = vpop.permute.xlu1 %6683  ;;  %v4288_v28 = vsel %vm1922_vm5, %v4256_v17, %v6670_v30  ;;  %v4192_v4 = vsel %vm1922_vm5, %v4160_v18, %v6671_v33  ;;  %v3106_v30 = vld [vmem:[#allocation2 + $0x170] sm:$0xff] }
 0x73f   : > { %v6679_v56 = vpop.permute.xlu0 %6678  ;;  %v4320_v60 = vsel %vm1955_vm6, %v4288_v28, %v6675_v50  ;;  %v4224_v46 = vsel %vm1955_vm6, %v4192_v4, %v6676_v52  ;;  %v6686_v54 = vunpack.i.h.bf16 %v6684_v62  ;;  %v6685_v45 = vunpack.i.l.bf16 %v6684_v62 }
 0x740   : > { %v6681_v43 = vunpack.i.h.bf16 %v6679_v56  ;;  %v6680_v19 = vunpack.i.l.bf16 %v6679_v56  ;;  %4660 = vmatprep.mubr.f32.mxu0 %v4320_v60  ;;  %v4323_v56 = vld [vmem:[%s6885_s21] sm:$0xff] }
 0x741   : > { %4661 = vmatmul.mubr.f32.gmra.mrb[96].mxu0 %v4224_v46 }
 0x742   : > { %v6694_v14 = vpop.permute.xlu1 %6693  ;;  %v4257_v34 = vsel %vm304_vm0, %v8973_v49, %v6680_v19  ;;  %v4161_v22 = vsel %vm304_vm0, %v3105_v48, %v6681_v43  ;;  %v4324_v19 = vld [vmem:[%s6885_s21 + $0x8] sm:$0xff] }
 0x743   : > { %v6689_v38 = vpop.permute.xlu0 %6688  ;;  %v6696_v15 = vunpack.i.h.bf16 %v6694_v14  ;;  %v6695_v53 = vunpack.i.l.bf16 %v6694_v14  ;;  %v4289_v35 = vsel %vm1922_vm5, %v4257_v34, %v6685_v45  ;;  %v4193_v40 = vsel %vm1922_vm5, %v4161_v22, %v6686_v54  ;;  %v4325_v34 = vld [vmem:[%s6885_s21 + $0x10] sm:$0xff] }
 0x744   : > { %v6691_v3 = vunpack.i.h.bf16 %v6689_v38  ;;  %v6690_v51 = vunpack.i.l.bf16 %v6689_v38 }
 0x745   : > { %v4258_v7 = vsel %vm304_vm0, %v8984_v58, %v6695_v53  ;;  %v4162_v17 = vsel %vm304_vm0, %v3106_v30, %v6696_v15 }
 0x746   : > { %v6704_v26 = vpop.permute.xlu1 %6703  ;;  %v4321_v55 = vsel %vm1955_vm6, %v4289_v35, %v6690_v51  ;;  %v4225_v39 = vsel %vm1955_vm6, %v4193_v40, %v6691_v3  ;;  %v4326_v51 = vld [vmem:[%s6885_s21 + $0x18] sm:$0xff]  ;;  %v4327_v40 = vld [vmem:[%s6885_s21 + $0x20] sm:$0xff] }
 0x747   : > { %v6706_v52 = vunpack.i.h.bf16 %v6704_v26  ;;  %v6705_v50 = vunpack.i.l.bf16 %v6704_v26  ;;  %v6699_v49 = vpop.permute.xlu0 %6698  ;;  %4665 = vmatprep.mubr.f32.mxu0 %v4321_v55 }
 0x748   : > { %v6701_v29 = vunpack.i.h.bf16 %v6699_v49  ;;  %v6700_v33 = vunpack.i.l.bf16 %v6699_v49  ;;  %4666 = vmatmul.mubr.f32.gmra.mrb[98].mxu0 %v4225_v39 }
 0x74a   : > { %v4290_v18 = vsel %vm1922_vm5, %v4258_v7, %v6700_v33  ;;  %v4194_v62 = vsel %vm1922_vm5, %v4162_v17, %v6701_v29  ;;  %v4329_v33 = vld [vmem:[%s6885_s21 + $0x30] sm:$0xff] }
 0x74b   : > { %v4322_v28 = vsel %vm1955_vm6, %v4290_v18, %v6705_v50  ;;  %v4226_v4 = vsel %vm1955_vm6, %v4194_v62, %v6706_v52  ;;  %v4328_v52 = vld [vmem:[%s6885_s21 + $0x28] sm:$0xff]  ;;  %v4330_v18 = vld [vmem:[%s6885_s21 + $0x38] sm:$0xff] }
 0x74c   : > { %4670 = vmatprep.mubr.f32.mxu0 %v4322_v28 }
 0x74d   : > { %4671 = vmatmul.mubr.f32.gmra.mrb[100].mxu0 %v4226_v4 }
 0x767   : > { %v4517_v60 = vpop.f32.mrb[38].mxu0 }
 0x768   : > { %v4518_v46 = vadd.f32 %v4517_v60, %v4323_v56  ;;  %v4519_v58 = vpop.f32.mrb[39].mxu0 }
 0x76a   : > { %v4743_v43 = vadd.f32 %v9050_v21, %v4518_v46 }
 0x76c   : > { %4901 = vst.msk [vmem:[%s9215_s13] sm:$0xff] %vm304_vm0, %v4743_v43  ;;  %v4522_v54 = vpop.f32.mrb[40].mxu0 }
 0x76d   : > { %v4523_v45 = vadd.f32 %v4522_v54, %v4324_v19  ;;  %v4524_v48 = vpop.f32.mrb[41].mxu0 }
 0x76f   : > { %v4748_v14 = vadd.f32 %v9045_v9, %v4523_v45 }
 0x771   : > { %4902 = vst.msk [vmem:[%s9215_s13 + $0x8] sm:$0xff] %vm304_vm0, %v4748_v14 }
 0x773   : > { %v4527_v22 = vpop.f32.mrb[42].mxu0 }
 0x774   : > { %v4528_v21 = vadd.f32 %v4527_v22, %v4325_v34  ;;  %v4529_v38 = vpop.f32.mrb[43].mxu0  ;;  %v4333_v34 = vld [vmem:[%s6885_s21 + $0x50] sm:$0xff] }
 0x776   : > { %v4753_v3 = vadd.f32 %v9057_v41, %v4528_v21 }
 0x778   : > { %4903 = vst.msk [vmem:[%s9215_s13 + $0x10] sm:$0xff] %vm304_vm0, %v4753_v3  ;;  %v4532_v15 = vpop.f32.mrb[44].mxu0  ;;  %v4334_v3 = vld [vmem:[%s6885_s21 + $0x58] sm:$0xff] }
 0x779   : > { %v4533_v53 = vadd.f32 %v4532_v15, %v4326_v51  ;;  %v4534_v35 = vpop.f32.mrb[45].mxu0 }
 0x77a   : > { %v4335_v35 = vld [vmem:[%s6885_s21 + $0x60] sm:$0xff] }
 0x77b   : > { %v4758_v9 = vadd.f32 %v9053_v31, %v4533_v53 }
 0x77d   : > { %4904 = vst.msk [vmem:[%s9215_s13 + $0x18] sm:$0xff] %vm304_vm0, %v4758_v9 }
 0x77f   : > { %v4537_v26 = vpop.f32.mrb[46].mxu0 }
 0x780   : > { %v4538_v55 = vadd.f32 %v4537_v26, %v4327_v40  ;;  %v4539_v39 = vpop.f32.mrb[47].mxu0 }
 0x782   : > { %v4763_v41 = vadd.f32 %v9065_v25, %v4538_v55  ;;  %v4336_v55 = vld [vmem:[%s6885_s21 + $0x68] sm:$0xff] }
 0x784   : > { %4905 = vst.msk [vmem:[%s9215_s13 + $0x20] sm:$0xff] %vm304_vm0, %v4763_v41  ;;  %v4542_v50 = vpop.f32.mrb[48].mxu0 }
 0x785   : > { %v4543_v49 = vadd.f32 %v4542_v50, %v4328_v52  ;;  %v4544_v29 = vpop.f32.mrb[49].mxu0  ;;  %v4337_v50 = vld [vmem:[%s6885_s21 + $0x70] sm:$0xff] }
 0x787   : > { %v4768_v31 = vadd.f32 %v9061_v10, %v4543_v49  ;;  %v4331_v10 = vld [vmem:[%s6885_s21 + $0x40] sm:$0xff] }
 0x789   : > { %4906 = vst.msk [vmem:[%s9215_s13 + $0x28] sm:$0xff] %vm304_vm0, %v4768_v31 }
 0x78b   : > { %v4547_v30 = vpop.f32.mrb[50].mxu0 }
 0x78c   : > { %v4548_v7 = vadd.f32 %v4547_v30, %v4329_v33  ;;  %v4549_v17 = vpop.f32.mrb[51].mxu0  ;;  %v4338_v33 = vld [vmem:[%s6885_s21 + $0x78] sm:$0xff] }
 0x78e   : > { %v4773_v25 = vadd.f32 %v9074_v13, %v4548_v7  ;;  %v4332_v13 = vld [vmem:[%s6885_s21 + $0x48] sm:$0xff]  ;;  %v9251_v48 = vpop.f32.mrb[100].mxu1 }
 0x78f   : > { %v9254_v14 = vpop.f32.mrb[101].mxu1 }
 0x790   : > { %4907 = vst.msk [vmem:[%s9215_s13 + $0x30] sm:$0xff] %vm304_vm0, %v4773_v25  ;;  %v4552_v62 = vpop.f32.mrb[52].mxu0  ;;  %v4339_v25 = vld [vmem:[%s6885_s21 + $0x80] sm:$0xff] }
 0x791   : > { %v4553_v28 = vadd.f32 %v4552_v62, %v4330_v18  ;;  %v4554_v4 = vpop.f32.mrb[53].mxu0 }
 0x792   : > { %v4340_v4 = vld [vmem:[%s6885_s21 + $0x88] sm:$0xff] }
 0x793   : > { %v4778_v56 = vadd.f32 %v9069_v36, %v4553_v28 }
 0x795   : > { %4908 = vst.msk [vmem:[%s9215_s13 + $0x38] sm:$0xff] %vm304_vm0, %v4778_v56 }
 0x797   : > { %v4557_v60 = vpop.f32.mrb[54].mxu0 }
 0x798   : > { %v4558_v46 = vadd.f32 %v4557_v60, %v4331_v10  ;;  %v4559_v58 = vpop.f32.mrb[55].mxu0 }
 0x79a   : > { %v4783_v43 = vadd.f32 %v9081_v2, %v4558_v46  ;;  %v4341_v46 = vld [vmem:[%s6885_s21 + $0x90] sm:$0xff] }
 0x79c   : > { %4909 = vst.msk [vmem:[%s9215_s13 + $0x40] sm:$0xff] %vm304_vm0, %v4783_v43  ;;  %v4562_v19 = vpop.f32.mrb[56].mxu0 }
 0x79d   : > { %v4563_v54 = vadd.f32 %v4562_v19, %v4332_v13  ;;  %v4564_v45 = vpop.f32.mrb[57].mxu0  ;;  %v4342_v19 = vld [vmem:[%s6885_s21 + $0x98] sm:$0xff] }
 0x79f   : > { %v4788_v36 = vadd.f32 %v9077_v6, %v4563_v54 }
 0x7a1   : > { %4910 = vst.msk [vmem:[%s9215_s13 + $0x48] sm:$0xff] %vm304_vm0, %v4788_v36 }
 0x7a3   : > { %v4567_v22 = vpop.f32.mrb[58].mxu0 }
 0x7a4   : > { %v4568_v2 = vadd.f32 %v4567_v22, %v4333_v34  ;;  %v4569_v21 = vpop.f32.mrb[59].mxu0  ;;  %v4343_v34 = vld [vmem:[%s6885_s21 + $0xa0] sm:$0xff] }
 0x7a6   : > { %v4793_v38 = vadd.f32 %v9089_v24, %v4568_v2 }
 0x7a8   : > { %4911 = vst.msk [vmem:[%s9215_s13 + $0x50] sm:$0xff] %vm304_vm0, %v4793_v38  ;;  %v4572_v51 = vpop.f32.mrb[60].mxu0  ;;  %v4344_v38 = vld [vmem:[%s6885_s21 + $0xa8] sm:$0xff] }
 0x7a9   : > { %v4573_v15 = vadd.f32 %v4572_v51, %v4334_v3  ;;  %v4574_v6 = vpop.f32.mrb[61].mxu0 }
 0x7aa   : > { %v4345_v6 = vld [vmem:[%s6885_s21 + $0xb0] sm:$0xff] }
 0x7ab   : > { %v4798_v53 = vadd.f32 %v9085_v1, %v4573_v15 }
 0x7ad   : > { %4912 = vst.msk [vmem:[%s9215_s13 + $0x58] sm:$0xff] %vm304_vm0, %v4798_v53 }
 0x7af   : > { %v4577_v9 = vpop.f32.mrb[62].mxu0 }
 0x7b0   : > { %v4578_v40 = vadd.f32 %v4577_v9, %v4335_v35  ;;  %v4579_v26 = vpop.f32.mrb[63].mxu0 }
 0x7b2   : > { %v4803_v24 = vadd.f32 %v9098_v37, %v4578_v40  ;;  %v4346_v40 = vld [vmem:[%s6885_s21 + $0xb8] sm:$0xff] }
 0x7b4   : > { %4913 = vst.msk [vmem:[%s9215_s13 + $0x60] sm:$0xff] %vm304_vm0, %v4803_v24  ;;  %v4582_v39 = vpop.f32.mrb[64].mxu0 }
 0x7b5   : > { %v4583_v41 = vadd.f32 %v4582_v39, %v4336_v55  ;;  %v4584_v52 = vpop.f32.mrb[65].mxu0  ;;  %v4347_v39 = vld [vmem:[%s6885_s21 + $0xc0] sm:$0xff] }
 0x7b7   : > { %v4808_v1 = vadd.f32 %v9093_v63, %v4583_v41 }
 0x7b9   : > { %4914 = vst.msk [vmem:[%s9215_s13 + $0x68] sm:$0xff] %vm304_vm0, %v4808_v1 }
 0x7bb   : > { %v4587_v49 = vpop.f32.mrb[66].mxu0 }
 0x7bc   : > { %v4588_v29 = vadd.f32 %v4587_v49, %v4337_v50  ;;  %v4589_v31 = vpop.f32.mrb[67].mxu0  ;;  %v4348_v50 = vld [vmem:[%s6885_s21 + $0xc8] sm:$0xff] }
 0x7be   : > { %v4813_v37 = vadd.f32 %v9105_v27, %v4588_v29 }
 0x7c0   : > { %4915 = vst.msk [vmem:[%s9215_s13 + $0x70] sm:$0xff] %vm304_vm0, %v4813_v37  ;;  %v4592_v30 = vpop.f32.mrb[68].mxu0  ;;  %v4349_v37 = vld [vmem:[%s6885_s21 + $0xd0] sm:$0xff] }
 0x7c1   : > { %v4593_v7 = vadd.f32 %v4592_v30, %v4338_v33  ;;  %v4594_v17 = vpop.f32.mrb[69].mxu0 }
 0x7c2   : > { %v4350_v17 = vld [vmem:[%s6885_s21 + $0xd8] sm:$0xff] }
 0x7c3   : > { %v4818_v63 = vadd.f32 %v9101_v0, %v4593_v7 }
 0x7c5   : > { %4916 = vst.msk [vmem:[%s9215_s13 + $0x78] sm:$0xff] %vm304_vm0, %v4818_v63 }
 0x7c7   : > { %v4597_v18 = vpop.f32.mrb[70].mxu0 }
 0x7c8   : > { %v4598_v62 = vadd.f32 %v4597_v18, %v4339_v25  ;;  %v4599_v28 = vpop.f32.mrb[71].mxu0 }
 0x7ca   : > { %v4823_v27 = vadd.f32 %v9113_v5, %v4598_v62  ;;  %v4351_v62 = vld [vmem:[%s6885_s21 + $0xe0] sm:$0xff] }
 0x7cc   : > { %4917 = vst.msk [vmem:[%s9215_s13 + $0x80] sm:$0xff] %vm304_vm0, %v4823_v27  ;;  %v4602_v56 = vpop.f32.mrb[72].mxu0 }
 0x7cd   : > { %v4603_v10 = vadd.f32 %v4602_v56, %v4340_v4  ;;  %v4604_v60 = vpop.f32.mrb[73].mxu0  ;;  %v4352_v56 = vld [vmem:[%s6885_s21 + $0xe8] sm:$0xff] }
 0x7cf   : > { %v4828_v0 = vadd.f32 %v9109_v32, %v4603_v10 }
 0x7d1   : > { %4918 = vst.msk [vmem:[%s9215_s13 + $0x88] sm:$0xff] %vm304_vm0, %v4828_v0 }
 0x7d3   : > { %v4607_v58 = vpop.f32.mrb[74].mxu0 }
 0x7d4   : > { %v4608_v43 = vadd.f32 %v4607_v58, %v4341_v46  ;;  %v4609_v13 = vpop.f32.mrb[75].mxu0  ;;  %v4353_v46 = vld [vmem:[%s6885_s21 + $0xf0] sm:$0xff] }
 0x7d6   : > { %v4833_v5 = vadd.f32 %v9122_v16, %v4608_v43 }
 0x7d8   : > { %4919 = vst.msk [vmem:[%s9215_s13 + $0x90] sm:$0xff] %vm304_vm0, %v4833_v5  ;;  %v4612_v54 = vpop.f32.mrb[76].mxu0  ;;  %v4354_v5 = vld [vmem:[%s6885_s21 + $0xf8] sm:$0xff]  ;;  %s6711_s21 = scalar_lea.vmem %s9350_s18, 4096 }
 0x7d9   : > { %v4613_v45 = vadd.f32 %v4612_v54, %v4342_v19  ;;  %v4614_v36 = vpop.f32.mrb[77].mxu0  ;;  %p6712_p11 = scmp.ne.s32.totalorder %s9350_s18, %s6711_s21  ;;  %p6719_p1 = scmp.lt.s32.totalorder %s6717_s26, %s6711_s21 }
 0x7db   : > { %v4838_v32 = vadd.f32 %v9117_v12, %v4613_v45  ;;  %p6713_p12 = pnand %p6712_p11, %p6868_p5  ;;  %p6720_p2 = por %p6719_p1, %p6718_p0 }
 0x7dd   : > { %4920 = vst.msk [vmem:[%s9215_s13 + $0x98] sm:$0xff] %vm304_vm0, %v4838_v32  ;;  %p6714_p13 = pneg %p6713_p12 }
 0x7df   : > { %v4617_v22 = vpop.f32.mrb[78].mxu0  ;;  %p6721_p3 = pnand %p6720_p2, %p6714_p13 }
 0x7e0   : > { %v4618_v2 = vadd.f32 %v4617_v22, %v4343_v34  ;;  %v4619_v21 = vpop.f32.mrb[79].mxu0 }
 0x7e2   : > { %v4843_v16 = vadd.f32 %v9129_v42, %v4618_v2 }
 0x7e4   : > { %4921 = vst.msk [vmem:[%s9215_s13 + $0xa0] sm:$0xff] %vm304_vm0, %v4843_v16  ;;  %v4622_v3 = vpop.f32.mrb[80].mxu0 }
 0x7e5   : > { %v4623_v51 = vadd.f32 %v4622_v3, %v4344_v38  ;;  %v4624_v15 = vpop.f32.mrb[81].mxu0 }
 0x7e7   : > { %v4848_v12 = vadd.f32 %v9125_v44, %v4623_v51 }
 0x7e9   : > { %4922 = vst.msk [vmem:[%s9215_s13 + $0xa8] sm:$0xff] %vm304_vm0, %v4848_v12 }
 0x7eb   : > { %v4627_v53 = vpop.f32.mrb[82].mxu0 }
 0x7ec   : > { %v4628_v35 = vadd.f32 %v4627_v53, %v4345_v6  ;;  %v4629_v9 = vpop.f32.mrb[83].mxu0 }
 0x7ee   : > { %v4853_v42 = vadd.f32 %v9137_v47, %v4628_v35 }
 0x7f0   : > { %4923 = vst.msk [vmem:[%s9215_s13 + $0xb0] sm:$0xff] %vm304_vm0, %v4853_v42  ;;  %v4632_v26 = vpop.f32.mrb[84].mxu0 }
 0x7f1   : > { %v4633_v24 = vadd.f32 %v4632_v26, %v4346_v40  ;;  %v4634_v55 = vpop.f32.mrb[85].mxu0 }
 0x7f3   : > { %v4858_v44 = vadd.f32 %v9133_v20, %v4633_v24 }
 0x7f5   : > { %4924 = vst.msk [vmem:[%s9215_s13 + $0xb8] sm:$0xff] %vm304_vm0, %v4858_v44 }
 0x7f7   : > { %v4637_v41 = vpop.f32.mrb[86].mxu0 }
 0x7f8   : > { %v4638_v52 = vadd.f32 %v4637_v41, %v4347_v39  ;;  %v4639_v1 = vpop.f32.mrb[87].mxu0 }
 0x7fa   : > { %v4863_v47 = vadd.f32 %v9146_v59, %v4638_v52 }
 0x7fc   : > { %4925 = vst.msk [vmem:[%s9215_s13 + $0xc0] sm:$0xff] %vm304_vm0, %v4863_v47  ;;  %v4642_v49 = vpop.f32.mrb[88].mxu0 }
 0x7fd   : > { %v4643_v29 = vadd.f32 %v4642_v49, %v4348_v50  ;;  %v4644_v31 = vpop.f32.mrb[89].mxu0 }
 0x7ff   : > { %v4868_v20 = vadd.f32 %v9141_v8, %v4643_v29 }
 0x801   : > { %4926 = vst.msk [vmem:[%s9215_s13 + $0xc8] sm:$0xff] %vm304_vm0, %v4868_v20 }
 0x803   : > { %v4647_v33 = vpop.f32.mrb[90].mxu0 }
 0x804   : > { %v4648_v30 = vadd.f32 %v4647_v33, %v4349_v37  ;;  %v4649_v7 = vpop.f32.mrb[91].mxu0 }
 0x806   : > { %v4873_v59 = vadd.f32 %v9153_v23, %v4648_v30 }
 0x808   : > { %4927 = vst.msk [vmem:[%s9215_s13 + $0xd0] sm:$0xff] %vm304_vm0, %v4873_v59  ;;  %v4652_v63 = vpop.f32.mrb[92].mxu0 }
 0x809   : > { %v4653_v25 = vadd.f32 %v4652_v63, %v4350_v17  ;;  %v4654_v18 = vpop.f32.mrb[93].mxu0 }
 0x80b   : > { %v4878_v8 = vadd.f32 %v9149_v11, %v4653_v25 }
 0x80d   : > { %4928 = vst.msk [vmem:[%s9215_s13 + $0xd8] sm:$0xff] %vm304_vm0, %v4878_v8 }
 0x80f   : > { %v4657_v28 = vpop.f32.mrb[94].mxu0 }
 0x810   : > { %v4658_v27 = vadd.f32 %v4657_v28, %v4351_v62  ;;  %v4659_v4 = vpop.f32.mrb[95].mxu0 }
 0x812   : > { %v4883_v23 = vadd.f32 %v9161_v57, %v4658_v27 }
 0x814   : > { %4929 = vst.msk [vmem:[%s9215_s13 + $0xe0] sm:$0xff] %vm304_vm0, %v4883_v23  ;;  %v4662_v10 = vpop.f32.mrb[96].mxu0 }
 0x815   : > { %v4663_v60 = vadd.f32 %v4662_v10, %v4352_v56  ;;  %v4664_v0 = vpop.f32.mrb[97].mxu0 }
 0x817   : > { %v4888_v11 = vadd.f32 %v9157_v61, %v4663_v60 }
 0x819   : > { %4930 = vst.msk [vmem:[%s9215_s13 + $0xe8] sm:$0xff] %vm304_vm0, %v4888_v11 }
 0x81b   : > { %v4667_v58 = vpop.f32.mrb[98].mxu0 }
 0x81c   : > { %v4668_v43 = vadd.f32 %v4667_v58, %v4353_v46  ;;  %v4669_v13 = vpop.f32.mrb[99].mxu0 }
 0x81e   : > { %v4893_v57 = vadd.f32 %v9254_v14, %v4668_v43 }
 0x820   : > { %4931 = vst.msk [vmem:[%s9215_s13 + $0xf0] sm:$0xff] %vm304_vm0, %v4893_v57  ;;  %v4672_v19 = vpop.f32.mrb[100].mxu0 }
 0x821   : > { %v4673_v54 = vadd.f32 %v4672_v19, %v4354_v5  ;;  %v4674_v45 = vpop.f32.mrb[101].mxu0 }
 0x823   : > { %v4898_v61 = vadd.f32 %v9251_v48, %v4673_v54 }
 0x825   : > { %4932 = vst.msk [vmem:[%s9215_s13 + $0xf8] sm:$0xff] %vm304_vm0, %v4898_v61 }
 0x826   : > { %6724 = shalt.err (!%p6721_p3)
}
 0x827   : > { %s6725_s10 = scalar_lea.hbm %s9348_s24, 4096  ;;  %s6729_s13 = scalar_lea.hbm %s9406_s8, 8192 }
 0x828   : > { %p6726_p4 = scmp.ne.s32.totalorder %s9348_s24, %s6725_s10  ;;  %p6730_p9 = scmp.lt.u32.totalorder %s9348_s24, %s9406_s8 }
 0x829   : > { %p6731_p10 = scmp.lt.u32.totalorder %s6729_s13, %s6725_s10  ;;  %p6733_p12 = scmp.lt.u32.totalorder %s6725_s10, %s9348_s24 }
 0x82a   : > { %p6727_p7 = pnand %p6726_p4, %p6868_p5 }
 0x82b   : > { %p6732_p11 = por %p6731_p10, %p6730_p9 }
 0x82c   : > { %p6728_p8 = pneg %p6727_p7 }
 0x82d   : > { %p6734_p13 = por %p6733_p12, %p6732_p11 }
 0x82f   : > { %p6735_p0 = pnand %p6734_p13, %p6728_p8 }
 0x831   : > { %6738 = shalt.err (!%p6735_p0)
}
 0x832   : > { %s6783_s20 = smov 128   ;;  %s6784_s21 = smov 8  }
 0x833   : > { %5699 = dma.vmem_to_hbm [thread:$0]  (%p6868_p5), %s9350_s18, 4096, %s9348_s24, %s9357_s9, %s6783_s20, %s6783_s20, %s6784_s21  }
 0x834 PF: > { %p5705_p1 = scmp.ge.s32.totalorder %s6773_s30, 2  ;;  %s4962_s25 = sand.u32 1, %s6761_s27  }
 0x835   : > { %s4963_s23 = scalar_lea.sflag [#allocation4], %s4962_s25 }
 0x836   : > { %p5702_p2 = pnand %p5705_p1, %p6872_p6 }
 0x838   : > { %6756 = dma.done.wait (!%p5702_p2), %s4963_s23, 4096  }
 0x839   : > { %6758 = vsyncadd (!%p5702_p2), %s4963_s23, 4294963200  ;;  %p18_p3 = scmp.ge.s32.totalorder %s6855_s11, 4   ;;  %s9412_s27 = smov %s6765_s28 }
 0x83a   : > { %s9413_s28 = smov %s6769_s29  ;;  %s9414_s29 = smov %s6866_s14 }
 0x83b   : > { %s9415_s30 = smov %s6855_s11  ;;  %20 = sbr.rel (!%p18_p3) target bundleno = 3 (0x3), region = 90 }
 0x842   :  { %4968 = vsyncpa [#allocation4], 1 }
 0x843   :  { %4970 = vsyncpa [#allocation4 + $0x1], 1 }

</bundles_post_ra>
